<compile_context>
chip_gen: v6e
topology: v6e:2x2x1
jax: 0.10.0
libtpu: 0.0.40
codegen_flags: <defaults>
</compile_context>

<pallas_src>
import math

import jax
import jax.numpy as jnp
from jax.experimental import pallas as pl
from jax.experimental.pallas import tpu as pltpu


def _recip(z):
    # EUP approximate reciprocal + one Newton refinement (~full f32 accuracy,
    # avoids the longer exact-divide sequence on the VALU).
    r = pl.reciprocal(z, approx=True)
    return r * (2.0 - z * r)


def score_kernel(params_ref, coord4_ref, verts_ref, out_ref):
    """One grid step processes a block of B samples, fully vectorized.

    params_ref : (B, 8, 16) packed per-sample scalars
        [:, 0:3, 0:3]  gt_R          [:, 0:3, 4:7]   pred_R
        [:, 0:3, 8:11] Ag = K@gt_R   [:, 0:3, 12:15] Ap = K@pred_R
        [:, 4:7, 0]    gt_t          [:, 4:7, 1]     pred_t
        [:, 4:7, 2]    bg = K@gt_t   [:, 4:7, 3]     bp = K@pred_t
        [:, 4,   4]    diameter
    coord4_ref : (4, B, P)  channel-major: rows 0:3 = object coords, row 3 = vis mask
    verts_ref  : (3, B, V)  channel-major per-sample mesh vertices
    out_ref    : (B, 8)     cols = [cos(angle), te, add, proj, proj_vis, 0, 0, 0]
    """
    p = params_ref[...]
    B = p.shape[0]
    V = verts_ref.shape[2]

    Rg = p[:, 0:3, 0:3]
    Rp = p[:, 0:3, 4:7]
    Ag = p[:, 0:3, 8:11]
    Ap = p[:, 0:3, 12:15]
    tg = p[:, 4:7, 0:1]          # (B, 3, 1)
    tp = p[:, 4:7, 1:2]
    bg = p[:, 4:7, 2:3]
    bp = p[:, 4:7, 3:4]
    diam = p[:, 4:5, 4]          # (B, 1)

    def affine(A, t, X0, X1, X2):
        # A (B,3,3), t (B,3,1), Xc (B,L) -> 3 x (B,L); full (8,128) vreg fill,
        # K=3 contraction kept on the VPU via broadcasts (never the MXU).
        def row(r):
            return (A[:, r, 0:1] * X0 + A[:, r, 1:2] * X1 +
                    A[:, r, 2:3] * X2 + t[:, r])
        return row(0), row(1), row(2)

    # --- RE: cos(angle) from trace(Rp @ Rg^T) == sum(Rp * Rg)
    trace = jnp.sum(jnp.sum(Rp * Rg, axis=2), axis=1, keepdims=True)     # (B, 1)
    cosang = (jnp.clip(trace, -1.0, 3.0) - 1.0) * 0.5

    # --- TE (cm)
    dt = (tp - tg)[:, :, 0]                                              # (B, 3)
    te = jnp.sqrt(jnp.sum(dt * dt, axis=1, keepdims=True)) * 100.0       # (B, 1)

    # --- PROJ over visible ROI pixels (dominant cost; K pre-fused into Ag/Ap)
    C0 = coord4_ref[0]
    C1 = coord4_ref[1]
    C2 = coord4_ref[2]
    M = coord4_ref[3]                                                    # (B, P)
    vis = M > 0.0
    qg0, qg1, qg2 = affine(Ag, bg, C0, C1, C2)
    qp0, qp1, qp2 = affine(Ap, bp, C0, C1, C2)
    ig = _recip(jnp.where(vis, qg2, 1.0))     # invisible pixels may have z ~ 0
    ip = _recip(jnp.where(vis, qp2, 1.0))
    du = qp0 * ip - qg0 * ig
    dv = qp1 * ip - qg1 * ig
    cd = jnp.where(vis, jnp.sqrt(du * du + dv * dv), 0.0)
    nvis = jnp.maximum(jnp.sum(M, axis=1, keepdims=True), 1.0)
    pv = jnp.sum(cd, axis=1, keepdims=True) / nvis                       # (B, 1)

    # --- ADD / PROJ over mesh vertices (channel-major (B, V) tiles)
    V0 = verts_ref[0]
    V1 = verts_ref[1]
    V2 = verts_ref[2]
    pg0, pg1, pg2 = affine(Rg, tg, V0, V1, V2)
    pp0, pp1, pp2 = affine(Rp, tp, V0, V1, V2)
    d0 = pp0 - pg0
    d1 = pp1 - pg1
    d2 = pp2 - pg2
    inv_nv = 1.0 / float(V)
    ad = (jnp.sum(jnp.sqrt(d0 * d0 + d1 * d1 + d2 * d2), axis=1, keepdims=True)
          * inv_nv / diam)                                               # (B, 1)

    wg0, wg1, wg2 = affine(Ag, bg, V0, V1, V2)
    wp0, wp1, wp2 = affine(Ap, bp, V0, V1, V2)
    iwg = _recip(wg2)
    iwp = _recip(wp2)
    eu = wp0 * iwp - wg0 * iwg
    ev = wp1 * iwp - wg1 * iwg
    pj = jnp.sum(jnp.sqrt(eu * eu + ev * ev), axis=1, keepdims=True) * inv_nv

    # single consolidated store (one writeback per grid step)
    out_ref[...] = jnp.concatenate(
        [cosang, te, ad, pj, pv, jnp.zeros((B, 3), jnp.float32)], axis=1)


def score_forward(obj_id, cam_K, gt_R, gt_t, pred_R, pred_t,
                  gt_coord_3d_roi, gt_mask_vis_roi, verts_table, diam_table,
                  *, block_b=None):
    """Returns (re, te, ad, pj, pv), each [N] float32."""
    N = obj_id.shape[0]
    V = verts_table.shape[-1]
    H, W = gt_coord_3d_roi.shape[-2:]
    P = H * W
    f32 = jnp.float32

    cam_K = cam_K.astype(f32)
    gt_R = gt_R.astype(f32)
    pred_R = pred_R.astype(f32)
    gt_t = gt_t.astype(f32)
    pred_t = pred_t.astype(f32)

    # Pre-compose intrinsics with each pose (tiny N x 3x3 matmuls, done once in XLA).
    Ag = jnp.einsum('nij,njk->nik', cam_K, gt_R)
    Ap = jnp.einsum('nij,njk->nik', cam_K, pred_R)
    bg = jnp.einsum('nij,nj->ni', cam_K, gt_t)
    bp = jnp.einsum('nij,nj->ni', cam_K, pred_t)

    params = jnp.zeros((N, 8, 16), f32)
    params = params.at[:, 0:3, 0:3].set(gt_R)
    params = params.at[:, 0:3, 4:7].set(pred_R)
    params = params.at[:, 0:3, 8:11].set(Ag)
    params = params.at[:, 0:3, 12:15].set(Ap)
    params = params.at[:, 4:7, 0].set(gt_t)
    params = params.at[:, 4:7, 1].set(pred_t)
    params = params.at[:, 4:7, 2].set(bg)
    params = params.at[:, 4:7, 3].set(bp)
    params = params.at[:, 4, 4].set(diam_table[obj_id].astype(f32))

    # Channel-major ROI tensor (4, N, P): rows 0:3 coords, row 3 visibility mask.
    coord_cm = jnp.transpose(gt_coord_3d_roi.reshape(N, 3, P).astype(f32), (1, 0, 2))
    mask_cm = jnp.transpose(gt_mask_vis_roi.reshape(N, 1, P).astype(f32), (1, 0, 2))
    coord4 = jnp.concatenate([coord_cm, mask_cm], axis=0)

    # Mesh vertices gathered per-sample in XLA (replaces in-kernel DMA gathers),
    # channel-major (3, N, V) for full sublane occupancy in the vertex loops.
    verts_g = jnp.transpose(verts_table.astype(f32)[obj_id], (1, 0, 2))

    if block_b is None:
        block_b = 32 if N >= 64 else 8   # keep >=2 grid blocks for small N (v7x 2 TCs)
    B = block_b
    n_blocks = -(-N // B)
    N_pad = n_blocks * B
    if N_pad != N:
        pad = N_pad - N
        params = jnp.concatenate([params, jnp.repeat(params[-1:], pad, axis=0)], axis=0)
        coord4 = jnp.concatenate([coord4, jnp.repeat(coord4[:, -1:], pad, axis=1)], axis=1)
        verts_g = jnp.concatenate([verts_g, jnp.repeat(verts_g[:, -1:], pad, axis=1)], axis=1)

    out = pl.pallas_call(
        score_kernel,
        out_shape=jax.ShapeDtypeStruct((N_pad, 8), jnp.float32),
        grid_spec=pltpu.PrefetchScalarGridSpec(
            num_scalar_prefetch=0,
            grid=(n_blocks,),
            in_specs=[pl.BlockSpec((B, 8, 16), lambda i: (i, 0, 0)),
                      pl.BlockSpec((4, B, P), lambda i: (0, i, 0)),
                      pl.BlockSpec((3, B, V), lambda i: (0, i, 0))],
            out_specs=pl.BlockSpec((B, 8), lambda i: (i, 0))),
        compiler_params=pltpu.CompilerParams(dimension_semantics=("parallel",)),
    )(params, coord4, verts_g)

    out = out[:N]
    # TODO(synk): acos has no Mosaic lowering; applied here as JAX glue on [N] cosines.
    re = jnp.arccos(out[:, 0]) * (180.0 / math.pi)
    return re, out[:, 1], out[:, 2], out[:, 3], out[:, 4]


# ----------------------------- pure-JAX reference -----------------------------
def score_reference(obj_id, cam_K, gt_R, gt_t, pred_R, pred_t,
                    gt_coord_3d_roi, gt_mask_vis_roi, verts_table, diam_table):
    N = obj_id.shape[0]
    P = gt_coord_3d_roi.shape[-2] * gt_coord_3d_roi.shape[-1]

    def rot_apply(R, X, t):
        return (R[:, :, 0:1] * X[:, 0:1, :] + R[:, :, 1:2] * X[:, 1:2, :]
                + R[:, :, 2:3] * X[:, 2:3, :] + t)

    def project(K, Pc):
        q = (K[:, :, 0:1] * Pc[:, 0:1, :] + K[:, :, 1:2] * Pc[:, 1:2, :]
             + K[:, :, 2:3] * Pc[:, 2:3, :])
        return q[:, 0:2, :] / q[:, 2:3, :]

    verts = verts_table[obj_id]
    diam = diam_table[obj_id]
    coord = gt_coord_3d_roi.reshape(N, 3, P)
    mask = gt_mask_vis_roi.reshape(N, 1, P).astype(jnp.float32)
    tg = gt_t.reshape(N, 3, 1)
    tp = pred_t.reshape(N, 3, 1)

    trace = jnp.sum(pred_R * gt_R, axis=(-2, -1))
    re = jnp.arccos((jnp.clip(trace, -1.0, 3.0) - 1.0) * 0.5) * (180.0 / math.pi)
    te = jnp.sqrt(jnp.sum((pred_t - gt_t) ** 2, axis=-1)) * 100.0

    pg = rot_apply(gt_R, verts, tg)
    pp = rot_apply(pred_R, verts, tp)
    ad = jnp.mean(jnp.sqrt(jnp.sum((pp - pg) ** 2, axis=1)), axis=-1) / diam

    pj = jnp.mean(jnp.sqrt(jnp.sum((project(cam_K, pp) - project(cam_K, pg)) ** 2, axis=1)), axis=-1)

    cg = rot_apply(gt_R, coord, tg)
    cp = rot_apply(pred_R, coord, tp)
    cdist = jnp.sqrt(jnp.sum((project(cam_K, cp) - project(cam_K, cg)) ** 2, axis=1))
    pv = jnp.sum(cdist * mask[:, 0, :], axis=-1) / jnp.sum(mask[:, 0, :], axis=-1)
    return re, te, ad, pj, pv


def quat_to_rot(q):
    q = q / jnp.linalg.norm(q, axis=-1, keepdims=True)
    w, x, y, z = q[..., 0], q[..., 1], q[..., 2], q[..., 3]
    return jnp.stack([
        jnp.stack([1 - 2 * (y * y + z * z), 2 * (x * y - w * z), 2 * (x * z + w * y)], -1),
        jnp.stack([2 * (x * y + w * z), 1 - 2 * (x * x + z * z), 2 * (y * z - w * x)], -1),
        jnp.stack([2 * (x * z - w * y), 2 * (y * z + w * x), 1 - 2 * (x * x + y * y)], -1),
    ], -2)


if __name__ == "__main__":
    N, V, H, W, NUM_OBJS = 16, 128, 16, 16, 3
    keys = jax.random.split(jax.random.PRNGKey(0), 8)

    # synthetic "ObjMesh" table: V vertices per object (object frame, ~10cm objects)
    verts_table = jax.random.uniform(keys[0], (NUM_OBJS, 3, V), jnp.float32, -0.05, 0.05)
    pts = jnp.transpose(verts_table, (0, 2, 1))                       # (O, V, 3)
    d2 = jnp.sum((pts[:, :, None, :] - pts[:, None, :, :]) ** 2, axis=-1)
    diam_table = jnp.sqrt(jnp.max(d2, axis=(1, 2)))                   # (O,)

    obj_id = (jnp.arange(N) % NUM_OBJS).astype(jnp.int32)

    q_gt = jax.random.normal(keys[1], (N, 4), jnp.float32)
    q_pr = q_gt + 0.05 * jax.random.normal(keys[2], (N, 4), jnp.float32)
    gt_R = quat_to_rot(q_gt)
    pred_R = quat_to_rot(q_pr)

    gt_t = jnp.concatenate([
        jax.random.uniform(keys[3], (N, 2), jnp.float32, -0.1, 0.1),
        jax.random.uniform(keys[4], (N, 1), jnp.float32, 0.8, 1.2)], axis=-1)
    pred_t = gt_t + 0.01 * jax.random.normal(keys[5], (N, 3), jnp.float32)

    fx = fy = 400.0
    cx = cy = W / 2.0
    cam_K = jnp.tile(jnp.array([[fx, 0.0, cx], [0.0, fy, cy], [0.0, 0.0, 1.0]],
                               jnp.float32), (N, 1, 1))

    gt_coord_3d_roi = jax.random.uniform(keys[6], (N, 3, H, W), jnp.float32, -0.05, 0.05)
    gt_mask_vis_roi = jax.random.uniform(keys[7], (N, 1, H, W)) > 0.4

    outs = score_forward(obj_id, cam_K, gt_R, gt_t, pred_R, pred_t,
                         gt_coord_3d_roi, gt_mask_vis_roi, verts_table, diam_table)
    outs = jax.block_until_ready(outs)

    refs = score_reference(obj_id, cam_K, gt_R, gt_t, pred_R, pred_t,
                           gt_coord_3d_roi, gt_mask_vis_roi, verts_table, diam_table)
    names = ("re", "te", "ad", "pj", "pv")
    for name, o, r in zip(names, outs, refs):
        assert o.shape == (N,) and jnp.all(jnp.isfinite(o)), (name, o)
        assert jnp.allclose(o, r, atol=1e-3, rtol=1e-3), (name, o, r)

    print("KERNEL_OK")
</pallas_src>

<mosaic_0001>
module attributes {stable_mosaic.version = 11 : i64} {
  func.func @score_kernel(%arg0: i32, %arg1: memref<8x8x16xf32, #tpu.memory_space<vmem>>, %arg2: memref<4x8x256xf32, #tpu.memory_space<vmem>>, %arg3: memref<3x8x128xf32, #tpu.memory_space<vmem>>, %arg4: memref<8x8xf32, #tpu.memory_space<vmem>>) attributes {dimension_semantics = [#tpu.dimension_semantics<parallel>], iteration_bounds = array<i64: 2>, scalar_prefetch = 0 : i64, scratch_operands = 0 : i64, tpu.core_type = #tpu.core_type<tc>, window_params = [{transform_indices = @transform_0, window_bounds = array<i64: 8, 8, 16>}, {transform_indices = @transform_1, window_bounds = array<i64: 4, 8, 256>}, {transform_indices = @transform_2, window_bounds = array<i64: 3, 8, 128>}, {transform_indices = @transform_3, window_bounds = array<i64: 8, 8>}]} {
    %c0 = arith.constant 0 : index
    %c0_0 = arith.constant 0 : index
    %c0_1 = arith.constant 0 : index
    %0 = vector.load %arg1[%c0, %c0_0, %c0_1] : memref<8x8x16xf32, #tpu.memory_space<vmem>>, vector<8x8x16xf32>
    %1 = vector.extract_strided_slice %0 {offsets = [0, 0, 0], sizes = [8, 3, 3], strides = [1, 1, 1]} : vector<8x8x16xf32> to vector<8x3x3xf32>
    %2 = vector.extract_strided_slice %0 {offsets = [0, 0, 4], sizes = [8, 3, 3], strides = [1, 1, 1]} : vector<8x8x16xf32> to vector<8x3x3xf32>
    %3 = vector.extract_strided_slice %0 {offsets = [0, 0, 8], sizes = [8, 3, 3], strides = [1, 1, 1]} : vector<8x8x16xf32> to vector<8x3x3xf32>
    %4 = vector.extract_strided_slice %0 {offsets = [0, 0, 12], sizes = [8, 3, 3], strides = [1, 1, 1]} : vector<8x8x16xf32> to vector<8x3x3xf32>
    %5 = vector.extract_strided_slice %0 {offsets = [0, 4, 0], sizes = [8, 3, 1], strides = [1, 1, 1]} : vector<8x8x16xf32> to vector<8x3x1xf32>
    %6 = vector.extract_strided_slice %0 {offsets = [0, 4, 1], sizes = [8, 3, 1], strides = [1, 1, 1]} : vector<8x8x16xf32> to vector<8x3x1xf32>
    %7 = vector.extract_strided_slice %0 {offsets = [0, 4, 2], sizes = [8, 3, 1], strides = [1, 1, 1]} : vector<8x8x16xf32> to vector<8x3x1xf32>
    %8 = vector.extract_strided_slice %0 {offsets = [0, 4, 3], sizes = [8, 3, 1], strides = [1, 1, 1]} : vector<8x8x16xf32> to vector<8x3x1xf32>
    %9 = vector.extract_strided_slice %0 {offsets = [0, 4, 4], sizes = [8, 1, 1], strides = [1, 1, 1]} : vector<8x8x16xf32> to vector<8x1x1xf32>
    %10 = vector.shape_cast %9 : vector<8x1x1xf32> to vector<8x1xf32>
    %11 = arith.mulf %2, %1 : vector<8x3x3xf32>
    %cst = arith.constant dense<0.000000e+00> : vector<8x3xf32>
    %12 = vector.multi_reduction <add>, %11, %cst [2] : vector<8x3x3xf32> to vector<8x3xf32>
    %cst_2 = arith.constant dense<0.000000e+00> : vector<8xf32>
    %13 = vector.multi_reduction <add>, %12, %cst_2 [1] : vector<8x3xf32> to vector<8xf32>
    %14 = vector.shape_cast %13 : vector<8xf32> to vector<8x1xf32>
    %cst_3 = arith.constant -1.000000e+00 : f32
    %cst_4 = arith.constant 3.000000e+00 : f32
    %15 = vector.broadcast %cst_3 : f32 to vector<8x1xf32>
    %16 = arith.maximumf %15, %14 : vector<8x1xf32>
    %17 = vector.broadcast %cst_4 : f32 to vector<8x1xf32>
    %18 = arith.minimumf %17, %16 : vector<8x1xf32>
    %cst_5 = arith.constant 1.000000e+00 : f32
    %19 = vector.broadcast %cst_5 : f32 to vector<8x1xf32>
    %20 = arith.subf %18, %19 : vector<8x1xf32>
    %cst_6 = arith.constant 5.000000e-01 : f32
    %21 = vector.broadcast %cst_6 : f32 to vector<8x1xf32>
    %22 = arith.mulf %20, %21 : vector<8x1xf32>
    %23 = arith.subf %6, %5 : vector<8x3x1xf32>
    %24 = vector.shape_cast %23 : vector<8x3x1xf32> to vector<8x3xf32>
    %25 = arith.mulf %24, %24 : vector<8x3xf32>
    %cst_7 = arith.constant dense<0.000000e+00> : vector<8xf32>
    %26 = vector.multi_reduction <add>, %25, %cst_7 [1] : vector<8x3xf32> to vector<8xf32>
    %27 = vector.shape_cast %26 : vector<8xf32> to vector<8x1xf32>
    %28 = math.sqrt %27 : vector<8x1xf32>
    %cst_8 = arith.constant 1.000000e+02 : f32
    %29 = vector.broadcast %cst_8 : f32 to vector<8x1xf32>
    %30 = arith.mulf %28, %29 : vector<8x1xf32>
    %c0_9 = arith.constant 0 : index
    %c0_10 = arith.constant 0 : index
    %c0_11 = arith.constant 0 : index
    %31 = vector.load %arg2[%c0_9, %c0_10, %c0_11] : memref<4x8x256xf32, #tpu.memory_space<vmem>>, vector<1x8x256xf32>
    %32 = vector.shape_cast %31 : vector<1x8x256xf32> to vector<8x256xf32>
    %c1 = arith.constant 1 : index
    %c0_12 = arith.constant 0 : index
    %c0_13 = arith.constant 0 : index
    %33 = vector.load %arg2[%c1, %c0_12, %c0_13] : memref<4x8x256xf32, #tpu.memory_space<vmem>>, vector<1x8x256xf32>
    %34 = vector.shape_cast %33 : vector<1x8x256xf32> to vector<8x256xf32>
    %c2 = arith.constant 2 : index
    %c0_14 = arith.constant 0 : index
    %c0_15 = arith.constant 0 : index
    %35 = vector.load %arg2[%c2, %c0_14, %c0_15] : memref<4x8x256xf32, #tpu.memory_space<vmem>>, vector<1x8x256xf32>
    %36 = vector.shape_cast %35 : vector<1x8x256xf32> to vector<8x256xf32>
    %c3 = arith.constant 3 : index
    %c0_16 = arith.constant 0 : index
    %c0_17 = arith.constant 0 : index
    %37 = vector.load %arg2[%c3, %c0_16, %c0_17] : memref<4x8x256xf32, #tpu.memory_space<vmem>>, vector<1x8x256xf32>
    %38 = vector.shape_cast %37 : vector<1x8x256xf32> to vector<8x256xf32>
    %cst_18 = arith.constant 0.000000e+00 : f32
    %39 = vector.broadcast %cst_18 : f32 to vector<8x256xf32>
    %40 = arith.cmpf ogt, %38, %39 : vector<8x256xf32>
    %41 = vector.extract_strided_slice %3 {offsets = [0, 0, 0], sizes = [8, 1, 1], strides = [1, 1, 1]} : vector<8x3x3xf32> to vector<8x1x1xf32>
    %42 = vector.shape_cast %41 : vector<8x1x1xf32> to vector<8x1xf32>
    %43 = vector.broadcast %42 : vector<8x1xf32> to vector<8x256xf32>
    %44 = arith.mulf %43, %32 : vector<8x256xf32>
    %45 = vector.extract_strided_slice %3 {offsets = [0, 0, 1], sizes = [8, 1, 1], strides = [1, 1, 1]} : vector<8x3x3xf32> to vector<8x1x1xf32>
    %46 = vector.shape_cast %45 : vector<8x1x1xf32> to vector<8x1xf32>
    %47 = vector.broadcast %46 : vector<8x1xf32> to vector<8x256xf32>
    %48 = arith.mulf %47, %34 : vector<8x256xf32>
    %49 = arith.addf %44, %48 : vector<8x256xf32>
    %50 = vector.extract_strided_slice %3 {offsets = [0, 0, 2], sizes = [8, 1, 1], strides = [1, 1, 1]} : vector<8x3x3xf32> to vector<8x1x1xf32>
    %51 = vector.shape_cast %50 : vector<8x1x1xf32> to vector<8x1xf32>
    %52 = vector.broadcast %51 : vector<8x1xf32> to vector<8x256xf32>
    %53 = arith.mulf %52, %36 : vector<8x256xf32>
    %54 = arith.addf %49, %53 : vector<8x256xf32>
    %55 = vector.extract_strided_slice %7 {offsets = [0, 0, 0], sizes = [8, 1, 1], strides = [1, 1, 1]} : vector<8x3x1xf32> to vector<8x1x1xf32>
    %56 = vector.shape_cast %55 : vector<8x1x1xf32> to vector<8x1xf32>
    %57 = vector.broadcast %56 : vector<8x1xf32> to vector<8x256xf32>
    %58 = arith.addf %54, %57 : vector<8x256xf32>
    %59 = vector.extract_strided_slice %3 {offsets = [0, 1, 0], sizes = [8, 1, 1], strides = [1, 1, 1]} : vector<8x3x3xf32> to vector<8x1x1xf32>
    %60 = vector.shape_cast %59 : vector<8x1x1xf32> to vector<8x1xf32>
    %61 = vector.broadcast %60 : vector<8x1xf32> to vector<8x256xf32>
    %62 = arith.mulf %61, %32 : vector<8x256xf32>
    %63 = vector.extract_strided_slice %3 {offsets = [0, 1, 1], sizes = [8, 1, 1], strides = [1, 1, 1]} : vector<8x3x3xf32> to vector<8x1x1xf32>
    %64 = vector.shape_cast %63 : vector<8x1x1xf32> to vector<8x1xf32>
    %65 = vector.broadcast %64 : vector<8x1xf32> to vector<8x256xf32>
    %66 = arith.mulf %65, %34 : vector<8x256xf32>
    %67 = arith.addf %62, %66 : vector<8x256xf32>
    %68 = vector.extract_strided_slice %3 {offsets = [0, 1, 2], sizes = [8, 1, 1], strides = [1, 1, 1]} : vector<8x3x3xf32> to vector<8x1x1xf32>
    %69 = vector.shape_cast %68 : vector<8x1x1xf32> to vector<8x1xf32>
    %70 = vector.broadcast %69 : vector<8x1xf32> to vector<8x256xf32>
    %71 = arith.mulf %70, %36 : vector<8x256xf32>
    %72 = arith.addf %67, %71 : vector<8x256xf32>
    %73 = vector.extract_strided_slice %7 {offsets = [0, 1, 0], sizes = [8, 1, 1], strides = [1, 1, 1]} : vector<8x3x1xf32> to vector<8x1x1xf32>
    %74 = vector.shape_cast %73 : vector<8x1x1xf32> to vector<8x1xf32>
    %75 = vector.broadcast %74 : vector<8x1xf32> to vector<8x256xf32>
    %76 = arith.addf %72, %75 : vector<8x256xf32>
    %77 = vector.extract_strided_slice %3 {offsets = [0, 2, 0], sizes = [8, 1, 1], strides = [1, 1, 1]} : vector<8x3x3xf32> to vector<8x1x1xf32>
    %78 = vector.shape_cast %77 : vector<8x1x1xf32> to vector<8x1xf32>
    %79 = vector.broadcast %78 : vector<8x1xf32> to vector<8x256xf32>
    %80 = arith.mulf %79, %32 : vector<8x256xf32>
    %81 = vector.extract_strided_slice %3 {offsets = [0, 2, 1], sizes = [8, 1, 1], strides = [1, 1, 1]} : vector<8x3x3xf32> to vector<8x1x1xf32>
    %82 = vector.shape_cast %81 : vector<8x1x1xf32> to vector<8x1xf32>
    %83 = vector.broadcast %82 : vector<8x1xf32> to vector<8x256xf32>
    %84 = arith.mulf %83, %34 : vector<8x256xf32>
    %85 = arith.addf %80, %84 : vector<8x256xf32>
    %86 = vector.extract_strided_slice %3 {offsets = [0, 2, 2], sizes = [8, 1, 1], strides = [1, 1, 1]} : vector<8x3x3xf32> to vector<8x1x1xf32>
    %87 = vector.shape_cast %86 : vector<8x1x1xf32> to vector<8x1xf32>
    %88 = vector.broadcast %87 : vector<8x1xf32> to vector<8x256xf32>
    %89 = arith.mulf %88, %36 : vector<8x256xf32>
    %90 = arith.addf %85, %89 : vector<8x256xf32>
    %91 = vector.extract_strided_slice %7 {offsets = [0, 2, 0], sizes = [8, 1, 1], strides = [1, 1, 1]} : vector<8x3x1xf32> to vector<8x1x1xf32>
    %92 = vector.shape_cast %91 : vector<8x1x1xf32> to vector<8x1xf32>
    %93 = vector.broadcast %92 : vector<8x1xf32> to vector<8x256xf32>
    %94 = arith.addf %90, %93 : vector<8x256xf32>
    %95 = vector.extract_strided_slice %4 {offsets = [0, 0, 0], sizes = [8, 1, 1], strides = [1, 1, 1]} : vector<8x3x3xf32> to vector<8x1x1xf32>
    %96 = vector.shape_cast %95 : vector<8x1x1xf32> to vector<8x1xf32>
    %97 = vector.broadcast %96 : vector<8x1xf32> to vector<8x256xf32>
    %98 = arith.mulf %97, %32 : vector<8x256xf32>
    %99 = vector.extract_strided_slice %4 {offsets = [0, 0, 1], sizes = [8, 1, 1], strides = [1, 1, 1]} : vector<8x3x3xf32> to vector<8x1x1xf32>
    %100 = vector.shape_cast %99 : vector<8x1x1xf32> to vector<8x1xf32>
    %101 = vector.broadcast %100 : vector<8x1xf32> to vector<8x256xf32>
    %102 = arith.mulf %101, %34 : vector<8x256xf32>
    %103 = arith.addf %98, %102 : vector<8x256xf32>
    %104 = vector.extract_strided_slice %4 {offsets = [0, 0, 2], sizes = [8, 1, 1], strides = [1, 1, 1]} : vector<8x3x3xf32> to vector<8x1x1xf32>
    %105 = vector.shape_cast %104 : vector<8x1x1xf32> to vector<8x1xf32>
    %106 = vector.broadcast %105 : vector<8x1xf32> to vector<8x256xf32>
    %107 = arith.mulf %106, %36 : vector<8x256xf32>
    %108 = arith.addf %103, %107 : vector<8x256xf32>
    %109 = vector.extract_strided_slice %8 {offsets = [0, 0, 0], sizes = [8, 1, 1], strides = [1, 1, 1]} : vector<8x3x1xf32> to vector<8x1x1xf32>
    %110 = vector.shape_cast %109 : vector<8x1x1xf32> to vector<8x1xf32>
    %111 = vector.broadcast %110 : vector<8x1xf32> to vector<8x256xf32>
    %112 = arith.addf %108, %111 : vector<8x256xf32>
    %113 = vector.extract_strided_slice %4 {offsets = [0, 1, 0], sizes = [8, 1, 1], strides = [1, 1, 1]} : vector<8x3x3xf32> to vector<8x1x1xf32>
    %114 = vector.shape_cast %113 : vector<8x1x1xf32> to vector<8x1xf32>
    %115 = vector.broadcast %114 : vector<8x1xf32> to vector<8x256xf32>
    %116 = arith.mulf %115, %32 : vector<8x256xf32>
    %117 = vector.extract_strided_slice %4 {offsets = [0, 1, 1], sizes = [8, 1, 1], strides = [1, 1, 1]} : vector<8x3x3xf32> to vector<8x1x1xf32>
    %118 = vector.shape_cast %117 : vector<8x1x1xf32> to vector<8x1xf32>
    %119 = vector.broadcast %118 : vector<8x1xf32> to vector<8x256xf32>
    %120 = arith.mulf %119, %34 : vector<8x256xf32>
    %121 = arith.addf %116, %120 : vector<8x256xf32>
    %122 = vector.extract_strided_slice %4 {offsets = [0, 1, 2], sizes = [8, 1, 1], strides = [1, 1, 1]} : vector<8x3x3xf32> to vector<8x1x1xf32>
    %123 = vector.shape_cast %122 : vector<8x1x1xf32> to vector<8x1xf32>
    %124 = vector.broadcast %123 : vector<8x1xf32> to vector<8x256xf32>
    %125 = arith.mulf %124, %36 : vector<8x256xf32>
    %126 = arith.addf %121, %125 : vector<8x256xf32>
    %127 = vector.extract_strided_slice %8 {offsets = [0, 1, 0], sizes = [8, 1, 1], strides = [1, 1, 1]} : vector<8x3x1xf32> to vector<8x1x1xf32>
    %128 = vector.shape_cast %127 : vector<8x1x1xf32> to vector<8x1xf32>
    %129 = vector.broadcast %128 : vector<8x1xf32> to vector<8x256xf32>
    %130 = arith.addf %126, %129 : vector<8x256xf32>
    %131 = vector.extract_strided_slice %4 {offsets = [0, 2, 0], sizes = [8, 1, 1], strides = [1, 1, 1]} : vector<8x3x3xf32> to vector<8x1x1xf32>
    %132 = vector.shape_cast %131 : vector<8x1x1xf32> to vector<8x1xf32>
    %133 = vector.broadcast %132 : vector<8x1xf32> to vector<8x256xf32>
    %134 = arith.mulf %133, %32 : vector<8x256xf32>
    %135 = vector.extract_strided_slice %4 {offsets = [0, 2, 1], sizes = [8, 1, 1], strides = [1, 1, 1]} : vector<8x3x3xf32> to vector<8x1x1xf32>
    %136 = vector.shape_cast %135 : vector<8x1x1xf32> to vector<8x1xf32>
    %137 = vector.broadcast %136 : vector<8x1xf32> to vector<8x256xf32>
    %138 = arith.mulf %137, %34 : vector<8x256xf32>
    %139 = arith.addf %134, %138 : vector<8x256xf32>
    %140 = vector.extract_strided_slice %4 {offsets = [0, 2, 2], sizes = [8, 1, 1], strides = [1, 1, 1]} : vector<8x3x3xf32> to vector<8x1x1xf32>
    %141 = vector.shape_cast %140 : vector<8x1x1xf32> to vector<8x1xf32>
    %142 = vector.broadcast %141 : vector<8x1xf32> to vector<8x256xf32>
    %143 = arith.mulf %142, %36 : vector<8x256xf32>
    %144 = arith.addf %139, %143 : vector<8x256xf32>
    %145 = vector.extract_strided_slice %8 {offsets = [0, 2, 0], sizes = [8, 1, 1], strides = [1, 1, 1]} : vector<8x3x1xf32> to vector<8x1x1xf32>
    %146 = vector.shape_cast %145 : vector<8x1x1xf32> to vector<8x1xf32>
    %147 = vector.broadcast %146 : vector<8x1xf32> to vector<8x256xf32>
    %148 = arith.addf %144, %147 : vector<8x256xf32>
    %cst_19 = arith.constant 1.000000e+00 : f32
    %149 = vector.broadcast %cst_19 : f32 to vector<8x256xf32>
    %150 = arith.select %40, %94, %149 : vector<8x256xi1>, vector<8x256xf32>
    %151 = tpu.reciprocal %150 {approx = true} : vector<8x256xf32> -> vector<8x256xf32>
    %152 = arith.mulf %150, %151 : vector<8x256xf32>
    %cst_20 = arith.constant 2.000000e+00 : f32
    %153 = vector.broadcast %cst_20 : f32 to vector<8x256xf32>
    %154 = arith.subf %153, %152 : vector<8x256xf32>
    %155 = arith.mulf %151, %154 : vector<8x256xf32>
    %cst_21 = arith.constant 1.000000e+00 : f32
    %156 = vector.broadcast %cst_21 : f32 to vector<8x256xf32>
    %157 = arith.select %40, %148, %156 : vector<8x256xi1>, vector<8x256xf32>
    %158 = tpu.reciprocal %157 {approx = true} : vector<8x256xf32> -> vector<8x256xf32>
    %159 = arith.mulf %157, %158 : vector<8x256xf32>
    %cst_22 = arith.constant 2.000000e+00 : f32
    %160 = vector.broadcast %cst_22 : f32 to vector<8x256xf32>
    %161 = arith.subf %160, %159 : vector<8x256xf32>
    %162 = arith.mulf %158, %161 : vector<8x256xf32>
    %163 = arith.mulf %112, %162 : vector<8x256xf32>
    %164 = arith.mulf %58, %155 : vector<8x256xf32>
    %165 = arith.subf %163, %164 : vector<8x256xf32>
    %166 = arith.mulf %130, %162 : vector<8x256xf32>
    %167 = arith.mulf %76, %155 : vector<8x256xf32>
    %168 = arith.subf %166, %167 : vector<8x256xf32>
    %169 = arith.mulf %165, %165 : vector<8x256xf32>
    %170 = arith.mulf %168, %168 : vector<8x256xf32>
    %171 = arith.addf %169, %170 : vector<8x256xf32>
    %172 = math.sqrt %171 : vector<8x256xf32>
    %cst_23 = arith.constant 0.000000e+00 : f32
    %173 = vector.broadcast %cst_23 : f32 to vector<8x256xf32>
    %174 = arith.select %40, %172, %173 : vector<8x256xi1>, vector<8x256xf32>
    %cst_24 = arith.constant dense<0.000000e+00> : vector<8xf32>
    %175 = vector.multi_reduction <add>, %38, %cst_24 [1] : vector<8x256xf32> to vector<8xf32>
    %176 = vector.shape_cast %175 : vector<8xf32> to vector<8x1xf32>
    %cst_25 = arith.constant 1.000000e+00 : f32
    %177 = vector.broadcast %cst_25 : f32 to vector<8x1xf32>
    %178 = arith.maximumf %176, %177 : vector<8x1xf32>
    %cst_26 = arith.constant dense<0.000000e+00> : vector<8xf32>
    %179 = vector.multi_reduction <add>, %174, %cst_26 [1] : vector<8x256xf32> to vector<8xf32>
    %180 = vector.shape_cast %179 : vector<8xf32> to vector<8x1xf32>
    %181 = arith.divf %180, %178 : vector<8x1xf32>
    %c0_27 = arith.constant 0 : index
    %c0_28 = arith.constant 0 : index
    %c0_29 = arith.constant 0 : index
    %182 = vector.load %arg3[%c0_27, %c0_28, %c0_29] : memref<3x8x128xf32, #tpu.memory_space<vmem>>, vector<1x8x128xf32>
    %183 = vector.shape_cast %182 : vector<1x8x128xf32> to vector<8x128xf32>
    %c1_30 = arith.constant 1 : index
    %c0_31 = arith.constant 0 : index
    %c0_32 = arith.constant 0 : index
    %184 = vector.load %arg3[%c1_30, %c0_31, %c0_32] : memref<3x8x128xf32, #tpu.memory_space<vmem>>, vector<1x8x128xf32>
    %185 = vector.shape_cast %184 : vector<1x8x128xf32> to vector<8x128xf32>
    %c2_33 = arith.constant 2 : index
    %c0_34 = arith.constant 0 : index
    %c0_35 = arith.constant 0 : index
    %186 = vector.load %arg3[%c2_33, %c0_34, %c0_35] : memref<3x8x128xf32, #tpu.memory_space<vmem>>, vector<1x8x128xf32>
    %187 = vector.shape_cast %186 : vector<1x8x128xf32> to vector<8x128xf32>
    %188 = vector.extract_strided_slice %1 {offsets = [0, 0, 0], sizes = [8, 1, 1], strides = [1, 1, 1]} : vector<8x3x3xf32> to vector<8x1x1xf32>
    %189 = vector.shape_cast %188 : vector<8x1x1xf32> to vector<8x1xf32>
    %190 = vector.broadcast %189 : vector<8x1xf32> to vector<8x128xf32>
    %191 = arith.mulf %190, %183 : vector<8x128xf32>
    %192 = vector.extract_strided_slice %1 {offsets = [0, 0, 1], sizes = [8, 1, 1], strides = [1, 1, 1]} : vector<8x3x3xf32> to vector<8x1x1xf32>
    %193 = vector.shape_cast %192 : vector<8x1x1xf32> to vector<8x1xf32>
    %194 = vector.broadcast %193 : vector<8x1xf32> to vector<8x128xf32>
    %195 = arith.mulf %194, %185 : vector<8x128xf32>
    %196 = arith.addf %191, %195 : vector<8x128xf32>
    %197 = vector.extract_strided_slice %1 {offsets = [0, 0, 2], sizes = [8, 1, 1], strides = [1, 1, 1]} : vector<8x3x3xf32> to vector<8x1x1xf32>
    %198 = vector.shape_cast %197 : vector<8x1x1xf32> to vector<8x1xf32>
    %199 = vector.broadcast %198 : vector<8x1xf32> to vector<8x128xf32>
    %200 = arith.mulf %199, %187 : vector<8x128xf32>
    %201 = arith.addf %196, %200 : vector<8x128xf32>
    %202 = vector.extract_strided_slice %5 {offsets = [0, 0, 0], sizes = [8, 1, 1], strides = [1, 1, 1]} : vector<8x3x1xf32> to vector<8x1x1xf32>
    %203 = vector.shape_cast %202 : vector<8x1x1xf32> to vector<8x1xf32>
    %204 = vector.broadcast %203 : vector<8x1xf32> to vector<8x128xf32>
    %205 = arith.addf %201, %204 : vector<8x128xf32>
    %206 = vector.extract_strided_slice %1 {offsets = [0, 1, 0], sizes = [8, 1, 1], strides = [1, 1, 1]} : vector<8x3x3xf32> to vector<8x1x1xf32>
    %207 = vector.shape_cast %206 : vector<8x1x1xf32> to vector<8x1xf32>
    %208 = vector.broadcast %207 : vector<8x1xf32> to vector<8x128xf32>
    %209 = arith.mulf %208, %183 : vector<8x128xf32>
    %210 = vector.extract_strided_slice %1 {offsets = [0, 1, 1], sizes = [8, 1, 1], strides = [1, 1, 1]} : vector<8x3x3xf32> to vector<8x1x1xf32>
    %211 = vector.shape_cast %210 : vector<8x1x1xf32> to vector<8x1xf32>
    %212 = vector.broadcast %211 : vector<8x1xf32> to vector<8x128xf32>
    %213 = arith.mulf %212, %185 : vector<8x128xf32>
    %214 = arith.addf %209, %213 : vector<8x128xf32>
    %215 = vector.extract_strided_slice %1 {offsets = [0, 1, 2], sizes = [8, 1, 1], strides = [1, 1, 1]} : vector<8x3x3xf32> to vector<8x1x1xf32>
    %216 = vector.shape_cast %215 : vector<8x1x1xf32> to vector<8x1xf32>
    %217 = vector.broadcast %216 : vector<8x1xf32> to vector<8x128xf32>
    %218 = arith.mulf %217, %187 : vector<8x128xf32>
    %219 = arith.addf %214, %218 : vector<8x128xf32>
    %220 = vector.extract_strided_slice %5 {offsets = [0, 1, 0], sizes = [8, 1, 1], strides = [1, 1, 1]} : vector<8x3x1xf32> to vector<8x1x1xf32>
    %221 = vector.shape_cast %220 : vector<8x1x1xf32> to vector<8x1xf32>
    %222 = vector.broadcast %221 : vector<8x1xf32> to vector<8x128xf32>
    %223 = arith.addf %219, %222 : vector<8x128xf32>
    %224 = vector.extract_strided_slice %1 {offsets = [0, 2, 0], sizes = [8, 1, 1], strides = [1, 1, 1]} : vector<8x3x3xf32> to vector<8x1x1xf32>
    %225 = vector.shape_cast %224 : vector<8x1x1xf32> to vector<8x1xf32>
    %226 = vector.broadcast %225 : vector<8x1xf32> to vector<8x128xf32>
    %227 = arith.mulf %226, %183 : vector<8x128xf32>
    %228 = vector.extract_strided_slice %1 {offsets = [0, 2, 1], sizes = [8, 1, 1], strides = [1, 1, 1]} : vector<8x3x3xf32> to vector<8x1x1xf32>
    %229 = vector.shape_cast %228 : vector<8x1x1xf32> to vector<8x1xf32>
    %230 = vector.broadcast %229 : vector<8x1xf32> to vector<8x128xf32>
    %231 = arith.mulf %230, %185 : vector<8x128xf32>
    %232 = arith.addf %227, %231 : vector<8x128xf32>
    %233 = vector.extract_strided_slice %1 {offsets = [0, 2, 2], sizes = [8, 1, 1], strides = [1, 1, 1]} : vector<8x3x3xf32> to vector<8x1x1xf32>
    %234 = vector.shape_cast %233 : vector<8x1x1xf32> to vector<8x1xf32>
    %235 = vector.broadcast %234 : vector<8x1xf32> to vector<8x128xf32>
    %236 = arith.mulf %235, %187 : vector<8x128xf32>
    %237 = arith.addf %232, %236 : vector<8x128xf32>
    %238 = vector.extract_strided_slice %5 {offsets = [0, 2, 0], sizes = [8, 1, 1], strides = [1, 1, 1]} : vector<8x3x1xf32> to vector<8x1x1xf32>
    %239 = vector.shape_cast %238 : vector<8x1x1xf32> to vector<8x1xf32>
    %240 = vector.broadcast %239 : vector<8x1xf32> to vector<8x128xf32>
    %241 = arith.addf %237, %240 : vector<8x128xf32>
    %242 = vector.extract_strided_slice %2 {offsets = [0, 0, 0], sizes = [8, 1, 1], strides = [1, 1, 1]} : vector<8x3x3xf32> to vector<8x1x1xf32>
    %243 = vector.shape_cast %242 : vector<8x1x1xf32> to vector<8x1xf32>
    %244 = vector.broadcast %243 : vector<8x1xf32> to vector<8x128xf32>
    %245 = arith.mulf %244, %183 : vector<8x128xf32>
    %246 = vector.extract_strided_slice %2 {offsets = [0, 0, 1], sizes = [8, 1, 1], strides = [1, 1, 1]} : vector<8x3x3xf32> to vector<8x1x1xf32>
    %247 = vector.shape_cast %246 : vector<8x1x1xf32> to vector<8x1xf32>
    %248 = vector.broadcast %247 : vector<8x1xf32> to vector<8x128xf32>
    %249 = arith.mulf %248, %185 : vector<8x128xf32>
    %250 = arith.addf %245, %249 : vector<8x128xf32>
    %251 = vector.extract_strided_slice %2 {offsets = [0, 0, 2], sizes = [8, 1, 1], strides = [1, 1, 1]} : vector<8x3x3xf32> to vector<8x1x1xf32>
    %252 = vector.shape_cast %251 : vector<8x1x1xf32> to vector<8x1xf32>
    %253 = vector.broadcast %252 : vector<8x1xf32> to vector<8x128xf32>
    %254 = arith.mulf %253, %187 : vector<8x128xf32>
    %255 = arith.addf %250, %254 : vector<8x128xf32>
    %256 = vector.extract_strided_slice %6 {offsets = [0, 0, 0], sizes = [8, 1, 1], strides = [1, 1, 1]} : vector<8x3x1xf32> to vector<8x1x1xf32>
    %257 = vector.shape_cast %256 : vector<8x1x1xf32> to vector<8x1xf32>
    %258 = vector.broadcast %257 : vector<8x1xf32> to vector<8x128xf32>
    %259 = arith.addf %255, %258 : vector<8x128xf32>
    %260 = vector.extract_strided_slice %2 {offsets = [0, 1, 0], sizes = [8, 1, 1], strides = [1, 1, 1]} : vector<8x3x3xf32> to vector<8x1x1xf32>
    %261 = vector.shape_cast %260 : vector<8x1x1xf32> to vector<8x1xf32>
    %262 = vector.broadcast %261 : vector<8x1xf32> to vector<8x128xf32>
    %263 = arith.mulf %262, %183 : vector<8x128xf32>
    %264 = vector.extract_strided_slice %2 {offsets = [0, 1, 1], sizes = [8, 1, 1], strides = [1, 1, 1]} : vector<8x3x3xf32> to vector<8x1x1xf32>
    %265 = vector.shape_cast %264 : vector<8x1x1xf32> to vector<8x1xf32>
    %266 = vector.broadcast %265 : vector<8x1xf32> to vector<8x128xf32>
    %267 = arith.mulf %266, %185 : vector<8x128xf32>
    %268 = arith.addf %263, %267 : vector<8x128xf32>
    %269 = vector.extract_strided_slice %2 {offsets = [0, 1, 2], sizes = [8, 1, 1], strides = [1, 1, 1]} : vector<8x3x3xf32> to vector<8x1x1xf32>
    %270 = vector.shape_cast %269 : vector<8x1x1xf32> to vector<8x1xf32>
    %271 = vector.broadcast %270 : vector<8x1xf32> to vector<8x128xf32>
    %272 = arith.mulf %271, %187 : vector<8x128xf32>
    %273 = arith.addf %268, %272 : vector<8x128xf32>
    %274 = vector.extract_strided_slice %6 {offsets = [0, 1, 0], sizes = [8, 1, 1], strides = [1, 1, 1]} : vector<8x3x1xf32> to vector<8x1x1xf32>
    %275 = vector.shape_cast %274 : vector<8x1x1xf32> to vector<8x1xf32>
    %276 = vector.broadcast %275 : vector<8x1xf32> to vector<8x128xf32>
    %277 = arith.addf %273, %276 : vector<8x128xf32>
    %278 = vector.extract_strided_slice %2 {offsets = [0, 2, 0], sizes = [8, 1, 1], strides = [1, 1, 1]} : vector<8x3x3xf32> to vector<8x1x1xf32>
    %279 = vector.shape_cast %278 : vector<8x1x1xf32> to vector<8x1xf32>
    %280 = vector.broadcast %279 : vector<8x1xf32> to vector<8x128xf32>
    %281 = arith.mulf %280, %183 : vector<8x128xf32>
    %282 = vector.extract_strided_slice %2 {offsets = [0, 2, 1], sizes = [8, 1, 1], strides = [1, 1, 1]} : vector<8x3x3xf32> to vector<8x1x1xf32>
    %283 = vector.shape_cast %282 : vector<8x1x1xf32> to vector<8x1xf32>
    %284 = vector.broadcast %283 : vector<8x1xf32> to vector<8x128xf32>
    %285 = arith.mulf %284, %185 : vector<8x128xf32>
    %286 = arith.addf %281, %285 : vector<8x128xf32>
    %287 = vector.extract_strided_slice %2 {offsets = [0, 2, 2], sizes = [8, 1, 1], strides = [1, 1, 1]} : vector<8x3x3xf32> to vector<8x1x1xf32>
    %288 = vector.shape_cast %287 : vector<8x1x1xf32> to vector<8x1xf32>
    %289 = vector.broadcast %288 : vector<8x1xf32> to vector<8x128xf32>
    %290 = arith.mulf %289, %187 : vector<8x128xf32>
    %291 = arith.addf %286, %290 : vector<8x128xf32>
    %292 = vector.extract_strided_slice %6 {offsets = [0, 2, 0], sizes = [8, 1, 1], strides = [1, 1, 1]} : vector<8x3x1xf32> to vector<8x1x1xf32>
    %293 = vector.shape_cast %292 : vector<8x1x1xf32> to vector<8x1xf32>
    %294 = vector.broadcast %293 : vector<8x1xf32> to vector<8x128xf32>
    %295 = arith.addf %291, %294 : vector<8x128xf32>
    %296 = arith.subf %259, %205 : vector<8x128xf32>
    %297 = arith.subf %277, %223 : vector<8x128xf32>
    %298 = arith.subf %295, %241 : vector<8x128xf32>
    %299 = arith.mulf %296, %296 : vector<8x128xf32>
    %300 = arith.mulf %297, %297 : vector<8x128xf32>
    %301 = arith.addf %299, %300 : vector<8x128xf32>
    %302 = arith.mulf %298, %298 : vector<8x128xf32>
    %303 = arith.addf %301, %302 : vector<8x128xf32>
    %304 = math.sqrt %303 : vector<8x128xf32>
    %cst_36 = arith.constant dense<0.000000e+00> : vector<8xf32>
    %305 = vector.multi_reduction <add>, %304, %cst_36 [1] : vector<8x128xf32> to vector<8xf32>
    %306 = vector.shape_cast %305 : vector<8xf32> to vector<8x1xf32>
    %cst_37 = arith.constant 7.812500e-03 : f32
    %307 = vector.broadcast %cst_37 : f32 to vector<8x1xf32>
    %308 = arith.mulf %306, %307 : vector<8x1xf32>
    %309 = arith.divf %308, %10 : vector<8x1xf32>
    %310 = vector.extract_strided_slice %3 {offsets = [0, 0, 0], sizes = [8, 1, 1], strides = [1, 1, 1]} : vector<8x3x3xf32> to vector<8x1x1xf32>
    %311 = vector.shape_cast %310 : vector<8x1x1xf32> to vector<8x1xf32>
    %312 = vector.broadcast %311 : vector<8x1xf32> to vector<8x128xf32>
    %313 = arith.mulf %312, %183 : vector<8x128xf32>
    %314 = vector.extract_strided_slice %3 {offsets = [0, 0, 1], sizes = [8, 1, 1], strides = [1, 1, 1]} : vector<8x3x3xf32> to vector<8x1x1xf32>
    %315 = vector.shape_cast %314 : vector<8x1x1xf32> to vector<8x1xf32>
    %316 = vector.broadcast %315 : vector<8x1xf32> to vector<8x128xf32>
    %317 = arith.mulf %316, %185 : vector<8x128xf32>
    %318 = arith.addf %313, %317 : vector<8x128xf32>
    %319 = vector.extract_strided_slice %3 {offsets = [0, 0, 2], sizes = [8, 1, 1], strides = [1, 1, 1]} : vector<8x3x3xf32> to vector<8x1x1xf32>
    %320 = vector.shape_cast %319 : vector<8x1x1xf32> to vector<8x1xf32>
    %321 = vector.broadcast %320 : vector<8x1xf32> to vector<8x128xf32>
    %322 = arith.mulf %321, %187 : vector<8x128xf32>
    %323 = arith.addf %318, %322 : vector<8x128xf32>
    %324 = vector.extract_strided_slice %7 {offsets = [0, 0, 0], sizes = [8, 1, 1], strides = [1, 1, 1]} : vector<8x3x1xf32> to vector<8x1x1xf32>
    %325 = vector.shape_cast %324 : vector<8x1x1xf32> to vector<8x1xf32>
    %326 = vector.broadcast %325 : vector<8x1xf32> to vector<8x128xf32>
    %327 = arith.addf %323, %326 : vector<8x128xf32>
    %328 = vector.extract_strided_slice %3 {offsets = [0, 1, 0], sizes = [8, 1, 1], strides = [1, 1, 1]} : vector<8x3x3xf32> to vector<8x1x1xf32>
    %329 = vector.shape_cast %328 : vector<8x1x1xf32> to vector<8x1xf32>
    %330 = vector.broadcast %329 : vector<8x1xf32> to vector<8x128xf32>
    %331 = arith.mulf %330, %183 : vector<8x128xf32>
    %332 = vector.extract_strided_slice %3 {offsets = [0, 1, 1], sizes = [8, 1, 1], strides = [1, 1, 1]} : vector<8x3x3xf32> to vector<8x1x1xf32>
    %333 = vector.shape_cast %332 : vector<8x1x1xf32> to vector<8x1xf32>
    %334 = vector.broadcast %333 : vector<8x1xf32> to vector<8x128xf32>
    %335 = arith.mulf %334, %185 : vector<8x128xf32>
    %336 = arith.addf %331, %335 : vector<8x128xf32>
    %337 = vector.extract_strided_slice %3 {offsets = [0, 1, 2], sizes = [8, 1, 1], strides = [1, 1, 1]} : vector<8x3x3xf32> to vector<8x1x1xf32>
    %338 = vector.shape_cast %337 : vector<8x1x1xf32> to vector<8x1xf32>
    %339 = vector.broadcast %338 : vector<8x1xf32> to vector<8x128xf32>
    %340 = arith.mulf %339, %187 : vector<8x128xf32>
    %341 = arith.addf %336, %340 : vector<8x128xf32>
    %342 = vector.extract_strided_slice %7 {offsets = [0, 1, 0], sizes = [8, 1, 1], strides = [1, 1, 1]} : vector<8x3x1xf32> to vector<8x1x1xf32>
    %343 = vector.shape_cast %342 : vector<8x1x1xf32> to vector<8x1xf32>
    %344 = vector.broadcast %343 : vector<8x1xf32> to vector<8x128xf32>
    %345 = arith.addf %341, %344 : vector<8x128xf32>
    %346 = vector.extract_strided_slice %3 {offsets = [0, 2, 0], sizes = [8, 1, 1], strides = [1, 1, 1]} : vector<8x3x3xf32> to vector<8x1x1xf32>
    %347 = vector.shape_cast %346 : vector<8x1x1xf32> to vector<8x1xf32>
    %348 = vector.broadcast %347 : vector<8x1xf32> to vector<8x128xf32>
    %349 = arith.mulf %348, %183 : vector<8x128xf32>
    %350 = vector.extract_strided_slice %3 {offsets = [0, 2, 1], sizes = [8, 1, 1], strides = [1, 1, 1]} : vector<8x3x3xf32> to vector<8x1x1xf32>
    %351 = vector.shape_cast %350 : vector<8x1x1xf32> to vector<8x1xf32>
    %352 = vector.broadcast %351 : vector<8x1xf32> to vector<8x128xf32>
    %353 = arith.mulf %352, %185 : vector<8x128xf32>
    %354 = arith.addf %349, %353 : vector<8x128xf32>
    %355 = vector.extract_strided_slice %3 {offsets = [0, 2, 2], sizes = [8, 1, 1], strides = [1, 1, 1]} : vector<8x3x3xf32> to vector<8x1x1xf32>
    %356 = vector.shape_cast %355 : vector<8x1x1xf32> to vector<8x1xf32>
    %357 = vector.broadcast %356 : vector<8x1xf32> to vector<8x128xf32>
    %358 = arith.mulf %357, %187 : vector<8x128xf32>
    %359 = arith.addf %354, %358 : vector<8x128xf32>
    %360 = vector.extract_strided_slice %7 {offsets = [0, 2, 0], sizes = [8, 1, 1], strides = [1, 1, 1]} : vector<8x3x1xf32> to vector<8x1x1xf32>
    %361 = vector.shape_cast %360 : vector<8x1x1xf32> to vector<8x1xf32>
    %362 = vector.broadcast %361 : vector<8x1xf32> to vector<8x128xf32>
    %363 = arith.addf %359, %362 : vector<8x128xf32>
    %364 = vector.extract_strided_slice %4 {offsets = [0, 0, 0], sizes = [8, 1, 1], strides = [1, 1, 1]} : vector<8x3x3xf32> to vector<8x1x1xf32>
    %365 = vector.shape_cast %364 : vector<8x1x1xf32> to vector<8x1xf32>
    %366 = vector.broadcast %365 : vector<8x1xf32> to vector<8x128xf32>
    %367 = arith.mulf %366, %183 : vector<8x128xf32>
    %368 = vector.extract_strided_slice %4 {offsets = [0, 0, 1], sizes = [8, 1, 1], strides = [1, 1, 1]} : vector<8x3x3xf32> to vector<8x1x1xf32>
    %369 = vector.shape_cast %368 : vector<8x1x1xf32> to vector<8x1xf32>
    %370 = vector.broadcast %369 : vector<8x1xf32> to vector<8x128xf32>
    %371 = arith.mulf %370, %185 : vector<8x128xf32>
    %372 = arith.addf %367, %371 : vector<8x128xf32>
    %373 = vector.extract_strided_slice %4 {offsets = [0, 0, 2], sizes = [8, 1, 1], strides = [1, 1, 1]} : vector<8x3x3xf32> to vector<8x1x1xf32>
    %374 = vector.shape_cast %373 : vector<8x1x1xf32> to vector<8x1xf32>
    %375 = vector.broadcast %374 : vector<8x1xf32> to vector<8x128xf32>
    %376 = arith.mulf %375, %187 : vector<8x128xf32>
    %377 = arith.addf %372, %376 : vector<8x128xf32>
    %378 = vector.extract_strided_slice %8 {offsets = [0, 0, 0], sizes = [8, 1, 1], strides = [1, 1, 1]} : vector<8x3x1xf32> to vector<8x1x1xf32>
    %379 = vector.shape_cast %378 : vector<8x1x1xf32> to vector<8x1xf32>
    %380 = vector.broadcast %379 : vector<8x1xf32> to vector<8x128xf32>
    %381 = arith.addf %377, %380 : vector<8x128xf32>
    %382 = vector.extract_strided_slice %4 {offsets = [0, 1, 0], sizes = [8, 1, 1], strides = [1, 1, 1]} : vector<8x3x3xf32> to vector<8x1x1xf32>
    %383 = vector.shape_cast %382 : vector<8x1x1xf32> to vector<8x1xf32>
    %384 = vector.broadcast %383 : vector<8x1xf32> to vector<8x128xf32>
    %385 = arith.mulf %384, %183 : vector<8x128xf32>
    %386 = vector.extract_strided_slice %4 {offsets = [0, 1, 1], sizes = [8, 1, 1], strides = [1, 1, 1]} : vector<8x3x3xf32> to vector<8x1x1xf32>
    %387 = vector.shape_cast %386 : vector<8x1x1xf32> to vector<8x1xf32>
    %388 = vector.broadcast %387 : vector<8x1xf32> to vector<8x128xf32>
    %389 = arith.mulf %388, %185 : vector<8x128xf32>
    %390 = arith.addf %385, %389 : vector<8x128xf32>
    %391 = vector.extract_strided_slice %4 {offsets = [0, 1, 2], sizes = [8, 1, 1], strides = [1, 1, 1]} : vector<8x3x3xf32> to vector<8x1x1xf32>
    %392 = vector.shape_cast %391 : vector<8x1x1xf32> to vector<8x1xf32>
    %393 = vector.broadcast %392 : vector<8x1xf32> to vector<8x128xf32>
    %394 = arith.mulf %393, %187 : vector<8x128xf32>
    %395 = arith.addf %390, %394 : vector<8x128xf32>
    %396 = vector.extract_strided_slice %8 {offsets = [0, 1, 0], sizes = [8, 1, 1], strides = [1, 1, 1]} : vector<8x3x1xf32> to vector<8x1x1xf32>
    %397 = vector.shape_cast %396 : vector<8x1x1xf32> to vector<8x1xf32>
    %398 = vector.broadcast %397 : vector<8x1xf32> to vector<8x128xf32>
    %399 = arith.addf %395, %398 : vector<8x128xf32>
    %400 = vector.extract_strided_slice %4 {offsets = [0, 2, 0], sizes = [8, 1, 1], strides = [1, 1, 1]} : vector<8x3x3xf32> to vector<8x1x1xf32>
    %401 = vector.shape_cast %400 : vector<8x1x1xf32> to vector<8x1xf32>
    %402 = vector.broadcast %401 : vector<8x1xf32> to vector<8x128xf32>
    %403 = arith.mulf %402, %183 : vector<8x128xf32>
    %404 = vector.extract_strided_slice %4 {offsets = [0, 2, 1], sizes = [8, 1, 1], strides = [1, 1, 1]} : vector<8x3x3xf32> to vector<8x1x1xf32>
    %405 = vector.shape_cast %404 : vector<8x1x1xf32> to vector<8x1xf32>
    %406 = vector.broadcast %405 : vector<8x1xf32> to vector<8x128xf32>
    %407 = arith.mulf %406, %185 : vector<8x128xf32>
    %408 = arith.addf %403, %407 : vector<8x128xf32>
    %409 = vector.extract_strided_slice %4 {offsets = [0, 2, 2], sizes = [8, 1, 1], strides = [1, 1, 1]} : vector<8x3x3xf32> to vector<8x1x1xf32>
    %410 = vector.shape_cast %409 : vector<8x1x1xf32> to vector<8x1xf32>
    %411 = vector.broadcast %410 : vector<8x1xf32> to vector<8x128xf32>
    %412 = arith.mulf %411, %187 : vector<8x128xf32>
    %413 = arith.addf %408, %412 : vector<8x128xf32>
    %414 = vector.extract_strided_slice %8 {offsets = [0, 2, 0], sizes = [8, 1, 1], strides = [1, 1, 1]} : vector<8x3x1xf32> to vector<8x1x1xf32>
    %415 = vector.shape_cast %414 : vector<8x1x1xf32> to vector<8x1xf32>
    %416 = vector.broadcast %415 : vector<8x1xf32> to vector<8x128xf32>
    %417 = arith.addf %413, %416 : vector<8x128xf32>
    %418 = tpu.reciprocal %363 {approx = true} : vector<8x128xf32> -> vector<8x128xf32>
    %419 = arith.mulf %363, %418 : vector<8x128xf32>
    %cst_38 = arith.constant 2.000000e+00 : f32
    %420 = vector.broadcast %cst_38 : f32 to vector<8x128xf32>
    %421 = arith.subf %420, %419 : vector<8x128xf32>
    %422 = arith.mulf %418, %421 : vector<8x128xf32>
    %423 = tpu.reciprocal %417 {approx = true} : vector<8x128xf32> -> vector<8x128xf32>
    %424 = arith.mulf %417, %423 : vector<8x128xf32>
    %cst_39 = arith.constant 2.000000e+00 : f32
    %425 = vector.broadcast %cst_39 : f32 to vector<8x128xf32>
    %426 = arith.subf %425, %424 : vector<8x128xf32>
    %427 = arith.mulf %423, %426 : vector<8x128xf32>
    %428 = arith.mulf %381, %427 : vector<8x128xf32>
    %429 = arith.mulf %327, %422 : vector<8x128xf32>
    %430 = arith.subf %428, %429 : vector<8x128xf32>
    %431 = arith.mulf %399, %427 : vector<8x128xf32>
    %432 = arith.mulf %345, %422 : vector<8x128xf32>
    %433 = arith.subf %431, %432 : vector<8x128xf32>
    %434 = arith.mulf %430, %430 : vector<8x128xf32>
    %435 = arith.mulf %433, %433 : vector<8x128xf32>
    %436 = arith.addf %434, %435 : vector<8x128xf32>
    %437 = math.sqrt %436 : vector<8x128xf32>
    %cst_40 = arith.constant dense<0.000000e+00> : vector<8xf32>
    %438 = vector.multi_reduction <add>, %437, %cst_40 [1] : vector<8x128xf32> to vector<8xf32>
    %439 = vector.shape_cast %438 : vector<8xf32> to vector<8x1xf32>
    %cst_41 = arith.constant 7.812500e-03 : f32
    %440 = vector.broadcast %cst_41 : f32 to vector<8x1xf32>
    %441 = arith.mulf %439, %440 : vector<8x1xf32>
    %cst_42 = arith.constant 0.000000e+00 : f32
    %442 = vector.broadcast %cst_42 : f32 to vector<8x3xf32>
    %443 = tpu.concatenate %22, %30, %309, %441, %181, %442 in 1 : vector<8x1xf32>, vector<8x1xf32>, vector<8x1xf32>, vector<8x1xf32>, vector<8x1xf32>, vector<8x3xf32> -> vector<8x8xf32>
    %c0_43 = arith.constant 0 : index
    %c0_44 = arith.constant 0 : index
    %444 = vector.load %arg4[%c0_43, %c0_44] : memref<8x8xf32, #tpu.memory_space<vmem>>, vector<8x8xf32>
    tpu.vector_store %arg4[%c0_43, %c0_44], %443 {strides = array<i32>} : memref<8x8xf32, #tpu.memory_space<vmem>>, vector<8x8xf32>,
    return
  }
  func.func @transform_0(%arg0: i32) -> (i32, i32, i32) {
    %c0_i32 = arith.constant 0 : i32
    %c0_i32_0 = arith.constant 0 : i32
    %c0_i32_1 = arith.constant 0 : i32
    return %arg0, %c0_i32, %c0_i32_0 : i32, i32, i32
  }
  func.func @transform_1(%arg0: i32) -> (i32, i32, i32) {
    %c0_i32 = arith.constant 0 : i32
    %c0_i32_0 = arith.constant 0 : i32
    %c0_i32_1 = arith.constant 0 : i32
    return %c0_i32, %arg0, %c0_i32_0 : i32, i32, i32
  }
  func.func @transform_2(%arg0: i32) -> (i32, i32, i32) {
    %c0_i32 = arith.constant 0 : i32
    %c0_i32_0 = arith.constant 0 : i32
    %c0_i32_1 = arith.constant 0 : i32
    return %c0_i32, %arg0, %c0_i32_0 : i32, i32, i32
  }
  func.func @transform_3(%arg0: i32) -> (i32, i32) {
    %c0_i32 = arith.constant 0 : i32
    %c0_i32_0 = arith.constant 0 : i32
    return %arg0, %c0_i32 : i32, i32
  }
}

</mosaic_0001>

<bundles_post_ra>
// kernel: tpu_custom_call.1
= control target key start
LH: loop header
LB: loop body
LE: loop exit
PB: predicated region body
PF: predicated region fallthrough
CT: control target
= control target key end

     0   :  { %8 = vsyncpa [#allocation3], 0  ;;  %s8714_s0 = inlined_call_operand.hbm [shape: f32[16,8,16], index: 0, kind: input, shape index: {}]   ;;  %s8715_s1 = inlined_call_operand.hbm [shape: f32[4,16,256], index: 1, kind: input, shape index: {}]   ;;  %s8716_s2 = inlined_call_operand.hbm [shape: f32[3,16,128], index: 2, kind: input, shape index: {}]   ;;  %s8717_s3 = inlined_call_operand.vmem [shape: f32[16,8], index: 3, kind: output, shape index: {}]  }
   0x1   :  { %10 = vsyncpa [#allocation3 + $0x1], 0 }
   0x2   :  { %11 = vsyncpa [#allocation5], 0 }
   0x3   :  { %13 = vsyncpa [#allocation5 + $0x1], 0  ;;  %s4004_s12 = smov 0   ;;  %s4006_s13 = smov 0  }
   0x4   :  { %s4008_s14 = smov 0   ;;  %s4010_s15 = smov 0  }
   0x5 LB: > { %s4023_s16 = sadd.s32 4294967295, %s3957_s15   ;;  %s4026_s17 = sadd.s32 1, %s3957_s15   ;;  %s3957_s15 = sphi %s4010_s15, %s10283_s15   ;;  %s3953_s14 = sphi %s4008_s14, %s10282_s14   ;;  %s3949_s13 = sphi %s4006_s13, %s10281_s13   ;;  %s3945_s12 = sphi %s4004_s12, %s10280_s12  }
   0x6   : > { %s23_s18 = ssub.s32 %s3957_s15, %s4026_s17  ;;  %s26_s19 = sadd.s32 1, %s3953_s14 }
   0x7   : > { %p24_p0 = scmp.eq.s32.totalorder %s23_s18, 0  ;;  %p33_p1 = scmp.ne.s32.totalorder %s3953_s14, %s3949_s13 }
   0x8   : > { %p34_p2 = scmp.eq.s32.totalorder %s3957_s15, 0  ;;  %p39_p3 = scmp.ne.s32.totalorder %s3949_s13, %s3945_s12 }
   0x9   : > { %s4036_s20 = scalar_select %p24_p0, %s3953_s14, %s26_s19  }
   0xa   : > { %p35_p4 = por %p34_p2, %p33_p1  ;;  %p40_p5 = scmp.eq.s32.totalorder %s4023_s16, 0 }
   0xb   : > { %p3586_p6 = scmp.lt.s32.totalorder %s3957_s15, 2  ;;  %s4045_s22 = sand.u32 1, %s3953_s14  }
   0xc   : > { %p4040_p7 = por %p40_p5, %p39_p3  ;;  %s3544_s23 = sshll.u32 %s4045_s22, 6 }
   0xd   : > { %p4048_p8 = pnand %p3586_p6, %p35_p4  ;;  %s162_s25 = sand.u32 1, %s3957_s15  }
   0xe   : > { %s9029_s21 = scalar_select %p4040_p7, 1, 0 }
   0xf   : > { %s3567_s26 = sshll.u32 %s3957_s15, 8  ;;  %s166_s27 = scalar_lea.vmem [#allocation4], %s3544_s23 }
  0x10   : > { %s173_s28 = sshll.u32 %s166_s27, 4  ;;  %s4059_s4 = scalar_lea.hbm %s8715_s1, %s3567_s26  ;;  %s4061_s28 = int_to_ptr.vmem [resolvable:$true] %s173_s28 }
  0x11   : > { %s4064_s5 = scalar_lea.sflag [#allocation5], %s162_s25  ;;  %s3835_s6 = scalar_lea.hbm %s4059_s4, 1024 }
  0x12   : > { %p3836_p10 = scmp.ne.s32.totalorder %s4059_s4, %s3835_s6  ;;  %p4070_p11 = pneg %p4048_p8 }
  0x13   : > { %s3840_s10 = scalar_lea.hbm %s8715_s1, 2048  ;;  %p3841_p0 = scmp.lt.s32.totalorder %s4059_s4, %s8715_s1 }
  0x14   : > { %p3838_p12 = pnand %p4070_p11, %p3836_p10  ;;  %p3842_p1 = scmp.lt.s32.totalorder %s3840_s10, %s3835_s6 }
  0x16   : > { %p3839_p13 = pneg %p3838_p12  ;;  %p3843_p2 = por %p3842_p1, %p3841_p0 }
  0x18   : > { %p3844_p3 = pnand %p3843_p2, %p3839_p13 }
  0x1a   : > { %3847 = shalt.err (!%p3844_p3)
}
  0x1b   : > { %s3848_s18 = scalar_lea.vmem %s4061_s28, 1024  ;;  %s3959_s19 = smov [#allocation4]  }
  0x1c   : > { %p3849_p4 = scmp.ne.s32.totalorder %s4061_s28, %s3848_s18  ;;  %s3853_s25 = sshll.u32 %s3959_s19, 4  ;;  %s3854_s25 = int_to_ptr.vmem [resolvable:$false] %s3853_s25 }
  0x1d   : > { %s3855_s26 = scalar_lea.vmem %s3854_s25, 2048  ;;  %p3856_p10 = scmp.lt.s32.totalorder %s4061_s28, %s3854_s25 }
  0x1e   : > { %p3851_p5 = pnand %p3849_p4, %p4070_p11  ;;  %p3857_p12 = scmp.lt.s32.totalorder %s3855_s26, %s3848_s18 }
  0x20   : > { %p3852_p6 = pneg %p3851_p5  ;;  %p3858_p9 = por %p3857_p12, %p3856_p10 }
  0x22   : > { %p3859_p7 = pnand %p3858_p9, %p3852_p6 }
  0x24   : > { %3862 = shalt.err (!%p3859_p7)
}
  0x25   : > { %s3960_s27 = smov 512   ;;  %s3961_s29 = smov 256  }
  0x26   : > { %s3962_s30 = smov 16   ;;  %p201_p13 = scmp.lt.s32.totalorder %s3957_s15, 3 }
  0x27   : > { %3582 = dma.hbm_to_vmem [thread:$0]  (!%p4048_p8), %s4059_s4, 1024, %s4061_s28, %s4064_s5, %s3960_s27, %s3961_s29, %s3962_s30  }
  0x28   : > { %s3566_s6 = sshll.u32 %s3957_s15, 10  ;;  %p9032_p9 = scmp.ge.s32.totalorder %s3957_s15, 1 }
  0x29   : > { %s4105_s11 = scalar_lea.hbm %s8714_s0, %s3566_s6  ;;  %s145_s12 = scalar_lea.vmem [#allocation2], %s3544_s23 }
  0x2a   : > { %p4098_p7 = pnand %p9032_p9, %p201_p13  ;;  %s152_s18 = sshll.u32 %s145_s12, 4  ;;  %s4109_s18 = int_to_ptr.vmem [resolvable:$true] %s152_s18 }
  0x2b   : > { %s142_s28 = scalar_lea.sflag [#allocation3], %s4045_s22  ;;  %s3863_s4 = scalar_lea.hbm %s4105_s11, 1024 }
  0x2c   : > { %s9033_s8 = scalar_select %p4098_p7, 1, 0 }
  0x2d   : > { %p3864_p0 = scmp.ne.s32.totalorder %s4105_s11, %s3863_s4  ;;  %s3868_s26 = scalar_lea.hbm %s8714_s0, 2048 }
  0x2e   : > { %p3869_p3 = scmp.lt.s32.totalorder %s4105_s11, %s8714_s0  ;;  %p3870_p4 = scmp.lt.s32.totalorder %s3868_s26, %s3863_s4 }
  0x2f   : > { %p3866_p1 = pnand %p3864_p0, %p4070_p11 }
  0x30   : > { %p3871_p5 = por %p3870_p4, %p3869_p3 }
  0x31   : > { %p3867_p2 = pneg %p3866_p1 }
  0x33   : > { %p3872_p6 = pnand %p3871_p5, %p3867_p2 }
  0x35   : > { %3875 = shalt.err (!%p3872_p6)
}
  0x36   : > { %s3876_s23 = scalar_lea.vmem %s4109_s18, 1024  ;;  %s3963_s6 = smov [#allocation2]  }
  0x37   : > { %p3877_p10 = scmp.ne.s32.totalorder %s4109_s18, %s3876_s23  ;;  %s3881_s9 = sshll.u32 %s3963_s6, 4  ;;  %s3882_s9 = int_to_ptr.vmem [resolvable:$false] %s3881_s9 }
  0x38   : > { %s3883_s10 = scalar_lea.vmem %s3882_s9, 2048  ;;  %p3884_p9 = scmp.lt.s32.totalorder %s4109_s18, %s3882_s9 }
  0x39   : > { %p3879_p12 = pnand %p3877_p10, %p4070_p11  ;;  %p3885_p0 = scmp.lt.s32.totalorder %s3883_s10, %s3876_s23 }
  0x3b   : > { %p3880_p13 = pneg %p3879_p12  ;;  %p3886_p1 = por %p3885_p0, %p3884_p9 }
  0x3d   : > { %p3887_p7 = pnand %p3886_p1, %p3880_p13 }
  0x3f   : > { %3890 = shalt.err (!%p3887_p7)
}
  0x40   : > { %s3964_s12 = smov 128   ;;  %s3965_s4 = smov 8  }
  0x41   : > { %3579 = dma.hbm_to_vmem [thread:$0]  (!%p4048_p8), %s4105_s11, 1024, %s4109_s18, %s142_s28, %s3964_s12, %s3964_s12, %s3965_s4  }
  0x42   : > { %s3568_s19 = smul.u32 24, %s4045_s22  ;;  %s3550_s25 = sshll.u32 %s3957_s15, 7 }
  0x43   : > { %s4142_s30 = scalar_lea.hbm %s8716_s2, %s3550_s25  ;;  %s3896_s15 = scalar_lea.hbm %s8716_s2, 768 }
  0x44   : > { %s187_s23 = scalar_lea.vmem [#allocation6], %s3568_s19  ;;  %s3891_s9 = scalar_lea.hbm %s4142_s30, 384 }
  0x45   : > { %s193_s6 = sshll.u32 %s187_s23, 4  ;;  %p3892_p7 = scmp.ne.s32.totalorder %s4142_s30, %s3891_s9  ;;  %s194_s6 = int_to_ptr.vmem [resolvable:$true] %s193_s6 }
  0x46   : > { %p3897_p4 = scmp.lt.s32.totalorder %s4142_s30, %s8716_s2  ;;  %p3898_p5 = scmp.lt.s32.totalorder %s3896_s15, %s3891_s9 }
  0x47   : > { %p3894_p2 = pnand %p3892_p7, %p4070_p11 }
  0x48   : > { %p3899_p6 = por %p3898_p5, %p3897_p4 }
  0x49   : > { %p3895_p3 = pneg %p3894_p2 }
  0x4b   : > { %p3900_p10 = pnand %p3899_p6, %p3895_p3 }
  0x4d   : > { %3903 = shalt.err (!%p3900_p10)
}
  0x4e   : > { %s3904_s28 = scalar_lea.vmem %s194_s6, 384  ;;  %s3966_s19 = smov [#allocation6]  }
  0x4f   : > { %p3905_p12 = scmp.ne.s32.totalorder %s194_s6, %s3904_s28  ;;  %s3909_s25 = sshll.u32 %s3966_s19, 4  ;;  %s3910_s25 = int_to_ptr.vmem [resolvable:$false] %s3909_s25 }
  0x50   : > { %s3911_s26 = scalar_lea.vmem %s3910_s25, 768  ;;  %p3912_p0 = scmp.lt.s32.totalorder %s194_s6, %s3910_s25 }
  0x51   : > { %p3907_p13 = pnand %p3905_p12, %p4070_p11  ;;  %p3913_p1 = scmp.lt.s32.totalorder %s3911_s26, %s3904_s28 }
  0x53   : > { %p3908_p9 = pneg %p3907_p13  ;;  %p3914_p7 = por %p3913_p1, %p3912_p0 }
  0x55   : > { %p3915_p2 = pnand %p3914_p7, %p3908_p9 }
  0x57   : > { %3918 = shalt.err (!%p3915_p2)
}
  0x58   : > { %3585 = dma.hbm_to_vmem [thread:$0]  (!%p4048_p8), %s4142_s30, 384, %s194_s6, %s4064_s5, %s3961_s29, %s3964_s12, %s3965_s4  }
  0x59   : > { %p9034_p11 = scmp.ne.s32.totalorder %s9033_s8, 0 }
  0x5b   : > { %205 = sbr.rel (%p9034_p11) target bundleno = 1172 (0x494), region = 32 }
  0x60   : > { %s4167_s7 = sand.u32 1, %s3949_s13   ;;  %p9035_p3 = scmp.ne.s32.totalorder %s9029_s21, 0 }
  0x61   : > { %s3552_s27 = sshll.u32 %s4167_s7, 6  ;;  %s208_s23 = scalar_lea.sflag [#allocation3], %s4167_s7 }
  0x62   : > { %s4171_s9 = scalar_lea.vmem [#allocation2], %s3552_s27 }
  0x63   : > { %3936 = dma.done.wait (%p9035_p3), %s208_s23, 1024  }
  0x64   : > { %3938 = vsyncadd (%p9035_p3), %s208_s23, 4294966272  ;;  %s216_s24 = sand.u32 1, %s4023_s16   ;;  %s4178_s29 = scalar_lea.vmem [#allocation4], %s3552_s27 }
  0x65   : > { %s217_s5 = scalar_lea.sflag [#allocation5], %s216_s24 }
  0x66   : > { %3940 = dma.done.wait (%p9035_p3), %s217_s5, 1408  }
  0x67   : > { %3942 = vsyncadd (%p9035_p3), %s217_s5, 4294965888  ;;  %v3967_v0 = vmov 8   ;;  %v3968_v1 = vmov 9   ;;  %v4186_v2 = vld [vmem:[%s4171_s9 + $0x10] sm:$0xff]  ;;  %v4189_v3 = vld [vmem:[%s4171_s9] sm:$0xff]  ;;  %s3969_s8 = smov 4  }
  0x68   : > { %3641 = vset.pattern.permute.xlu1 %v3967_v0  ;;  %3642 = vset.pattern.permute.xlu0 %v3968_v1  ;;  %9036 = vst [vmem:[#allocation9_spill] sm:$0xff] %v4186_v2  ;;  %9037 = vst [vmem:[#allocation10_spill] sm:$0xff] %v4189_v3  ;;  %v4194_v4 = vld [vmem:[%s4171_s9 + $0x18] sm:$0xff]  ;;  %v4197_v5 = vld [vmem:[%s4171_s9 + $0x8] sm:$0xff]  ;;  %s3970_s21 = smov 1   ;;  %v8719_v10 = vmov 1  }
  0x69   : > { %286 = vrot.lane.b32.xlu1 %v4186_v2, %s3969_s8  ;;  %282 = vrot.lane.b32.xlu0 %v4189_v3, %s3969_s8  ;;  %9038 = vst [vmem:[#allocation11_spill] sm:$0xff] %v4194_v4  ;;  %9039 = vst [vmem:[#allocation12_spill] sm:$0xff] %v4197_v5  ;;  %v4202_v6 = vld [vmem:[%s4171_s9 + $0x28] sm:$0xff]  ;;  %v4205_v7 = vld [vmem:[%s4171_s9 + $0x20] sm:$0xff]  ;;  %s3972_s12 = smov 124   ;;  %v3973_v51 = vmov 10  }
  0x6a   : > { %9040 = vst [vmem:[#allocation13_spill] sm:$0xff] %v4205_v7  ;;  %v4210_v8 = vld [vmem:[%s4171_s9 + $0x38] sm:$0xff]  ;;  %v4213_v9 = vld [vmem:[%s4171_s9 + $0x30] sm:$0xff]  ;;  %v3974_v52 = vmov 2   ;;  %v3975_v55 = vmov 12   ;;  %v3976_v59 = vmov 13  }
  0x6b   : > { %s3569_s4 = smul.u32 24, %s4167_s7  ;;  %vm346_vm0 = vcmask 18432   ;;  %vm413_vm1 = vcmask 1041409   ;;  %vm8994_vm2 = vcmask 1042434   ;;  %vm8993_vm3 = vcmask 1043459   ;;  %s3983_s6 = smov 2  }
  0x6c   : > { %vm8992_vm4 = vcmask 1044484   ;;  %vm8991_vm5 = vcmask 1045509   ;;  %vm8990_vm6 = vcmask 1046534   ;;  %vm8989_vm7 = vcmask 1047559   ;;  %p262_p8 = scmp.lt.s32.totalorder %s4023_s16, 1 }
  0x6d   : > { %288 = vrot.lane.b32.xlu1 %v4194_v4, %s3969_s8  ;;  %284 = vrot.lane.b32.xlu0 %v4197_v5, %s3969_s8  ;;  %s4319_s30 = scalar_lea.vmem [#allocation6], %s3569_s4  ;;  %vm8986_vm8 = vcmask 23552  }
  0x6e   : > { %s10285_s16 = smov (!%p262_p8, %s4023_s16), 1 }
  0x6f   : > { %s3554_s10 = sshll.u32 %s10285_s16, 3 }
  0x70   : > { %s265_s22 = scalar_lea.vmem %s8717_s3, %s3554_s10 }
  0x71   : > { %292 = vrot.lane.b32.xlu1 %v4202_v6, %s3969_s8  ;;  %290 = vrot.lane.b32.xlu0 %v4205_v7, %s3969_s8 }
  0x75   : > { %296 = vrot.lane.b32.xlu1 %v4210_v8, %s3969_s8  ;;  %294 = vrot.lane.b32.xlu0 %v4213_v9, %s3969_s8 }
  0x79   : > { %438 = vrot.lane.b32.xlu1 %v4197_v5, %s3970_s21  ;;  %436 = vrot.lane.b32.xlu0 %v4189_v3, %s3970_s21 }
  0x7d   : > { %440 = vrot.lane.b32.xlu1 %v4186_v2, %s3970_s21  ;;  %442 = vrot.lane.b32.xlu0 %v4194_v4, %s3970_s21 }
  0x81   : > { %444 = vrot.lane.b32.xlu1 %v4205_v7, %s3970_s21  ;;  %446 = vrot.lane.b32.xlu0 %v4202_v6, %s3970_s21 }
  0x85   : > { %448 = vrot.lane.b32.xlu1 %v4213_v9, %s3970_s21  ;;  %450 = vrot.lane.b32.xlu0 %v4210_v8, %s3970_s21 }
  0x89   : > { %574 = vperm.xlu1 %3641, %v4189_v3   ;;  %654 = vperm.xlu0 %3642, %v4189_v3  }
  0x8d   : > { %578 = vperm.xlu1 %3641, %v4197_v5   ;;  %3645 = vset.pattern.permute.xlu0 %v8719_v10 }
  0x91   : > { %582 = vperm.xlu1 %3641, %v4186_v2  }
  0x95   : > { %586 = vperm.xlu1 %3641, %v4194_v4  }
  0x99   : > { %590 = vperm.xlu1 %3641, %v4205_v7  }
  0x9d   : > { %594 = vperm.xlu1 %3641, %v4202_v6  }
  0xa1   : > { %598 = vperm.xlu1 %3641, %v4213_v9  }
  0xa5   : > { %602 = vperm.xlu1 %3641, %v4210_v8  }
  0xa9   : > { %3643 = vset.pattern.permute.xlu1 %v3968_v1 }
  0xaa   : > { %658 = vperm.xlu1 %3643, %v4197_v5  }
  0xae   : > { %662 = vperm.xlu1 %3643, %v4186_v2  }
  0xb2   : > { %666 = vperm.xlu1 %3643, %v4194_v4  }
  0xb6   : > { %670 = vperm.xlu1 %3643, %v4205_v7  }
  0xba   : > { %3644 = vset.pattern.permute.xlu1 %v8719_v10 }
  0xdb   : > { %v287_v11 = vpop.permute.xlu1 %286  ;;  %v283_v12 = vpop.permute.xlu0 %282 }
  0xdc   : > { %v306_v13 = vmul.f32 %v283_v12, %v4189_v3  ;;  %v308_v16 = vmul.f32 %v287_v11, %v4186_v2  ;;  %v4317_v11 = vld [vmem:[%s4178_s29 + $0x8] sm:$0xff] }
  0xde   : > { %322 = vrot.lane.b32.xlu0 %v306_v13, %s3972_s12  ;;  %v4328_v13 = vrot.slane %v4317_v11, 1 }
  0xdf   : > { %v289_v14 = vpop.permute.xlu1 %288  ;;  %v285_v15 = vpop.permute.xlu0 %284 }
  0xe0   : > { %v307_v17 = vmul.f32 %v285_v15, %v4197_v5  ;;  %v309_v20 = vmul.f32 %v289_v14, %v4194_v4  ;;  %9043 = vst [vmem:[#allocation16_spill] sm:$0xff] %v4328_v13  ;;  %v4334_v15 = vrot.slane %v4317_v11, 7 }
  0xe2   : > { %326 = vrot.lane.b32.xlu0 %v308_v16, %s3972_s12  ;;  %324 = vrot.lane.b32.xlu1 %v307_v17, %s3972_s12  ;;  %9045 = vst [vmem:[#allocation18_spill] sm:$0xff] %v4334_v15 }
  0xe3   : > { %v293_v18 = vpop.permute.xlu1 %292  ;;  %v291_v19 = vpop.permute.xlu0 %290 }
  0xe4   : > { %v310_v21 = vmul.f32 %v291_v19, %v4205_v7  ;;  %v311_v24 = vmul.f32 %v293_v18, %v4202_v6 }
  0xe6   : > { %328 = vrot.lane.b32.xlu1 %v309_v20, %s3972_s12  ;;  %330 = vrot.lane.b32.xlu0 %v310_v21, %s3972_s12  ;;  %v4349_v20 = vrot.slane %v4317_v11, 2 }
  0xe7   : > { %v297_v22 = vpop.permute.xlu1 %296  ;;  %v295_v23 = vpop.permute.xlu0 %294 }
  0xe8   : > { %v312_v25 = vmul.f32 %v295_v23, %v4213_v9  ;;  %v313_v28 = vmul.f32 %v297_v22, %v4210_v8  ;;  %9050 = vst [vmem:[#allocation23_spill] sm:$0xff] %v4349_v20  ;;  %v4358_v23 = vrot.slane %v4317_v11, 3 }
  0xea   : > { %332 = vrot.lane.b32.xlu1 %v311_v24, %s3972_s12  ;;  %334 = vrot.lane.b32.xlu0 %v312_v25, %s3972_s12  ;;  %9053 = vst [vmem:[#allocation26_spill] sm:$0xff] %v4358_v23  ;;  %v4364_v25 = vld [vmem:[%s4178_s29 + $0x10] sm:$0xff] }
  0xeb   : > { %v439_v26 = vpop.permute.xlu1 %438  ;;  %v437_v27 = vpop.permute.xlu0 %436  ;;  %9055 = vst [vmem:[#allocation28_spill] sm:$0xff] %v4364_v25 }
  0xec   : > { %v461_v29 = vsub.f32 %v4197_v5, %v439_v26  ;;  %v460_v30 = vsub.f32 %v4189_v3, %v437_v27 }
  0xee   : > { %v469_v31 = vmul.f32 %v461_v29, %v461_v29  ;;  %v468_v32 = vmul.f32 %v460_v30, %v460_v30  ;;  %336 = vrot.lane.b32.xlu1 %v313_v28, %s3972_s12  ;;  %v4372_v28 = vrot.slane %v4317_v11, 4  ;;  %v4378_v30 = vld [vmem:[%s4178_s29 + $0x18] sm:$0xff] }
  0xef   : > { %v441_v33 = vpop.permute.xlu1 %440  ;;  %v443_v34 = vpop.permute.xlu0 %442  ;;  %9059 = vst [vmem:[#allocation32_spill] sm:$0xff] %v4378_v30 }
  0xf0   : > { %v462_v35 = vsub.f32 %v4186_v2, %v441_v33  ;;  %488 = vperm.xlu0 %3645, %v469_v31   ;;  %v463_v37 = vsub.f32 %v4194_v4, %v443_v34  ;;  %9057 = vst [vmem:[#allocation30_spill] sm:$0xff] %v4372_v28  ;;  %v4381_v31 = vld [vmem:[%s4319_s30 + $0x8] sm:$0xff]  ;;  %v4389_v34 = vrot.slane %v4317_v11, 5 }
  0xf1   : > { %9060 = vst [vmem:[#allocation33_spill] sm:$0xff] %v4381_v31  ;;  %v4451_v10 = vrot.slane %v4381_v31, 6 }
  0xf2   : > { %v470_v36 = vmul.f32 %v462_v35, %v462_v35  ;;  %485 = vperm.xlu1 %3644, %v468_v32   ;;  %v471_v42 = vmul.f32 %v463_v37, %v463_v37  ;;  %9063 = vst [vmem:[#allocation36_spill] sm:$0xff] %v4389_v34  ;;  %v4399_v37 = vrot.slane %v4317_v11, 6 }
  0xf3   : > { %v445_v38 = vpop.permute.xlu1 %444  ;;  %v447_v39 = vpop.permute.xlu0 %446  ;;  %9083 = vst [vmem:[#allocation56_spill] sm:$0xff] %v4451_v10 }
  0xf4   : > { %v464_v40 = vsub.f32 %v4205_v7, %v445_v38  ;;  %v465_v43 = vsub.f32 %v4202_v6, %v447_v39  ;;  %9066 = vst [vmem:[#allocation39_spill] sm:$0xff] %v4399_v37  ;;  %v4405_v39 = vrot.slane %v4364_v25, 1 }
  0xf6   : > { %v472_v41 = vmul.f32 %v464_v40, %v464_v40  ;;  %491 = vperm.xlu1 %3644, %v470_v36   ;;  %v473_v48 = vmul.f32 %v465_v43, %v465_v43  ;;  %9068 = vst [vmem:[#allocation41_spill] sm:$0xff] %v4405_v39  ;;  %v4408_v40 = vrot.slane %v4378_v30, 1 }
  0xf7   : > { %v449_v44 = vpop.permute.xlu1 %448  ;;  %v451_v45 = vpop.permute.xlu0 %450 }
  0xf8   : > { %v466_v46 = vsub.f32 %v4213_v9, %v449_v44  ;;  %497 = vperm.xlu0 %3645, %v472_v41   ;;  %v467_v49 = vsub.f32 %v4210_v8, %v451_v45  ;;  %9069 = vst [vmem:[#allocation42_spill] sm:$0xff] %v4408_v40  ;;  %v4414_v41 = vrot.slane %v4378_v30, 7  ;;  %v4422_v45 = vrot.slane %v4381_v31, 7 }
  0xfa   : > { %v474_v47 = vmul.f32 %v466_v46, %v466_v46  ;;  %494 = vperm.xlu1 %3644, %v471_v42   ;;  %v475_v50 = vmul.f32 %v467_v49, %v467_v49  ;;  %9071 = vst [vmem:[#allocation44_spill] sm:$0xff] %v4414_v41  ;;  %v4417_v42 = vrot.slane %v4381_v31, 1  ;;  %9074 = vst [vmem:[#allocation47_spill] sm:$0xff] %v4422_v45  ;;  %v4429_v49 = vrot.slane %v4364_v25, 2 }
  0xfc   : > { %503 = vperm.xlu0 %3645, %v474_v47   ;;  %9072 = vst [vmem:[#allocation45_spill] sm:$0xff] %v4417_v42  ;;  %9076 = vst [vmem:[#allocation49_spill] sm:$0xff] %v4429_v49 }
  0xfe   : > { %500 = vperm.xlu1 %3644, %v473_v48  }
 0x100   : > { %3648 = vset.pattern.permute.xlu0 %v3973_v51 }
 0x101   : > { %766 = vperm.xlu0 %3648, %v4205_v7  }
 0x102   : > { %506 = vperm.xlu1 %3644, %v475_v50   ;;  %v4432_v50 = vrot.slane %v4378_v30, 2 }
 0x104   : > { %v4271_v53 = vpop.permute.xlu1 %574  ;;  %v4366_v26 = vpop.permute.xlu0 %654  ;;  %9077 = vst [vmem:[#allocation50_spill] sm:$0xff] %v4432_v50 }
 0x105   : > { %778 = vperm.xlu0 %3648, %v4210_v8   ;;  %v718_v49 = vmul.f32 %v4378_v30, %v4366_v26 }
 0x106   : > { %3646 = vset.pattern.permute.xlu1 %v3968_v1  ;;  %v4314_v1 = vld [vmem:[%s4178_s29] sm:$0xff] }
 0x107   : > { %674 = vperm.xlu1 %3646, %v4202_v6   ;;  %v4325_v12 = vrot.slane %v4314_v1, 1  ;;  %v4331_v14 = vrot.slane %v4314_v1, 7  ;;  %v4346_v19 = vrot.slane %v4314_v1, 2  ;;  %v4355_v22 = vrot.slane %v4314_v1, 3 }
 0x108   : > { %v4276_v54 = vpop.permute.xlu1 %578  ;;  %v4369_v27 = vrot.slane %v4314_v1, 4  ;;  %v4386_v33 = vrot.slane %v4314_v1, 5  ;;  %v4396_v36 = vrot.slane %v4314_v1, 6 }
 0x109   : > { %3650 = vset.pattern.permute.xlu0 %v3974_v52  ;;  %9042 = vst [vmem:[#allocation15_spill] sm:$0xff] %v4325_v12  ;;  %9044 = vst [vmem:[#allocation17_spill] sm:$0xff] %v4331_v14 }
 0x10a   : > { %849 = vperm.xlu0 %3650, %v4197_v5   ;;  %9049 = vst [vmem:[#allocation22_spill] sm:$0xff] %v4346_v19  ;;  %9052 = vst [vmem:[#allocation25_spill] sm:$0xff] %v4355_v22 }
 0x10b   : > { %678 = vperm.xlu1 %3646, %v4213_v9   ;;  %9056 = vst [vmem:[#allocation29_spill] sm:$0xff] %v4369_v27  ;;  %9062 = vst [vmem:[#allocation35_spill] sm:$0xff] %v4386_v33 }
 0x10c   : > { %v4281_v56 = vpop.permute.xlu1 %582  ;;  %9065 = vst [vmem:[#allocation38_spill] sm:$0xff] %v4396_v36 }
 0x10e   : > { %858 = vperm.xlu0 %3650, %v4205_v7  }
 0x10f   : > { %682 = vperm.xlu1 %3646, %v4210_v8  }
 0x110   : > { %v4286_v57 = vpop.permute.xlu1 %586 }
 0x112   : > { %864 = vperm.xlu0 %3650, %v4213_v9  }
 0x113   : > { %3647 = vset.pattern.permute.xlu1 %v3973_v51  ;;  %v4435_v51 = vrot.slane %v4381_v31, 2 }
 0x114   : > { %750 = vperm.xlu1 %3647, %v4189_v3   ;;  %v4291_v58 = vpop.permute.xlu1 %590 }
 0x115   : > { %9078 = vst [vmem:[#allocation51_spill] sm:$0xff] %v4435_v51 }
 0x116   : > { %3651 = vset.pattern.permute.xlu0 %v3975_v55 }
 0x117   : > { %1094 = vperm.xlu0 %3651, %v4189_v3  }
 0x118   : > { %754 = vperm.xlu1 %3647, %v4197_v5   ;;  %v4295_v60 = vpop.permute.xlu1 %594 }
 0x11b   : > { %1106 = vperm.xlu0 %3651, %v4194_v4  }
 0x11c   : > { %758 = vperm.xlu1 %3647, %v4186_v2   ;;  %v4299_v61 = vpop.permute.xlu1 %598 }
 0x11f   : > { %1114 = vperm.xlu0 %3651, %v4202_v6  }
 0x120   : > { %762 = vperm.xlu1 %3647, %v4194_v4   ;;  %v4302_v62 = vpop.permute.xlu1 %602 }
 0x123   : > { %1122 = vperm.xlu0 %3651, %v4210_v8  }
 0x124   : > { %770 = vperm.xlu1 %3647, %v4202_v6  }
 0x125   : > { %v4306_v63 = vpop.permute.xlu1 %658 }
 0x127   : > { %3654 = vset.pattern.permute.xlu0 %v3976_v59 }
 0x128   : > { %774 = vperm.xlu1 %3647, %v4213_v9  }
 0x129   : > { %v4310_v0 = vpop.permute.xlu1 %662 }
 0x12a   : > { %9041 = vst [vmem:[#allocation14_spill] sm:$0xff] %v4310_v0 }
 0x12c   : > { %3649 = vset.pattern.permute.xlu1 %v3974_v52  ;;  %v4438_v52 = vrot.slane %v4364_v25, 6 }
 0x12d   : > { %846 = vperm.xlu1 %3649, %v4189_v3   ;;  %v4336_v16 = vpop.permute.xlu1 %666  ;;  %v4466_v3 = vrot.slane %v4364_v25, 4 }
 0x12e   : > { %9046 = vst [vmem:[#allocation19_spill] sm:$0xff] %v4336_v16  ;;  %9079 = vst [vmem:[#allocation52_spill] sm:$0xff] %v4438_v52 }
 0x12f   : > { %9088 = vst [vmem:[#allocation61_spill] sm:$0xff] %v4466_v3 }
 0x131   : > { %852 = vperm.xlu1 %3649, %v4186_v2   ;;  %v4419_v43 = vpop.permute.xlu1 %670 }
 0x132   : > { %9073 = vst [vmem:[#allocation46_spill] sm:$0xff] %v4419_v43  ;;  %v4472_v43 = vrot.slane %v4381_v31, 4 }
 0x134   : > { %9090 = vst [vmem:[#allocation63_spill] sm:$0xff] %v4472_v43 }
 0x135   : > { %855 = vperm.xlu1 %3649, %v4194_v4   ;;  %v4454_v4 = vrot.slane %v4364_v25, 3 }
 0x137   : > { %9084 = vst [vmem:[#allocation57_spill] sm:$0xff] %v4454_v4 }
 0x139   : > { %861 = vperm.xlu1 %3649, %v4202_v6   ;;  %v4322_v6 = vld [vmem:[%s4319_s30] sm:$0xff] }
 0x13a   : > { %v4340_v17 = vrot.slane %v4322_v6, 1  ;;  %v4343_v18 = vrot.slane %v4322_v6, 7  ;;  %v4352_v21 = vrot.slane %v4322_v6, 2  ;;  %v4361_v24 = vrot.slane %v4322_v6, 3 }
 0x13b   : > { %v4375_v29 = vrot.slane %v4322_v6, 4  ;;  %v4392_v35 = vrot.slane %v4322_v6, 5  ;;  %v4402_v38 = vrot.slane %v4322_v6, 6 }
 0x13c   : > { %9047 = vst [vmem:[#allocation20_spill] sm:$0xff] %v4340_v17  ;;  %9048 = vst [vmem:[#allocation21_spill] sm:$0xff] %v4343_v18 }
 0x13d   : > { %867 = vperm.xlu1 %3649, %v4210_v8   ;;  %v379_v8 = vlaneseq  ;;  %9051 = vst [vmem:[#allocation24_spill] sm:$0xff] %v4352_v21  ;;  %9054 = vst [vmem:[#allocation27_spill] sm:$0xff] %v4361_v24 }
 0x13e   : > { %9058 = vst [vmem:[#allocation31_spill] sm:$0xff] %v4375_v29  ;;  %9064 = vst [vmem:[#allocation37_spill] sm:$0xff] %v4392_v35 }
 0x13f   : > { %v4383_v32 = vand.u32 127, %v379_v8  ;;  %9067 = vst [vmem:[#allocation40_spill] sm:$0xff] %v4402_v38  ;;  %v4425_v47 = vshrl.u32 %v379_v8, 7  ;;  %v4448_v8 = vrot.slane %v4378_v30, 6 }
 0x141   : > { %3652 = vset.pattern.permute.xlu1 %v3975_v55  ;;  %9061 = vst [vmem:[#allocation34_spill] sm:$0xff] %v4383_v32  ;;  %9075 = vst [vmem:[#allocation48_spill] sm:$0xff] %v4425_v47  ;;  %v508_v48 = vadd.s32 4, %v4383_v32  ;;  %v4441_v55 = vld [vmem:[%s4178_s29 + $0x20] sm:$0xff]  ;;  %v4460_v32 = vld [vmem:[%s4319_s30 + $0x10] sm:$0xff] }
 0x142   : > { %1098 = vperm.xlu1 %3652, %v4197_v5   ;;  %9080 = vst [vmem:[#allocation53_spill] sm:$0xff] %v4441_v55  ;;  %9082 = vst [vmem:[#allocation55_spill] sm:$0xff] %v4448_v8  ;;  %v4481_v51 = vrot.slane %v4441_v55, 3  ;;  %v4493_v3 = vrot.slane %v4460_v32, 2  ;;  %v918_v5 = vmul.f32 %v4414_v41, %v4366_v26 }
 0x143   : > { %9086 = vst [vmem:[#allocation59_spill] sm:$0xff] %v4460_v32 }
 0x144   : > { %9093 = vst [vmem:[#allocation66_spill] sm:$0xff] %v4481_v51  ;;  %9097 = vst [vmem:[#allocation70_spill] sm:$0xff] %v4493_v3  ;;  %v4514_v3 = vrot.slane %v4441_v55, 7 }
 0x146   : > { %1102 = vperm.xlu1 %3652, %v4186_v2   ;;  %v4457_v2 = vrot.slane %v4378_v30, 3  ;;  %9104 = vst [vmem:[#allocation77_spill] sm:$0xff] %v4514_v3  ;;  %v997_v3 = vmul.f32 %v4396_v36, %v4271_v53 }
 0x148   : > { %9085 = vst [vmem:[#allocation58_spill] sm:$0xff] %v4457_v2  ;;  %v4478_v2 = vsub.s32 %v508_v48, %v4425_v47  ;;  %v4499_v48 = vrot.slane %v4460_v32, 4  ;;  %v4502_v47 = vrot.slane %v4441_v55, 6 }
 0x14a   : > { %1110 = vperm.xlu1 %3652, %v4205_v7   ;;  %9092 = vst [vmem:[#allocation65_spill] sm:$0xff] %v4478_v2  ;;  %9099 = vst [vmem:[#allocation72_spill] sm:$0xff] %v4499_v48  ;;  %v4520_v48 = vrot.slane %v4460_v32, 5  ;;  %v717_v2 = vmul.f32 %v4364_v25, %v4366_v26 }
 0x14b   : > { %9100 = vst [vmem:[#allocation73_spill] sm:$0xff] %v4502_v47 }
 0x14c   : > { %9106 = vst [vmem:[#allocation79_spill] sm:$0xff] %v4520_v48  ;;  %v4537_v48 = vrot.slane %v4378_v30, 5 }
 0x14e   : > { %1118 = vperm.xlu1 %3652, %v4213_v9   ;;  %v4411_v9 = vrot.slane %v4364_v25, 7  ;;  %9110 = vst [vmem:[#allocation83_spill] sm:$0xff] %v4537_v48  ;;  %v2856_v48 = vmul.f32 %v4343_v18, %v4271_v53 }
 0x150   : > { %9070 = vst [vmem:[#allocation43_spill] sm:$0xff] %v4411_v9  ;;  %v323_v44 = vpop.permute.xlu0 %322  ;;  %v917_v0 = vmul.f32 %v4411_v9, %v4366_v26  ;;  %v4577_v9 = vmul.f32 %v4328_v13, %v4276_v54 }
 0x151   : > { %v347_v46 = vsel %vm346_vm0, %v323_v44, 0.0  ;;  %v4444_v44 = vld [vmem:[%s4178_s29 + $0x28] sm:$0xff] }
 0x152   : > { %348 = vadd.xlane.f32.xlu0 %v347_v46  ;;  %9081 = vst [vmem:[#allocation54_spill] sm:$0xff] %v4444_v44  ;;  %3653 = vset.pattern.permute.xlu1 %v3976_v59  ;;  %v4463_v46 = vrot.slane %v4381_v31, 3  ;;  %v4469_v59 = vrot.slane %v4378_v30, 4  ;;  %v4490_v43 = vrot.slane %v4444_v44, 4  ;;  %v2816_v30 = vmul.f32 %v4381_v31, %v4366_v26  ;;  %9113 = vst [vmem:[#allocation86_spill] sm:$0xff] %v4577_v9 }
 0x153   : > { %v4601_v9 = vmul.f32 %v4322_v6, %v4276_v54 }
 0x154   : > { %9087 = vst [vmem:[#allocation60_spill] sm:$0xff] %v4463_v46  ;;  %9089 = vst [vmem:[#allocation62_spill] sm:$0xff] %v4469_v59  ;;  %v4474_v16 = vpop.permute.xlu1 %324  ;;  %v327_v4 = vpop.permute.xlu0 %326  ;;  %v4484_v46 = vrot.slane %v4444_v44, 3  ;;  %v4487_v59 = vrot.slane %v4441_v55, 4 }
 0x155   : > { %9091 = vst [vmem:[#allocation64_spill] sm:$0xff] %v4474_v16  ;;  %v353_v7 = vsel %vm346_vm0, %v327_v4, 0.0  ;;  %9096 = vst [vmem:[#allocation69_spill] sm:$0xff] %v4490_v43  ;;  %v4496_v4 = vrot.slane %v4460_v32, 3  ;;  %v4511_v43 = vrot.slane %v4444_v44, 6  ;;  %v4567_v16 = vmul.f32 %v4325_v12, %v4276_v54 }
 0x156   : > { %9094 = vst [vmem:[#allocation67_spill] sm:$0xff] %v4484_v46  ;;  %354 = vadd.xlane.f32.xlu0 %v353_v7  ;;  %9095 = vst [vmem:[#allocation68_spill] sm:$0xff] %v4487_v59  ;;  %v4505_v7 = vrot.slane %v4441_v55, 2  ;;  %v4508_v46 = vrot.slane %v4444_v44, 2  ;;  %v4530_v59 = vrot.slane %v4364_v25, 5  ;;  %v1014_v25 = vmul.f32 %v4448_v8, %v4366_v26 }
 0x157   : > { %9098 = vst [vmem:[#allocation71_spill] sm:$0xff] %v4496_v4  ;;  %9103 = vst [vmem:[#allocation76_spill] sm:$0xff] %v4511_v43  ;;  %v4517_v4 = vrot.slane %v4444_v44, 7  ;;  %v637_v43 = vmul.f32 %v4271_v53, %v4314_v1  ;;  %v4593_v8 = vmul.f32 %v4334_v15, %v4276_v54 }
 0x158   : > { %9101 = vst [vmem:[#allocation74_spill] sm:$0xff] %v4505_v7  ;;  %9102 = vst [vmem:[#allocation75_spill] sm:$0xff] %v4508_v46  ;;  %v329_v51 = vpop.permute.xlu1 %328  ;;  %v4524_v7 = vrot.slane %v4460_v32, 6  ;;  %v4527_v46 = vrot.slane %v4460_v32, 7 }
 0x159   : > { %9105 = vst [vmem:[#allocation78_spill] sm:$0xff] %v4517_v4  ;;  %v356_v47 = vsel %vm346_vm0, %v329_v51, 0.0  ;;  %9109 = vst [vmem:[#allocation82_spill] sm:$0xff] %v4530_v59  ;;  %v638_v4 = vmul.f32 %v4271_v53, %v4317_v11  ;;  %v4540_v51 = vrot.slane %v4381_v31, 5  ;;  %v998_v59 = vmul.f32 %v4399_v37, %v4271_v53 }
 0x15a   : > { %9107 = vst [vmem:[#allocation80_spill] sm:$0xff] %v4524_v7  ;;  %9108 = vst [vmem:[#allocation81_spill] sm:$0xff] %v4527_v46  ;;  %357 = vadd.xlane.f32.xlu0 %v356_v47  ;;  %v901_v7 = vmul.f32 %v4331_v14, %v4271_v53  ;;  %v902_v46 = vmul.f32 %v4334_v15, %v4271_v53  ;;  %v2808_v47 = vmul.f32 %v4322_v6, %v4271_v53 }
 0x15b   : > { %9111 = vst [vmem:[#allocation84_spill] sm:$0xff] %v4540_v51  ;;  %v2904_v51 = vmul.f32 %v4402_v38, %v4271_v53  ;;  %9112 = vst [vmem:[#allocation85_spill] sm:$0xff] %v4567_v16  ;;  %v1013_v53 = vmul.f32 %v4438_v52, %v4366_v26  ;;  %v4585_v16 = vmul.f32 %v4276_v54, %v4317_v11 }
 0x15c   : > { %v333_v50 = vpop.permute.xlu1 %332  ;;  %v4589_v52 = vmul.f32 %v4331_v14, %v4276_v54  ;;  %9117 = vst [vmem:[#allocation90_spill] sm:$0xff] %v4593_v8  ;;  %9119 = vst [vmem:[#allocation92_spill] sm:$0xff] %v4601_v9  ;;  %v4609_v31 = vadd.f32 %v718_v49, %v638_v4  ;;  %v2864_v8 = vmul.f32 %v4422_v45, %v4366_v26 }
 0x15d   : > { %v362_v42 = vsel %vm346_vm0, %v333_v50, 0.0  ;;  %v4581_v50 = vmul.f32 %v4276_v54, %v4314_v1  ;;  %9115 = vst [vmem:[#allocation88_spill] sm:$0xff] %v4585_v16  ;;  %v4607_v16 = vadd.f32 %v717_v2, %v637_v43  ;;  %v4615_v41 = vadd.f32 %v918_v5, %v902_v46 }
 0x15e   : > { %363 = vadd.xlane.f32.xlu0 %v362_v42  ;;  %9116 = vst [vmem:[#allocation89_spill] sm:$0xff] %v4589_v52  ;;  %v4597_v42 = vmul.f32 %v4340_v17, %v4276_v54  ;;  %9121 = vst [vmem:[#allocation94_spill] sm:$0xff] %v4609_v31  ;;  %v4611_v52 = vadd.f32 %v917_v0, %v901_v7  ;;  %v4619_v40 = vadd.f32 %v1014_v25, %v998_v59 }
 0x15f   : > { %9114 = vst [vmem:[#allocation87_spill] sm:$0xff] %v4581_v50  ;;  %v4605_v50 = vmul.f32 %v4343_v18, %v4276_v54  ;;  %9120 = vst [vmem:[#allocation93_spill] sm:$0xff] %v4607_v16  ;;  %v4621_v9 = vadd.f32 %v2816_v30, %v2808_v47  ;;  %v4625_v54 = vmul.f32 %v4346_v19, %v4281_v56  ;;  %v4656_v46 = vrot.slane %v4460_v32, 1 }
 0x160   : > { %9118 = vst [vmem:[#allocation91_spill] sm:$0xff] %v4597_v42  ;;  %9122 = vst [vmem:[#allocation95_spill] sm:$0xff] %v4611_v52  ;;  %v4617_v42 = vadd.f32 %v1013_v53, %v997_v3  ;;  %v4629_v2 = vmul.f32 %v4349_v20, %v4281_v56  ;;  %v4633_v0 = vmul.f32 %v4325_v12, %v4281_v56  ;;  %v4659_v59 = vrot.slane %v4441_v55, 5 }
 0x161   : > { %9123 = vst [vmem:[#allocation96_spill] sm:$0xff] %v4615_v41  ;;  %9125 = vst [vmem:[#allocation98_spill] sm:$0xff] %v4619_v40  ;;  %v4637_v3 = vmul.f32 %v4328_v13, %v4281_v56  ;;  %v4641_v5 = vmul.f32 %v4352_v21, %v4281_v56  ;;  %v4645_v25 = vmul.f32 %v4340_v17, %v4281_v56  ;;  %v4748_v41 = vrot.slane %v4444_v44, 1 }
 0x162   : > { %9124 = vst [vmem:[#allocation97_spill] sm:$0xff] %v4617_v42  ;;  %9126 = vst [vmem:[#allocation99_spill] sm:$0xff] %v4621_v9  ;;  %v4649_v30 = vmul.f32 %v4322_v6, %v4281_v56  ;;  %v2912_v43 = vmul.f32 %v4451_v10, %v4366_v26  ;;  %v4653_v49 = vadd.f32 %v2864_v8, %v2856_v48  ;;  %v4674_v26 = vrot.slane %v4444_v44, 5 }
 0x163   : > { %9128 = vst [vmem:[#allocation101_spill] sm:$0xff] %v4656_v46  ;;  %9129 = vst [vmem:[#allocation102_spill] sm:$0xff] %v4659_v59  ;;  %v4663_v4 = vmul.f32 %v4281_v56, %v4314_v1  ;;  %v4667_v7 = vmul.f32 %v4355_v22, %v4286_v57  ;;  %v4671_v6 = vmul.f32 %v4358_v23, %v4286_v57 }
 0x164   : > { %9127 = vst [vmem:[#allocation100_spill] sm:$0xff] %v4653_v49  ;;  %9130 = vst [vmem:[#allocation103_spill] sm:$0xff] %v4674_v26  ;;  %v4678_v8 = vmul.f32 %v4281_v56, %v4317_v11  ;;  %v4682_v48 = vmul.f32 %v4346_v19, %v4286_v57  ;;  %v4686_v1 = vmul.f32 %v4349_v20, %v4286_v57  ;;  %v4741_v49 = vrot.slane %v4441_v55, 1 }
 0x165   : > { %v4690_v47 = vmul.f32 %v4361_v24, %v4286_v57  ;;  %v4694_v53 = vmul.f32 %v4352_v21, %v4286_v57  ;;  %v4698_v56 = vmul.f32 %v4340_v17, %v4286_v57  ;;  %v4700_v11 = vadd.f32 %v2912_v43, %v2904_v51  ;;  %v4726_v17 = vpop.permute.xlu1 %336  ;;  %9135 = vst [vmem:[#allocation108_spill] sm:$0xff] %v4748_v41 }
 0x166   : > { %v4704_v40 = vmul.f32 %v4325_v12, %v4286_v57  ;;  %v4708_v42 = vmul.f32 %v4328_v13, %v4286_v57  ;;  %v4712_v26 = vmul.f32 %v4369_v27, %v4291_v58  ;;  %v4716_v59 = vmul.f32 %v4372_v28, %v4291_v58  ;;  %9132 = vst [vmem:[#allocation105_spill] sm:$0xff] %v4726_v17 }
 0x167   : > { %9131 = vst [vmem:[#allocation104_spill] sm:$0xff] %v4700_v11  ;;  %v4720_v51 = vmul.f32 %v4355_v22, %v4291_v58  ;;  %v4724_v43 = vmul.f32 %v4358_v23, %v4291_v58  ;;  %v4730_v57 = vmul.f32 %v4375_v29, %v4291_v58  ;;  %v4734_v13 = vmul.f32 %v4361_v24, %v4291_v58  ;;  %v331_v11 = vpop.permute.xlu0 %330 }
 0x168   : > { %v4738_v12 = vmul.f32 %v4352_v21, %v4291_v58  ;;  %9133 = vst [vmem:[#allocation106_spill] sm:$0xff] %v4741_v49  ;;  %v4745_v9 = vmul.f32 %v4386_v33, %v4295_v60  ;;  %v4752_v52 = vmul.f32 %v4346_v19, %v4291_v58  ;;  %v4756_v31 = vmul.f32 %v4349_v20, %v4291_v58 }
 0x169   : > { %v4760_v21 = vmul.f32 %v4389_v34, %v4295_v60  ;;  %v4764_v16 = vmul.f32 %v4369_v27, %v4295_v60  ;;  %v4768_v44 = vmul.f32 %v4372_v28, %v4295_v60  ;;  %v4772_v19 = vmul.f32 %v4392_v35, %v4295_v60 }
 0x16a   : > { %9134 = vst [vmem:[#allocation107_spill] sm:$0xff] %v4745_v9  ;;  %9136 = vst [vmem:[#allocation109_spill] sm:$0xff] %v4756_v31  ;;  %v4776_v58 = vmul.f32 %v4375_v29, %v4295_v60  ;;  %v4780_v20 = vmul.f32 %v4361_v24, %v4295_v60  ;;  %v4786_v41 = vmul.f32 %v4355_v22, %v4295_v60 }
 0x16b   : > { %9137 = vst [vmem:[#allocation110_spill] sm:$0xff] %v4760_v21  ;;  %9138 = vst [vmem:[#allocation111_spill] sm:$0xff] %v4764_v16  ;;  %v4790_v49 = vmul.f32 %v4358_v23, %v4295_v60  ;;  %v4794_v10 = vmul.f32 %v4396_v36, %v4299_v61  ;;  %v4798_v32 = vmul.f32 %v4399_v37, %v4299_v61  ;;  %v9176_v16 = vld [vmem:[#allocation87_spill] sm:$0xff] }
 0x16c   : > { %9139 = vst [vmem:[#allocation112_spill] sm:$0xff] %v4768_v44  ;;  %9140 = vst [vmem:[#allocation113_spill] sm:$0xff] %v4772_v19  ;;  %v4802_v24 = vmul.f32 %v4386_v33, %v4299_v61  ;;  %v4806_v22 = vmul.f32 %v4389_v34, %v4299_v61  ;;  %v4810_v60 = vmul.f32 %v4402_v38, %v4299_v61  ;;  %v359_v44 = vsel %vm346_vm0, %v331_v11, 0.0  ;;  %v9186_v11 = vld [vmem:[#allocation92_spill] sm:$0xff] }
 0x16d   : > { %9141 = vst [vmem:[#allocation114_spill] sm:$0xff] %v4776_v58  ;;  %9142 = vst [vmem:[#allocation115_spill] sm:$0xff] %v4780_v20  ;;  %v4782_v55 = vpop.permute.xlu1 %485  ;;  %v4814_v23 = vmul.f32 %v4392_v35, %v4299_v61  ;;  %v9174_v58 = vld [vmem:[#allocation86_spill] sm:$0xff] }
 0x16e   : > { %9143 = vst [vmem:[#allocation116_spill] sm:$0xff] %v4786_v41  ;;  %9144 = vst [vmem:[#allocation117_spill] sm:$0xff] %v4790_v49  ;;  %v4818_v49 = vmul.f32 %v4375_v29, %v4299_v61  ;;  %v4822_v41 = vmul.f32 %v4369_v27, %v4299_v61  ;;  %v4838_v29 = vmul.f32 %v4372_v28, %v4299_v61  ;;  %v9162_v28 = vld [vmem:[#allocation28_spill] sm:$0xff] }
 0x16f   : > { %9145 = vst [vmem:[#allocation118_spill] sm:$0xff] %v4794_v10  ;;  %9146 = vst [vmem:[#allocation119_spill] sm:$0xff] %v4798_v32  ;;  %v4842_v27 = vmul.f32 %v4399_v37, %v4302_v62  ;;  %v4858_v61 = vmul.f32 %v4402_v38, %v4302_v62  ;;  %v9163_v37 = vld [vmem:[#allocation32_spill] sm:$0xff]  ;;  %v9167_v38 = vld [vmem:[#allocation43_spill] sm:$0xff] }
 0x170   : > { %9147 = vst [vmem:[#allocation120_spill] sm:$0xff] %v4802_v24  ;;  %9148 = vst [vmem:[#allocation121_spill] sm:$0xff] %v4806_v22  ;;  %v4826_v24 = vmul.f32 %v4331_v14, %v4302_v62  ;;  %v4830_v22 = vmul.f32 %v4334_v15, %v4302_v62  ;;  %v9158_v14 = vld [vmem:[#allocation42_spill] sm:$0xff] }
 0x171   : > { %9149 = vst [vmem:[#allocation122_spill] sm:$0xff] %v4810_v60  ;;  %9150 = vst [vmem:[#allocation123_spill] sm:$0xff] %v4814_v23  ;;  %v4834_v60 = vmul.f32 %v4396_v36, %v4302_v62  ;;  %v335_v23 = vpop.permute.xlu0 %334  ;;  %v720_v15 = vmul.f32 %v9158_v14, %v4306_v63 }
 0x172   : > { %9151 = vst [vmem:[#allocation124_spill] sm:$0xff] %v4818_v49  ;;  %9152 = vst [vmem:[#allocation125_spill] sm:$0xff] %v4822_v41  ;;  %v719_v41 = vmul.f32 %v4405_v39, %v4306_v63  ;;  %v4848_v49 = vpop.permute.xlu1 %491  ;;  %v365_v17 = vsel %vm346_vm0, %v335_v23, 0.0 }
 0x173   : > { %9153 = vst [vmem:[#allocation126_spill] sm:$0xff] %v4826_v24  ;;  %9154 = vst [vmem:[#allocation127_spill] sm:$0xff] %v4830_v22  ;;  %v9159_v22 = vld [vmem:[#allocation64_spill] sm:$0xff]  ;;  %v4866_v24 = vmul.f32 %v4392_v35, %v4302_v62 }
 0x174   : > { %9155 = vst [vmem:[#allocation128_spill] sm:$0xff] %v4834_v60  ;;  %9156 = vst [vmem:[#allocation129_spill] sm:$0xff] %v4838_v29  ;;  %v350_v36 = vsel %vm346_vm0, %v9159_v22, 0.0  ;;  %v4854_v60 = vmul.f32 %v4343_v18, %v4302_v62  ;;  %v919_v29 = vmul.f32 %v9162_v28, %v4306_v63  ;;  %v9165_v22 = vld [vmem:[#allocation45_spill] sm:$0xff]  ;;  %v4872_v18 = vmul.f32 %v4386_v33, %v4302_v62  ;;  %v9170_v35 = vld [vmem:[#allocation12_spill] sm:$0xff] }
 0x175   : > { %9157 = vst [vmem:[#allocation130_spill] sm:$0xff] %v4842_v27  ;;  %9161 = vst [vmem:[#allocation131_spill] sm:$0xff] %v4858_v61  ;;  %v920_v27 = vmul.f32 %v9163_v37, %v4306_v63  ;;  %351 = vadd.xlane.f32.xlu1 %v350_v36  ;;  %v2817_v32 = vmul.f32 %v9165_v22, %v4306_v63  ;;  %v1015_v61 = vmul.f32 %v9167_v38, %v4306_v63  ;;  %v9169_v36 = vld [vmem:[#allocation33_spill] sm:$0xff]  ;;  %v4882_v20 = vpop.permute.xlu0 %488 }
 0x176   : > { %9160 = vst [vmem:[#allocation64_spill] sm:$0xff] %v4854_v60  ;;  %9164 = vst [vmem:[#allocation28_spill] sm:$0xff] %v4866_v24  ;;  %v9168_v60 = vld [vmem:[#allocation44_spill] sm:$0xff]  ;;  %v2865_v46 = vmul.f32 %v9169_v36, %v4306_v63  ;;  %1146 = vperm.xlu0 %3654, %v9170_v35   ;;  %v4887_v24 = vmul.f32 %v4389_v34, %v4302_v62  ;;  %v9172_v33 = vld [vmem:[#allocation85_spill] sm:$0xff]  ;;  %v4893_v38 = vadd.f32 %v720_v15, %v9174_v58  ;;  %v4897_v19 = vpop.permute.xlu1 %494 }
 0x177   : > { %9166 = vst [vmem:[#allocation32_spill] sm:$0xff] %v4872_v18  ;;  %v4878_v10 = vmul.f32 %v9168_v60, %v4306_v63  ;;  %v4890_v18 = vadd.f32 %v719_v41, %v9172_v33  ;;  %v2913_v60 = vmul.f32 %v4422_v45, %v4306_v63  ;;  %v4901_v21 = vadd.f32 %v919_v29, %v9176_v16  ;;  %v9178_v35 = vld [vmem:[#allocation88_spill] sm:$0xff]  ;;  %v9180_v62 = vld [vmem:[#allocation14_spill] sm:$0xff]  ;;  %v9181_v34 = vld [vmem:[#allocation49_spill] sm:$0xff] }
 0x178   : > { %9171 = vst [vmem:[#allocation33_spill] sm:$0xff] %v4887_v24  ;;  %9175 = vst [vmem:[#allocation85_spill] sm:$0xff] %v4893_v38  ;;  %v4904_v9 = vadd.f32 %v920_v27, %v9178_v35  ;;  %v721_v33 = vmul.f32 %v9181_v34, %v9180_v62  ;;  %v9182_v41 = vld [vmem:[#allocation50_spill] sm:$0xff]  ;;  %v9183_v58 = vld [vmem:[#allocation91_spill] sm:$0xff]  ;;  %v921_v63 = vmul.f32 %v4405_v39, %v9180_v62 }
 0x179   : > { %9173 = vst [vmem:[#allocation12_spill] sm:$0xff] %v4890_v18  ;;  %9177 = vst [vmem:[#allocation86_spill] sm:$0xff] %v4901_v21  ;;  %v722_v15 = vmul.f32 %v9182_v41, %v9180_v62  ;;  %360 = vadd.xlane.f32.xlu1 %v359_v44  ;;  %v4911_v24 = vadd.f32 %v2817_v32, %v9183_v58  ;;  %v922_v16 = vmul.f32 %v9158_v14, %v9180_v62  ;;  %v9185_v29 = vld [vmem:[#allocation51_spill] sm:$0xff]  ;;  %v4926_v32 = vpop.permute.xlu0 %497  ;;  %v9188_v58 = vld [vmem:[#allocation13_spill] sm:$0xff] }
 0x17a   : > { %9179 = vst [vmem:[#allocation87_spill] sm:$0xff] %v4904_v9  ;;  %v2818_v27 = vmul.f32 %v9185_v29, %v9180_v62  ;;  %v4920_v35 = vadd.f32 %v2865_v46, %v9186_v11  ;;  %v2866_v9 = vmul.f32 %v9165_v22, %v9180_v62  ;;  %v2914_v44 = vmul.f32 %v9169_v36, %v9180_v62  ;;  %v9191_v18 = vld [vmem:[#allocation19_spill] sm:$0xff]  ;;  %v9192_v45 = vld [vmem:[#allocation57_spill] sm:$0xff]  ;;  %v9193_v11 = vld [vmem:[#allocation58_spill] sm:$0xff]  ;;  %v4940_v36 = vpop.permute.xlu1 %500 }
 0x17b   : > { %9184 = vst [vmem:[#allocation88_spill] sm:$0xff] %v4911_v24  ;;  %1158 = vperm.xlu0 %3654, %v9188_v58   ;;  %v9189_v24 = vld [vmem:[#allocation89_spill] sm:$0xff]  ;;  %v4933_v38 = vadd.f32 %v2913_v60, %v4605_v50  ;;  %v723_v46 = vmul.f32 %v9192_v45, %v9191_v18  ;;  %v4943_v31 = vadd.f32 %v721_v33, %v4625_v54 }
 0x17c   : > { %9187 = vst [vmem:[#allocation14_spill] sm:$0xff] %v4920_v35  ;;  %v4930_v21 = vadd.f32 %v1015_v61, %v9189_v24  ;;  %v724_v35 = vmul.f32 %v9193_v11, %v9191_v18  ;;  %v4946_v24 = vadd.f32 %v722_v15, %v4629_v2  ;;  %v923_v50 = vmul.f32 %v9181_v34, %v9191_v18  ;;  %v9194_v2 = vld [vmem:[#allocation60_spill] sm:$0xff] }
 0x17d   : > { %v924_v60 = vmul.f32 %v9182_v41, %v9191_v18  ;;  %366 = vadd.xlane.f32.xlu1 %v365_v17  ;;  %v4953_v61 = vadd.f32 %v921_v63, %v4633_v0  ;;  %v4956_v23 = vadd.f32 %v922_v16, %v4637_v3  ;;  %v4959_v54 = vadd.f32 %v2818_v27, %v4641_v5 }
 0x17e   : > { %9190 = vst [vmem:[#allocation91_spill] sm:$0xff] %v4930_v21  ;;  %v2819_v33 = vmul.f32 %v9194_v2, %v9191_v18  ;;  %v4964_v15 = vadd.f32 %v2866_v9, %v4645_v25  ;;  %v4967_v58 = vadd.f32 %v2914_v44, %v4649_v30  ;;  %v2867_v17 = vmul.f32 %v9185_v29, %v9191_v18  ;;  %v4981_v9 = vpop.permute.xlu1 %506  ;;  %v4995_v44 = vpop.permute.xlu0 %503 }
 0x17f   : > { %v1017_v0 = vmul.f32 %v9162_v28, %v9180_v62  ;;  %v4974_v3 = vadd.f32 %v723_v46, %v4667_v7  ;;  %v4977_v5 = vadd.f32 %v724_v35, %v4671_v6  ;;  %v2915_v63 = vmul.f32 %v9165_v22, %v9191_v18  ;;  %v9197_v28 = vld [vmem:[#allocation46_spill] sm:$0xff]  ;;  %v9198_v7 = vld [vmem:[#allocation61_spill] sm:$0xff] }
 0x180   : > { %v1018_v25 = vmul.f32 %v9163_v37, %v9180_v62  ;;  %v4986_v30 = vadd.f32 %v923_v50, %v4682_v48  ;;  %v4989_v16 = vadd.f32 %v924_v60, %v4686_v1  ;;  %v725_v27 = vmul.f32 %v9198_v7, %v9197_v28  ;;  %v9199_v6 = vld [vmem:[#allocation62_spill] sm:$0xff]  ;;  %v9201_v1 = vld [vmem:[#allocation63_spill] sm:$0xff]  ;;  %v9202_v22 = vld [vmem:[#allocation65_spill] sm:$0xff] }
 0x181   : > { %v726_v35 = vmul.f32 %v9199_v6, %v9197_v28  ;;  %v4998_v46 = vadd.f32 %v2819_v33, %v4690_v47  ;;  %v925_v37 = vmul.f32 %v9192_v45, %v9197_v28  ;;  %v926_v48 = vmul.f32 %v9193_v11, %v9197_v28 }
 0x182   : > { %9195 = vst [vmem:[#allocation92_spill] sm:$0xff] %v4986_v30  ;;  %9196 = vst [vmem:[#allocation13_spill] sm:$0xff] %v4989_v16  ;;  %v2820_v62 = vmul.f32 %v9201_v1, %v9197_v28  ;;  %v2868_v50 = vmul.f32 %v9194_v2, %v9197_v28  ;;  %v2916_v60 = vmul.f32 %v9185_v29, %v9197_v28 }
 0x183   : > { %9200 = vst [vmem:[#allocation89_spill] sm:$0xff] %v4998_v46  ;;  %v512_v47 = vrot.slane %v4782_v55, %v9202_v22  ;;  %v516_v33 = vrot.slane %v4882_v20, %v9202_v22  ;;  %v5015_v21 = vadd.f32 %v2867_v17, %v4694_v53  ;;  %v5018_v11 = vadd.f32 %v2915_v63, %v4698_v56  ;;  %v5028_v20 = vpop.permute.xlu1 %674 }
 0x184   : > { %v520_v46 = vrot.slane %v4848_v49, %v9202_v22  ;;  %v1019_v16 = vmul.f32 %v4405_v39, %v9191_v18  ;;  %v524_v29 = vrot.slane %v4897_v19, %v9202_v22  ;;  %v741_v55 = vadd.f32 %v725_v27, %v4712_v26  ;;  %9205 = vst [vmem:[#allocation65_spill] sm:$0xff] %v5028_v20  ;;  %v5040_v27 = vpop.permute.xlu0 %766  ;;  %v9227_v39 = vld [vmem:[#allocation10_spill] sm:$0xff] }
 0x185   : > { %9203 = vst [vmem:[#allocation19_spill] sm:$0xff] %v5015_v21  ;;  %9204 = vst [vmem:[#allocation46_spill] sm:$0xff] %v5018_v11  ;;  %v742_v30 = vadd.f32 %v726_v35, %v4716_v59  ;;  %v941_v53 = vadd.f32 %v925_v37, %v4720_v51  ;;  %v942_v56 = vadd.f32 %v926_v48, %v4724_v43  ;;  %v9207_v35 = vld [vmem:[#allocation90_spill] sm:$0xff] }
 0x186   : > { %v1020_v49 = vmul.f32 %v9158_v14, %v9191_v18  ;;  %v1021_v17 = vmul.f32 %v9181_v34, %v9197_v28  ;;  %v541_v19 = vsel %vm413_vm1, %v516_v33, %v512_v47  ;;  %v2828_v26 = vadd.f32 %v2820_v62, %v4730_v57  ;;  %9206 = vst [vmem:[#allocation132_spill] sm:$0xff] %v5040_v27  ;;  %v9217_v48 = vld [vmem:[#allocation66_spill] sm:$0xff]  ;;  %v9218_v62 = vld [vmem:[#allocation67_spill] sm:$0xff]  ;;  %v9225_v34 = vld [vmem:[#allocation109_spill] sm:$0xff] }
 0x187   : > { %v2876_v59 = vadd.f32 %v2868_v50, %v4734_v13  ;;  %v2924_v63 = vadd.f32 %v2916_v60, %v4738_v12  ;;  %v542_v51 = vsel %vm8994_vm2, %v520_v46, %v541_v19  ;;  %v528_v43 = vrot.slane %v4926_v32, %v9202_v22  ;;  %v5054_v12 = vpop.permute.xlu1 %678  ;;  %v9261_v11 = vld [vmem:[#allocation114_spill] sm:$0xff] }
 0x188   : > { %v1022_v18 = vmul.f32 %v9182_v41, %v9197_v28  ;;  %v5049_v37 = vadd.f32 %v4878_v10, %v9207_v35  ;;  %v543_v57 = vsel %vm8993_vm3, %v524_v29, %v542_v51  ;;  %v532_v13 = vrot.slane %v4940_v36, %v9202_v22  ;;  %9209 = vst [vmem:[#allocation133_spill] sm:$0xff] %v5054_v12  ;;  %v5096_v35 = vld [vmem:[%s4178_s29 + $0x30] sm:$0xff]  ;;  %v5099_v41 = vld [vmem:[%s4178_s29 + $0x38] sm:$0xff] }
 0x189   : > { %v5057_v46 = vadd.f32 %v1017_v0, %v4663_v4  ;;  %v5060_v32 = vadd.f32 %v1018_v25, %v4678_v8  ;;  %v536_v28 = vrot.slane %v4995_v44, %v9202_v22  ;;  %v5065_v10 = vadd.f32 %v1019_v16, %v4704_v40  ;;  %v9215_v4 = vld [vmem:[#allocation68_spill] sm:$0xff]  ;;  %v9216_v8 = vld [vmem:[#allocation69_spill] sm:$0xff]  ;;  %9223 = vst [vmem:[#allocation140_spill] sm:$0xff] %v5096_v35 }
 0x18a   : > { %9208 = vst [vmem:[#allocation90_spill] sm:$0xff] %v5049_v37  ;;  %v5068_v29 = vadd.f32 %v1020_v49, %v4708_v42  ;;  %v5071_v36 = vadd.f32 %v1021_v17, %v4752_v52  ;;  %v821_v0 = vmul.f32 %v9215_v4, %v5040_v27  ;;  %v822_v25 = vmul.f32 %v9216_v8, %v5040_v27  ;;  %v9219_v16 = vld [vmem:[#allocation72_spill] sm:$0xff]  ;;  %v9220_v42 = vld [vmem:[#allocation71_spill] sm:$0xff]  ;;  %v9221_v52 = vld [vmem:[#allocation70_spill] sm:$0xff]  ;;  %v5090_v17 = vpop.permute.xlu0 %778 }
 0x18b   : > { %9210 = vst [vmem:[#allocation134_spill] sm:$0xff] %v5057_v46  ;;  %9211 = vst [vmem:[#allocation135_spill] sm:$0xff] %v5060_v32  ;;  %v957_v44 = vmul.f32 %v9217_v48, %v5040_v27  ;;  %v958_v40 = vmul.f32 %v9218_v62, %v5040_v27  ;;  %v2836_v50 = vmul.f32 %v9219_v16, %v5040_v27  ;;  %v5092_v19 = vpop.permute.xlu1 %682  ;;  %v9254_v32 = vld [vmem:[#allocation111_spill] sm:$0xff]  ;;  %v9256_v37 = vld [vmem:[#allocation52_spill] sm:$0xff] }
 0x18c   : > { %9212 = vst [vmem:[#allocation136_spill] sm:$0xff] %v5065_v10  ;;  %9213 = vst [vmem:[#allocation137_spill] sm:$0xff] %v5068_v29  ;;  %v2884_v60 = vmul.f32 %v9220_v42, %v5040_v27  ;;  %v2932_v47 = vmul.f32 %v9221_v52, %v5040_v27  ;;  %v544_v33 = vsel %vm8992_vm4, %v528_v43, %v543_v57  ;;  %v9229_v57 = vld [vmem:[#allocation48_spill] sm:$0xff] }
 0x18d   : > { %9214 = vst [vmem:[#allocation138_spill] sm:$0xff] %v5071_v36  ;;  %v540_v49 = vrot.slane %v4981_v9, %v9202_v22  ;;  %9222 = vst [vmem:[#allocation139_spill] sm:$0xff] %v5090_v17  ;;  %v545_v51 = vsel %vm8991_vm5, %v532_v13, %v544_v33  ;;  %v5102_v14 = vadd.f32 %v1022_v18, %v9225_v34  ;;  %v9228_v36 = vld [vmem:[#allocation105_spill] sm:$0xff]  ;;  %v9230_v22 = vld [vmem:[#allocation34_spill] sm:$0xff] }
 0x18e   : > { %9224 = vst [vmem:[#allocation141_spill] sm:$0xff] %v5099_v41  ;;  %1142 = vperm.xlu1 %3653, %v9227_v39   ;;  %v368_v43 = vsel %vm346_vm0, %v9228_v36, 0.0  ;;  %v5109_v9 = vsub.s32 %v9230_v22, %v9229_v57  ;;  %v5113_v27 = vadd.f32 %v5099_v41, %v5096_v35  ;;  %v5115_v13 = vadd.f32 %v821_v0, %v741_v55  ;;  %v9239_v22 = vld [vmem:[#allocation82_spill] sm:$0xff]  ;;  %v9240_v55 = vld [vmem:[#allocation83_spill] sm:$0xff]  ;;  %v5250_v8 = vld [vmem:[%s4171_s9 + $0x28] sm:$0xff] }
 0x18f   : > { %9226 = vst [vmem:[#allocation109_spill] sm:$0xff] %v5102_v14  ;;  %v5117_v33 = vadd.f32 %v822_v25, %v742_v30  ;;  %v5119_v29 = vadd.f32 %v957_v44, %v941_v53  ;;  %v5121_v34 = vadd.f32 %v958_v40, %v942_v56  ;;  %v5123_v39 = vadd.f32 %v2836_v50, %v2828_v26  ;;  %v9241_v26 = vld [vmem:[#allocation84_spill] sm:$0xff]  ;;  %v5145_v25 = vpop.permute.xlu1 %750  ;;  %v9242_v44 = vld [vmem:[#allocation9_spill] sm:$0xff]  ;;  %v9250_v41 = vld [vmem:[#allocation107_spill] sm:$0xff] }
 0x190   : > { %9231 = vst [vmem:[#allocation10_spill] sm:$0xff] %v5109_v9  ;;  %9232 = vst [vmem:[#allocation105_spill] sm:$0xff] %v5113_v27  ;;  %v5125_v18 = vadd.f32 %v2884_v60, %v2876_v59  ;;  %v5127_v36 = vadd.f32 %v2932_v47, %v2924_v63  ;;  %v546_v57 = vsel %vm8990_vm6, %v536_v28, %v545_v51  ;;  %v9243_v40 = vld [vmem:[#allocation77_spill] sm:$0xff]  ;;  %v9244_v60 = vld [vmem:[#allocation78_spill] sm:$0xff] }
 0x191   : > { %9233 = vst [vmem:[#allocation48_spill] sm:$0xff] %v5115_v13  ;;  %9234 = vst [vmem:[#allocation34_spill] sm:$0xff] %v5117_v33  ;;  %v727_v9 = vmul.f32 %v9239_v22, %v5028_v20  ;;  %v728_v0 = vmul.f32 %v9240_v55, %v5028_v20  ;;  %v927_v30 = vmul.f32 %v9198_v7, %v5028_v20  ;;  %v9248_v33 = vld [vmem:[#allocation80_spill] sm:$0xff]  ;;  %v9252_v35 = vld [vmem:[#allocation110_spill] sm:$0xff] }
 0x192   : > { %9235 = vst [vmem:[#allocation142_spill] sm:$0xff] %v5119_v29  ;;  %9236 = vst [vmem:[#allocation143_spill] sm:$0xff] %v5121_v34  ;;  %v547_v53 = vsel %vm8989_vm7, %v540_v49, %v546_v57  ;;  %v928_v56 = vmul.f32 %v9199_v6, %v5028_v20  ;;  %v2821_v59 = vmul.f32 %v9241_v26, %v5028_v20  ;;  %1150 = vperm.xlu1 %3653, %v9242_v44   ;;  %v9245_v49 = vld [vmem:[#allocation73_spill] sm:$0xff]  ;;  %v9246_v57 = vld [vmem:[#allocation76_spill] sm:$0xff] }
 0x193   : > { %9237 = vst [vmem:[#allocation144_spill] sm:$0xff] %v5123_v39  ;;  %9238 = vst [vmem:[#allocation145_spill] sm:$0xff] %v5125_v18  ;;  %v2869_v63 = vmul.f32 %v9201_v1, %v5028_v20  ;;  %v2917_v28 = vmul.f32 %v9194_v2, %v5028_v20  ;;  %v5150_v50 = vmul.f32 %v9243_v40, %v5090_v17  ;;  %v850_v2 = vpop.permute.xlu0 %849  ;;  %v9247_v29 = vld [vmem:[#allocation81_spill] sm:$0xff]  ;;  %v9249_v18 = vld [vmem:[#allocation79_spill] sm:$0xff]  ;;  %v549_v39 = vsel %vm8986_vm8, %v547_v53, 0.0 }
 0x194   : > { %v5154_v47 = vmul.f32 %v9244_v60, %v5090_v17  ;;  %v5158_v51 = vmul.f32 %v9245_v49, %v5090_v17  ;;  %v5162_v34 = vmul.f32 %v9246_v57, %v5090_v17  ;;  %v5166_v44 = vmul.f32 %v9247_v29, %v5090_v17  ;;  %v9257_v7 = vld [vmem:[#allocation112_spill] sm:$0xff]  ;;  %v9259_v49 = vld [vmem:[#allocation113_spill] sm:$0xff]  ;;  %9283 = vst [vmem:[#allocation147_spill] sm:$0xff] %v5250_v8 }
 0x195   : > { %v5170_v13 = vmul.f32 %v9248_v33, %v5090_v17  ;;  %v5174_v27 = vmul.f32 %v9249_v18, %v5090_v17  ;;  %v5178_v14 = vadd.f32 %v727_v9, %v9250_v41  ;;  %v5181_v10 = vadd.f32 %v728_v0, %v9252_v35  ;;  %v9263_v41 = vld [vmem:[#allocation115_spill] sm:$0xff]  ;;  %v5200_v35 = vpop.permute.xlu1 %754 }
 0x196   : > { %v5184_v46 = vadd.f32 %v927_v30, %v9254_v32  ;;  %v729_v6 = vmul.f32 %v9256_v37, %v5054_v12  ;;  %v5189_v57 = vadd.f32 %v928_v56, %v9257_v7  ;;  %v5192_v17 = vadd.f32 %v2821_v59, %v9259_v49  ;;  %v9265_v0 = vld [vmem:[#allocation11_spill] sm:$0xff]  ;;  %v9267_v30 = vld [vmem:[#allocation101_spill] sm:$0xff] }
 0x197   : > { %9251 = vst [vmem:[#allocation9_spill] sm:$0xff] %v5178_v14  ;;  %9253 = vst [vmem:[#allocation107_spill] sm:$0xff] %v5181_v10  ;;  %v5195_v53 = vadd.f32 %v2869_v63, %v9261_v11  ;;  %v5198_v9 = vadd.f32 %v2917_v28, %v9263_v41  ;;  %1154 = vperm.xlu1 %3653, %v9265_v0   ;;  %v5203_v32 = vrot.slane %v850_v2, 4  ;;  %v9269_v7 = vld [vmem:[#allocation55_spill] sm:$0xff]  ;;  %v9274_v0 = vld [vmem:[#allocation44_spill] sm:$0xff] }
 0x198   : > { %9255 = vst [vmem:[#allocation110_spill] sm:$0xff] %v5184_v46  ;;  %9258 = vst [vmem:[#allocation111_spill] sm:$0xff] %v5189_v57  ;;  %v5206_v46 = vmul.f32 %v9267_v30, %v850_v2  ;;  %v730_v56 = vmul.f32 %v9269_v7, %v5054_v12  ;;  %v929_v59 = vmul.f32 %v9239_v22, %v5054_v12  ;;  %v9270_v11 = vld [vmem:[#allocation59_spill] sm:$0xff]  ;;  %v9277_v22 = vld [vmem:[#allocation56_spill] sm:$0xff] }
 0x199   : > { %9260 = vst [vmem:[#allocation112_spill] sm:$0xff] %v5192_v17  ;;  %9262 = vst [vmem:[#allocation113_spill] sm:$0xff] %v5195_v53  ;;  %v5213_v63 = vmul.f32 %v9270_v11, %v850_v2  ;;  %v5216_v28 = vmul.f32 %v9247_v29, %v850_v2  ;;  %v9273_v49 = vld [vmem:[#allocation43_spill] sm:$0xff]  ;;  %v930_v17 = vmul.f32 %v9240_v55, %v5054_v12  ;;  %v5239_v55 = vpop.permute.xlu1 %758  ;;  %v9281_v14 = vld [vmem:[#allocation120_spill] sm:$0xff] }
 0x19a   : > { %9264 = vst [vmem:[#allocation114_spill] sm:$0xff] %v5198_v9  ;;  %9266 = vst [vmem:[#allocation115_spill] sm:$0xff] %v5203_v32  ;;  %v731_v41 = vmul.f32 %v9273_v49, %v5092_v19  ;;  %v732_v9 = vmul.f32 %v9274_v0, %v5092_v19  ;;  %v2822_v57 = vmul.f32 %v9277_v22, %v5054_v12  ;;  %369 = vadd.xlane.f32.xlu0 %v368_v43  ;;  %v9286_v43 = vld [vmem:[#allocation126_spill] sm:$0xff] }
 0x19b   : > { %9268 = vst [vmem:[#allocation11_spill] sm:$0xff] %v5206_v46  ;;  %9271 = vst [vmem:[#allocation59_spill] sm:$0xff] %v5213_v63  ;;  %v9275_v46 = vld [vmem:[#allocation118_spill] sm:$0xff]  ;;  %v859_v63 = vpop.permute.xlu0 %858  ;;  %v931_v2 = vmul.f32 %v9256_v37, %v5092_v19  ;;  %v2918_v49 = vmul.f32 %v9201_v1, %v5054_v12  ;;  %v5245_v37 = vadd.f32 %v929_v59, %v9281_v14  ;;  %1162 = vperm.xlu1 %3653, %v5250_v8   ;;  %v9288_v59 = vld [vmem:[#allocation121_spill] sm:$0xff] }
 0x19c   : > { %9272 = vst [vmem:[#allocation146_spill] sm:$0xff] %v5216_v28  ;;  %v5223_v53 = vadd.f32 %v729_v6, %v9275_v46  ;;  %v2870_v28 = vmul.f32 %v9241_v26, %v5054_v12  ;;  %v932_v6 = vmul.f32 %v9269_v7, %v5092_v19  ;;  %v9278_v46 = vld [vmem:[#allocation47_spill] sm:$0xff]  ;;  %v2929_v18 = vmul.f32 %v9247_v29, %v5200_v35  ;;  %v9290_v8 = vld [vmem:[#allocation128_spill] sm:$0xff] }
 0x19d   : > { %v2823_v0 = vmul.f32 %v9278_v46, %v5092_v19  ;;  %9282 = vst [vmem:[#allocation120_spill] sm:$0xff] %v5245_v37  ;;  %v5255_v7 = vmul.f32 %v9192_v45, %v5028_v20  ;;  %v5257_v1 = vrot.slane %v859_v63, 4  ;;  %v747_v46 = vadd.f32 %v731_v41, %v9286_v43  ;;  %v9289_v37 = vld [vmem:[#allocation122_spill] sm:$0xff]  ;;  %v9292_v41 = vld [vmem:[#allocation124_spill] sm:$0xff] }
 0x19e   : > { %9276 = vst [vmem:[#allocation118_spill] sm:$0xff] %v5223_v53  ;;  %v9279_v53 = vld [vmem:[#allocation119_spill] sm:$0xff]  ;;  %v2871_v14 = vmul.f32 %v9277_v22, %v5092_v19  ;;  %v5264_v12 = vadd.f32 %v930_v17, %v9288_v59  ;;  %v947_v4 = vadd.f32 %v931_v2, %v9290_v8  ;;  %v2919_v45 = vmul.f32 %v9241_v26, %v5092_v19  ;;  %v9293_v43 = vld [vmem:[#allocation130_spill] sm:$0xff]  ;;  %v9294_v22 = vld [vmem:[#allocation64_spill] sm:$0xff]  ;;  %v5280_v17 = vpop.permute.xlu1 %762 }
 0x19f   : > { %v5242_v10 = vadd.f32 %v730_v56, %v9279_v53  ;;  %9284 = vst [vmem:[#allocation148_spill] sm:$0xff] %v5255_v7  ;;  %9285 = vst [vmem:[#allocation149_spill] sm:$0xff] %v5257_v1  ;;  %v9287_v53 = vld [vmem:[#allocation127_spill] sm:$0xff]  ;;  %v2831_v21 = vadd.f32 %v2823_v0, %v9294_v22  ;;  %550 = vadd.xlane.f32.xlu0 %v549_v39  ;;  %v5286_v8 = vmul.f32 %v9220_v42, %v859_v63 }
 0x1a0   : > { %v748_v56 = vadd.f32 %v732_v9, %v9287_v53  ;;  %v9291_v7 = vld [vmem:[#allocation123_spill] sm:$0xff]  ;;  %v5276_v9 = vadd.f32 %v2918_v49, %v9292_v41  ;;  %v948_v53 = vadd.f32 %v932_v6, %v9293_v43  ;;  %v5298_v22 = vadd.f32 %v5127_v36, %v5257_v1  ;;  %v9304_v6 = vld [vmem:[#allocation106_spill] sm:$0xff]  ;;  %v9305_v41 = vld [vmem:[#allocation108_spill] sm:$0xff] }
 0x1a1   : > { %9280 = vst [vmem:[#allocation119_spill] sm:$0xff] %v5242_v10  ;;  %v5267_v10 = vadd.f32 %v2822_v57, %v9289_v37  ;;  %v5273_v20 = vadd.f32 %v2870_v28, %v9291_v7  ;;  %v5283_v37 = vmul.f32 %v9219_v16, %v859_v63  ;;  %9296 = vst [vmem:[#allocation127_spill] sm:$0xff] %v5286_v8  ;;  %v5293_v28 = vld [vmem:[%s4171_s9 + $0x38] sm:$0xff]  ;;  %v9301_v0 = vld [vmem:[#allocation131_spill] sm:$0xff] }
 0x1a2   : > { %v5289_v57 = vmul.f32 %v9221_v52, %v859_v63  ;;  %v2937_v7 = vadd.f32 %v2929_v18, %v4933_v38  ;;  %1170 = vperm.xlu1 %3653, %v5293_v28   ;;  %9298 = vst [vmem:[#allocation122_spill] sm:$0xff] %v5298_v22  ;;  %v5301_v39 = vadd.f32 %v5150_v50, %v747_v46  ;;  %v9303_v38 = vld [vmem:[#allocation28_spill] sm:$0xff]  ;;  %v9308_v46 = vld [vmem:[#allocation53_spill] sm:$0xff] }
 0x1a3   : > { %9295 = vst [vmem:[#allocation126_spill] sm:$0xff] %v5283_v37  ;;  %v5304_v49 = vadd.f32 %v5154_v47, %v748_v56  ;;  %v2879_v2 = vadd.f32 %v2871_v14, %v9301_v0  ;;  %v5308_v63 = vadd.f32 %v5158_v51, %v947_v4  ;;  %v2927_v18 = vadd.f32 %v2919_v45, %v9303_v38  ;;  %v9309_v45 = vld [vmem:[#allocation54_spill] sm:$0xff]  ;;  %v9312_v37 = vld [vmem:[#allocation85_spill] sm:$0xff] }
 0x1a4   : > { %9297 = vst [vmem:[#allocation121_spill] sm:$0xff] %v5289_v57  ;;  %9299 = vst [vmem:[#allocation128_spill] sm:$0xff] %v5301_v39  ;;  %v815_v59 = vmul.f32 %v9304_v6, %v5200_v35  ;;  %v816_v36 = vmul.f32 %v9305_v41, %v5200_v35  ;;  %v5316_v50 = vadd.f32 %v5162_v34, %v948_v53  ;;  %v9316_v39 = vld [vmem:[#allocation86_spill] sm:$0xff]  ;;  %v9379_v1 = vld [vmem:[#allocation113_spill] sm:$0xff] }
 0x1a5   : > { %9300 = vst [vmem:[#allocation123_spill] sm:$0xff] %v5304_v49  ;;  %9302 = vst [vmem:[#allocation124_spill] sm:$0xff] %v5308_v63  ;;  %v5319_v47 = vadd.f32 %v5166_v44, %v2831_v21  ;;  %v813_v56 = vmul.f32 %v9308_v46, %v5145_v25  ;;  %v951_v4 = vmul.f32 %v9308_v46, %v5200_v35  ;;  %v5334_v21 = vpop.permute.xlu1 %770  ;;  %v8865_v44 = vmov 14   ;;  %v9314_v63 = vld [vmem:[#allocation93_spill] sm:$0xff] }
 0x1a6   : > { %9306 = vst [vmem:[#allocation130_spill] sm:$0xff] %v5316_v50  ;;  %v814_v51 = vmul.f32 %v9309_v45, %v5145_v25  ;;  %v949_v14 = vmul.f32 %v9243_v40, %v5145_v25  ;;  %v952_v43 = vmul.f32 %v9309_v45, %v5200_v35  ;;  %v5332_v34 = vadd.f32 %v2937_v7, %v5203_v32  ;;  %v5346_v45 = vld [vmem:[%s4171_s9 + $0x8] sm:$0xff] }
 0x1a7   : > { %9307 = vst [vmem:[#allocation64_spill] sm:$0xff] %v5319_v47  ;;  %3656 = vset.pattern.permute.xlu1 %v8865_v44  ;;  %v950_v53 = vmul.f32 %v9244_v60, %v5145_v25  ;;  %v2832_v0 = vmul.f32 %v9270_v11, %v5145_v25  ;;  %v2880_v38 = vmul.f32 %v9247_v29, %v5145_v25  ;;  %v9311_v44 = vld [vmem:[#allocation12_spill] sm:$0xff] }
 0x1a8   : > { %v2928_v46 = vmul.f32 %v9248_v33, %v5145_v25  ;;  %1210 = vperm.xlu1 %3656, %v5346_v45   ;;  %v5350_v7 = vadd.f32 %v5170_v13, %v2879_v2  ;;  %v831_v57 = vadd.f32 %v815_v59, %v9311_v44  ;;  %v832_v8 = vadd.f32 %v816_v36, %v9312_v37  ;;  %v9317_v2 = vld [vmem:[#allocation94_spill] sm:$0xff]  ;;  %v9319_v59 = vld [vmem:[#allocation95_spill] sm:$0xff] }
 0x1a9   : > { %v2833_v26 = vmul.f32 %v9267_v30, %v5200_v35  ;;  %v5357_v50 = vadd.f32 %v5174_v27, %v2927_v18  ;;  %v5360_v49 = vadd.f32 %v813_v56, %v9314_v63  ;;  %v967_v47 = vadd.f32 %v951_v4, %v9316_v39  ;;  %v9321_v37 = vld [vmem:[#allocation87_spill] sm:$0xff]  ;;  %v9322_v27 = vld [vmem:[#allocation96_spill] sm:$0xff] }
 0x1aa   : > { %9310 = vst [vmem:[#allocation131_spill] sm:$0xff] %v5350_v7  ;;  %v2881_v13 = vmul.f32 %v9270_v11, %v5200_v35  ;;  %v5366_v7 = vadd.f32 %v814_v51, %v9317_v2  ;;  %v5369_v44 = vadd.f32 %v949_v14, %v9319_v59  ;;  %v968_v36 = vadd.f32 %v952_v43, %v9321_v37  ;;  %v9324_v63 = vld [vmem:[#allocation99_spill] sm:$0xff]  ;;  %v9326_v39 = vld [vmem:[#allocation100_spill] sm:$0xff]  ;;  %v5386_v51 = vld [vmem:[%s4171_s9 + $0x10] sm:$0xff]  ;;  %v5398_v59 = vpop.permute.xlu1 %774 }
 0x1ab   : > { %9313 = vst [vmem:[#allocation28_spill] sm:$0xff] %v5357_v50  ;;  %9315 = vst [vmem:[#allocation53_spill] sm:$0xff] %v5360_v49  ;;  %3692 = vrcp.f32 %v5332_v34  ;;  %v5374_v18 = vadd.f32 %v950_v53, %v9322_v27  ;;  %v5377_v56 = vadd.f32 %v2832_v0, %v9324_v63  ;;  %v5380_v4 = vadd.f32 %v2880_v38, %v9326_v39  ;;  %v9328_v49 = vld [vmem:[#allocation104_spill] sm:$0xff]  ;;  %v9333_v2 = vld [vmem:[#allocation74_spill] sm:$0xff] }
 0x1ac   : > { %9318 = vst [vmem:[#allocation54_spill] sm:$0xff] %v5366_v7  ;;  %9320 = vst [vmem:[#allocation12_spill] sm:$0xff] %v5369_v44  ;;  %v5383_v50 = vadd.f32 %v2928_v46, %v9328_v49  ;;  %1214 = vperm.xlu1 %3656, %v5386_v51   ;;  %v5390_v14 = vadd.f32 %v5203_v32, %v831_v57  ;;  %v5393_v43 = vadd.f32 %v5203_v32, %v832_v8  ;;  %v9332_v53 = vld [vmem:[#allocation88_spill] sm:$0xff]  ;;  %v9335_v46 = vld [vmem:[#allocation14_spill] sm:$0xff] }
 0x1ad   : > { %9323 = vst [vmem:[#allocation85_spill] sm:$0xff] %v5374_v18  ;;  %9325 = vst [vmem:[#allocation93_spill] sm:$0xff] %v5377_v56  ;;  %v2841_v0 = vadd.f32 %v2833_v26, %v9332_v53  ;;  %v817_v38 = vmul.f32 %v9333_v2, %v5239_v55  ;;  %v5401_v49 = vadd.f32 %v967_v47, %v5203_v32  ;;  %v9336_v27 = vld [vmem:[#allocation75_spill] sm:$0xff]  ;;  %v9368_v56 = vld [vmem:[#allocation9_spill] sm:$0xff]  ;;  %3694 = vrcp.f32 %v5298_v22 }
 0x1ae   : > { %9327 = vst [vmem:[#allocation86_spill] sm:$0xff] %v5380_v4  ;;  %9329 = vst [vmem:[#allocation94_spill] sm:$0xff] %v5383_v50  ;;  %v2889_v37 = vadd.f32 %v2881_v13, %v9335_v46  ;;  %v818_v57 = vmul.f32 %v9336_v27, %v5239_v55  ;;  %v953_v8 = vmul.f32 %v9304_v6, %v5239_v55  ;;  %v9370_v50 = vld [vmem:[#allocation107_spill] sm:$0xff]  ;;  %v9443_v22 = vld [vmem:[#allocation136_spill] sm:$0xff] }
 0x1af   : > { %9330 = vst [vmem:[#allocation95_spill] sm:$0xff] %v5390_v14  ;;  %9331 = vst [vmem:[#allocation87_spill] sm:$0xff] %v5393_v43  ;;  %v5409_v63 = vadd.f32 %v968_v36, %v5203_v32  ;;  %v954_v26 = vmul.f32 %v9305_v41, %v5239_v55  ;;  %v2834_v39 = vmul.f32 %v9221_v52, %v5239_v55 }
 0x1b0   : > { %9334 = vst [vmem:[#allocation96_spill] sm:$0xff] %v5401_v49  ;;  %v2882_v47 = vmul.f32 %v9267_v30, %v5239_v55  ;;  %v2930_v13 = vmul.f32 %v9270_v11, %v5239_v55  ;;  %v819_v53 = vmul.f32 %v9217_v48, %v5280_v17  ;;  %v820_v46 = vmul.f32 %v9218_v62, %v5280_v17 }
 0x1b1   : > { %9337 = vst [vmem:[#allocation99_spill] sm:$0xff] %v5409_v63  ;;  %v955_v36 = vmul.f32 %v9333_v2, %v5280_v17  ;;  %v5426_v63 = vld [vmem:[%s4171_s9 + $0x20] sm:$0xff]  ;;  %v5430_v49 = vadd.f32 %v2841_v0, %v5203_v32  ;;  %v5433_v43 = vadd.f32 %v817_v38, %v4943_v31  ;;  %v956_v14 = vmul.f32 %v9336_v27, %v5280_v17 }
 0x1b2   : > { %9338 = vst [vmem:[#allocation100_spill] sm:$0xff] %v5426_v63  ;;  %1222 = vperm.xlu1 %3656, %v5426_v63   ;;  %v2835_v18 = vmul.f32 %v9220_v42, %v5280_v17  ;;  %v5440_v44 = vadd.f32 %v2889_v37, %v5203_v32  ;;  %v5443_v7 = vadd.f32 %v818_v57, %v4946_v24  ;;  %v847_v24 = vpop.permute.xlu1 %846  ;;  %v9381_v32 = vld [vmem:[#allocation114_spill] sm:$0xff] }
 0x1b3   : > { %9339 = vst [vmem:[#allocation104_spill] sm:$0xff] %v5430_v49  ;;  %9340 = vst [vmem:[#allocation88_spill] sm:$0xff] %v5433_v43  ;;  %v5446_v4 = vadd.f32 %v953_v8, %v4953_v61  ;;  %v2883_v31 = vmul.f32 %v9221_v52, %v5280_v17  ;;  %v5451_v0 = vadd.f32 %v954_v26, %v4956_v23  ;;  %v9350_v23 = vld [vmem:[#allocation92_spill] sm:$0xff] }
 0x1b4   : > { %9341 = vst [vmem:[#allocation14_spill] sm:$0xff] %v5440_v44  ;;  %9342 = vst [vmem:[#allocation150_spill] sm:$0xff] %v5443_v7  ;;  %v5454_v38 = vadd.f32 %v2834_v39, %v4959_v54  ;;  %v5457_v43 = vadd.f32 %v2882_v47, %v4964_v15  ;;  %v2931_v37 = vmul.f32 %v9267_v30, %v5280_v17  ;;  %v5474_v54 = vld [vmem:[%s4171_s9 + $0x30] sm:$0xff] }
 0x1b5   : > { %9343 = vst [vmem:[#allocation151_spill] sm:$0xff] %v5446_v4  ;;  %9344 = vst [vmem:[#allocation152_spill] sm:$0xff] %v5451_v0  ;;  %v5462_v57 = vadd.f32 %v2930_v13, %v4967_v58  ;;  %v5465_v61 = vadd.f32 %v819_v53, %v4974_v3  ;;  %v5468_v8 = vadd.f32 %v820_v46, %v4977_v5  ;;  %v9353_v15 = vld [vmem:[#allocation13_spill] sm:$0xff]  ;;  %v9357_v58 = vld [vmem:[#allocation102_spill] sm:$0xff]  ;;  %1166 = vperm.xlu0 %3654, %v5474_v54  }
 0x1b6   : > { %9345 = vst [vmem:[#allocation153_spill] sm:$0xff] %v5454_v38  ;;  %9346 = vst [vmem:[#allocation154_spill] sm:$0xff] %v5457_v43  ;;  %v5471_v26 = vadd.f32 %v955_v36, %v9350_v23  ;;  %1230 = vperm.xlu1 %3656, %v5474_v54   ;;  %v5478_v39 = vadd.f32 %v956_v14, %v9353_v15  ;;  %v9355_v47 = vld [vmem:[#allocation89_spill] sm:$0xff]  ;;  %v823_v3 = vmul.f32 %v9357_v58, %v5334_v21  ;;  %v9358_v13 = vld [vmem:[#allocation103_spill] sm:$0xff]  ;;  %v853_v0 = vpop.permute.xlu1 %852 }
 0x1b7   : > { %9347 = vst [vmem:[#allocation155_spill] sm:$0xff] %v5462_v57  ;;  %9348 = vst [vmem:[#allocation156_spill] sm:$0xff] %v5465_v61  ;;  %v5481_v7 = vadd.f32 %v2835_v18, %v9355_v47  ;;  %v824_v5 = vmul.f32 %v9358_v13, %v5334_v21  ;;  %v9359_v53 = vld [vmem:[#allocation19_spill] sm:$0xff]  ;;  %v9361_v36 = vld [vmem:[#allocation68_spill] sm:$0xff]  ;;  %v2838_v49 = vmul.f32 %v9248_v33, %v5398_v59 }
 0x1b8   : > { %9349 = vst [vmem:[#allocation157_spill] sm:$0xff] %v5468_v8  ;;  %9351 = vst [vmem:[#allocation92_spill] sm:$0xff] %v5471_v26  ;;  %v5488_v46 = vadd.f32 %v2883_v31, %v9359_v53  ;;  %v959_v23 = vmul.f32 %v9361_v36, %v5334_v21  ;;  %v9362_v26 = vld [vmem:[#allocation69_spill] sm:$0xff]  ;;  %v9363_v14 = vld [vmem:[#allocation79_spill] sm:$0xff]  ;;  %v2933_v31 = vmul.f32 %v9220_v42, %v5334_v21  ;;  %v3693_v43 = vpop.eup %3692 }
 0x1b9   : > { %9352 = vst [vmem:[#allocation158_spill] sm:$0xff] %v5474_v54  ;;  %9354 = vst [vmem:[#allocation13_spill] sm:$0xff] %v5478_v39  ;;  %v960_v8 = vmul.f32 %v9362_v26, %v5334_v21  ;;  %v2837_v15 = vmul.f32 %v9363_v14, %v5334_v21  ;;  %v9364_v18 = vld [vmem:[#allocation46_spill] sm:$0xff]  ;;  %v2885_v39 = vmul.f32 %v9219_v16, %v5334_v21  ;;  %v9366_v53 = vld [vmem:[#allocation73_spill] sm:$0xff] }
 0x1ba   : > { %9356 = vst [vmem:[#allocation89_spill] sm:$0xff] %v5481_v7  ;;  %9360 = vst [vmem:[#allocation19_spill] sm:$0xff] %v5488_v46  ;;  %v5497_v47 = vadd.f32 %v2931_v37, %v9364_v18  ;;  %v825_v61 = vmul.f32 %v9366_v53, %v5398_v59  ;;  %v9367_v38 = vld [vmem:[#allocation76_spill] sm:$0xff]  ;;  %v961_v7 = vmul.f32 %v9357_v58, %v5398_v59  ;;  %v8868_v18 = vmov 3   ;;  %v5524_v4 = vld [vmem:[%s4171_s9] sm:$0xff] }
 0x1bb   : > { %v826_v46 = vmul.f32 %v9367_v38, %v5398_v59  ;;  %v962_v37 = vmul.f32 %v9358_v13, %v5398_v59  ;;  %3657 = vset.pattern.permute.xlu1 %v8868_v18  ;;  %v5517_v44 = vadd.f32 %v824_v5, %v9370_v50  ;;  %v2886_v42 = vmul.f32 %v9363_v14, %v5398_v59  ;;  %v9373_v18 = vld [vmem:[#allocation110_spill] sm:$0xff]  ;;  %v9375_v54 = vld [vmem:[#allocation111_spill] sm:$0xff] }
 0x1bc   : > { %9365 = vst [vmem:[#allocation46_spill] sm:$0xff] %v5497_v47  ;;  %v5514_v47 = vadd.f32 %v823_v3, %v9368_v56  ;;  %9372 = vst [vmem:[#allocation159_spill] sm:$0xff] %v5524_v4  ;;  %1270 = vperm.xlu1 %3657, %v5524_v4   ;;  %v5528_v57 = vadd.f32 %v959_v23, %v9373_v18  ;;  %v5531_v56 = vadd.f32 %v960_v8, %v9375_v54  ;;  %v9377_v3 = vld [vmem:[#allocation112_spill] sm:$0xff]  ;;  %v9383_v23 = vld [vmem:[#allocation118_spill] sm:$0xff] }
 0x1bd   : > { %9371 = vst [vmem:[#allocation107_spill] sm:$0xff] %v5517_v44  ;;  %v5534_v50 = vadd.f32 %v2837_v15, %v9377_v3  ;;  %v2934_v5 = vmul.f32 %v9219_v16, %v5398_v59  ;;  %v5538_v44 = vpop.permute.xlu0 %864  ;;  %v5542_v63 = vadd.f32 %v2885_v39, %v9379_v1  ;;  %v5545_v13 = vadd.f32 %v2933_v31, %v9381_v32  ;;  %v9385_v8 = vld [vmem:[#allocation119_spill] sm:$0xff]  ;;  %v9387_v15 = vld [vmem:[#allocation120_spill] sm:$0xff] }
 0x1be   : > { %9369 = vst [vmem:[#allocation9_spill] sm:$0xff] %v5514_v47  ;;  %9374 = vst [vmem:[#allocation110_spill] sm:$0xff] %v5528_v57  ;;  %v3105_v47 = vmul.f32 %v3693_v43, %v5332_v34  ;;  %v5548_v18 = vadd.f32 %v825_v61, %v9383_v23  ;;  %v5551_v54 = vadd.f32 %v826_v46, %v9385_v8  ;;  %v9391_v1 = vmov 14   ;;  %v5604_v23 = vld [vmem:[%s4178_s29 + $0x8] sm:$0xff] }
 0x1bf   : > { %9376 = vst [vmem:[#allocation111_spill] sm:$0xff] %v5531_v56  ;;  %9378 = vst [vmem:[#allocation112_spill] sm:$0xff] %v5534_v50  ;;  %v5554_v3 = vadd.f32 %v961_v7, %v9387_v15  ;;  %v5557_v56 = vadd.f32 %v962_v37, %v5264_v12  ;;  %v5561_v34 = vmul.f32 %v9248_v33, %v5538_v44  ;;  %3655 = vset.pattern.permute.xlu0 %v9391_v1  ;;  %v5598_v37 = vld [vmem:[%s4178_s29] sm:$0xff]  ;;  %v9404_v1 = vld [vmem:[#allocation18_spill] sm:$0xff] }
 0x1c0   : > { %9380 = vst [vmem:[#allocation113_spill] sm:$0xff] %v5542_v63  ;;  %9382 = vst [vmem:[#allocation114_spill] sm:$0xff] %v5545_v13  ;;  %v5566_v32 = vadd.f32 %v2838_v49, %v5267_v10  ;;  %v5569_v61 = vadd.f32 %v2886_v42, %v5273_v20  ;;  %v5573_v12 = vmul.f32 %v9363_v14, %v5538_v44  ;;  %1276 = vperm.xlu1 %3657, %v5386_v51   ;;  %v9444_v13 = vld [vmem:[#allocation137_spill] sm:$0xff] }
 0x1c1   : > { %9384 = vst [vmem:[#allocation118_spill] sm:$0xff] %v5548_v18  ;;  %9386 = vst [vmem:[#allocation119_spill] sm:$0xff] %v5551_v54  ;;  %1206 = vperm.xlu0 %3655, %v5524_v4   ;;  %v5578_v7 = vadd.f32 %v2934_v5, %v5276_v9  ;;  %v5582_v39 = vmul.f32 %v9219_v16, %v5538_v44  ;;  %v5584_v10 = vrot.slane %v847_v24, 4  ;;  %v1095_v42 = vpop.permute.xlu0 %1094  ;;  %v3113_v49 = vsub.f32 2.0, %v3105_v47  ;;  %v5595_v9 = vpop.permute.xlu1 %855  ;;  %v9402_v47 = vld [vmem:[#allocation17_spill] sm:$0xff] }
 0x1c2   : > { %9388 = vst [vmem:[#allocation120_spill] sm:$0xff] %v5554_v3  ;;  %9389 = vst [vmem:[#allocation160_spill] sm:$0xff] %v5557_v56  ;;  %v5587_v20 = vmul.f32 %v9270_v11, %v847_v24  ;;  %v5590_v46 = vmul.f32 %v9247_v29, %v847_v24  ;;  %v5593_v31 = vmul.f32 %v9248_v33, %v847_v24  ;;  %v9406_v24 = vld [vmem:[#allocation38_spill] sm:$0xff]  ;;  %v9411_v33 = vld [vmem:[#allocation39_spill] sm:$0xff] }
 0x1c3   : > { %9390 = vst [vmem:[#allocation161_spill] sm:$0xff] %v5561_v34  ;;  %9392 = vst [vmem:[#allocation162_spill] sm:$0xff] %v5566_v32  ;;  %v5601_v5 = vmul.f32 %v5598_v37, %v1095_v42  ;;  %v5607_v8 = vmul.f32 %v5604_v23, %v1095_v42  ;;  %v5610_v15 = vmul.f32 %v1095_v42, %v9402_v47  ;;  %v5618_v34 = vrot.slane %v853_v0, 4  ;;  %v9417_v56 = vld [vmem:[#allocation133_spill] sm:$0xff]  ;;  %v9441_v32 = vld [vmem:[#allocation135_spill] sm:$0xff] }
 0x1c4   : > { %9393 = vst [vmem:[#allocation163_spill] sm:$0xff] %v5569_v61  ;;  %9394 = vst [vmem:[#allocation164_spill] sm:$0xff] %v5573_v12  ;;  %v5616_v12 = vmul.f32 %v1095_v42, %v9406_v24  ;;  %v9418_v3 = vld [vmem:[#allocation61_spill] sm:$0xff]  ;;  %v5647_v54 = vmul.f32 %v3693_v43, %v3113_v49  ;;  %v9427_v43 = vld [vmem:[#allocation148_spill] sm:$0xff] }
 0x1c5   : > { %9395 = vst [vmem:[#allocation165_spill] sm:$0xff] %v5578_v7  ;;  %9396 = vst [vmem:[#allocation166_spill] sm:$0xff] %v5582_v39  ;;  %v5613_v39 = vmul.f32 %v1095_v42, %v9404_v1  ;;  %v1025_v57 = vmul.f32 %v9418_v3, %v9417_v56  ;;  %v9419_v18 = vld [vmem:[#allocation21_spill] sm:$0xff]  ;;  %v9426_v3 = vld [vmem:[#allocation116_spill] sm:$0xff] }
 0x1c6   : > { %9397 = vst [vmem:[#allocation167_spill] sm:$0xff] %v5587_v20  ;;  %9398 = vst [vmem:[#allocation168_spill] sm:$0xff] %v5590_v46  ;;  %v5624_v46 = vmul.f32 %v9267_v30, %v853_v0  ;;  %v5627_v20 = vld [vmem:[%s4171_s9 + $0x18] sm:$0xff]  ;;  %v5650_v4 = vmul.f32 %v9419_v18, %v1095_v42  ;;  %v1039_v49 = vadd.f32 %v9427_v43, %v9426_v3 }
 0x1c7   : > { %9399 = vst [vmem:[#allocation169_spill] sm:$0xff] %v5593_v31  ;;  %9400 = vst [vmem:[#allocation170_spill] sm:$0xff] %v5601_v5  ;;  %v5621_v31 = vmul.f32 %v9221_v52, %v853_v0  ;;  %1279 = vperm.xlu1 %3657, %v5627_v20   ;;  %1218 = vperm.xlu0 %3655, %v5627_v20   ;;  %v9416_v5 = vld [vmem:[#allocation58_spill] sm:$0xff]  ;;  %v1047_v3 = vmul.f32 %v9243_v40, %v5200_v35 }
 0x1c8   : > { %9401 = vst [vmem:[#allocation171_spill] sm:$0xff] %v5607_v8  ;;  %9403 = vst [vmem:[#allocation17_spill] sm:$0xff] %v5610_v15  ;;  %v5632_v15 = vmul.f32 %v1095_v42, %v9411_v33 }
 0x1c9   : > { %9405 = vst [vmem:[#allocation18_spill] sm:$0xff] %v5613_v39  ;;  %9407 = vst [vmem:[#allocation38_spill] sm:$0xff] %v5616_v12  ;;  %v5635_v39 = vmul.f32 %v9270_v11, %v853_v0  ;;  %v5638_v12 = vld [vmem:[%s4319_s30] sm:$0xff] }
 0x1ca   : > { %9408 = vst [vmem:[#allocation172_spill] sm:$0xff] %v5621_v31  ;;  %9409 = vst [vmem:[#allocation173_spill] sm:$0xff] %v5624_v46  ;;  %v5641_v8 = vmul.f32 %v5638_v12, %v1095_v42  ;;  %v9415_v31 = vld [vmem:[#allocation65_spill] sm:$0xff]  ;;  %v9423_v0 = vld [vmem:[#allocation62_spill] sm:$0xff] }
 0x1cb   : > { %9410 = vst [vmem:[#allocation174_spill] sm:$0xff] %v5627_v20  ;;  %9412 = vst [vmem:[#allocation39_spill] sm:$0xff] %v5632_v15  ;;  %v1024_v46 = vmul.f32 %v9416_v5, %v9415_v31  ;;  %v9421_v15 = vld [vmem:[#allocation40_spill] sm:$0xff]  ;;  %v9425_v31 = vld [vmem:[#allocation83_spill] sm:$0xff] }
 0x1cc   : > { %9413 = vst [vmem:[#allocation175_spill] sm:$0xff] %v5635_v39  ;;  %9414 = vst [vmem:[#allocation176_spill] sm:$0xff] %v5641_v8  ;;  %v5653_v11 = vmul.f32 %v9421_v15, %v1095_v42  ;;  %v1026_v39 = vmul.f32 %v9423_v0, %v9417_v56  ;;  %v9424_v8 = vld [vmem:[#allocation82_spill] sm:$0xff]  ;;  %v1028_v5 = vmul.f32 %v9425_v31, %v5092_v19  ;;  %v9428_v20 = vld [vmem:[#allocation117_spill] sm:$0xff]  ;;  %v5667_v42 = vpop.permute.xlu1 %861 }
 0x1cd   : > { %9420 = vst [vmem:[#allocation65_spill] sm:$0xff] %v5650_v4  ;;  %v1027_v61 = vmul.f32 %v9424_v8, %v5092_v19  ;;  %v1040_v7 = vadd.f32 %v1024_v46, %v9428_v20  ;;  %v5665_v4 = vrot.slane %v5595_v9, 4  ;;  %v9430_v56 = vld [vmem:[#allocation125_spill] sm:$0xff]  ;;  %v1045_v8 = vmul.f32 %v9366_v53, %v5145_v25  ;;  %v5681_v46 = vld [vmem:[%s4178_s29 + $0x20] sm:$0xff] }
 0x1ce   : > { %9422 = vst [vmem:[#allocation133_spill] sm:$0xff] %v5653_v11  ;;  %v9429_v11 = vld [vmem:[#allocation147_spill] sm:$0xff]  ;;  %v1041_v0 = vadd.f32 %v1025_v57, %v9430_v56  ;;  %v1046_v19 = vmul.f32 %v9367_v38, %v5145_v25  ;;  %v1048_v20 = vmul.f32 %v9244_v60, %v5200_v35  ;;  %9431 = vst [vmem:[#allocation116_spill] sm:$0xff] %v5681_v46  ;;  %v9433_v56 = vld [vmem:[#allocation129_spill] sm:$0xff] }
 0x1cf   : > { %1285 = vperm.xlu1 %3657, %v9429_v11   ;;  %1226 = vperm.xlu0 %3655, %v9429_v11   ;;  %v1049_v43 = vmul.f32 %v5681_v46, %v5239_v55  ;;  %v5686_v11 = vld [vmem:[%s4178_s29 + $0x28] sm:$0xff]  ;;  %v1042_v53 = vadd.f32 %v1026_v39, %v9433_v56  ;;  %v1051_v25 = vmul.f32 %v9304_v6, %v5280_v17  ;;  %v5705_v39 = vrot.slane %v5667_v42, 4 }
 0x1d0   : > { %9432 = vst [vmem:[#allocation148_spill] sm:$0xff] %v5686_v11  ;;  %v1050_v57 = vmul.f32 %v5686_v11, %v5239_v55  ;;  %v1052_v38 = vmul.f32 %v9305_v41, %v5280_v17  ;;  %v1055_v35 = vmul.f32 %v9217_v48, %v5334_v21  ;;  %v9434_v60 = vld [vmem:[#allocation32_spill] sm:$0xff]  ;;  %v1056_v46 = vmul.f32 %v9218_v62, %v5334_v21  ;;  %v9435_v17 = vld [vmem:[#allocation33_spill] sm:$0xff]  ;;  %v5712_v21 = vpop.eup %3694  ;;  %v9438_v62 = vld [vmem:[#allocation91_spill] sm:$0xff]  ;;  %v5718_v50 = vpop.permute.xlu1 %867 }
 0x1d1   : > { %v1043_v40 = vadd.f32 %v1027_v61, %v9434_v60  ;;  %v1057_v31 = vmul.f32 %v9361_v36, %v5398_v59  ;;  %v1058_v55 = vmul.f32 %v9362_v26, %v5398_v59  ;;  %v1044_v56 = vadd.f32 %v1028_v5, %v9435_v17  ;;  %v9436_v48 = vld [vmem:[#allocation97_spill] sm:$0xff]  ;;  %v9437_v61 = vld [vmem:[#allocation98_spill] sm:$0xff]  ;;  %9442 = vst [vmem:[#allocation117_spill] sm:$0xff] %v5718_v50 }
 0x1d2   : > { %v1061_v60 = vadd.f32 %v1045_v8, %v9436_v48  ;;  %v1062_v11 = vadd.f32 %v1046_v19, %v9437_v61  ;;  %v1063_v36 = vadd.f32 %v1047_v3, %v9438_v62  ;;  %v9439_v41 = vld [vmem:[#allocation90_spill] sm:$0xff]  ;;  %v1066_v63 = vadd.f32 %v1050_v57, %v9441_v32 }
 0x1d3   : > { %1291 = vperm.xlu1 %3657, %v5293_v28   ;;  %1234 = vperm.xlu0 %3655, %v5293_v28   ;;  %v1064_v6 = vadd.f32 %v1048_v20, %v9439_v41  ;;  %v9440_v59 = vld [vmem:[#allocation134_spill] sm:$0xff]  ;;  %v1067_v28 = vadd.f32 %v1051_v25, %v9443_v22  ;;  %v1068_v5 = vadd.f32 %v1052_v38, %v9444_v13  ;;  %v5725_v41 = vrot.slane %v5538_v44, 4  ;;  %v9447_v20 = vld [vmem:[#allocation139_spill] sm:$0xff] }
 0x1d4   : > { %v1065_v26 = vadd.f32 %v1049_v43, %v9440_v59  ;;  %v1071_v17 = vadd.f32 %v1055_v35, %v1039_v49  ;;  %v1077_v48 = vadd.f32 %v1061_v60, %v5584_v10  ;;  %v1072_v8 = vadd.f32 %v1056_v46, %v1040_v7  ;;  %v9448_v43 = vld [vmem:[#allocation140_spill] sm:$0xff]  ;;  %v9450_v25 = vld [vmem:[#allocation138_spill] sm:$0xff]  ;;  %v9452_v59 = vld [vmem:[#allocation115_spill] sm:$0xff] }
 0x1d5   : > { %v1073_v19 = vadd.f32 %v1057_v31, %v1041_v0  ;;  %v1074_v61 = vadd.f32 %v1058_v55, %v1042_v53  ;;  %v1078_v62 = vadd.f32 %v1062_v11, %v5584_v10  ;;  %v8898_v3 = vmov 0   ;;  %v9446_v53 = vld [vmem:[#allocation132_spill] sm:$0xff]  ;;  %v9449_v11 = vld [vmem:[#allocation103_spill] sm:$0xff]  ;;  %v9451_v55 = vld [vmem:[#allocation109_spill] sm:$0xff] }
 0x1d6   : > { %v9445_v32 = vmov 3   ;;  %v1081_v22 = vadd.f32 %v1065_v26, %v5618_v34  ;;  %v1082_v38 = vadd.f32 %v1066_v63, %v5618_v34  ;;  %v1083_v13 = vadd.f32 %v1067_v28, %v5665_v4 }
 0x1d7   : > { %3659 = vset.pattern.permute.xlu1 %v8898_v3  ;;  %3658 = vset.pattern.permute.xlu0 %v9445_v32  ;;  %v5733_v7 = vrot.slane %v5718_v50, 4  ;;  %v1084_v44 = vadd.f32 %v1068_v5, %v5665_v4  ;;  %v1053_v0 = vmul.f32 %v9333_v2, %v9446_v53  ;;  %v1054_v31 = vmul.f32 %v9336_v27, %v9446_v53  ;;  %v9453_v5 = vld [vmem:[#allocation141_spill] sm:$0xff]  ;;  %v9455_v3 = vld [vmem:[#allocation100_spill] sm:$0xff] }
 0x1d8   : > { %2064 = vperm.xlu1 %3659, %v5346_v45   ;;  %1273 = vperm.xlu0 %3658, %v5346_v45   ;;  %v1087_v26 = vadd.f32 %v1071_v17, %v5705_v39  ;;  %v1088_v63 = vadd.f32 %v1072_v8, %v5705_v39  ;;  %v1533_v49 = vrot.slane %v1077_v48, 2  ;;  %v1059_v46 = vmul.f32 %v9357_v58, %v9447_v20  ;;  %v9456_v27 = vld [vmem:[#allocation149_spill] sm:$0xff] }
 0x1d9   : > { %vm8988_vm9 = vcmp.gt.f32.partialorder %v9448_v43, 0.0  ;;  %v1060_v57 = vmul.f32 %v9449_v11, %v9447_v20  ;;  %v1069_v35 = vadd.f32 %v1053_v0, %v9450_v25  ;;  %v1070_v60 = vadd.f32 %v1054_v31, %v9451_v55  ;;  %v1107_v31 = vpop.permute.xlu0 %1106 }
 0x1da   : > { %v1079_v28 = vadd.f32 %v1063_v36, %v9452_v59  ;;  %vm8987_vm10 = vcmp.gt.f32.partialorder %v9453_v5, 0.0  ;;  %v1537_v17 = vrot.slane %v1083_v13, 7  ;;  %v1547_v32 = vrot.slane %v1078_v62, 2  ;;  %v9488_v5 = vld [vmem:[#allocation20_spill] sm:$0xff] }
 0x1db   : > { %v1075_v8 = vadd.f32 %v1059_v46, %v1043_v40  ;;  %v1080_v48 = vadd.f32 %v1064_v6, %v9452_v59  ;;  %v9454_v53 = vmov 1   ;;  %v1076_v58 = vadd.f32 %v1060_v57, %v1044_v56 }
 0x1dc   : > { %3660 = vset.pattern.permute.xlu1 %v9454_v53  ;;  %1282 = vperm.xlu0 %3658, %v9455_v3   ;;  %v1085_v20 = vadd.f32 %v1069_v35, %v9456_v27  ;;  %v1086_v0 = vadd.f32 %v1070_v60, %v9456_v27  ;;  %v1534_v25 = vrot.slane %v1079_v28, 1  ;;  %v1551_v36 = vrot.slane %v1084_v44, 7  ;;  %v9457_v28 = vld [vmem:[#allocation158_spill] sm:$0xff] }
 0x1dd   : > { %2120 = vperm.xlu1 %3660, %v5346_v45   ;;  %v1089_v13 = vadd.f32 %v1073_v19, %v5725_v41  ;;  %v1091_v40 = vadd.f32 %v1075_v8, %v5733_v7  ;;  %v1548_v62 = vrot.slane %v1080_v48, 1  ;;  %v1541_v6 = vrot.slane %v1087_v26, 5 }
 0x1de   : > { %v1090_v46 = vadd.f32 %v1074_v61, %v5725_v41  ;;  %v1092_v55 = vadd.f32 %v1076_v58, %v5733_v7  ;;  %v1535_v56 = vsel %vm413_vm1, %v1534_v25, %v1533_v49  ;;  %v1555_v57 = vrot.slane %v1088_v63, 5  ;;  %v9458_v49 = vld [vmem:[#allocation155_spill] sm:$0xff] }
 0x1df   : > { %v1536_v35 = vsel %vm8994_vm2, %v1081_v22, %v1535_v56  ;;  %v1539_v60 = vrot.slane %v1085_v20, 6  ;;  %v1549_v59 = vsel %vm413_vm1, %v1548_v62, %v1547_v32  ;;  %v1545_v44 = vrot.slane %v1091_v40, 3  ;;  %v5776_v20 = vpop.permute.xlu1 %1098  ;;  %v9459_v25 = vld [vmem:[#allocation151_spill] sm:$0xff]  ;;  %v1115_v62 = vpop.permute.xlu0 %1114 }
 0x1e0   : > { %1288 = vperm.xlu0 %3658, %v9457_v28   ;;  %v1538_v19 = vsel %vm8993_vm3, %v1537_v17, %v1536_v35  ;;  %v1550_v8 = vsel %vm8994_vm2, %v1082_v38, %v1549_v59  ;;  %v1553_v26 = vrot.slane %v1086_v0, 6  ;;  %v8904_v48 = vmov 4   ;;  %v9521_v28 = vld [vmem:[#allocation94_spill] sm:$0xff] }
 0x1e1   : > { %3661 = vset.pattern.permute.xlu1 %v8904_v48  ;;  %v1540_v58 = vsel %vm8992_vm4, %v1539_v60, %v1538_v19  ;;  %v1543_v61 = vrot.slane %v1089_v13, 4  ;;  %v1552_v63 = vsel %vm8993_vm3, %v1551_v36, %v1550_v8  ;;  %v1559_v22 = vrot.slane %v1092_v55, 3  ;;  %v9461_v36 = vld [vmem:[#allocation152_spill] sm:$0xff]  ;;  %v9464_v19 = vld [vmem:[#allocation25_spill] sm:$0xff] }
 0x1e2   : > { %v5774_v32 = vadd.f32 %v9458_v49, %v5618_v34  ;;  %2344 = vperm.xlu1 %3661, %v5346_v45   ;;  %v1542_v38 = vsel %vm8991_vm5, %v1541_v6, %v1540_v58  ;;  %v1554_v17 = vsel %vm8992_vm4, %v1553_v26, %v1552_v63  ;;  %v1557_v0 = vrot.slane %v1090_v46, 4  ;;  %v9466_v26 = vld [vmem:[#allocation26_spill] sm:$0xff]  ;;  %v9470_v63 = vld [vmem:[#allocation23_spill] sm:$0xff] }
 0x1e3   : > { %v5783_v40 = vadd.f32 %v9459_v25, %v5618_v34  ;;  %v5787_v13 = vadd.f32 %v9461_v36, %v5618_v34  ;;  %v1544_v55 = vsel %vm8990_vm6, %v1543_v61, %v1542_v38  ;;  %v1556_v56 = vsel %vm8991_vm5, %v1555_v57, %v1554_v17  ;;  %v5841_v48 = vpop.permute.xlu1 %1102 }
 0x1e4   : > { %v3201_v35 = vrot.slane %v5647_v54, 2  ;;  %v3257_v6 = vrot.slane %v5647_v54, 1  ;;  %v1546_v60 = vsel %vm8989_vm7, %v1545_v44, %v1544_v55  ;;  %v1558_v46 = vsel %vm8990_vm6, %v1557_v0, %v1556_v56  ;;  %v9468_v54 = vld [vmem:[#allocation22_spill] sm:$0xff]  ;;  %v9476_v55 = vld [vmem:[#allocation15_spill] sm:$0xff] }
 0x1e5   : > { %9460 = vst [vmem:[#allocation147_spill] sm:$0xff] %v5783_v40  ;;  %9462 = vst [vmem:[#allocation125_spill] sm:$0xff] %v5787_v13  ;;  %v9463_v59 = vmov 0   ;;  %v5797_v8 = vmul.f32 %v1107_v31, %v9464_v19  ;;  %v5800_v58 = vmul.f32 %v1107_v31, %v9466_v26  ;;  %v1560_v61 = vsel %vm8989_vm7, %v1559_v22, %v1558_v46  ;;  %v9472_v22 = vld [vmem:[#allocation71_spill] sm:$0xff]  ;;  %v9482_v13 = vld [vmem:[#allocation16_spill] sm:$0xff] }
 0x1e6   : > { %3667 = vset.pattern.permute.xlu0 %v9463_v59  ;;  %v5805_v57 = vsel %vm8988_vm9, %v1546_v60, 1.0  ;;  %3696 = vrcp.f32 %v5774_v32  ;;  %v5809_v44 = vmul.f32 %v1107_v31, %v9468_v54  ;;  %v5812_v49 = vmul.f32 %v1107_v31, %v9470_v63  ;;  %v9478_v60 = vld [vmem:[#allocation104_spill] sm:$0xff] }
 0x1e7   : > { %9465 = vst [vmem:[#allocation129_spill] sm:$0xff] %v5797_v8  ;;  %9467 = vst [vmem:[#allocation32_spill] sm:$0xff] %v5800_v58  ;;  %v8902_v38 = vmov 5   ;;  %v5817_v17 = vsel %vm8987_vm10, %v1560_v61, 1.0  ;;  %v5821_v0 = vmul.f32 %v9472_v22, %v5595_v9  ;;  %v5825_v25 = vmul.f32 %v9221_v52, %v5595_v9  ;;  %v9480_v61 = vld [vmem:[#allocation14_spill] sm:$0xff]  ;;  %v9579_v8 = vld [vmem:[#allocation88_spill] sm:$0xff] }
 0x1e8   : > { %9469 = vst [vmem:[#allocation33_spill] sm:$0xff] %v5809_v44  ;;  %9471 = vst [vmem:[#allocation97_spill] sm:$0xff] %v5812_v49  ;;  %3662 = vset.pattern.permute.xlu1 %v8902_v38  ;;  %v5829_v36 = vmul.f32 %v9267_v30, %v5595_v9  ;;  %v5832_v56 = vmul.f32 %v1107_v31, %v9476_v55  ;;  %v5836_v46 = vmul.f32 %v3201_v35, %v9478_v60  ;;  %v9486_v9 = vld [vmem:[#allocation24_spill] sm:$0xff]  ;;  %v9526_v44 = vmov 4  }
 0x1e9   : > { %9473 = vst [vmem:[#allocation98_spill] sm:$0xff] %v5821_v0  ;;  %9474 = vst [vmem:[#allocation91_spill] sm:$0xff] %v5825_v25  ;;  %2384 = vperm.xlu1 %3662, %v5346_v45   ;;  %v5839_v38 = vmul.f32 %v3257_v6, %v9480_v61  ;;  %v5844_v40 = vmul.f32 %v1107_v31, %v9482_v13  ;;  %v9484_v25 = vld [vmem:[#allocation27_spill] sm:$0xff]  ;;  %v5853_v43 = vmul.f32 %v9488_v5, %v1107_v31  ;;  %v9492_v60 = vld [vmem:[#allocation36_spill] sm:$0xff]  ;;  %v1123_v61 = vpop.permute.xlu0 %1122 }
 0x1ea   : > { %9475 = vst [vmem:[#allocation90_spill] sm:$0xff] %v5829_v36  ;;  %9477 = vst [vmem:[#allocation134_spill] sm:$0xff] %v5832_v56  ;;  %v5847_v0 = vmul.f32 %v9484_v25, %v1107_v31  ;;  %v5850_v36 = vmul.f32 %v9486_v9, %v1107_v31  ;;  %v9490_v45 = vld [vmem:[#allocation35_spill] sm:$0xff]  ;;  %v5859_v6 = vmul.f32 %v1115_v62, %v9492_v60  ;;  %v9497_v31 = vld [vmem:[#allocation29_spill] sm:$0xff]  ;;  %3698 = vrcp.f32 %v5805_v57 }
 0x1eb   : > { %9479 = vst [vmem:[#allocation135_spill] sm:$0xff] %v5836_v46  ;;  %9481 = vst [vmem:[#allocation136_spill] sm:$0xff] %v5839_v38  ;;  %v5856_v35 = vmul.f32 %v1115_v62, %v9490_v45  ;;  %v5863_v38 = vmul.f32 %v9363_v14, %v5667_v42  ;;  %v5867_v46 = vmul.f32 %v9219_v16, %v5667_v42  ;;  %3700 = vrcp.f32 %v5817_v17 }
 0x1ec   : > { %9483 = vst [vmem:[#allocation137_spill] sm:$0xff] %v5844_v40  ;;  %9485 = vst [vmem:[#allocation132_spill] sm:$0xff] %v5847_v0  ;;  %v5871_v52 = vmul.f32 %v9472_v22, %v5667_v42  ;;  %v5874_v30 = vmul.f32 %v1115_v62, %v9497_v31  ;;  %v5880_v11 = vmul.f32 %v1115_v62, %v9464_v19 }
 0x1ed   : > { %9487 = vst [vmem:[#allocation139_spill] sm:$0xff] %v5850_v36  ;;  %9489 = vst [vmem:[#allocation138_spill] sm:$0xff] %v5853_v43  ;;  %v9499_v43 = vld [vmem:[#allocation30_spill] sm:$0xff]  ;;  %v5883_v14 = vmul.f32 %v1115_v62, %v9466_v26  ;;  %3663 = vset.pattern.permute.xlu1 %v9463_v59  ;;  %v5896_v22 = vmul.f32 %v1123_v61, %v9402_v47  ;;  %v5901_v16 = vmul.f32 %v1123_v61, %v9404_v1 }
 0x1ee   : > { %9491 = vst [vmem:[#allocation109_spill] sm:$0xff] %v5856_v35  ;;  %9493 = vst [vmem:[#allocation115_spill] sm:$0xff] %v5859_v6  ;;  %v5877_v36 = vmul.f32 %v1115_v62, %v9499_v43  ;;  %2068 = vperm.xlu1 %3663, %v5386_v51   ;;  %v5907_v2 = vmul.f32 %v1123_v61, %v9411_v33  ;;  %v6002_v56 = vmul.f32 %v5841_v48, %v9468_v54 }
 0x1ef   : > { %9494 = vst [vmem:[#allocation100_spill] sm:$0xff] %v5863_v38  ;;  %9495 = vst [vmem:[#allocation149_spill] sm:$0xff] %v5867_v46  ;;  %v9503_v38 = vld [vmem:[#allocation37_spill] sm:$0xff]  ;;  %v9505_v46 = vld [vmem:[#allocation31_spill] sm:$0xff]  ;;  %v6006_v49 = vmul.f32 %v5841_v48, %v9470_v63 }
 0x1f0   : > { %9496 = vst [vmem:[#allocation155_spill] sm:$0xff] %v5871_v52  ;;  %9498 = vst [vmem:[#allocation151_spill] sm:$0xff] %v5874_v30  ;;  %v5886_v0 = vmul.f32 %v9503_v38, %v1115_v62  ;;  %v5890_v42 = vmul.f32 %v9505_v46, %v1115_v62  ;;  %v5893_v52 = vmul.f32 %v9484_v25, %v1115_v62 }
 0x1f1   : > { %9500 = vst [vmem:[#allocation152_spill] sm:$0xff] %v5877_v36  ;;  %9501 = vst [vmem:[#allocation25_spill] sm:$0xff] %v5880_v11  ;;  %v5912_v62 = vmul.f32 %v9247_v29, %v5718_v50  ;;  %v5931_v50 = vmul.f32 %v5776_v20, %v9476_v55  ;;  %v5937_v29 = vpop.xlane.xlu0 %348 }
 0x1f2   : > { %9502 = vst [vmem:[#allocation26_spill] sm:$0xff] %v5883_v14  ;;  %9504 = vst [vmem:[#allocation22_spill] sm:$0xff] %v5886_v0  ;;  %v5904_v0 = vmul.f32 %v1123_v61, %v9406_v24  ;;  %3664 = vset.pattern.permute.xlu1 %v9454_v53  ;;  %v5967_v14 = vmul.f32 %v9419_v18, %v5776_v20 }
 0x1f3   : > { %9506 = vst [vmem:[#allocation23_spill] sm:$0xff] %v5890_v42  ;;  %9507 = vst [vmem:[#allocation15_spill] sm:$0xff] %v5893_v52  ;;  %v1111_v52 = vpop.permute.xlu1 %1110  ;;  %v5915_v42 = vmul.f32 %v1123_v61, %v9490_v45  ;;  %2124 = vperm.xlu1 %3664, %v5386_v51   ;;  %v3697_v6 = vpop.eup %3696 }
 0x1f4   : > { %9508 = vst [vmem:[#allocation104_spill] sm:$0xff] %v5896_v22  ;;  %9509 = vst [vmem:[#allocation14_spill] sm:$0xff] %v5901_v16  ;;  %v5918_v22 = vmul.f32 %v1123_v61, %v9492_v60  ;;  %v5921_v16 = vmul.f32 %v9419_v18, %v1123_v61  ;;  %v5976_v11 = vmul.f32 %v1111_v52, %v9464_v19 }
 0x1f5   : > { %9510 = vst [vmem:[#allocation16_spill] sm:$0xff] %v5904_v0  ;;  %9511 = vst [vmem:[#allocation35_spill] sm:$0xff] %v5907_v2  ;;  %v5924_v0 = vmul.f32 %v9421_v15, %v1123_v61  ;;  %v5927_v2 = vmul.f32 %v9503_v38, %v1123_v61  ;;  %v5946_v61 = vmul.f32 %v5604_v23, %v5776_v20 }
 0x1f6   : > { %9512 = vst [vmem:[#allocation36_spill] sm:$0xff] %v5912_v62  ;;  %9513 = vst [vmem:[#allocation29_spill] sm:$0xff] %v5915_v42  ;;  %v5935_v62 = vmul.f32 %v5776_v20, %v9482_v13  ;;  %v5963_v42 = vmul.f32 %v5638_v12, %v5776_v20  ;;  %v5979_v36 = vmul.f32 %v1111_v52, %v9466_v26 }
 0x1f7   : > { %9514 = vst [vmem:[#allocation30_spill] sm:$0xff] %v5918_v22  ;;  %9515 = vst [vmem:[#allocation177_spill] sm:$0xff] %v5921_v16  ;;  %v5942_v16 = vmul.f32 %v5598_v37, %v5776_v20  ;;  %v5959_v22 = vmul.f32 %v9488_v5, %v5776_v20  ;;  %v5982_v30 = vmul.f32 %v1111_v52, %v9468_v54  ;;  %v1119_v40 = vpop.permute.xlu1 %1118  ;;  %3665 = vset.pattern.permute.xlu1 %v9526_v44 }
 0x1f8   : > { %9516 = vst [vmem:[#allocation178_spill] sm:$0xff] %v5924_v0  ;;  %9517 = vst [vmem:[#allocation179_spill] sm:$0xff] %v5927_v2  ;;  %v5950_v2 = vmul.f32 %v5776_v20, %v9402_v47  ;;  %v5954_v0 = vmul.f32 %v5776_v20, %v9404_v1  ;;  %v5970_v47 = vmul.f32 %v1111_v52, %v9497_v31  ;;  %2348 = vperm.xlu1 %3665, %v5386_v51  }
 0x1f9   : > { %9518 = vst [vmem:[#allocation180_spill] sm:$0xff] %v5937_v29  ;;  %v5973_v1 = vmul.f32 %v1111_v52, %v9499_v43  ;;  %v5985_v35 = vmul.f32 %v1111_v52, %v9470_v63  ;;  %v5988_v20 = vmul.f32 %v9505_v46, %v1111_v52  ;;  %v5991_v18 = vmul.f32 %v9484_v25, %v1111_v52 }
 0x1fa   : > { %v5995_v19 = vadd.f32 %v9521_v28, %v5584_v10  ;;  %v5998_v26 = vmul.f32 %v9486_v9, %v1111_v52  ;;  %9523 = vst [vmem:[#allocation183_spill] sm:$0xff] %v6002_v56  ;;  %9524 = vst [vmem:[#allocation184_spill] sm:$0xff] %v6006_v49  ;;  %v6010_v25 = vmul.f32 %v5841_v48, %v9476_v55  ;;  %v6029_v55 = vpop.xlane.xlu0 %354 }
 0x1fb   : > { %9519 = vst [vmem:[#allocation181_spill] sm:$0xff] %v5988_v20  ;;  %9520 = vst [vmem:[#allocation182_spill] sm:$0xff] %v5991_v18  ;;  %v6015_v28 = vmul.f32 %v5841_v48, %v9482_v13  ;;  %v6019_v52 = vmul.f32 %v5598_v37, %v5841_v48  ;;  %v6023_v54 = vmul.f32 %v5604_v23, %v5841_v48 }
 0x1fc   : > { %9522 = vst [vmem:[#allocation94_spill] sm:$0xff] %v5998_v26  ;;  %9525 = vst [vmem:[#allocation185_spill] sm:$0xff] %v6010_v25  ;;  %v6027_v63 = vmul.f32 %v9486_v9, %v5841_v48  ;;  %v6034_v13 = vmul.f32 %v9488_v5, %v5841_v48  ;;  %v6038_v37 = vmul.f32 %v5638_v12, %v5841_v48  ;;  %3702 = vrcp.f32 %v5995_v19  ;;  %v9537_v5 = vld [vmem:[#allocation122_spill] sm:$0xff]  ;;  %v9591_v26 = vld [vmem:[#allocation9_spill] sm:$0xff] }
 0x1fd   : > { %9527 = vst [vmem:[#allocation186_spill] sm:$0xff] %v6015_v28  ;;  %9528 = vst [vmem:[#allocation187_spill] sm:$0xff] %v6019_v52  ;;  %v9534_v52 = vld [vmem:[#allocation46_spill] sm:$0xff]  ;;  %v6046_v9 = vmul.f32 %v1119_v40, %v9406_v24  ;;  %v6056_v12 = vmul.f32 %v1119_v40, %v9411_v33  ;;  %v6059_v48 = vmul.f32 %v1119_v40, %v9490_v45 }
 0x1fe   : > { %9529 = vst [vmem:[#allocation188_spill] sm:$0xff] %v6023_v54  ;;  %9530 = vst [vmem:[#allocation189_spill] sm:$0xff] %v6027_v63  ;;  %v6042_v23 = vadd.f32 %v9534_v52, %v5665_v4  ;;  %v3106_v54 = vmul.f32 %v3697_v6, %v5774_v32  ;;  %v9536_v63 = vld [vmem:[#allocation114_spill] sm:$0xff]  ;;  %v6062_v32 = vmul.f32 %v1119_v40, %v9492_v60  ;;  %v3699_v52 = vpop.eup %3698 }
 0x1ff   : > { %9531 = vst [vmem:[#allocation190_spill] sm:$0xff] %v6029_v55  ;;  %9532 = vst [vmem:[#allocation191_spill] sm:$0xff] %v6034_v13  ;;  %v6051_v28 = vadd.f32 %v9536_v63, %v5705_v39  ;;  %v3108_v13 = vmul.f32 %v5712_v21, %v9537_v5  ;;  %v6065_v24 = vmul.f32 %v1119_v40, %v9497_v31  ;;  %v3701_v45 = vpop.eup %3700  ;;  %v9548_v31 = vld [vmem:[#allocation93_spill] sm:$0xff] }
 0x200   : > { %9533 = vst [vmem:[#allocation192_spill] sm:$0xff] %v6038_v37  ;;  %9535 = vst [vmem:[#allocation46_spill] sm:$0xff] %v6046_v9  ;;  %v6068_v9 = vmul.f32 %v1119_v40, %v9499_v43  ;;  %v6071_v63 = vmul.f32 %v9421_v15, %v1119_v40  ;;  %v6074_v5 = vmul.f32 %v9503_v38, %v1119_v40  ;;  %3704 = vrcp.f32 %v6042_v23  ;;  %v9550_v38 = vld [vmem:[#allocation86_spill] sm:$0xff]  ;;  %v9562_v37 = vld [vmem:[#allocation144_spill] sm:$0xff] }
 0x201   : > { %9538 = vst [vmem:[#allocation114_spill] sm:$0xff] %v6056_v12  ;;  %9539 = vst [vmem:[#allocation122_spill] sm:$0xff] %v6059_v48  ;;  %v6077_v33 = vmul.f32 %v9505_v46, %v1119_v40  ;;  %v9546_v48 = vld [vmem:[#allocation10_spill] sm:$0xff]  ;;  %v3114_v43 = vsub.f32 2.0, %v3106_v54  ;;  %v6090_v15 = vadd.f32 %v9550_v38, %v5584_v10  ;;  %v9552_v40 = vld [vmem:[#allocation89_spill] sm:$0xff]  ;;  %3706 = vrcp.f32 %v6051_v28 }
 0x202   : > { %9540 = vst [vmem:[#allocation193_spill] sm:$0xff] %v6062_v32  ;;  %9541 = vst [vmem:[#allocation194_spill] sm:$0xff] %v6065_v24  ;;  %v9547_v32 = vmov 5   ;;  %v6084_v24 = vadd.f32 %v9548_v31, %v5584_v10  ;;  %v6094_v46 = vadd.f32 %v9552_v40, %v5665_v4  ;;  %v3116_v60 = vsub.f32 2.0, %v3108_v13  ;;  %v9555_v31 = vld [vmem:[#allocation19_spill] sm:$0xff]  ;;  %v9557_v54 = vld [vmem:[#allocation112_spill] sm:$0xff] }
 0x203   : > { %9542 = vst [vmem:[#allocation195_spill] sm:$0xff] %v6068_v9  ;;  %9543 = vst [vmem:[#allocation196_spill] sm:$0xff] %v6071_v63  ;;  %3666 = vset.pattern.permute.xlu1 %v9547_v32  ;;  %v9559_v38 = vld [vmem:[#allocation113_spill] sm:$0xff]  ;;  %v1567_v12 = vmul.f32 %v3699_v52, %v5805_v57  ;;  %v1568_v13 = vmul.f32 %v3701_v45, %v5817_v17  ;;  %v2852_v25 = vadd.f32 %v9562_v37, %v9456_v27  ;;  %v9575_v17 = vld [vmem:[#allocation131_spill] sm:$0xff] }
 0x204   : > { %9544 = vst [vmem:[#allocation197_spill] sm:$0xff] %v6074_v5  ;;  %9545 = vst [vmem:[#allocation198_spill] sm:$0xff] %v6077_v33  ;;  %2388 = vperm.xlu1 %3666, %v5386_v51   ;;  %v6097_v33 = vpop.xlane.xlu0 %357  ;;  %v6101_v5 = vadd.f32 %v9555_v31, %v5665_v4  ;;  %v6105_v51 = vadd.f32 %v9557_v54, %v5705_v39  ;;  %v6109_v63 = vadd.f32 %v9559_v38, %v5705_v39  ;;  %v9561_v40 = vld [vmem:[#allocation153_spill] sm:$0xff]  ;;  %v9563_v31 = vld [vmem:[#allocation162_spill] sm:$0xff] }
 0x205   : > { %9549 = vst [vmem:[#allocation93_spill] sm:$0xff] %v6084_v24  ;;  %9551 = vst [vmem:[#allocation86_spill] sm:$0xff] %v6090_v15  ;;  %v2850_v9 = vadd.f32 %v9561_v40, %v5618_v34  ;;  %v6119_v49 = vadd.f32 %v9563_v31, %v5725_v41  ;;  %v9565_v54 = vld [vmem:[#allocation64_spill] sm:$0xff]  ;;  %v9567_v38 = vld [vmem:[#allocation154_spill] sm:$0xff]  ;;  %v3122_v57 = vmul.f32 %v3697_v6, %v3114_v43  ;;  %v1570_v58 = vsub.f32 2.0, %v1568_v13 }
 0x206   : > { %9553 = vst [vmem:[#allocation89_spill] sm:$0xff] %v6094_v46  ;;  %9554 = vst [vmem:[#allocation199_spill] sm:$0xff] %v6097_v33  ;;  %v6123_v56 = vadd.f32 %v9565_v54, %v5733_v7  ;;  %v9568_v40 = vld [vmem:[#allocation165_spill] sm:$0xff]  ;;  %v9570_v31 = vld [vmem:[#allocation28_spill] sm:$0xff]  ;;  %v3124_v54 = vmul.f32 %v5712_v21, %v3116_v60  ;;  %v6149_v55 = vadd.f32 %v9575_v17, %v5733_v7 }
 0x207   : > { %9556 = vst [vmem:[#allocation19_spill] sm:$0xff] %v6101_v5  ;;  %9558 = vst [vmem:[#allocation112_spill] sm:$0xff] %v6105_v51  ;;  %v6129_v51 = vadd.f32 %v9568_v40, %v5725_v41  ;;  %v9569_v37 = vld [vmem:[#allocation105_spill] sm:$0xff]  ;;  %v9573_v6 = vld [vmem:[#allocation163_spill] sm:$0xff]  ;;  %v3202_v17 = vrot.slane %v3122_v57, 2  ;;  %v6196_v24 = vmul.f32 %v3701_v45, %v1570_v58 }
 0x208   : > { %9560 = vst [vmem:[#allocation113_spill] sm:$0xff] %v6109_v63  ;;  %9564 = vst [vmem:[#allocation153_spill] sm:$0xff] %v6119_v49  ;;  %v2898_v63 = vadd.f32 %v9567_v38, %v5618_v34  ;;  %3668 = vset.pattern.permute.xlu1 %v9463_v59  ;;  %2046 = vadd.xlane.f32.xlu0 %v9569_v37  ;;  %v6137_v49 = vadd.f32 %v9570_v31, %v5733_v7  ;;  %v9572_v38 = vld [vmem:[#allocation145_spill] sm:$0xff]  ;;  %v1569_v31 = vsub.f32 2.0, %v1567_v12  ;;  %v9578_v21 = vld [vmem:[#allocation54_spill] sm:$0xff] }
 0x209   : > { %9566 = vst [vmem:[#allocation144_spill] sm:$0xff] %v6123_v56  ;;  %v9571_v56 = vld [vmem:[#allocation174_spill] sm:$0xff]  ;;  %v2900_v40 = vadd.f32 %v9572_v38, %v9456_v27  ;;  %v6145_v43 = vadd.f32 %v9573_v6, %v5725_v41  ;;  %9576 = vst [vmem:[#allocation64_spill] sm:$0xff] %v6149_v55  ;;  %v9577_v37 = vld [vmem:[#allocation53_spill] sm:$0xff]  ;;  %v6157_v60 = vadd.f32 %v5584_v10, %v9578_v21  ;;  %v6163_v6 = vpop.xlane.xlu0 %363  ;;  %3708 = vrcp.f32 %v6129_v51  ;;  %v6173_v5 = vpop.eup %3702 }
 0x20a   : > { %2072 = vperm.xlu1 %3668, %v9571_v56   ;;  %v6153_v59 = vadd.f32 %v5584_v10, %v9577_v37  ;;  %v6161_v38 = vadd.f32 %v5618_v34, %v9579_v8  ;;  %9580 = vst [vmem:[#allocation154_spill] sm:$0xff] %v6163_v6  ;;  %v3258_v55 = vrot.slane %v3122_v57, 1  ;;  %3710 = vrcp.f32 %v6137_v49  ;;  %v9582_v8 = vld [vmem:[#allocation156_spill] sm:$0xff]  ;;  %v9583_v57 = vld [vmem:[#allocation157_spill] sm:$0xff]  ;;  %v9586_v12 = vld [vmem:[#allocation34_spill] sm:$0xff] }
 0x20b   : > { %9574 = vst [vmem:[#allocation162_spill] sm:$0xff] %v6145_v43  ;;  %v9581_v43 = vld [vmem:[#allocation150_spill] sm:$0xff]  ;;  %v3204_v13 = vrot.slane %v3124_v54, 2  ;;  %v3260_v21 = vrot.slane %v3124_v54, 1  ;;  %v6178_v29 = vadd.f32 %v5665_v4, %v9582_v8  ;;  %v6182_v46 = vadd.f32 %v5665_v4, %v9583_v57  ;;  %9589 = vst [vmem:[#allocation174_spill] sm:$0xff] %v6196_v24  ;;  %v9590_v8 = vld [vmem:[#allocation159_spill] sm:$0xff] }
 0x20c   : > { %v6168_v37 = vadd.f32 %v5618_v34, %v9581_v43  ;;  %v9584_v34 = vld [vmem:[#allocation48_spill] sm:$0xff]  ;;  %v6190_v33 = vadd.f32 %v9456_v27, %v9586_v12  ;;  %v6194_v15 = vmul.f32 %v3699_v52, %v1569_v31  ;;  %v6201_v57 = vadd.f32 %v5705_v39, %v9591_v26  ;;  %v9595_v12 = vld [vmem:[#allocation107_spill] sm:$0xff]  ;;  %v9597_v54 = vld [vmem:[#allocation118_spill] sm:$0xff] }
 0x20d   : > { %v6186_v43 = vadd.f32 %v9456_v27, %v9584_v34  ;;  %v1147_v18 = vpop.permute.xlu0 %1146  ;;  %v6203_v34 = vmul.f32 %v3202_v17, %v2850_v9  ;;  %v6213_v52 = vadd.f32 %v5725_v41, %v9597_v54  ;;  %v6215_v58 = vpop.eup %3704  ;;  %v3104_v45 = vmul.f32 %v6173_v5, %v5995_v19  ;;  %v9601_v9 = vld [vmem:[#allocation119_spill] sm:$0xff]  ;;  %v9604_v17 = vld [vmem:[#allocation128_spill] sm:$0xff] }
 0x20e   : > { %3669 = vset.pattern.permute.xlu1 %v9454_v53  ;;  %9587 = vst [vmem:[#allocation105_spill] sm:$0xff] %v6190_v33  ;;  %9588 = vst [vmem:[#allocation28_spill] sm:$0xff] %v6194_v15  ;;  %v6209_v33 = vadd.f32 %v5705_v39, %v9595_v12  ;;  %v6219_v26 = vmul.f32 %v3204_v13, %v2852_v25  ;;  %v6221_v31 = vmul.f32 %v3260_v21, %v2900_v40  ;;  %v9606_v54 = vld [vmem:[#allocation123_spill] sm:$0xff]  ;;  %v9608_v19 = vld [vmem:[#allocation12_spill] sm:$0xff] }
 0x20f   : > { %9585 = vst [vmem:[#allocation165_spill] sm:$0xff] %v6186_v43  ;;  %2116 = vperm.xlu1 %3669, %v9590_v8   ;;  %9592 = vst [vmem:[#allocation145_spill] sm:$0xff] %v6201_v57  ;;  %v6205_v43 = vmul.f32 %v3258_v55, %v2898_v63  ;;  %v6225_v55 = vadd.f32 %v5725_v41, %v9601_v9  ;;  %v6227_v63 = vpop.eup %3706  ;;  %v6231_v12 = vadd.f32 %v5733_v7, %v9604_v17  ;;  %v9610_v40 = vld [vmem:[#allocation85_spill] sm:$0xff]  ;;  %v9612_v21 = vld [vmem:[#allocation92_spill] sm:$0xff] }
 0x210   : > { %9593 = vst [vmem:[#allocation163_spill] sm:$0xff] %v6203_v34  ;;  %9596 = vst [vmem:[#allocation53_spill] sm:$0xff] %v6209_v33  ;;  %v6239_v25 = vadd.f32 %v9608_v19, %v5584_v10  ;;  %v6243_v13 = vadd.f32 %v9610_v40, %v5584_v10  ;;  %v6248_v9 = vadd.f32 %v9612_v21, %v5665_v4  ;;  %v9614_v17 = vld [vmem:[#allocation13_spill] sm:$0xff]  ;;  %v9618_v19 = vld [vmem:[#allocation143_spill] sm:$0xff]  ;;  %v6292_v33 = vpop.xlane.xlu1 %351 }
 0x211   : > { %9594 = vst [vmem:[#allocation131_spill] sm:$0xff] %v6205_v43  ;;  %9598 = vst [vmem:[#allocation54_spill] sm:$0xff] %v6213_v52  ;;  %v6235_v52 = vadd.f32 %v5733_v7, %v9606_v54  ;;  %v6252_v54 = vadd.f32 %v9614_v17, %v5665_v4  ;;  %v3107_v10 = vmul.f32 %v6215_v58, %v6042_v23  ;;  %v9620_v40 = vld [vmem:[#allocation110_spill] sm:$0xff]  ;;  %v9622_v21 = vld [vmem:[#allocation111_spill] sm:$0xff] }
 0x212   : > { %9599 = vst [vmem:[#allocation88_spill] sm:$0xff] %v6219_v26  ;;  %9600 = vst [vmem:[#allocation150_spill] sm:$0xff] %v6221_v31  ;;  %v6270_v4 = vadd.f32 %v9622_v21, %v5705_v39  ;;  %v9624_v17 = vld [vmem:[#allocation120_spill] sm:$0xff]  ;;  %v6280_v23 = vmul.f32 %v6227_v63, %v6051_v28  ;;  %v9628_v21 = vld [vmem:[#allocation43_spill] sm:$0xff] }
 0x213   : > { %9602 = vst [vmem:[#allocation156_spill] sm:$0xff] %v6225_v55  ;;  %9603 = vst [vmem:[#allocation157_spill] sm:$0xff] %v6227_v63  ;;  %2128 = vperm.xlu1 %3669, %v9571_v56   ;;  %v1159_v55 = vpop.permute.xlu0 %1158  ;;  %v6296_v31 = vld [vmem:[%s4319_s30 + $0x8] sm:$0xff] }
 0x214   : > { %9605 = vst [vmem:[#allocation48_spill] sm:$0xff] %v6231_v12  ;;  %9607 = vst [vmem:[#allocation34_spill] sm:$0xff] %v6235_v52  ;;  %v9616_v52 = vld [vmem:[#allocation142_spill] sm:$0xff]  ;;  %v3009_v28 = vmul.f32 %v6296_v31, %v1147_v18  ;;  %v9632_v26 = vld [vmem:[#allocation160_spill] sm:$0xff] }
 0x215   : > { %9609 = vst [vmem:[#allocation159_spill] sm:$0xff] %v6239_v25  ;;  %9611 = vst [vmem:[#allocation9_spill] sm:$0xff] %v6243_v13  ;;  %v6256_v12 = vadd.f32 %v9616_v52, %v9456_v27  ;;  %v6260_v25 = vadd.f32 %v9618_v19, %v9456_v27  ;;  %v6266_v13 = vadd.f32 %v9620_v40, %v5705_v39  ;;  %v9627_v27 = vld [vmem:[#allocation42_spill] sm:$0xff]  ;;  %v6283_v40 = vld [vmem:[%s4178_s29 + $0x10] sm:$0xff] }
 0x216   : > { %9613 = vst [vmem:[#allocation107_spill] sm:$0xff] %v6248_v9  ;;  %9615 = vst [vmem:[#allocation118_spill] sm:$0xff] %v6252_v54  ;;  %v6274_v52 = vadd.f32 %v9624_v17, %v5725_v41  ;;  %v1176_v19 = vmul.f32 %v1147_v18, %v9627_v27  ;;  %v6287_v9 = vld [vmem:[%s4178_s29 + $0x18] sm:$0xff]  ;;  %v1439_v17 = vmul.f32 %v1147_v18, %v9628_v21  ;;  %v9634_v34 = vld [vmem:[#allocation124_spill] sm:$0xff]  ;;  %v3115_v27 = vsub.f32 2.0, %v3107_v10 }
 0x217   : > { %9617 = vst [vmem:[#allocation119_spill] sm:$0xff] %v6256_v12  ;;  %9619 = vst [vmem:[#allocation128_spill] sm:$0xff] %v6260_v25  ;;  %v9626_v12 = vld [vmem:[#allocation41_spill] sm:$0xff]  ;;  %v3112_v25 = vsub.f32 2.0, %v3104_v45  ;;  %v1344_v39 = vmul.f32 %v6287_v9, %v1147_v18  ;;  %3670 = vset.pattern.permute.xlu1 %v9526_v44  ;;  %v6302_v43 = vadd.f32 %v9632_v26, %v5725_v41  ;;  %v6315_v44 = vpop.eup %3708 }
 0x218   : > { %9621 = vst [vmem:[#allocation123_spill] sm:$0xff] %v6266_v13  ;;  %9623 = vst [vmem:[#allocation12_spill] sm:$0xff] %v6270_v4  ;;  %v1175_v54 = vmul.f32 %v1147_v18, %v9626_v12  ;;  %v1343_v13 = vmul.f32 %v6283_v40, %v1147_v18  ;;  %v9630_v45 = vld [vmem:[#allocation45_spill] sm:$0xff]  ;;  %v6306_v6 = vadd.f32 %v9634_v34, %v5733_v7  ;;  %2340 = vperm.xlu1 %3670, %v9590_v8   ;;  %v9636_v12 = vld [vmem:[#allocation130_spill] sm:$0xff]  ;;  %v6325_v20 = vpop.eup %3710 }
 0x219   : > { %9625 = vst [vmem:[#allocation85_spill] sm:$0xff] %v6274_v52  ;;  %v9629_v52 = vld [vmem:[#allocation44_spill] sm:$0xff]  ;;  %v2961_v57 = vmul.f32 %v9630_v45, %v1147_v18  ;;  %9631 = vst [vmem:[#allocation92_spill] sm:$0xff] %v6296_v31  ;;  %v6311_v45 = vadd.f32 %v9636_v12, %v5733_v7  ;;  %v6321_v26 = vadd.f32 %v1176_v19, %v5935_v62  ;;  %v9638_v34 = vld [vmem:[#allocation47_spill] sm:$0xff]  ;;  %v6339_v62 = vpop.xlane.xlu1 %360 }
 0x21a   : > { %v1440_v4 = vmul.f32 %v1147_v18, %v9629_v52  ;;  %9633 = vst [vmem:[#allocation13_spill] sm:$0xff] %v6302_v43  ;;  %9635 = vst [vmem:[#allocation142_spill] sm:$0xff] %v6306_v6  ;;  %v6318_v41 = vadd.f32 %v1175_v54, %v5931_v50  ;;  %v3057_v6 = vmul.f32 %v9638_v34, %v1147_v18  ;;  %v9639_v43 = vld [vmem:[#allocation61_spill] sm:$0xff]  ;;  %v9644_v19 = vld [vmem:[#allocation62_spill] sm:$0xff] }
 0x21b   : > { %9637 = vst [vmem:[#allocation143_spill] sm:$0xff] %v6311_v45  ;;  %v1181_v10 = vmul.f32 %v1159_v55, %v9639_v43  ;;  %v6328_v7 = vadd.f32 %v1343_v13, %v5942_v16  ;;  %v6331_v12 = vadd.f32 %v1344_v39, %v5946_v61  ;;  %v6334_v53 = vadd.f32 %v1439_v17, %v5950_v2  ;;  %v9645_v13 = vld [vmem:[#allocation57_spill] sm:$0xff]  ;;  %v9646_v61 = vld [vmem:[#allocation58_spill] sm:$0xff] }
 0x21c   : > { %v6337_v50 = vadd.f32 %v1440_v4, %v5954_v0  ;;  %v6342_v18 = vadd.f32 %v2961_v57, %v5959_v22  ;;  %v6345_v54 = vadd.f32 %v3009_v28, %v5963_v42  ;;  %v1182_v16 = vmul.f32 %v1159_v55, %v9644_v19  ;;  %v9647_v45 = vld [vmem:[#allocation49_spill] sm:$0xff]  ;;  %v9648_v17 = vld [vmem:[#allocation50_spill] sm:$0xff]  ;;  %2352 = vperm.xlu1 %3670, %v9571_v56   ;;  %v9651_v57 = vld [vmem:[#allocation63_spill] sm:$0xff] }
 0x21d   : > { %9640 = vst [vmem:[#allocation110_spill] sm:$0xff] %v6334_v53  ;;  %v1349_v63 = vmul.f32 %v1159_v55, %v9645_v13  ;;  %v1350_v39 = vmul.f32 %v1159_v55, %v9646_v61  ;;  %v1445_v2 = vmul.f32 %v1159_v55, %v9647_v45  ;;  %v1446_v53 = vmul.f32 %v1159_v55, %v9648_v17 }
 0x21e   : > { %9641 = vst [vmem:[#allocation111_spill] sm:$0xff] %v6337_v50  ;;  %9642 = vst [vmem:[#allocation120_spill] sm:$0xff] %v6342_v18  ;;  %v6354_v0 = vmul.f32 %v6173_v5, %v3112_v25  ;;  %v6357_v22 = vadd.f32 %v3057_v6, %v5967_v14  ;;  %v6360_v42 = vadd.f32 %v1181_v10, %v5970_v47  ;;  %v9653_v14 = vld [vmem:[#allocation60_spill] sm:$0xff]  ;;  %2060 = vperm.xlu0 %3667, %v9590_v8  }
 0x21f   : > { %9643 = vst [vmem:[#allocation43_spill] sm:$0xff] %v6345_v54  ;;  %v2964_v4 = vmul.f32 %v9651_v57, %v1159_v55  ;;  %v6364_v54 = vpop.xlane.xlu1 %366  ;;  %v6367_v18 = vmul.f32 %v6215_v58, %v3115_v27  ;;  %v3012_v6 = vmul.f32 %v9653_v14, %v1159_v55  ;;  %v3117_v10 = vsub.f32 2.0, %v6280_v23  ;;  %v9657_v23 = vld [vmem:[#allocation95_spill] sm:$0xff]  ;;  %v9677_v14 = vld [vmem:[#allocation18_spill] sm:$0xff] }
 0x220   : > { %9649 = vst [vmem:[#allocation44_spill] sm:$0xff] %v6357_v22  ;;  %9650 = vst [vmem:[#allocation160_spill] sm:$0xff] %v6360_v42  ;;  %v9654_v22 = vld [vmem:[#allocation51_spill] sm:$0xff]  ;;  %v6378_v28 = vmul.f32 %v6315_v44, %v6129_v51  ;;  %3671 = vset.pattern.permute.xlu1 %v9547_v32  ;;  %v3200_v58 = vrot.slane %v6354_v0, 2  ;;  %v6384_v27 = vmul.f32 %v6325_v20, %v6137_v49  ;;  %v3256_v51 = vrot.slane %v6354_v0, 1 }
 0x221   : > { %9652 = vst [vmem:[#allocation124_spill] sm:$0xff] %v6364_v54  ;;  %v3060_v47 = vmul.f32 %v9654_v22, %v1159_v55  ;;  %v6388_v25 = vmul.f32 %v6194_v15, %v6153_v59  ;;  %v6392_v55 = vmul.f32 %v6196_v24, %v6157_v60  ;;  %2380 = vperm.xlu1 %3671, %v9590_v8   ;;  %v9658_v5 = vrot.slane %v6194_v15, 1  ;;  %v9660_v57 = vld [vmem:[#allocation87_spill] sm:$0xff] }
 0x222   : > { %v9661_v49 = vrot.slane %v6196_v24, 1  ;;  %v9663_v59 = vrot.slane %v6194_v15, 2  ;;  %v3203_v8 = vrot.slane %v6367_v18, 2  ;;  %v9666_v0 = vrot.slane %v6196_v24, 2  ;;  %3676 = vset.pattern.permute.xlu0 %v9547_v32 }
 0x223   : > { %9655 = vst [vmem:[#allocation130_spill] sm:$0xff] %v6388_v25  ;;  %9656 = vst [vmem:[#allocation61_spill] sm:$0xff] %v6392_v55  ;;  %v6399_v50 = vmul.f32 %v9658_v5, %v9657_v23  ;;  %v6411_v60 = vpop.permute.xlu1 %1142  ;;  %v9668_v5 = vrot.slane %v6194_v15, 3  ;;  %2396 = vperm.xlu0 %3676, %v9455_v3   ;;  %v9682_v3 = vld [vmem:[#allocation176_spill] sm:$0xff]  ;;  %v9760_v15 = vld [vmem:[#allocation30_spill] sm:$0xff] }
 0x224   : > { %v6404_v42 = vmul.f32 %v9661_v49, %v9660_v57  ;;  %v6409_v25 = vmul.f32 %v9663_v59, %v6161_v38  ;;  %9665 = vst [vmem:[#allocation49_spill] sm:$0xff] %v6411_v60  ;;  %v6417_v55 = vmul.f32 %v9666_v0, %v6168_v37  ;;  %v9670_v57 = vrot.slane %v6196_v24, 3  ;;  %v9676_v24 = vld [vmem:[#allocation17_spill] sm:$0xff] }
 0x225   : > { %9659 = vst [vmem:[#allocation62_spill] sm:$0xff] %v6399_v50  ;;  %v6422_v23 = vmul.f32 %v9668_v5, %v6178_v29  ;;  %v1173_v38 = vmul.f32 %v6283_v40, %v6411_v60  ;;  %v1174_v59 = vmul.f32 %v6287_v9, %v6411_v60  ;;  %v1341_v37 = vmul.f32 %v6411_v60, %v9628_v21  ;;  %v9672_v29 = vld [vmem:[#allocation52_spill] sm:$0xff] }
 0x226   : > { %9662 = vst [vmem:[#allocation57_spill] sm:$0xff] %v6404_v42  ;;  %9664 = vst [vmem:[#allocation58_spill] sm:$0xff] %v6409_v25  ;;  %v6427_v49 = vmul.f32 %v9670_v57, %v6182_v46  ;;  %v1342_v0 = vmul.f32 %v6411_v60, %v9629_v52  ;;  %v1437_v5 = vmul.f32 %v6411_v60, %v9672_v29  ;;  %v9675_v42 = vld [vmem:[#allocation171_spill] sm:$0xff]  ;;  %2392 = vperm.xlu1 %3671, %v9571_v56  }
 0x227   : > { %9667 = vst [vmem:[#allocation50_spill] sm:$0xff] %v6417_v55  ;;  %9669 = vst [vmem:[#allocation95_spill] sm:$0xff] %v6422_v23  ;;  %v9673_v23 = vld [vmem:[#allocation55_spill] sm:$0xff]  ;;  %v2960_v57 = vmul.f32 %v6296_v31, %v6411_v60  ;;  %v9674_v55 = vld [vmem:[#allocation170_spill] sm:$0xff]  ;;  %v6451_v50 = vadd.f32 %v1174_v59, %v9675_v42  ;;  %v6454_v32 = vadd.f32 %v1341_v37, %v9676_v24  ;;  %v6472_v59 = vpop.permute.xlu1 %1150 }
 0x228   : > { %9671 = vst [vmem:[#allocation87_spill] sm:$0xff] %v6427_v49  ;;  %v1438_v46 = vmul.f32 %v6411_v60, %v9673_v23  ;;  %v3008_v49 = vmul.f32 %v9638_v34, %v6411_v60  ;;  %v6448_v25 = vadd.f32 %v1173_v38, %v9674_v55  ;;  %v6457_v22 = vadd.f32 %v1342_v0, %v9677_v14  ;;  %v9678_v31 = vld [vmem:[#allocation38_spill] sm:$0xff]  ;;  %v9680_v34 = vld [vmem:[#allocation39_spill] sm:$0xff]  ;;  %v9684_v38 = vld [vmem:[#allocation65_spill] sm:$0xff] }
 0x229   : > { %v6461_v54 = vadd.f32 %v1437_v5, %v9678_v31  ;;  %v6467_v55 = vadd.f32 %v2960_v57, %v9682_v3  ;;  %v6475_v24 = vadd.f32 %v1182_v16, %v5973_v1  ;;  %v6478_v56 = vadd.f32 %v1349_v63, %v5976_v11  ;;  %v9686_v0 = vld [vmem:[#allocation181_spill] sm:$0xff]  ;;  %v9689_v11 = vld [vmem:[#allocation182_spill] sm:$0xff] }
 0x22a   : > { %v6464_v60 = vadd.f32 %v1438_v46, %v9680_v34  ;;  %v6470_v42 = vadd.f32 %v3008_v49, %v9684_v38  ;;  %v388_v31 = vrot.slane %v6292_v33, %v9546_v48  ;;  %v3259_v34 = vrot.slane %v6367_v18, 1  ;;  %v9691_v33 = vld [vmem:[#allocation94_spill] sm:$0xff] }
 0x22b   : > { %9679 = vst [vmem:[#allocation52_spill] sm:$0xff] %v6461_v54  ;;  %9683 = vst [vmem:[#allocation170_spill] sm:$0xff] %v6467_v55  ;;  %v6484_v14 = vadd.f32 %v1350_v39, %v5979_v36  ;;  %v6487_v49 = vadd.f32 %v1445_v2, %v5982_v30  ;;  %v6490_v37 = vadd.f32 %v1446_v53, %v5985_v35  ;;  %v9688_v16 = vmov 1   ;;  %v9693_v30 = vld [vmem:[#allocation157_spill] sm:$0xff]  ;;  %v6506_v35 = vld [vmem:[%s4171_s9 + $0x8] sm:$0xff]  ;;  %v6509_v2 = vpop.permute.xlu1 %1154 }
 0x22c   : > { %9681 = vst [vmem:[#allocation55_spill] sm:$0xff] %v6464_v60  ;;  %9685 = vst [vmem:[#allocation171_spill] sm:$0xff] %v6470_v42  ;;  %v6493_v1 = vadd.f32 %v2964_v4, %v9686_v0  ;;  %3679 = vset.pattern.permute.xlu0 %v9688_v16  ;;  %v6497_v63 = vadd.f32 %v3012_v6, %v9689_v11  ;;  %v6500_v18 = vadd.f32 %v3060_v47, %v9691_v33  ;;  %v8939_v36 = vmov 6   ;;  %v9695_v4 = vld [vmem:[#allocation93_spill] sm:$0xff]  ;;  %v9697_v6 = vld [vmem:[#allocation86_spill] sm:$0xff] }
 0x22d   : > { %3672 = vset.pattern.permute.xlu1 %v8939_v36  ;;  %v3125_v39 = vmul.f32 %v9693_v30, %v3117_v10  ;;  %v3118_v53 = vsub.f32 2.0, %v6378_v28  ;;  %9694 = vst [vmem:[#allocation39_spill] sm:$0xff] %v6506_v35  ;;  %v6512_v5 = vmul.f32 %v3200_v58, %v9695_v4  ;;  %v6515_v46 = vmul.f32 %v3256_v51, %v9697_v6  ;;  %v9699_v47 = vld [vmem:[#allocation89_spill] sm:$0xff]  ;;  %v9701_v10 = vld [vmem:[#allocation180_spill] sm:$0xff]  ;;  %v9704_v11 = vld [vmem:[#allocation19_spill] sm:$0xff] }
 0x22e   : > { %9687 = vst [vmem:[#allocation17_spill] sm:$0xff] %v6493_v1  ;;  %9690 = vst [vmem:[#allocation18_spill] sm:$0xff] %v6497_v63  ;;  %2432 = vperm.xlu1 %3672, %v6506_v35   ;;  %v6518_v57 = vmul.f32 %v3203_v8, %v9699_v47  ;;  %v3119_v3 = vsub.f32 2.0, %v6384_v27  ;;  %v9702_v28 = vrot.slane %v9701_v10, %v9546_v48  ;;  %v6526_v0 = vld [vmem:[%s4171_s9 + $0x28] sm:$0xff]  ;;  %v9706_v33 = vld [vmem:[#allocation41_spill] sm:$0xff]  ;;  %v9720_v63 = vmov 0  }
 0x22f   : > { %9692 = vst [vmem:[#allocation38_spill] sm:$0xff] %v6500_v18  ;;  %9696 = vst [vmem:[#allocation176_spill] sm:$0xff] %v6512_v5  ;;  %2136 = vperm.xlu0 %3679, %v6526_v0   ;;  %v1179_v58 = vmul.f32 %v6509_v2, %v9645_v13  ;;  %v1180_v51 = vmul.f32 %v6509_v2, %v9646_v61  ;;  %v6534_v8 = vmul.f32 %v3259_v34, %v9704_v11  ;;  %v9707_v4 = vld [vmem:[#allocation42_spill] sm:$0xff]  ;;  %v9708_v47 = vld [vmem:[#allocation129_spill] sm:$0xff] }
 0x230   : > { %9698 = vst [vmem:[#allocation65_spill] sm:$0xff] %v6515_v46  ;;  %9700 = vst [vmem:[#allocation181_spill] sm:$0xff] %v6518_v57  ;;  %v414_v38 = vsel %vm413_vm1, %v388_v31, %v9702_v28  ;;  %v1347_v27 = vmul.f32 %v6509_v2, %v9647_v45  ;;  %v1348_v31 = vmul.f32 %v6509_v2, %v9648_v17  ;;  %v9710_v28 = vld [vmem:[#allocation32_spill] sm:$0xff]  ;;  %v3205_v34 = vrot.slane %v3125_v39, 2  ;;  %v9712_v57 = vld [vmem:[#allocation33_spill] sm:$0xff] }
 0x231   : > { %9703 = vst [vmem:[#allocation182_spill] sm:$0xff] %v6526_v0  ;;  %9705 = vst [vmem:[#allocation94_spill] sm:$0xff] %v6534_v8  ;;  %v1443_v30 = vmul.f32 %v6509_v2, %v9706_v33  ;;  %v1444_v6 = vmul.f32 %v6509_v2, %v9707_v4  ;;  %v6545_v10 = vadd.f32 %v1179_v58, %v9708_v47  ;;  %v3261_v11 = vrot.slane %v3125_v39, 1  ;;  %v9714_v8 = vld [vmem:[#allocation97_spill] sm:$0xff]  ;;  %v9716_v5 = vld [vmem:[#allocation134_spill] sm:$0xff]  ;;  %v6563_v58 = vpop.permute.xlu1 %1162 }
 0x232   : > { %v6548_v36 = vadd.f32 %v1180_v51, %v9710_v28  ;;  %v6551_v35 = vadd.f32 %v1347_v27, %v9712_v57  ;;  %v6554_v46 = vadd.f32 %v1348_v31, %v9714_v8  ;;  %v9718_v42 = vld [vmem:[#allocation137_spill] sm:$0xff]  ;;  %3673 = vset.pattern.permute.xlu1 %v9720_v63  ;;  %v9721_v51 = vld [vmem:[#allocation190_spill] sm:$0xff]  ;;  %v6571_v27 = vld [vmem:[%s4171_s9 + $0x20] sm:$0xff]  ;;  %v1352_v28 = vmul.f32 %v6563_v58, %v9644_v19 }
 0x233   : > { %9709 = vst [vmem:[#allocation157_spill] sm:$0xff] %v6545_v10  ;;  %v6557_v18 = vadd.f32 %v1443_v30, %v9716_v5  ;;  %v6560_v55 = vadd.f32 %v1444_v6, %v9718_v42  ;;  %v9722_v47 = vrot.slane %v9721_v51, %v9546_v48  ;;  %v9723_v57 = vld [vmem:[#allocation158_spill] sm:$0xff]  ;;  %9724 = vst [vmem:[#allocation41_spill] sm:$0xff] %v6571_v27  ;;  %2076 = vperm.xlu1 %3673, %v6571_v27   ;;  %v9726_v30 = vld [vmem:[#allocation83_spill] sm:$0xff] }
 0x234   : > { %9711 = vst [vmem:[#allocation93_spill] sm:$0xff] %v6548_v36  ;;  %9713 = vst [vmem:[#allocation86_spill] sm:$0xff] %v6551_v35  ;;  %2140 = vperm.xlu0 %3679, %v9723_v57   ;;  %v6575_v5 = vmul.f32 %v6315_v44, %v3118_v53  ;;  %v6578_v42 = vmul.f32 %v6325_v20, %v3119_v3  ;;  %v9725_v8 = vld [vmem:[#allocation82_spill] sm:$0xff]  ;;  %v1184_v6 = vmul.f32 %v6563_v58, %v9726_v30  ;;  %v9727_v20 = vld [vmem:[#allocation112_spill] sm:$0xff] }
 0x235   : > { %9715 = vst [vmem:[#allocation89_spill] sm:$0xff] %v6554_v46  ;;  %9717 = vst [vmem:[#allocation180_spill] sm:$0xff] %v6557_v18  ;;  %v416_v39 = vsel %vm8994_vm2, %v9722_v47, %v414_v38  ;;  %v1183_v31 = vmul.f32 %v6563_v58, %v9725_v8  ;;  %v1351_v38 = vmul.f32 %v6563_v58, %v9639_v43  ;;  %v9729_v3 = vld [vmem:[#allocation113_spill] sm:$0xff]  ;;  %v9735_v46 = vld [vmem:[#allocation151_spill] sm:$0xff] }
 0x236   : > { %9719 = vst [vmem:[#allocation19_spill] sm:$0xff] %v6560_v55  ;;  %v400_v51 = vrot.slane %v6339_v62, %v9546_v48  ;;  %v1447_v44 = vmul.f32 %v6563_v58, %v9645_v13  ;;  %v6593_v53 = vmul.f32 %v3205_v34, %v9727_v20  ;;  %v6596_v47 = vmul.f32 %v3261_v11, %v9729_v3  ;;  %v9731_v57 = vld [vmem:[#allocation109_spill] sm:$0xff]  ;;  %v9733_v55 = vld [vmem:[#allocation115_spill] sm:$0xff]  ;;  %v9737_v62 = vld [vmem:[#allocation152_spill] sm:$0xff]  ;;  %v6610_v13 = vpop.permute.xlu1 %1170 }
 0x237   : > { %v6599_v1 = vadd.f32 %v1183_v31, %v9731_v57  ;;  %v6602_v18 = vadd.f32 %v1184_v6, %v9733_v55  ;;  %v6605_v35 = vadd.f32 %v1351_v38, %v9735_v46  ;;  %v6608_v36 = vadd.f32 %v1352_v28, %v9737_v62  ;;  %v9739_v34 = vld [vmem:[#allocation199_spill] sm:$0xff]  ;;  %v9741_v3 = vld [vmem:[#allocation25_spill] sm:$0xff]  ;;  %3674 = vset.pattern.permute.xlu1 %v9688_v16  ;;  %v9744_v57 = vld [vmem:[#allocation26_spill] sm:$0xff] }
 0x238   : > { %9728 = vst [vmem:[#allocation42_spill] sm:$0xff] %v6593_v53  ;;  %9730 = vst [vmem:[#allocation129_spill] sm:$0xff] %v6596_v47  ;;  %v9740_v20 = vrot.slane %v9739_v34, %v9546_v48  ;;  %v1448_v31 = vmul.f32 %v6563_v58, %v9646_v61  ;;  %v6619_v55 = vadd.f32 %v1447_v44, %v9741_v3  ;;  %v9743_v6 = vmov 4   ;;  %v6637_v34 = vld [vmem:[%s4171_s9 + $0x38] sm:$0xff]  ;;  %v9751_v47 = vld [vmem:[#allocation16_spill] sm:$0xff]  ;;  %2132 = vperm.xlu1 %3674, %v6571_v27  }
 0x239   : > { %9732 = vst [vmem:[#allocation32_spill] sm:$0xff] %v6599_v1  ;;  %9734 = vst [vmem:[#allocation33_spill] sm:$0xff] %v6602_v18  ;;  %3688 = vset.pattern.permute.xlu0 %v9743_v6  ;;  %v1187_v38 = vmul.f32 %v6610_v13, %v9628_v21  ;;  %v1188_v28 = vmul.f32 %v6610_v13, %v9629_v52  ;;  %v3207_v61 = vrot.slane %v6578_v42, 2  ;;  %v9747_v52 = vld [vmem:[#allocation104_spill] sm:$0xff]  ;;  %v9749_v46 = vld [vmem:[#allocation14_spill] sm:$0xff] }
 0x23a   : > { %9736 = vst [vmem:[#allocation97_spill] sm:$0xff] %v6605_v35  ;;  %9738 = vst [vmem:[#allocation134_spill] sm:$0xff] %v6608_v36  ;;  %v418_v11 = vsel %vm8993_vm3, %v9740_v20, %v416_v39  ;;  %v1355_v39 = vmul.f32 %v6610_v13, %v9672_v29  ;;  %v6632_v44 = vadd.f32 %v1448_v31, %v9744_v57  ;;  %2368 = vperm.xlu0 %3688, %v6637_v34   ;;  %v9758_v57 = vld [vmem:[#allocation29_spill] sm:$0xff]  ;;  %v9778_v35 = vld [vmem:[#allocation111_spill] sm:$0xff] }
 0x23b   : > { %9742 = vst [vmem:[#allocation137_spill] sm:$0xff] %v6619_v55  ;;  %v1356_v62 = vmul.f32 %v6610_v13, %v9673_v23  ;;  %9746 = vst [vmem:[#allocation158_spill] sm:$0xff] %v6637_v34  ;;  %v6643_v3 = vadd.f32 %v1187_v38, %v9747_v52  ;;  %v6646_v16 = vadd.f32 %v1188_v28, %v9749_v46  ;;  %v9753_v34 = vld [vmem:[#allocation35_spill] sm:$0xff]  ;;  %v6663_v28 = vpop.permute.xlu1 %1210  ;;  %v9756_v52 = vld [vmem:[#allocation106_spill] sm:$0xff] }
 0x23c   : > { %9745 = vst [vmem:[#allocation190_spill] sm:$0xff] %v6632_v44  ;;  %v6649_v31 = vadd.f32 %v1355_v39, %v9751_v47  ;;  %v6654_v53 = vsel %vm8992_vm4, %v400_v51, %v418_v11  ;;  %v1451_v38 = vmul.f32 %v6610_v13, %v9725_v8  ;;  %v1452_v46 = vmul.f32 %v6610_v13, %v9726_v30  ;;  %v9757_v11 = vld [vmem:[#allocation108_spill] sm:$0xff]  ;;  %v9776_v55 = vld [vmem:[#allocation110_spill] sm:$0xff]  ;;  %v9784_v60 = vld [vmem:[#allocation187_spill] sm:$0xff] }
 0x23d   : > { %9748 = vst [vmem:[#allocation82_spill] sm:$0xff] %v6643_v3  ;;  %9750 = vst [vmem:[#allocation83_spill] sm:$0xff] %v6646_v16  ;;  %v6657_v21 = vadd.f32 %v1356_v62, %v9753_v34  ;;  %v1177_v47 = vmul.f32 %v6472_v59, %v9647_v45  ;;  %v1178_v39 = vmul.f32 %v6472_v59, %v9648_v17  ;;  %v9762_v45 = vld [vmem:[#allocation116_spill] sm:$0xff]  ;;  %v9763_v17 = vmov 6   ;;  %3675 = vset.pattern.permute.xlu1 %v9743_v6  ;;  %v9783_v1 = vld [vmem:[#allocation186_spill] sm:$0xff] }
 0x23e   : > { %9752 = vst [vmem:[#allocation112_spill] sm:$0xff] %v6649_v31  ;;  %9755 = vst [vmem:[#allocation109_spill] sm:$0xff] %v6663_v28  ;;  %v1239_v51 = vmul.f32 %v6663_v28, %v9756_v52  ;;  %v1240_v62 = vmul.f32 %v6663_v28, %v9757_v11  ;;  %v1345_v34 = vmul.f32 %v6472_v59, %v9706_v33  ;;  %3689 = vset.pattern.permute.xlu0 %v9763_v17 }
 0x23f   : > { %9754 = vst [vmem:[#allocation113_spill] sm:$0xff] %v6657_v21  ;;  %v6676_v20 = vadd.f32 %v1451_v38, %v9758_v57  ;;  %v6679_v21 = vadd.f32 %v1452_v46, %v9760_v15  ;;  %v1375_v31 = vmul.f32 %v9762_v45, %v6663_v28  ;;  %v1346_v16 = vmul.f32 %v6472_v59, %v9707_v4  ;;  %v9766_v15 = vld [vmem:[#allocation148_spill] sm:$0xff]  ;;  %v9768_v46 = vld [vmem:[#allocation77_spill] sm:$0xff] }
 0x240   : > { %v1441_v3 = vmul.f32 %v6283_v40, %v6472_v59  ;;  %v6689_v44 = vadd.f32 %v1239_v51, %v6318_v41  ;;  %v6692_v33 = vadd.f32 %v1240_v62, %v6321_v26  ;;  %v1376_v57 = vmul.f32 %v9766_v15, %v6663_v28  ;;  %v6708_v41 = vpop.permute.xlu1 %1214  ;;  %v9772_v26 = vld [vmem:[#allocation183_spill] sm:$0xff]  ;;  %v9773_v62 = vld [vmem:[#allocation184_spill] sm:$0xff]  ;;  %2356 = vperm.xlu1 %3675, %v6571_v27  }
 0x241   : > { %9759 = vst [vmem:[#allocation115_spill] sm:$0xff] %v6676_v20  ;;  %9761 = vst [vmem:[#allocation151_spill] sm:$0xff] %v6679_v21  ;;  %v6698_v38 = vadd.f32 %v1375_v31, %v6328_v7  ;;  %v1471_v4 = vmul.f32 %v6663_v28, %v9768_v46  ;;  %v9769_v21 = vld [vmem:[#allocation78_spill] sm:$0xff]  ;;  %v6705_v20 = vld [vmem:[%s4171_s9] sm:$0xff]  ;;  %v1193_v51 = vadd.f32 %v1177_v47, %v9772_v26  ;;  %v6728_v26 = vpop.xlane.xlu0 %369 }
 0x242   : > { %9764 = vst [vmem:[#allocation152_spill] sm:$0xff] %v6689_v44  ;;  %9765 = vst [vmem:[#allocation199_spill] sm:$0xff] %v6692_v33  ;;  %v1472_v40 = vmul.f32 %v6663_v28, %v9769_v21  ;;  %2428 = vperm.xlu0 %3689, %v6705_v20   ;;  %v1194_v33 = vadd.f32 %v1178_v39, %v9773_v62  ;;  %v1442_v7 = vmul.f32 %v6287_v9, %v6472_v59  ;;  %v9774_v31 = vld [vmem:[#allocation74_spill] sm:$0xff]  ;;  %v9780_v47 = vld [vmem:[#allocation75_spill] sm:$0xff] }
 0x243   : > { %9767 = vst [vmem:[#allocation25_spill] sm:$0xff] %v6698_v38  ;;  %9770 = vst [vmem:[#allocation26_spill] sm:$0xff] %v6705_v20  ;;  %v1241_v38 = vmul.f32 %v6708_v41, %v9774_v31  ;;  %v6718_v44 = vadd.f32 %v1376_v57, %v6331_v12  ;;  %v6721_v36 = vadd.f32 %v1471_v4, %v9776_v55  ;;  %v9782_v9 = vld [vmem:[#allocation185_spill] sm:$0xff]  ;;  %v9789_v4 = vld [vmem:[#allocation144_spill] sm:$0xff] }
 0x244   : > { %9771 = vst [vmem:[#allocation104_spill] sm:$0xff] %v6708_v41  ;;  %v6724_v18 = vadd.f32 %v1472_v40, %v9778_v35  ;;  %v1242_v39 = vmul.f32 %v6708_v41, %v9780_v47  ;;  %9781 = vst [vmem:[#allocation29_spill] sm:$0xff] %v6728_v26  ;;  %v1361_v62 = vadd.f32 %v1345_v34, %v9782_v9  ;;  %v6744_v34 = vpop.permute.xlu1 %1222  ;;  %3677 = vset.pattern.permute.xlu1 %v9763_v17  ;;  %v9800_v17 = vld [vmem:[#allocation67_spill] sm:$0xff] }
 0x245   : > { %9775 = vst [vmem:[#allocation14_spill] sm:$0xff] %v6718_v44  ;;  %9777 = vst [vmem:[#allocation16_spill] sm:$0xff] %v6721_v36  ;;  %v1362_v10 = vadd.f32 %v1346_v16, %v9783_v1  ;;  %v1457_v28 = vadd.f32 %v1441_v3, %v9784_v60  ;;  %v6733_v54 = vadd.f32 %v1241_v38, %v1193_v51  ;;  %v9785_v1 = vld [vmem:[#allocation188_spill] sm:$0xff]  ;;  %v9786_v3 = vld [vmem:[#allocation153_spill] sm:$0xff] }
 0x246   : > { %9779 = vst [vmem:[#allocation35_spill] sm:$0xff] %v6724_v18  ;;  %v6735_v12 = vadd.f32 %v1242_v39, %v1194_v33  ;;  %v1377_v35 = vmul.f32 %v6708_v41, %v9756_v52  ;;  %v1378_v55 = vmul.f32 %v6708_v41, %v9757_v11  ;;  %v1473_v57 = vmul.f32 %v9762_v45, %v6708_v41  ;;  %v9791_v45 = vld [vmem:[#allocation124_spill] sm:$0xff]  ;;  %v6791_v18 = vld [vmem:[%s4171_s9 + $0x30] sm:$0xff] }
 0x247   : > { %2444 = vperm.xlu0 %3689, %v6571_v27   ;;  %v1458_v60 = vadd.f32 %v1442_v7, %v9785_v1  ;;  %v1474_v16 = vmul.f32 %v9766_v15, %v6708_v41  ;;  %v9787_v33 = vrot.slane %v6575_v5, 2  ;;  %v6756_v40 = vmul.f32 %v3207_v61, %v9789_v4  ;;  %v6767_v15 = vld [vmem:[%s4171_s9 + $0x10] sm:$0xff]  ;;  %v9795_v61 = vld [vmem:[#allocation51_spill] sm:$0xff]  ;;  %v6786_v27 = vpop.xlane.xlu0 %550  ;;  %9802 = vst [vmem:[#allocation78_spill] sm:$0xff] %v6791_v18  ;;  %v9804_v36 = vld [vmem:[#allocation60_spill] sm:$0xff] }
 0x248   : > { %v408_v51 = vrot.slane %v9791_v45, %v9546_v48  ;;  %v6760_v39 = vadd.f32 %v1377_v35, %v1361_v62  ;;  %v6762_v7 = vadd.f32 %v1378_v55, %v1362_v10  ;;  %v6764_v9 = vadd.f32 %v1473_v57, %v1457_v28  ;;  %9792 = vst [vmem:[#allocation148_spill] sm:$0xff] %v6767_v15  ;;  %v9793_v1 = vld [vmem:[#allocation49_spill] sm:$0xff]  ;;  %v9797_v62 = vld [vmem:[#allocation68_spill] sm:$0xff]  ;;  %v9799_v55 = vld [vmem:[#allocation66_spill] sm:$0xff] }
 0x249   : > { %v6753_v38 = vmul.f32 %v9787_v33, %v9786_v3  ;;  %9790 = vst [vmem:[#allocation116_spill] sm:$0xff] %v6756_v40  ;;  %2436 = vperm.xlu1 %3677, %v6767_v15   ;;  %v9794_v3 = vld [vmem:[#allocation56_spill] sm:$0xff]  ;;  %v2962_v4 = vmul.f32 %v9795_v61, %v6472_v59  ;;  %v6776_v40 = vadd.f32 %v1474_v16, %v1458_v60  ;;  %v9798_v28 = vld [vmem:[#allocation69_spill] sm:$0xff]  ;;  %9801 = vst [vmem:[#allocation77_spill] sm:$0xff] %v6786_v27  ;;  %v6788_v15 = vpop.permute.xlu1 %1230 }
 0x24a   : > { %v3056_v33 = vmul.f32 %v9794_v3, %v9793_v1  ;;  %v1245_v10 = vmul.f32 %v6744_v34, %v9797_v62  ;;  %v1246_v35 = vmul.f32 %v6744_v34, %v9798_v28  ;;  %v1381_v57 = vmul.f32 %v6744_v34, %v9799_v55  ;;  %v9803_v60 = vld [vmem:[#allocation92_spill] sm:$0xff] }
 0x24b   : > { %9788 = vst [vmem:[#allocation30_spill] sm:$0xff] %v6753_v38  ;;  %v9796_v38 = vld [vmem:[#allocation45_spill] sm:$0xff]  ;;  %v1382_v1 = vmul.f32 %v6744_v34, %v9800_v17  ;;  %2452 = vperm.xlu0 %3689, %v6791_v18   ;;  %v3058_v16 = vmul.f32 %v9803_v60, %v6472_v59  ;;  %v2963_v44 = vmul.f32 %v9804_v36, %v6509_v2  ;;  %v9805_v52 = vld [vmem:[#allocation160_spill] sm:$0xff] }
 0x24c   : > { %v3010_v45 = vmul.f32 %v9796_v38, %v6472_v59  ;;  %v1477_v26 = vmul.f32 %v6744_v34, %v9774_v31  ;;  %v1478_v11 = vmul.f32 %v6744_v34, %v9780_v47  ;;  %v6803_v27 = vadd.f32 %v1245_v10, %v9805_v52  ;;  %v9812_v52 = vld [vmem:[#allocation154_spill] sm:$0xff] }
 0x24d   : > { %v6806_v41 = vadd.f32 %v1246_v35, %v6475_v24  ;;  %v6809_v18 = vadd.f32 %v1381_v57, %v6478_v56  ;;  %v6812_v59 = vadd.f32 %v1382_v1, %v6484_v14  ;;  %3678 = vset.pattern.permute.xlu1 %v9720_v63  ;;  %v9813_v24 = vrot.slane %v9812_v52, %v9546_v48  ;;  %v9814_v10 = vld [vmem:[#allocation162_spill] sm:$0xff]  ;;  %v9817_v57 = vld [vmem:[#allocation133_spill] sm:$0xff]  ;;  %v9821_v63 = vld [vmem:[#allocation64_spill] sm:$0xff] }
 0x24e   : > { %9806 = vst [vmem:[#allocation183_spill] sm:$0xff] %v6803_v27  ;;  %v6816_v60 = vadd.f32 %v1477_v26, %v6487_v49  ;;  %v6819_v31 = vadd.f32 %v1478_v11, %v6490_v37  ;;  %2080 = vperm.xlu1 %3678, %v6526_v0   ;;  %v9815_v14 = vrot.slane %v6575_v5, 1  ;;  %v6833_v1 = vadd.f32 %v3056_v33, %v9817_v57  ;;  %v9818_v49 = vld [vmem:[#allocation189_spill] sm:$0xff]  ;;  %v6838_v37 = vpop.permute.xlu0 %1166  ;;  %v1271_v57 = vpop.permute.xlu1 %1270 }
 0x24f   : > { %9807 = vst [vmem:[#allocation184_spill] sm:$0xff] %v6806_v41  ;;  %9808 = vst [vmem:[#allocation110_spill] sm:$0xff] %v6809_v18  ;;  %v422_v56 = vsel %vm8991_vm5, %v9813_v24, %v6654_v53  ;;  %v6836_v26 = vadd.f32 %v2962_v4, %v9818_v49  ;;  %v9822_v52 = vrot.slane %v6578_v42, 1  ;;  %v9824_v24 = vld [vmem:[#allocation191_spill] sm:$0xff]  ;;  %v3011_v33 = vmul.f32 %v9795_v61, %v6509_v2  ;;  %v9829_v42 = vld [vmem:[#allocation84_spill] sm:$0xff] }
 0x250   : > { %9809 = vst [vmem:[#allocation111_spill] sm:$0xff] %v6812_v59  ;;  %9810 = vst [vmem:[#allocation75_spill] sm:$0xff] %v6816_v60  ;;  %v6830_v35 = vmul.f32 %v9815_v14, %v9814_v10  ;;  %v6841_v11 = vsel %vm8990_vm6, %v408_v51, %v422_v56  ;;  %v6849_v5 = vadd.f32 %v3010_v45, %v9824_v24  ;;  %v9825_v10 = vld [vmem:[#allocation192_spill] sm:$0xff]  ;;  %v9830_v49 = vld [vmem:[#allocation63_spill] sm:$0xff] }
 0x251   : > { %9811 = vst [vmem:[#allocation185_spill] sm:$0xff] %v6819_v31  ;;  %9819 = vst [vmem:[#allocation187_spill] sm:$0xff] %v6838_v37  ;;  %v6846_v53 = vmul.f32 %v9822_v52, %v9821_v63  ;;  %v6852_v14 = vadd.f32 %v3058_v16, %v9825_v10  ;;  %v3059_v4 = vmul.f32 %v9796_v38, %v6509_v2  ;;  %v9827_v51 = vld [vmem:[#allocation132_spill] sm:$0xff]  ;;  %v9831_v16 = vld [vmem:[#allocation73_spill] sm:$0xff] }
 0x252   : > { %9816 = vst [vmem:[#allocation186_spill] sm:$0xff] %v6830_v35  ;;  %9820 = vst [vmem:[#allocation188_spill] sm:$0xff] %v6841_v11  ;;  %v6859_v56 = vadd.f32 %v2963_v44, %v9827_v51  ;;  %v2965_v63 = vmul.f32 %v9829_v42, %v6563_v58  ;;  %v3013_v45 = vmul.f32 %v9830_v49, %v6563_v58  ;;  %v9832_v10 = vld [vmem:[#allocation76_spill] sm:$0xff]  ;;  %3680 = vset.pattern.permute.xlu1 %v9743_v6  ;;  %v9834_v11 = vld [vmem:[#allocation103_spill] sm:$0xff]  ;;  %v1277_v60 = vpop.permute.xlu1 %1276 }
 0x253   : > { %9823 = vst [vmem:[#allocation153_spill] sm:$0xff] %v6846_v53  ;;  %9826 = vst [vmem:[#allocation144_spill] sm:$0xff] %v6852_v14  ;;  %v1249_v24 = vmul.f32 %v6788_v15, %v9831_v16  ;;  %v1250_v35 = vmul.f32 %v6788_v15, %v9832_v10  ;;  %v9833_v53 = vld [vmem:[#allocation102_spill] sm:$0xff]  ;;  %v1185_v44 = vmul.f32 %v6838_v37, %v9672_v29  ;;  %2360 = vperm.xlu1 %3680, %v6526_v0   ;;  %v9900_v48 = vld [vmem:[#allocation33_spill] sm:$0xff] }
 0x254   : > { %9828 = vst [vmem:[#allocation124_spill] sm:$0xff] %v6859_v56  ;;  %v1385_v2 = vmul.f32 %v6788_v15, %v9833_v53  ;;  %v1186_v51 = vmul.f32 %v6838_v37, %v9673_v23  ;;  %v1353_v52 = vmul.f32 %v6838_v37, %v9725_v8  ;;  %v1354_v20 = vmul.f32 %v6838_v37, %v9726_v30  ;;  %v9835_v31 = vld [vmem:[#allocation46_spill] sm:$0xff]  ;;  %v9838_v30 = vld [vmem:[#allocation193_spill] sm:$0xff]  ;;  %v9840_v56 = vld [vmem:[#allocation139_spill] sm:$0xff] }
 0x255   : > { %v1449_v61 = vmul.f32 %v6838_v37, %v9639_v43  ;;  %v1386_v6 = vmul.f32 %v6788_v15, %v9834_v11  ;;  %v1481_v29 = vmul.f32 %v6788_v15, %v9797_v62  ;;  %v1201_v0 = vadd.f32 %v1185_v44, %v9835_v31  ;;  %v9836_v59 = vld [vmem:[#allocation114_spill] sm:$0xff]  ;;  %v9842_v44 = vld [vmem:[#allocation195_spill] sm:$0xff] }
 0x256   : > { %v1450_v23 = vmul.f32 %v6838_v37, %v9644_v19  ;;  %v1202_v8 = vadd.f32 %v1186_v51, %v9836_v59  ;;  %v9837_v18 = vld [vmem:[#allocation122_spill] sm:$0xff]  ;;  %v1370_v27 = vadd.f32 %v1354_v20, %v9838_v30  ;;  %v6896_v49 = vadd.f32 %v3011_v33, %v9840_v56  ;;  %v6903_v37 = vpop.permute.xlu0 %1206 }
 0x257   : > { %v1369_v41 = vadd.f32 %v1353_v52, %v9837_v18  ;;  %v9839_v38 = vld [vmem:[#allocation194_spill] sm:$0xff]  ;;  %v1482_v14 = vmul.f32 %v6788_v15, %v9798_v28  ;;  %v6900_v31 = vadd.f32 %v1249_v24, %v1201_v0  ;;  %v3061_v24 = vmul.f32 %v9804_v36, %v6563_v58 }
 0x258   : > { %v1465_v43 = vadd.f32 %v1449_v61, %v9839_v38  ;;  %v1466_v19 = vadd.f32 %v1450_v23, %v9842_v44  ;;  %v6905_v59 = vadd.f32 %v1250_v35, %v1202_v8  ;;  %v6909_v20 = vadd.f32 %v1386_v6, %v1370_v27  ;;  %v9848_v33 = vld [vmem:[#allocation138_spill] sm:$0xff]  ;;  %v1280_v35 = vpop.permute.xlu1 %1279  ;;  %v3825_v6 = vld [vmem:[%s4178_s29 + $0x20] sm:$0xff]  ;;  %v3826_v23 = vld [vmem:[%s4178_s29 + $0x28] sm:$0xff] }
 0x259   : > { %9841 = vst [vmem:[#allocation49_spill] sm:$0xff] %v6900_v31  ;;  %v6907_v18 = vadd.f32 %v1385_v2, %v1369_v41  ;;  %v9847_v61 = vmov 5   ;;  %v6915_v56 = vadd.f32 %v3059_v4, %v9848_v33  ;;  %v9849_v0 = vld [vmem:[#allocation22_spill] sm:$0xff]  ;;  %v9851_v41 = vld [vmem:[#allocation23_spill] sm:$0xff]  ;;  %v6927_v27 = vrot.slane %v1277_v60, 4 }
 0x25a   : > { %9843 = vst [vmem:[#allocation68_spill] sm:$0xff] %v6905_v59  ;;  %9845 = vst [vmem:[#allocation66_spill] sm:$0xff] %v6909_v20  ;;  %v6911_v38 = vadd.f32 %v1481_v29, %v1465_v43  ;;  %3681 = vset.pattern.permute.xlu1 %v9847_v61  ;;  %v6918_v52 = vadd.f32 %v2965_v63, %v9849_v0  ;;  %v6922_v51 = vadd.f32 %v1482_v14, %v1466_v19  ;;  %v9857_v44 = vld [vmem:[#allocation15_spill] sm:$0xff]  ;;  %v9861_v20 = vld [vmem:[#allocation101_spill] sm:$0xff] }
 0x25b   : > { %9844 = vst [vmem:[#allocation69_spill] sm:$0xff] %v6907_v18  ;;  %v6925_v2 = vadd.f32 %v3013_v45, %v9851_v41  ;;  %v1237_v29 = vmul.f32 %v3825_v6, %v6903_v37  ;;  %v1238_v4 = vmul.f32 %v3826_v23, %v6903_v37  ;;  %v1373_v63 = vmul.f32 %v6903_v37, %v9768_v46  ;;  %v9858_v33 = vld [vmem:[#allocation47_spill] sm:$0xff]  ;;  %v9880_v59 = vld [vmem:[#allocation93_spill] sm:$0xff]  ;;  %v9881_v31 = vld [vmem:[#allocation74_spill] sm:$0xff] }
 0x25c   : > { %9846 = vst [vmem:[#allocation67_spill] sm:$0xff] %v6911_v38  ;;  %9850 = vst [vmem:[#allocation160_spill] sm:$0xff] %v6922_v51  ;;  %v1374_v58 = vmul.f32 %v6903_v37, %v9769_v21  ;;  %v1469_v14 = vmul.f32 %v6903_v37, %v9831_v16  ;;  %v1470_v45 = vmul.f32 %v6903_v37, %v9832_v10  ;;  %v6976_v41 = vrot.slane %v1271_v57, 4 }
 0x25d   : > { %9852 = vst [vmem:[#allocation154_spill] sm:$0xff] %v6925_v2  ;;  %v6943_v60 = vadd.f32 %v6927_v27, %v6733_v54  ;;  %v6947_v8 = vadd.f32 %v6927_v27, %v6735_v12  ;;  %v6951_v30 = vadd.f32 %v6760_v39, %v6927_v27  ;;  %v6955_v43 = vadd.f32 %v6762_v7, %v6927_v27  ;;  %v6970_v39 = vpop.permute.xlu1 %1285  ;;  %v9903_v2 = vld [vmem:[#allocation17_spill] sm:$0xff] }
 0x25e   : > { %v6958_v19 = vadd.f32 %v3061_v24, %v9857_v44  ;;  %v2967_v54 = vmul.f32 %v9858_v33, %v6610_v13  ;;  %v6964_v0 = vadd.f32 %v6764_v9, %v6927_v27  ;;  %v6968_v12 = vadd.f32 %v6776_v40, %v6927_v27  ;;  %v9859_v40 = vld [vmem:[#allocation52_spill] sm:$0xff] }
 0x25f   : > { %9853 = vst [vmem:[#allocation162_spill] sm:$0xff] %v6943_v60  ;;  %9854 = vst [vmem:[#allocation133_spill] sm:$0xff] %v6947_v8  ;;  %v3015_v7 = vmul.f32 %v9794_v3, %v6610_v13  ;;  %v3063_v24 = vmul.f32 %v9829_v42, %v6610_v13  ;;  %v1253_v6 = vadd.f32 %v1237_v29, %v6448_v25  ;;  %v6986_v8 = vld [vmem:[%s4319_s30 + $0x10] sm:$0xff]  ;;  %v9864_v25 = vld [vmem:[#allocation55_spill] sm:$0xff] }
 0x260   : > { %9855 = vst [vmem:[#allocation189_spill] sm:$0xff] %v6951_v30  ;;  %9856 = vst [vmem:[#allocation64_spill] sm:$0xff] %v6955_v43  ;;  %v1254_v23 = vadd.f32 %v1238_v4, %v6451_v50  ;;  %v1389_v9 = vadd.f32 %v1373_v63, %v6454_v32  ;;  %v1390_v44 = vadd.f32 %v1374_v58, %v6457_v22  ;;  %v9860_v30 = vld [vmem:[#allocation109_spill] sm:$0xff]  ;;  %v6994_v50 = vpop.permute.xlu0 %1218 }
 0x261   : > { %v1485_v43 = vadd.f32 %v1469_v14, %v9859_v40  ;;  %v2977_v18 = vmul.f32 %v9861_v20, %v9860_v30  ;;  %9862 = vst [vmem:[#allocation191_spill] sm:$0xff] %v6986_v8  ;;  %v3025_v13 = vmul.f32 %v6986_v8, %v9860_v30  ;;  %v6991_v57 = vadd.f32 %v6976_v41, %v1253_v6  ;;  %v7008_v58 = vpop.permute.xlu1 %1291  ;;  %v9868_v14 = vld [vmem:[#allocation177_spill] sm:$0xff] }
 0x262   : > { %v1486_v29 = vadd.f32 %v1470_v45, %v9864_v25  ;;  %v6997_v32 = vadd.f32 %v6976_v41, %v1254_v23  ;;  %v7000_v22 = vadd.f32 %v1389_v9, %v6976_v41  ;;  %v7003_v4 = vadd.f32 %v1390_v44, %v6976_v41  ;;  %v9870_v45 = vld [vmem:[#allocation178_spill] sm:$0xff]  ;;  %v9872_v9 = vld [vmem:[#allocation80_spill] sm:$0xff] }
 0x263   : > { %9863 = vst [vmem:[#allocation192_spill] sm:$0xff] %v6991_v57  ;;  %v7006_v63 = vadd.f32 %v1485_v43, %v6976_v41  ;;  %v7011_v6 = vadd.f32 %v2967_v54, %v9868_v14  ;;  %v7014_v40 = vadd.f32 %v3015_v7, %v9870_v45  ;;  %v3072_v25 = vmul.f32 %v9872_v9, %v6903_v37  ;;  %v9874_v43 = vld [vmem:[#allocation81_spill] sm:$0xff]  ;;  %v9875_v7 = vld [vmem:[#allocation120_spill] sm:$0xff] }
 0x264   : > { %9865 = vst [vmem:[#allocation132_spill] sm:$0xff] %v6997_v32  ;;  %9866 = vst [vmem:[#allocation73_spill] sm:$0xff] %v7000_v22  ;;  %v7017_v23 = vadd.f32 %v1486_v29, %v6976_v41  ;;  %v9873_v22 = vld [vmem:[#allocation179_spill] sm:$0xff]  ;;  %v1243_v60 = vmul.f32 %v6994_v50, %v9799_v55  ;;  %v1244_v54 = vmul.f32 %v6994_v50, %v9800_v17  ;;  %v7037_v57 = vrot.slane %v1280_v35, 4  ;;  %v9885_v35 = vld [vmem:[#allocation108_spill] sm:$0xff]  ;;  %v7069_v51 = vpop.permute.xlu0 %1226 }
 0x265   : > { %9867 = vst [vmem:[#allocation76_spill] sm:$0xff] %v7003_v4  ;;  %9869 = vst [vmem:[#allocation102_spill] sm:$0xff] %v7011_v6  ;;  %v7022_v44 = vadd.f32 %v3063_v24, %v9873_v22  ;;  %v3073_v4 = vmul.f32 %v9874_v43, %v9860_v30  ;;  %v7031_v14 = vadd.f32 %v2977_v18, %v9875_v7  ;;  %v9877_v29 = vld [vmem:[#allocation43_spill] sm:$0xff]  ;;  %v9879_v24 = vld [vmem:[#allocation157_spill] sm:$0xff] }
 0x266   : > { %9871 = vst [vmem:[#allocation103_spill] sm:$0xff] %v7014_v40  ;;  %v7034_v45 = vadd.f32 %v3025_v13, %v9877_v29  ;;  %v3080_v32 = vadd.f32 %v3072_v25, %v6833_v1  ;;  %v1259_v22 = vadd.f32 %v1243_v60, %v9879_v24  ;;  %v1260_v30 = vadd.f32 %v1244_v54, %v9880_v59  ;;  %v9882_v40 = vld [vmem:[#allocation104_spill] sm:$0xff]  ;;  %v9883_v18 = vld [vmem:[#allocation70_spill] sm:$0xff]  ;;  %v7054_v25 = vpop.permute.xlu1 %2064  ;;  %v9889_v24 = vld [vmem:[#allocation89_spill] sm:$0xff] }
 0x267   : > { %9876 = vst [vmem:[#allocation46_spill] sm:$0xff] %v7031_v14  ;;  %v1379_v61 = vmul.f32 %v6994_v50, %v9881_v31  ;;  %v1380_v36 = vmul.f32 %v6994_v50, %v9780_v47  ;;  %v2978_v7 = vmul.f32 %v9883_v18, %v9882_v40  ;;  %v9884_v29 = vld [vmem:[#allocation106_spill] sm:$0xff]  ;;  %v1476_v60 = vmul.f32 %v6994_v50, %v9885_v35  ;;  %v9891_v35 = vld [vmem:[#allocation19_spill] sm:$0xff] }
 0x268   : > { %9878 = vst [vmem:[#allocation114_spill] sm:$0xff] %v7034_v45  ;;  %v7048_v13 = vadd.f32 %v3080_v32, %v6976_v41  ;;  %v1475_v1 = vmul.f32 %v6994_v50, %v9884_v29  ;;  %v7057_v59 = vadd.f32 %v7037_v57, %v1259_v22  ;;  %v7060_v31 = vadd.f32 %v7037_v57, %v1260_v30  ;;  %v9888_v47 = vld [vmem:[#allocation86_spill] sm:$0xff]  ;;  %v9890_v29 = vld [vmem:[#allocation180_spill] sm:$0xff] }
 0x269   : > { %v1395_v54 = vadd.f32 %v1379_v61, %v9888_v47  ;;  %v1396_v45 = vadd.f32 %v1380_v36, %v9889_v24  ;;  %v3026_v32 = vmul.f32 %v9861_v20, %v9882_v40  ;;  %v1492_v6 = vadd.f32 %v1476_v60, %v9891_v35  ;;  %v9892_v22 = vld [vmem:[#allocation44_spill] sm:$0xff] }
 0x26a   : > { %9886 = vst [vmem:[#allocation122_spill] sm:$0xff] %v7057_v59  ;;  %9887 = vst [vmem:[#allocation193_spill] sm:$0xff] %v7060_v31  ;;  %3712 = vrcp.f32 %v7048_v13  ;;  %v1491_v14 = vadd.f32 %v1475_v1, %v9890_v29  ;;  %v7072_v59 = vadd.f32 %v3073_v4, %v9892_v22  ;;  %v3075_v36 = vmul.f32 %v9861_v20, %v6994_v50  ;;  %v7099_v22 = vpop.permute.xlu1 %2120  ;;  %v9899_v31 = vld [vmem:[#allocation32_spill] sm:$0xff] }
 0x26b   : > { %v7075_v30 = vadd.f32 %v1395_v54, %v7037_v57  ;;  %v7078_v61 = vadd.f32 %v1396_v45, %v7037_v57  ;;  %v3074_v47 = vmul.f32 %v6986_v8, %v9882_v40  ;;  %v7090_v4 = vadd.f32 %v1492_v6, %v7037_v57  ;;  %v9896_v54 = vld [vmem:[#allocation72_spill] sm:$0xff]  ;;  %9897 = vst [vmem:[#allocation195_spill] sm:$0xff] %v7099_v22  ;;  %v9898_v6 = vld [vmem:[#allocation71_spill] sm:$0xff] }
 0x26c   : > { %v7087_v24 = vadd.f32 %v1491_v14, %v7037_v57  ;;  %v2980_v29 = vmul.f32 %v9896_v54, %v6744_v34  ;;  %v3083_v45 = vadd.f32 %v3075_v36, %v6915_v56  ;;  %v1247_v35 = vmul.f32 %v7069_v51, %v9833_v53 }
 0x26d   : > { %9893 = vst [vmem:[#allocation194_spill] sm:$0xff] %v7075_v30  ;;  %9894 = vst [vmem:[#allocation139_spill] sm:$0xff] %v7078_v61  ;;  %v1248_v40 = vmul.f32 %v7069_v51, %v9834_v11  ;;  %v7102_v60 = vadd.f32 %v2978_v7, %v6836_v26  ;;  %v7105_v14 = vadd.f32 %v3026_v32, %v6849_v5  ;;  %v7115_v30 = vrot.slane %v6970_v39, 4  ;;  %v9901_v7 = vld [vmem:[#allocation144_spill] sm:$0xff]  ;;  %v9902_v32 = vld [vmem:[#allocation97_spill] sm:$0xff] }
 0x26e   : > { %v3028_v61 = vmul.f32 %v9898_v6, %v6744_v34  ;;  %v1383_v56 = vmul.f32 %v7069_v51, %v9797_v62  ;;  %v7112_v36 = vadd.f32 %v3083_v45, %v7037_v57  ;;  %v1263_v20 = vadd.f32 %v1247_v35, %v9899_v31 }
 0x26f   : > { %v1264_v26 = vadd.f32 %v1248_v40, %v9900_v48  ;;  %v3082_v1 = vadd.f32 %v3074_v47, %v9901_v7  ;;  %v1384_v5 = vmul.f32 %v7069_v51, %v9798_v28  ;;  %v1479_v62 = vmul.f32 %v7069_v51, %v9799_v55  ;;  %v9907_v47 = vld [vmem:[#allocation18_spill] sm:$0xff]  ;;  %v9911_v55 = vld [vmem:[#allocation137_spill] sm:$0xff] }
 0x270   : > { %v1399_v38 = vadd.f32 %v1383_v56, %v9902_v32  ;;  %v7126_v45 = vadd.f32 %v2980_v29, %v9903_v2  ;;  %v7129_v39 = vadd.f32 %v7115_v30, %v1263_v20  ;;  %v1480_v48 = vmul.f32 %v7069_v51, %v9800_v17  ;;  %v9909_v28 = vld [vmem:[#allocation134_spill] sm:$0xff]  ;;  %v7144_v29 = vpop.permute.xlu1 %2344 }
 0x271   : > { %v7132_v31 = vadd.f32 %v7115_v30, %v1264_v26  ;;  %v7137_v35 = vadd.f32 %v3028_v61, %v9907_v47  ;;  %v1400_v40 = vadd.f32 %v1384_v5, %v9909_v28  ;;  %v1495_v2 = vadd.f32 %v1479_v62, %v9911_v55  ;;  %9912 = vst [vmem:[#allocation109_spill] sm:$0xff] %v7144_v29  ;;  %v9913_v26 = vld [vmem:[#allocation190_spill] sm:$0xff]  ;;  %v7152_v61 = vpop.permute.xlu0 %1234  ;;  %v9915_v47 = vld [vmem:[#allocation187_spill] sm:$0xff]  ;;  %v9921_v29 = vld [vmem:[#allocation112_spill] sm:$0xff] }
 0x272   : > { %9904 = vst [vmem:[#allocation138_spill] sm:$0xff] %v7126_v45  ;;  %9905 = vst [vmem:[#allocation22_spill] sm:$0xff] %v7129_v39  ;;  %v7141_v56 = vadd.f32 %v1399_v38, %v7115_v30  ;;  %v2976_v20 = vmul.f32 %v6986_v8, %v6903_v37  ;;  %3714 = vrcp.f32 %v7112_v36  ;;  %v1496_v7 = vadd.f32 %v1480_v48, %v9913_v26  ;;  %v9916_v26 = vld [vmem:[#allocation63_spill] sm:$0xff] }
 0x273   : > { %9906 = vst [vmem:[#allocation23_spill] sm:$0xff] %v7132_v31  ;;  %9908 = vst [vmem:[#allocation15_spill] sm:$0xff] %v7137_v35  ;;  %v3077_v17 = vmul.f32 %v9898_v6, %v7069_v51  ;;  %v3076_v38 = vmul.f32 %v9883_v18, %v6744_v34  ;;  %v2982_v5 = vmul.f32 %v9872_v9, %v6788_v15  ;;  %v7187_v8 = vrot.slane %v7008_v58, 4  ;;  %v9919_v35 = vld [vmem:[#allocation83_spill] sm:$0xff] }
 0x274   : > { %9910 = vst [vmem:[#allocation52_spill] sm:$0xff] %v7141_v56  ;;  %v7159_v32 = vadd.f32 %v1400_v40, %v7115_v30  ;;  %v7162_v62 = vadd.f32 %v1495_v2, %v7115_v30  ;;  %v2966_v48 = vmul.f32 %v9794_v3, %v9915_v47  ;;  %v3014_v28 = vmul.f32 %v9829_v42, %v9915_v47 }
 0x275   : > { %v3024_v55 = vmul.f32 %v9874_v43, %v6903_v37  ;;  %v7171_v34 = vadd.f32 %v1496_v7, %v7115_v30  ;;  %v3062_v56 = vmul.f32 %v9916_v26, %v9915_v47  ;;  %v1251_v40 = vmul.f32 %v7152_v61, %v9768_v46  ;;  %v9917_v37 = vld [vmem:[#allocation170_spill] sm:$0xff]  ;;  %v7189_v47 = vpop.permute.xlu1 %2384 }
 0x276   : > { %9914 = vst [vmem:[#allocation55_spill] sm:$0xff] %v7159_v32  ;;  %v1252_v2 = vmul.f32 %v7152_v61, %v9769_v21  ;;  %v1387_v32 = vmul.f32 %v7152_v61, %v9831_v16  ;;  %v7182_v39 = vadd.f32 %v3082_v1, %v6927_v27  ;;  %v2984_v42 = vadd.f32 %v2976_v20, %v9917_v37  ;;  %v9918_v26 = vld [vmem:[#allocation82_spill] sm:$0xff]  ;;  %v9920_v1 = vld [vmem:[#allocation171_spill] sm:$0xff] }
 0x277   : > { %v3713_v31 = vpop.eup %3712  ;;  %v3085_v7 = vadd.f32 %v3077_v17, %v6958_v19  ;;  %v1267_v21 = vadd.f32 %v1251_v40, %v9918_v26  ;;  %v1388_v16 = vmul.f32 %v7152_v61, %v9832_v10  ;;  %v3032_v3 = vadd.f32 %v3024_v55, %v9920_v1  ;;  %v9925_v10 = vld [vmem:[#allocation196_spill] sm:$0xff]  ;;  %v9929_v1 = vld [vmem:[#allocation197_spill] sm:$0xff] }
 0x278   : > { %v3136_v46 = vmul.f32 %v3713_v31, %v7048_v13  ;;  %v1268_v45 = vadd.f32 %v1252_v2, %v9919_v35  ;;  %v1403_v20 = vadd.f32 %v1387_v32, %v9921_v29  ;;  %v1483_v19 = vmul.f32 %v7152_v61, %v9833_v53  ;;  %v9924_v35 = vld [vmem:[#allocation113_spill] sm:$0xff]  ;;  %v9927_v29 = vld [vmem:[#allocation115_spill] sm:$0xff] }
 0x279   : > { %v1484_v58 = vmul.f32 %v7152_v61, %v9834_v11  ;;  %v7203_v13 = vadd.f32 %v7187_v8, %v1267_v21  ;;  %v1404_v40 = vadd.f32 %v1388_v16, %v9924_v35  ;;  %v2974_v2 = vadd.f32 %v2966_v48, %v9925_v10  ;;  %v9928_v53 = vld [vmem:[#allocation151_spill] sm:$0xff]  ;;  %v9931_v16 = vld [vmem:[#allocation198_spill] sm:$0xff] }
 0x27a   : > { %v3144_v17 = vsub.f32 2.0, %v3136_v46  ;;  %v7206_v26 = vadd.f32 %v7187_v8, %v1268_v45  ;;  %v7211_v55 = vadd.f32 %v1403_v20, %v7187_v8  ;;  %v1499_v32 = vadd.f32 %v1483_v19, %v9927_v29 }
 0x27b   : > { %9922 = vst [vmem:[#allocation177_spill] sm:$0xff] %v7203_v13  ;;  %v1500_v37 = vadd.f32 %v1484_v58, %v9928_v53  ;;  %v3022_v11 = vadd.f32 %v3014_v28, %v9929_v1  ;;  %v7217_v21 = vadd.f32 %v3085_v7, %v7115_v30  ;;  %v7220_v45 = vadd.f32 %v1404_v40, %v7187_v8  ;;  %v9933_v40 = vld [vmem:[#allocation79_spill] sm:$0xff] }
 0x27c   : > { %9923 = vst [vmem:[#allocation178_spill] sm:$0xff] %v7206_v26  ;;  %9926 = vst [vmem:[#allocation179_spill] sm:$0xff] %v7211_v55  ;;  %v3152_v46 = vmul.f32 %v3713_v31, %v3144_v17  ;;  %v7222_v26 = vpop.permute.xlu1 %2068  ;;  %v3070_v48 = vadd.f32 %v3062_v56, %v9931_v16  ;;  %3716 = vrcp.f32 %v7182_v39  ;;  %v7227_v20 = vadd.f32 %v1499_v32, %v7187_v8  ;;  %v9932_v17 = vld [vmem:[#allocation38_spill] sm:$0xff]  ;;  %v1274_v32 = vpop.permute.xlu0 %1273 }
 0x27d   : > { %9930 = vst [vmem:[#allocation120_spill] sm:$0xff] %v7220_v45  ;;  %v7230_v19 = vadd.f32 %v1500_v37, %v7187_v8  ;;  %v2992_v31 = vadd.f32 %v2984_v42, %v6976_v41  ;;  %v3040_v28 = vadd.f32 %v3032_v3, %v6976_v41  ;;  %v7235_v35 = vadd.f32 %v3076_v38, %v9932_v17  ;;  %v9951_v45 = vld [vmem:[#allocation35_spill] sm:$0xff] }
 0x27e   : > { %v3168_v7 = vrot.slane %v3152_v46, 2  ;;  %v3232_v58 = vrot.slane %v3152_v46, 1  ;;  %v3030_v56 = vmul.f32 %v9933_v40, %v6788_v15  ;;  %v3078_v10 = vmul.f32 %v9896_v54, %v6788_v15  ;;  %v9937_v46 = vld [vmem:[#allocation176_spill] sm:$0xff] }
 0x27f   : > { %v7241_v29 = vadd.f32 %v2982_v5, %v2974_v2  ;;  %v3715_v53 = vpop.eup %3714  ;;  %v2979_v3 = vmul.f32 %v9898_v6, %v6994_v50  ;;  %3718 = vrcp.f32 %v7217_v21  ;;  %v7252_v38 = vadd.f32 %v7102_v60, %v6927_v27 }
 0x280   : > { %v3184_v37 = vmul.f32 %v3168_v7, %v2992_v31  ;;  %v3248_v1 = vmul.f32 %v3232_v58, %v3040_v28  ;;  %v7246_v42 = vadd.f32 %v3030_v56, %v3022_v11  ;;  %v7248_v41 = vadd.f32 %v3078_v10, %v3070_v48  ;;  %v7258_v5 = vpop.permute.xlu1 %2124  ;;  %v9938_v31 = vld [vmem:[#allocation65_spill] sm:$0xff]  ;;  %v9939_v58 = vld [vmem:[#allocation124_spill] sm:$0xff]  ;;  %v9942_v10 = vld [vmem:[#allocation199_spill] sm:$0xff] }
 0x281   : > { %v7256_v15 = vadd.f32 %v7105_v14, %v6927_v27  ;;  %9936 = vst [vmem:[#allocation93_spill] sm:$0xff] %v7258_v5  ;;  %v1589_v2 = vrot.slane %v7006_v63, 2  ;;  %v7263_v11 = vrot.slane %v1274_v32, 4  ;;  %v1603_v48 = vrot.slane %v7017_v23, 2  ;;  %v9940_v63 = vld [vmem:[#allocation152_spill] sm:$0xff]  ;;  %v9944_v23 = vld [vmem:[#allocation25_spill] sm:$0xff] }
 0x282   : > { %9934 = vst [vmem:[#allocation43_spill] sm:$0xff] %v7246_v42  ;;  %v3224_v16 = vsub.f32 %v3184_v37, %v9937_v46  ;;  %v3280_v28 = vsub.f32 %v3248_v1, %v9938_v31  ;;  %v3027_v60 = vmul.f32 %v9883_v18, %v6994_v50  ;;  %v3139_v7 = vmul.f32 %v3715_v53, %v7112_v36  ;;  %v9946_v36 = vld [vmem:[#allocation14_spill] sm:$0xff]  ;;  %v9948_v1 = vld [vmem:[#allocation45_spill] sm:$0xff]  ;;  %v9949_v46 = vld [vmem:[#allocation92_spill] sm:$0xff] }
 0x283   : > { %9935 = vst [vmem:[#allocation157_spill] sm:$0xff] %v7256_v15  ;;  %v3079_v27 = vmul.f32 %v9933_v40, %v7152_v61  ;;  %v2987_v17 = vadd.f32 %v2979_v3, %v9939_v58  ;;  %v7274_v56 = vadd.f32 %v7263_v11, %v9940_v63  ;;  %v7278_v32 = vadd.f32 %v7263_v11, %v9942_v10  ;;  %v9950_v63 = vld [vmem:[#allocation16_spill] sm:$0xff]  ;;  %v9953_v42 = vld [vmem:[#allocation21_spill] sm:$0xff] }
 0x284   : > { %v3296_v14 = vmul.f32 %v3280_v28, %v3280_v28  ;;  %v7282_v50 = vadd.f32 %v9944_v23, %v7263_v11  ;;  %v7286_v37 = vadd.f32 %v9946_v36, %v7263_v11  ;;  %v2164_v3 = vmul.f32 %v9948_v1, %v7099_v22  ;;  %v1283_v23 = vpop.permute.xlu0 %1282 }
 0x285   : > { %9941 = vst [vmem:[#allocation74_spill] sm:$0xff] %v7274_v56  ;;  %9943 = vst [vmem:[#allocation104_spill] sm:$0xff] %v7278_v32  ;;  %v2252_v31 = vmul.f32 %v9949_v46, %v7099_v22  ;;  %v3288_v28 = vmul.f32 %v3224_v16, %v3224_v16  ;;  %v1503_v10 = vadd.f32 %v9950_v63, %v7263_v11  ;;  %v3147_v13 = vsub.f32 2.0, %v3139_v7  ;;  %v7302_v56 = vld [vmem:[%s4319_s30] sm:$0xff] }
 0x286   : > { %9945 = vst [vmem:[#allocation106_spill] sm:$0xff] %v7282_v50  ;;  %9947 = vst [vmem:[#allocation108_spill] sm:$0xff] %v7286_v37  ;;  %v3312_v58 = vrot.slane %v3296_v14, 1  ;;  %v1504_v55 = vadd.f32 %v9951_v45, %v7263_v11  ;;  %v7296_v50 = vpop.permute.xlu1 %2348  ;;  %v3087_v36 = vadd.f32 %v3079_v27, %v7022_v44  ;;  %v9952_v37 = vld [vmem:[#allocation20_spill] sm:$0xff]  ;;  %v2244_v16 = vmul.f32 %v7302_v56, %v7054_v25 }
 0x287   : > { %v2108_v32 = vmul.f32 %v9952_v37, %v7054_v25  ;;  %v1590_v46 = vrot.slane %v1503_v10, 1  ;;  %v2300_v45 = vmul.f32 %v9858_v33, %v7099_v22  ;;  %v1593_v18 = vrot.slane %v7087_v24, 7 }
 0x288   : > { %v7306_v14 = vadd.f32 %v3312_v58, %v3288_v28  ;;  %v1604_v63 = vrot.slane %v1504_v55, 1  ;;  %v1607_v7 = vrot.slane %v7090_v4, 7  ;;  %v3035_v44 = vadd.f32 %v3027_v60, %v6896_v49 }
 0x289   : > { %v2172_v27 = vadd.f32 %v2164_v3, %v2108_v32  ;;  %v7313_v6 = vpop.eup %3716  ;;  %v2292_v15 = vmul.f32 %v9953_v42, %v7054_v25  ;;  %v1591_v28 = vsel %vm413_vm1, %v1590_v46, %v1589_v2  ;;  %v2260_v55 = vadd.f32 %v2252_v31, %v2244_v16  ;;  %v9954_v2 = vld [vmem:[#allocation11_spill] sm:$0xff]  ;;  %v9957_v16 = vld [vmem:[#allocation146_spill] sm:$0xff] }
 0x28a   : > { %v1605_v58 = vsel %vm413_vm1, %v1604_v63, %v1603_v48  ;;  %v7320_v10 = vadd.f32 %v2987_v17, %v7037_v57  ;;  %v7322_v22 = vmul.f32 %v3715_v53, %v3147_v13  ;;  %v7325_v24 = vadd.f32 %v3087_v36, %v7187_v8  ;;  %v7329_v4 = vpop.permute.xlu1 %2388  ;;  %v9955_v48 = vld [vmem:[#allocation59_spill] sm:$0xff]  ;;  %v1289_v13 = vpop.permute.xlu0 %1288 }
 0x28b   : > { %v1592_v49 = vsel %vm8994_vm2, %v6964_v0, %v1591_v28  ;;  %v1606_v60 = vsel %vm8994_vm2, %v6968_v12, %v1605_v58  ;;  %v7334_v32 = vadd.f32 %v9954_v2, %v2172_v27  ;;  %v7337_v3 = vadd.f32 %v9955_v48, %v2260_v55  ;;  %v9959_v27 = vld [vmem:[#allocation183_spill] sm:$0xff] }
 0x28c   : > { %v2308_v17 = vadd.f32 %v2300_v45, %v2292_v15  ;;  %v3719_v53 = vpop.eup %3718  ;;  %v7341_v31 = vmul.f32 %v7313_v6, %v7182_v39  ;;  %v3043_v0 = vadd.f32 %v3035_v44, %v7037_v57  ;;  %v2981_v36 = vmul.f32 %v9933_v40, %v7069_v51  ;;  %v9968_v2 = vld [vmem:[#allocation75_spill] sm:$0xff] }
 0x28d   : > { %9956 = vst [vmem:[#allocation86_spill] sm:$0xff] %v7337_v3  ;;  %v3029_v12 = vmul.f32 %v9896_v54, %v7069_v51  ;;  %v1594_v63 = vsel %vm8993_vm3, %v1593_v18, %v1592_v49  ;;  %v1608_v15 = vsel %vm8993_vm3, %v1607_v7, %v1606_v60  ;;  %v7353_v45 = vrot.slane %v1283_v23, 4  ;;  %v9961_v18 = vld [vmem:[#allocation184_spill] sm:$0xff]  ;;  %v9963_v7 = vld [vmem:[#allocation110_spill] sm:$0xff] }
 0x28e   : > { %v7349_v46 = vadd.f32 %v9957_v16, %v2308_v17  ;;  %v3235_v39 = vrot.slane %v7322_v22, 1  ;;  %3720 = vrcp.f32 %v7325_v24  ;;  %v7359_v57 = vadd.f32 %v7072_v59, %v7263_v11  ;;  %v7376_v55 = vpop.permute.xlu1 %2072  ;;  %v7523_v3 = vld [vmem:[%s4171_s9 + $0x18] sm:$0xff] }
 0x28f   : > { %v7361_v44 = vrot.slane %v1289_v13, 4  ;;  %v3141_v51 = vmul.f32 %v3719_v53, %v7217_v21  ;;  %v7366_v28 = vadd.f32 %v7353_v45, %v9959_v27  ;;  %v7370_v23 = vadd.f32 %v7353_v45, %v9961_v18  ;;  %9965 = vst [vmem:[#allocation32_spill] sm:$0xff] %v7376_v55  ;;  %v9966_v21 = vld [vmem:[#allocation111_spill] sm:$0xff]  ;;  %v9969_v13 = vld [vmem:[#allocation154_spill] sm:$0xff]  ;;  %v9970_v27 = vld [vmem:[#allocation185_spill] sm:$0xff] }
 0x290   : > { %9958 = vst [vmem:[#allocation89_spill] sm:$0xff] %v7349_v46  ;;  %v7374_v58 = vadd.f32 %v9963_v7, %v7353_v45  ;;  %v2989_v49 = vadd.f32 %v2981_v36, %v6918_v52  ;;  %v7382_v60 = vadd.f32 %v9966_v21, %v7353_v45  ;;  %v1509_v48 = vadd.f32 %v9968_v2, %v7353_v45  ;;  %v9971_v7 = vld [vmem:[#allocation67_spill] sm:$0xff]  ;;  %v9972_v36 = vld [vmem:[#allocation160_spill] sm:$0xff] }
 0x291   : > { %9960 = vst [vmem:[#allocation180_spill] sm:$0xff] %v7366_v28  ;;  %9962 = vst [vmem:[#allocation19_spill] sm:$0xff] %v7370_v23  ;;  %v1597_v17 = vrot.slane %v7162_v62, 5  ;;  %v3037_v16 = vadd.f32 %v3029_v12, %v9969_v13  ;;  %v1510_v18 = vadd.f32 %v9970_v27, %v7353_v45  ;;  %v1513_v40 = vadd.f32 %v9971_v7, %v7361_v44 }
 0x292   : > { %9964 = vst [vmem:[#allocation44_spill] sm:$0xff] %v7374_v58  ;;  %9967 = vst [vmem:[#allocation33_spill] sm:$0xff] %v7382_v60  ;;  %v1611_v59 = vrot.slane %v7171_v34, 5  ;;  %3722 = vrcp.f32 %v7359_v57  ;;  %v1595_v52 = vrot.slane %v1509_v48, 6  ;;  %v1514_v21 = vadd.f32 %v9972_v36, %v7361_v44  ;;  %v7400_v23 = vpop.permute.xlu1 %2116 }
 0x293   : > { %v3251_v60 = vmul.f32 %v3235_v39, %v3043_v0  ;;  %v3149_v2 = vsub.f32 2.0, %v3141_v51  ;;  %v1609_v58 = vrot.slane %v1510_v18, 6  ;;  %v1599_v62 = vrot.slane %v1513_v40, 4  ;;  %v9973_v18 = vld [vmem:[#allocation94_spill] sm:$0xff] }
 0x294   : > { %v2997_v12 = vadd.f32 %v2989_v49, %v7115_v30  ;;  %v2983_v13 = vmul.f32 %v9874_v43, %v7152_v61  ;;  %v1596_v27 = vsel %vm8992_vm4, %v1595_v52, %v1594_v63  ;;  %v1613_v7 = vrot.slane %v1514_v21, 4  ;;  %v9996_v43 = vld [vmem:[#allocation26_spill] sm:$0xff] }
 0x295   : > { %v1601_v34 = vrot.slane %v7227_v20, 3  ;;  %v3031_v48 = vmul.f32 %v9872_v9, %v7152_v61  ;;  %v1610_v0 = vsel %vm8992_vm4, %v1609_v58, %v1608_v15  ;;  %v1598_v39 = vsel %vm8991_vm5, %v1597_v17, %v1596_v27 }
 0x296   : > { %v3171_v40 = vrot.slane %v7322_v22, 2  ;;  %v1615_v51 = vrot.slane %v7230_v19, 3  ;;  %v1612_v49 = vsel %vm8991_vm5, %v1611_v59, %v1610_v0  ;;  %v1600_v63 = vsel %vm8990_vm6, %v1599_v62, %v1598_v39  ;;  %v9976_v19 = vld [vmem:[#allocation109_spill] sm:$0xff]  ;;  %v9980_v39 = vld [vmem:[#allocation188_spill] sm:$0xff] }
 0x297   : > { %v3283_v52 = vsub.f32 %v3251_v60, %v9973_v18  ;;  %v3157_v36 = vmul.f32 %v3719_v53, %v3149_v2  ;;  %v7414_v20 = vadd.f32 %v7235_v35, %v7353_v45  ;;  %v1602_v61 = vsel %vm8989_vm7, %v1601_v34, %v1600_v63  ;;  %v7426_v60 = vpop.permute.xlu1 %2128  ;;  %v7434_v2 = vld [vmem:[%s4319_s30 + $0x8] sm:$0xff] }
 0x298   : > { %v1614_v15 = vsel %vm8990_vm6, %v1613_v7, %v1612_v49  ;;  %v7420_v22 = vsel %vm8988_vm9, %v1602_v61, 1.0  ;;  %v2372_v59 = vmul.f32 %v9976_v19, %v9952_v37  ;;  %v2412_v17 = vmul.f32 %v7189_v47, %v9948_v1  ;;  %9977 = vst [vmem:[#allocation97_spill] sm:$0xff] %v7426_v60  ;;  %v9982_v49 = vld [vmem:[#allocation10_spill] sm:$0xff] }
 0x299   : > { %9975 = vst [vmem:[#allocation144_spill] sm:$0xff] %v7420_v22  ;;  %v1616_v53 = vsel %vm8989_vm7, %v1615_v51, %v1614_v15  ;;  %v2500_v35 = vmul.f32 %v7302_v56, %v9976_v19  ;;  %v2548_v21 = vmul.f32 %v9976_v19, %v9953_v42  ;;  %v2508_v62 = vmul.f32 %v7434_v2, %v7189_v47  ;;  %v9981_v51 = vld [vmem:[#allocation29_spill] sm:$0xff] }
 0x29a   : > { %v7440_v7 = vsel %vm8987_vm10, %v1616_v53, 1.0  ;;  %v7442_v34 = vadd.f32 %v2412_v17, %v2372_v59  ;;  %v2556_v0 = vmul.f32 %v7189_v47, %v9858_v33  ;;  %v9983_v63 = vrot.slane %v9981_v51, %v9982_v49  ;;  %v9985_v17 = vld [vmem:[#allocation102_spill] sm:$0xff]  ;;  %v9986_v47 = vld [vmem:[#allocation103_spill] sm:$0xff] }
 0x29b   : > { %v7451_v61 = vpop.eup %3720  ;;  %v3045_v15 = vadd.f32 %v3037_v16, %v7115_v30  ;;  %v3173_v19 = vrot.slane %v3157_v36, 2  ;;  %v7454_v58 = vadd.f32 %v2508_v62, %v2500_v35  ;;  %v3187_v59 = vmul.f32 %v3171_v40, %v7320_v10  ;;  %v9988_v30 = vld [vmem:[#allocation24_spill] sm:$0xff]  ;;  %v9989_v35 = vld [vmem:[#allocation51_spill] sm:$0xff]  ;;  %v7473_v10 = vpop.permute.xlu1 %2340 }
 0x29c   : > { %9979 = vst [vmem:[#allocation17_spill] sm:$0xff] %v7442_v34  ;;  %v426_v18 = vsel %vm8989_vm7, %v9983_v63, %v9980_v39  ;;  %v7459_v27 = vadd.f32 %v2983_v13, %v9985_v17  ;;  %v7462_v28 = vadd.f32 %v3031_v48, %v9986_v47  ;;  %v7464_v51 = vadd.f32 %v2556_v0, %v2548_v21 }
 0x29d   : > { %9984 = vst [vmem:[#allocation18_spill] sm:$0xff] %v7454_v58  ;;  %v429_v53 = vsel %vm8986_vm8, %v426_v18, 0.0  ;;  %v7466_v39 = vmul.f32 %v3283_v52, %v3283_v52  ;;  %3724 = vrcp.f32 %v7414_v20  ;;  %v2109_v16 = vmul.f32 %v9988_v30, %v7222_v26 }
 0x29e   : > { %9987 = vst [vmem:[#allocation134_spill] sm:$0xff] %v7464_v51  ;;  %430 = vadd.xlane.f32.xlu1 %v429_v53  ;;  %v2165_v62 = vmul.f32 %v9989_v35, %v7258_v5  ;;  %v2245_v13 = vmul.f32 %v9952_v37, %v7222_v26  ;;  %v2293_v48 = vmul.f32 %v7302_v56, %v7222_v26  ;;  %v3237_v49 = vrot.slane %v3157_v36, 1  ;;  %v9994_v51 = vld [vmem:[#allocation148_spill] sm:$0xff] }
 0x29f   : > { %v2253_v40 = vmul.f32 %v9948_v1, %v7258_v5  ;;  %v2301_v52 = vmul.f32 %v7434_v2, %v7258_v5  ;;  %v3723_v21 = vpop.eup %3722  ;;  %v3189_v0 = vmul.f32 %v3173_v19, %v2997_v12  ;;  %v3143_v63 = vmul.f32 %v7451_v61, %v7325_v24 }
 0x2a0   : > { %v7485_v18 = vadd.f32 %v2165_v62, %v2109_v16  ;;  %v2373_v47 = vmul.f32 %v7296_v50, %v9988_v30  ;;  %v2413_v54 = vmul.f32 %v7329_v4, %v9989_v35  ;;  %v2501_v12 = vmul.f32 %v7296_v50, %v9952_v37  ;;  %v7503_v16 = vpop.permute.xlu1 %2352 }
 0x2a1   : > { %v7487_v53 = vadd.f32 %v2253_v40, %v2245_v13  ;;  %v7489_v17 = vadd.f32 %v2301_v52, %v2293_v48  ;;  %v2549_v36 = vmul.f32 %v7302_v56, %v7296_v50  ;;  %v2509_v24 = vmul.f32 %v7329_v4, %v9948_v1  ;;  %v9991_v40 = vld [vmem:[#allocation39_spill] sm:$0xff] }
 0x2a2   : > { %v2557_v19 = vmul.f32 %v7434_v2, %v7329_v4  ;;  %v3137_v62 = vmul.f32 %v3723_v21, %v7359_v57  ;;  %v7508_v13 = vadd.f32 %v7248_v41, %v7361_v44  ;;  %v7510_v48 = vadd.f32 %v2413_v54, %v2373_v47  ;;  %v9995_v4 = vld [vmem:[#allocation181_spill] sm:$0xff]  ;;  %v9998_v41 = vld [vmem:[#allocation182_spill] sm:$0xff] }
 0x2a3   : > { %v2790_v52 = vrot.slane %v9991_v40, 3  ;;  %v3253_v5 = vmul.f32 %v3237_v49, %v3045_v15  ;;  %v7513_v50 = vadd.f32 %v2509_v24, %v2501_v12  ;;  %v2792_v58 = vrot.slane %v9994_v51, 2 }
 0x2a4   : > { %9990 = vst [vmem:[#allocation137_spill] sm:$0xff] %v7510_v48  ;;  %v7515_v9 = vadd.f32 %v2557_v19, %v2549_v36  ;;  %v3227_v34 = vsub.f32 %v3187_v59, %v9995_v4  ;;  %v9997_v46 = vrot.slane %v9996_v43, 4  ;;  %v2794_v54 = vrot.slane %v7523_v3, 1  ;;  %v9999_v36 = vld [vmem:[#allocation78_spill] sm:$0xff] }
 0x2a5   : > { %9992 = vst [vmem:[#allocation190_spill] sm:$0xff] %v7513_v50  ;;  %v2797_v47 = vrot.slane %v9998_v41, 7  ;;  %v3315_v15 = vrot.slane %v7466_v39, 1  ;;  %v3151_v49 = vsub.f32 2.0, %v3143_v63  ;;  %v2799_v24 = vrot.slane %v9999_v36, 6  ;;  %v10000_v59 = vld [vmem:[#allocation158_spill] sm:$0xff] }
 0x2a6   : > { %9993 = vst [vmem:[#allocation187_spill] sm:$0xff] %v7515_v9  ;;  %v2791_v57 = vsel %vm413_vm1, %v2790_v52, %v9997_v46  ;;  %v3145_v51 = vsub.f32 2.0, %v3137_v62  ;;  %3726 = vrcp.f32 %v7508_v13  ;;  %v2801_v46 = vrot.slane %v10000_v59, 5  ;;  %v10001_v19 = vld [vmem:[#allocation42_spill] sm:$0xff]  ;;  %v10002_v52 = vld [vmem:[#allocation129_spill] sm:$0xff]  ;;  %v10004_v39 = vld [vmem:[#allocation27_spill] sm:$0xff] }
 0x2a7   : > { %v2793_v12 = vsel %vm8994_vm2, %v2792_v58, %v2791_v57  ;;  %v3229_v40 = vsub.f32 %v3189_v0, %v10001_v19  ;;  %v3285_v4 = vsub.f32 %v3253_v5, %v10002_v52  ;;  %v10003_v9 = vld [vmem:[#allocation41_spill] sm:$0xff]  ;;  %v2110_v63 = vmul.f32 %v10004_v39, %v7376_v55  ;;  %v2381_v58 = vpop.permute.xlu1 %2380 }
 0x2a8   : > { %v2795_v43 = vsel %vm8993_vm3, %v2794_v54, %v2793_v12  ;;  %v2246_v62 = vmul.f32 %v9988_v30, %v7376_v55  ;;  %v10005_v54 = vld [vmem:[#allocation60_spill] sm:$0xff]  ;;  %v2254_v0 = vmul.f32 %v9989_v35, %v7426_v60  ;;  %v3159_v5 = vmul.f32 %v7451_v61, %v3151_v49 }
 0x2a9   : > { %v2796_v41 = vsel %vm8992_vm4, %v10003_v9, %v2795_v43  ;;  %v2166_v12 = vmul.f32 %v10005_v54, %v7426_v60  ;;  %v2294_v9 = vmul.f32 %v9952_v37, %v7376_v55  ;;  %v2302_v43 = vmul.f32 %v9948_v1, %v7426_v60 }
 0x2aa   : > { %v2798_v57 = vsel %vm8991_vm5, %v2797_v47, %v2796_v41  ;;  %v3725_v47 = vpop.eup %3724  ;;  %v3153_v19 = vmul.f32 %v3723_v21, %v3145_v51  ;;  %v7555_v50 = vadd.f32 %v2254_v0, %v2246_v62  ;;  %v10008_v48 = vsub.f32 2.0, %v7341_v31 }
 0x2ab   : > { %v2800_v59 = vsel %vm8990_vm6, %v2799_v24, %v2798_v57  ;;  %v7553_v41 = vadd.f32 %v2166_v12, %v2110_v63  ;;  %v3291_v49 = vmul.f32 %v3227_v34, %v3227_v34  ;;  %v2999_v24 = vadd.f32 %v7459_v27, %v7187_v8  ;;  %v7576_v34 = vpop.xlane.xlu0 %2046 }
 0x2ac   : > { %v2802_v52 = vsel %vm8989_vm7, %v2801_v46, %v2800_v59  ;;  %10007 = vst [vmem:[#allocation82_spill] sm:$0xff] %v7555_v50  ;;  %v7560_v61 = vmul.f32 %v7313_v6, %v10008_v48  ;;  %v7565_v57 = vadd.f32 %v2302_v43, %v2294_v9  ;;  %v3047_v21 = vadd.f32 %v7462_v28, %v7187_v8  ;;  %v10010_v46 = vld [vmem:[#allocation46_spill] sm:$0xff]  ;;  %v7586_v8 = vld [vmem:[%s4171_s9 + $0x28] sm:$0xff] }
 0x2ad   : > { %10006 = vst [vmem:[#allocation170_spill] sm:$0xff] %v7553_v41  ;;  %2803 = vrot.lane.b32.xlu0 %v2802_v52, %s3972_s12  ;;  %v7570_v51 = vrot.slane %v7054_v25, 4  ;;  %v2993_v31 = vadd.f32 %v10010_v46, %v7263_v11  ;;  %v10011_v6 = vld [vmem:[#allocation114_spill] sm:$0xff]  ;;  %10012 = vst [vmem:[#allocation171_spill] sm:$0xff] %v7576_v34  ;;  %v7578_v63 = vadd.f32 %v3315_v15, %v3291_v49  ;;  %v2393_v25 = vpop.permute.xlu1 %2392  ;;  %v3175_v28 = vrot.slane %v3159_v5, 2  ;;  %v10014_v49 = vld [vmem:[#allocation56_spill] sm:$0xff] }
 0x2ae   : > { %10009 = vst [vmem:[#allocation83_spill] sm:$0xff] %v7565_v57  ;;  %v3041_v48 = vadd.f32 %v10011_v6, %v7263_v11  ;;  %v7580_v27 = vmul.f32 %v3229_v40, %v3229_v40  ;;  %v7582_v62 = vmul.f32 %v3285_v4, %v3285_v4  ;;  %v3140_v12 = vmul.f32 %v3725_v47, %v7414_v20  ;;  %v10013_v20 = vld [vmem:[#allocation40_spill] sm:$0xff] }
 0x2af   : > { %2400 = vperm.xlu1 %3681, %v7586_v8   ;;  %v3239_v0 = vrot.slane %v3159_v5, 1  ;;  %v3169_v59 = vrot.slane %v3153_v19, 2  ;;  %v3233_v9 = vrot.slane %v3153_v19, 1  ;;  %v2371_v11 = vmul.f32 %v7302_v56, %v7473_v10  ;;  %v7610_v55 = vpop.permute.xlu0 %2060 }
 0x2b0   : > { %v2499_v15 = vmul.f32 %v7473_v10, %v9953_v42  ;;  %v2411_v40 = vmul.f32 %v7434_v2, %v2381_v58  ;;  %v2507_v4 = vmul.f32 %v2381_v58, %v9858_v33  ;;  %v2547_v43 = vmul.f32 %v7473_v10, %v10013_v20 }
 0x2b1   : > { %v2374_v52 = vmul.f32 %v7503_v16, %v10004_v39  ;;  %v2555_v5 = vmul.f32 %v2381_v58, %v10014_v49  ;;  %v2414_v19 = vmul.f32 %v2393_v25, %v10005_v54  ;;  %v3148_v46 = vsub.f32 2.0, %v3140_v12 }
 0x2b2   : > { %3728 = vrcp.f32 %v7420_v22  ;;  %v10015_v6 = vmov 6   ;;  %v7603_v34 = vadd.f32 %v2411_v40, %v2371_v11  ;;  %v7605_v60 = vadd.f32 %v2507_v4, %v2499_v15 }
 0x2b3   : > { %3682 = vset.pattern.permute.xlu1 %v10015_v6  ;;  %v2502_v10 = vmul.f32 %v7503_v16, %v9988_v30  ;;  %v7612_v57 = vadd.f32 %v2555_v5, %v2547_v43  ;;  %v7614_v58 = vadd.f32 %v2414_v19, %v2374_v52  ;;  %v2510_v12 = vmul.f32 %v2393_v25, %v9989_v35  ;;  %v3727_v50 = vpop.eup %3726 }
 0x2b4   : > { %2440 = vperm.xlu1 %3682, %v7523_v3   ;;  %v3185_v41 = vmul.f32 %v3169_v59, %v2993_v31  ;;  %v3249_v22 = vmul.f32 %v3233_v9, %v3041_v48  ;;  %v2550_v11 = vmul.f32 %v7503_v16, %v9952_v37  ;;  %v2558_v15 = vmul.f32 %v2393_v25, %v9948_v1  ;;  %v10020_v1 = vld [vmem:[#allocation138_spill] sm:$0xff]  ;;  %v10023_v9 = vld [vmem:[#allocation136_spill] sm:$0xff] }
 0x2b5   : > { %10016 = vst [vmem:[#allocation112_spill] sm:$0xff] %v7614_v58  ;;  %v3191_v3 = vmul.f32 %v3175_v28, %v2999_v24  ;;  %v3255_v40 = vmul.f32 %v3239_v0, %v3047_v21  ;;  %3730 = vrcp.f32 %v7440_v7  ;;  %v7621_v4 = vadd.f32 %v2510_v12, %v2502_v10  ;;  %v10022_v28 = vld [vmem:[#allocation135_spill] sm:$0xff] }
 0x2b6   : > { %v2163_v43 = vmul.f32 %v7434_v2, %v7400_v23  ;;  %v2107_v52 = vmul.f32 %v7302_v56, %v7610_v55  ;;  %v7629_v31 = vmul.f32 %v9953_v42, %v7610_v55  ;;  %v7631_v48 = vadd.f32 %v2558_v15, %v2550_v11  ;;  %v10021_v56 = vld [vmem:[#allocation15_spill] sm:$0xff]  ;;  %v10025_v15 = vld [vmem:[#allocation153_spill] sm:$0xff] }
 0x2b7   : > { %10017 = vst [vmem:[#allocation113_spill] sm:$0xff] %v7621_v4  ;;  %v10019_v37 = vmov 0   ;;  %v2996_v16 = vadd.f32 %v10020_v1, %v7353_v45  ;;  %v3142_v24 = vmul.f32 %v3727_v50, %v7508_v13  ;;  %v3156_v21 = vmul.f32 %v3725_v47, %v3148_v46  ;;  %v10024_v47 = vld [vmem:[#allocation157_spill] sm:$0xff] }
 0x2b8   : > { %10018 = vst [vmem:[#allocation196_spill] sm:$0xff] %v7631_v48  ;;  %3683 = vset.pattern.permute.xlu1 %v10019_v37  ;;  %v3170_v25 = vrot.slane %v7560_v61, 2  ;;  %v3044_v2 = vadd.f32 %v10021_v56, %v7353_v45  ;;  %v3225_v0 = vsub.f32 %v3185_v41, %v10022_v28  ;;  %v3234_v59 = vrot.slane %v7560_v61, 1  ;;  %v10026_v45 = vld [vmem:[#allocation43_spill] sm:$0xff] }
 0x2b9   : > { %2084 = vperm.xlu1 %3683, %v9999_v36   ;;  %v3281_v5 = vsub.f32 %v3249_v22, %v10023_v9  ;;  %v3150_v19 = vsub.f32 2.0, %v3142_v24  ;;  %v3172_v10 = vrot.slane %v3156_v21, 2  ;;  %v3236_v11 = vrot.slane %v3156_v21, 1  ;;  %v10028_v24 = vld [vmem:[#allocation163_spill] sm:$0xff] }
 0x2ba   : > { %v3186_v12 = vmul.f32 %v3170_v25, %v7252_v38  ;;  %v2998_v13 = vadd.f32 %v7241_v29, %v7361_v44  ;;  %v3250_v46 = vmul.f32 %v3234_v59, %v10024_v47  ;;  %v3287_v1 = vsub.f32 %v3255_v40, %v10025_v15  ;;  %v10029_v38 = vld [vmem:[#allocation131_spill] sm:$0xff]  ;;  %v10030_v59 = vld [vmem:[#allocation88_spill] sm:$0xff]  ;;  %v10031_v47 = vld [vmem:[#allocation150_spill] sm:$0xff] }
 0x2bb   : > { %v3297_v48 = vmul.f32 %v3281_v5, %v3281_v5  ;;  %v3046_v41 = vadd.f32 %v10026_v45, %v7361_v44  ;;  %v3158_v56 = vmul.f32 %v3727_v50, %v3150_v19  ;;  %v3188_v61 = vmul.f32 %v3172_v10, %v2996_v16 }
 0x2bc   : > { %v3252_v28 = vmul.f32 %v3236_v11, %v3044_v2  ;;  %v10027_v22 = vmov 4   ;;  %v3226_v9 = vsub.f32 %v3186_v12, %v10028_v24  ;;  %v3282_v21 = vsub.f32 %v3250_v46, %v10029_v38 }
 0x2bd   : > { %3684 = vset.pattern.permute.xlu1 %v10027_v22  ;;  %v3289_v25 = vmul.f32 %v3225_v0, %v3225_v0  ;;  %v3313_v4 = vrot.slane %v3297_v48, 1  ;;  %v3174_v29 = vrot.slane %v3158_v56, 2  ;;  %v3228_v40 = vsub.f32 %v3188_v61, %v10030_v59  ;;  %v10032_v48 = vld [vmem:[#allocation116_spill] sm:$0xff] }
 0x2be   : > { %2364 = vperm.xlu1 %3684, %v9999_v36   ;;  %v3238_v5 = vrot.slane %v3158_v56, 1  ;;  %v3284_v15 = vsub.f32 %v3252_v28, %v10031_v47  ;;  %v2291_v50 = vmul.f32 %v10013_v20, %v7610_v55  ;;  %v3298_v16 = vmul.f32 %v3282_v21, %v3282_v21  ;;  %v10034_v28 = vld [vmem:[#allocation30_spill] sm:$0xff] }
 0x2bf   : > { %v3303_v2 = vmul.f32 %v3287_v1, %v3287_v1  ;;  %v7659_v19 = vadd.f32 %v3313_v4, %v3289_v25  ;;  %v7661_v10 = vpop.eup %3728  ;;  %v3190_v0 = vmul.f32 %v3174_v29, %v2998_v13  ;;  %v3231_v12 = vsub.f32 %v3191_v3, %v10032_v48  ;;  %v10035_v4 = vld [vmem:[#allocation186_spill] sm:$0xff]  ;;  %v3832_v13 = vld [vmem:[%s4171_s9 + $0x30] sm:$0xff] }
 0x2c0   : > { %v3254_v36 = vmul.f32 %v3238_v5, %v3046_v41  ;;  %v3300_v11 = vmul.f32 %v3284_v15, %v3284_v15  ;;  %v3290_v46 = vmul.f32 %v3226_v9, %v3226_v9  ;;  %v3314_v45 = vrot.slane %v3298_v16, 1  ;;  %v7686_v15 = vpop.permute.xlu0 %2396 }
 0x2c1   : > { %v3317_v56 = vrot.slane %v7582_v62, 1  ;;  %3732 = vrsqrt.f32 %v7306_v14  ;;  %v10033_v61 = vmov 5   ;;  %v3230_v1 = vsub.f32 %v3190_v0, %v10034_v28 }
 0x2c2   : > { %3685 = vset.pattern.permute.xlu1 %v10033_v61  ;;  %v3286_v22 = vsub.f32 %v3254_v36, %v10035_v4  ;;  %v3292_v24 = vmul.f32 %v3228_v40, %v3228_v40  ;;  %v3316_v38 = vrot.slane %v3300_v11, 1  ;;  %v7669_v21 = vpop.eup %3730  ;;  %v2251_v3 = vmul.f32 %v9858_v33, %v7400_v23  ;;  %v10039_v11 = vld [vmem:[#allocation175_spill] sm:$0xff] }
 0x2c3   : > { %2404 = vperm.xlu1 %3685, %v3832_v13   ;;  %v3319_v41 = vrot.slane %v3303_v2, 1  ;;  %v7674_v9 = vadd.f32 %v3314_v45, %v3290_v46  ;;  %3734 = vrsqrt.f32 %v7659_v19  ;;  %v2299_v62 = vmul.f32 %v10014_v49, %v7400_v23 }
 0x2c4   : > { %v2171_v25 = vadd.f32 %v2163_v43, %v2107_v52  ;;  %v3302_v29 = vmul.f32 %v3286_v22, %v3286_v22  ;;  %v7679_v59 = vadd.f32 %v3316_v38, %v3292_v24  ;;  %v2259_v40 = vadd.f32 %v2251_v3, %v7629_v31  ;;  %v10036_v43 = vld [vmem:[#allocation195_spill] sm:$0xff] }
 0x2c5   : > { %v3295_v5 = vmul.f32 %v3231_v12, %v3231_v12  ;;  %v7683_v47 = vadd.f32 %v3317_v56, %v7580_v27  ;;  %3736 = vrsqrt.f32 %v7674_v9  ;;  %v2307_v16 = vadd.f32 %v2299_v62, %v2291_v50  ;;  %v10037_v27 = vld [vmem:[#allocation172_spill] sm:$0xff]  ;;  %v10038_v50 = vld [vmem:[#allocation173_spill] sm:$0xff]  ;;  %v10040_v56 = vld [vmem:[#allocation167_spill] sm:$0xff] }
 0x2c6   : > { %v3294_v2 = vmul.f32 %v3230_v1, %v3230_v1  ;;  %v3318_v0 = vrot.slane %v3302_v29, 1  ;;  %3738 = vrsqrt.f32 %v7578_v63  ;;  %v7690_v52 = vrot.slane %v10036_v43, 4  ;;  %v10042_v1 = vld [vmem:[#allocation169_spill] sm:$0xff] }
 0x2c7   : > { %v7693_v48 = vrot.slane %v7222_v26, 4  ;;  %3686 = vset.pattern.permute.xlu1 %v10019_v37  ;;  %v7696_v31 = vadd.f32 %v3319_v41, %v3295_v5  ;;  %3740 = vrsqrt.f32 %v7679_v59  ;;  %v7701_v12 = vadd.f32 %v10037_v27, %v7485_v18  ;;  %v7712_v26 = vld [vmem:[%s4171_s9 + $0x38] sm:$0xff]  ;;  %v10049_v43 = vld [vmem:[#allocation81_spill] sm:$0xff] }
 0x2c8   : > { %v7705_v36 = vadd.f32 %v10038_v50, %v7487_v53  ;;  %v7709_v46 = vadd.f32 %v10039_v11, %v7489_v17  ;;  %2088 = vperm.xlu1 %3686, %v7712_v26   ;;  %v7715_v37 = vadd.f32 %v3318_v0, %v3294_v2  ;;  %v7718_v45 = vrot.slane %v7400_v23, 4  ;;  %v10041_v53 = vld [vmem:[#allocation168_spill] sm:$0xff]  ;;  %v2433_v23 = vpop.permute.xlu1 %2432  ;;  %v10045_v41 = vld [vmem:[#allocation86_spill] sm:$0xff]  ;;  %v10050_v11 = vld [vmem:[#allocation17_spill] sm:$0xff] }
 0x2c9   : > { %v7721_v18 = vadd.f32 %v10040_v56, %v2171_v25  ;;  %v7724_v28 = vrot.slane %v7610_v55, 4  ;;  %3742 = vrsqrt.f32 %v7683_v47  ;;  %v7728_v17 = vadd.f32 %v10041_v53, %v2259_v40  ;;  %v7740_v55 = vpop.permute.xlu0 %2136  ;;  %v10046_v25 = vld [vmem:[#allocation89_spill] sm:$0xff] }
 0x2ca   : > { %v7731_v4 = vadd.f32 %v10042_v1, %v2307_v16  ;;  %vm3338_vm11 = vcmp.eq.f32.partialorder %v7306_v14, inf  ;;  %3744 = vrsqrt.f32 %v7715_v37  ;;  %vm3340_vm12 = vcmp.eq.f32.partialorder %v7306_v14, 0.0  ;;  %10043 = vst [vmem:[#allocation115_spill] sm:$0xff] %v7740_v55  ;;  %v10047_v40 = vld [vmem:[#allocation101_spill] sm:$0xff]  ;;  %v10048_v16 = vld [vmem:[#allocation191_spill] sm:$0xff] }
 0x2cb   : > { %v3341_v22 = vand.u32 2147483648, %v7306_v14  ;;  %vm3345_vm13 = vcmp.eq.f32.partialorder %v7659_v19, inf  ;;  %vm3347_vm14 = vcmp.eq.f32.partialorder %v7659_v19, 0.0  ;;  %3746 = vrsqrt.f32 %v7696_v31 }
 0x2cc   : > { %v10044_v24 = vmov 1   ;;  %v3348_v38 = vand.u32 2147483648, %v7659_v19  ;;  %vm3352_vm15 = vcmp.eq.f32.partialorder %v7674_v9, inf  ;;  %v3355_v3 = vand.u32 2147483648, %v7674_v9  ;;  %v7791_v58 = vpop.permute.xlu1 %2076 }
 0x2cd   : > { %3687 = vset.pattern.permute.xlu1 %v10044_v24  ;;  %v2236_v13 = vadd.f32 %v7570_v51, %v7334_v32  ;;  %vm3354_vm0 = vcmp.eq.f32.partialorder %v7674_v9, 0.0  ;;  %vm3359_vm8 = vcmp.eq.f32.partialorder %v7578_v63, inf  ;;  %v2284_v62 = vadd.f32 %v10045_v41, %v7570_v51 }
 0x2ce   : > { %2144 = vperm.xlu1 %3687, %v7712_v26   ;;  %v2332_v29 = vadd.f32 %v10046_v25, %v7570_v51  ;;  %v2460_v5 = vmul.f32 %v2433_v23, %v10047_v40  ;;  %v2524_v2 = vmul.f32 %v10048_v16, %v2433_v23  ;;  %v3733_v0 = vpop.eup %3732  ;;  %vm3361_vm10 = vcmp.eq.f32.partialorder %v7578_v63, 0.0  ;;  %v10051_v51 = vld [vmem:[#allocation18_spill] sm:$0xff] }
 0x2cf   : > { %v3362_v32 = vand.u32 2147483648, %v7578_v63  ;;  %vm3366_vm9 = vcmp.eq.f32.partialorder %v7679_v59, inf  ;;  %v2572_v27 = vmul.f32 %v2433_v23, %v10049_v43  ;;  %v3337_v50 = vmul.f32 %v3733_v0, %v7306_v14  ;;  %v10052_v25 = vld [vmem:[#allocation134_spill] sm:$0xff] }
 0x2d0   : > { %vm3368_vm7 = vcmp.eq.f32.partialorder %v7679_v59, 0.0  ;;  %v2468_v56 = vadd.f32 %v2460_v5, %v10050_v11  ;;  %v2532_v53 = vadd.f32 %v2524_v2, %v10051_v51  ;;  %v3735_v1 = vpop.eup %3734  ;;  %v3369_v24 = vand.u32 2147483648, %v7679_v59  ;;  %v7778_v11 = vpop.permute.xlu0 %2140 }
 0x2d1   : > { %vm3373_vm6 = vcmp.eq.f32.partialorder %v7683_v47, inf  ;;  %v3376_v41 = vand.u32 2147483648, %v7683_v47  ;;  %v2580_v16 = vadd.f32 %v2572_v27, %v10052_v25  ;;  %v3339_v23 = vsel %vm3338_vm11, %v7306_v14, %v3337_v50  ;;  %10053 = vst [vmem:[#allocation151_spill] sm:$0xff] %v7778_v11 }
 0x2d2   : > { %3690 = vset.pattern.permute.xlu1 %v10033_v61  ;;  %v3344_v0 = vmul.f32 %v3735_v1, %v7659_v19  ;;  %vm3375_vm5 = vcmp.eq.f32.partialorder %v7683_v47, 0.0  ;;  %vm3380_vm4 = vcmp.eq.f32.partialorder %v7715_v37, inf  ;;  %v2492_v5 = vadd.f32 %v7690_v52, %v2468_v56  ;;  %v3737_v51 = vpop.eup %3736 }
 0x2d3   : > { %v2540_v2 = vadd.f32 %v2532_v53, %v7690_v52  ;;  %2408 = vperm.xlu1 %3690, %v7712_v26   ;;  %vm3382_vm3 = vcmp.eq.f32.partialorder %v7715_v37, 0.0  ;;  %v3383_v61 = vand.u32 2147483648, %v7715_v37  ;;  %vm3387_vm11 = vcmp.eq.f32.partialorder %v7696_v31, inf  ;;  %v3739_v1 = vpop.eup %3738 }
 0x2d4   : > { %v3390_v27 = vand.u32 2147483648, %v7696_v31  ;;  %v2588_v50 = vadd.f32 %v2580_v16, %v7690_v52  ;;  %v3346_v56 = vsel %vm3345_vm13, %v7659_v19, %v3344_v0  ;;  %v3351_v53 = vmul.f32 %v3737_v51, %v7674_v9  ;;  %v3741_v20 = vpop.eup %3740 }
 0x2d5   : > { %vm3389_vm2 = vcmp.eq.f32.partialorder %v7696_v31, 0.0  ;;  %v2596_v25 = vsub.f32 %v2492_v5, %v2236_v13  ;;  %v2604_v33 = vsub.f32 %v2540_v2, %v2284_v62  ;;  %v3342_v42 = vsel %vm3340_vm12, %v3341_v22, %v3339_v23 }
 0x2d6   : > { %v3349_v52 = vsel %vm3347_vm14, %v3348_v38, %v3346_v56  ;;  %v3358_v16 = vmul.f32 %v3739_v1, %v7578_v63  ;;  %v2612_v49 = vsub.f32 %v2588_v50, %v2332_v29  ;;  %v3353_v0 = vsel %vm3352_vm15, %v7674_v9, %v3351_v53  ;;  %v3743_v5 = vpop.eup %3742  ;;  %v2133_v53 = vpop.permute.xlu1 %2132 }
 0x2d7   : > { %v3365_v51 = vmul.f32 %v3741_v20, %v7679_v59  ;;  %v3400_v13 = vrot.slane %v3349_v52, 7  ;;  %v2620_v62 = vmul.f32 %v2596_v25, %v2596_v25  ;;  %v3356_v2 = vsel %vm3354_vm0, %v3355_v3, %v3353_v0  ;;  %3691 = vset.pattern.permute.xlu1 %v10015_v6  ;;  %v3745_v38 = vpop.eup %3744  ;;  %v7816_v3 = vpop.permute.xlu0 %2368 }
 0x2d8   : > { %v3360_v14 = vsel %vm3359_vm8, %v7578_v63, %v3358_v16  ;;  %v2628_v19 = vmul.f32 %v2604_v33, %v2604_v33  ;;  %v2668_v22 = vmul.f32 %v2612_v49, %v2612_v49  ;;  %v3372_v23 = vmul.f32 %v3743_v5, %v7683_v47  ;;  %2448 = vperm.xlu1 %3691, %v7586_v8   ;;  %v3747_v50 = vpop.eup %3746 }
 0x2d9   : > { %v3363_v29 = vsel %vm3361_vm10, %v3362_v32, %v3360_v14  ;;  %v3367_v20 = vsel %vm3366_vm9, %v7679_v59, %v3365_v51  ;;  %v3401_v9 = vsel %vm413_vm1, %v3400_v13, %v3342_v42  ;;  %10054 = vst [vmem:[#allocation197_spill] sm:$0xff] %v7816_v3  ;;  %v3379_v49 = vmul.f32 %v3745_v38, %v7715_v37  ;;  %v10178_v3 = vld [vmem:[#allocation118_spill] sm:$0xff] }
 0x2da   : > { %v3370_v33 = vsel %vm3368_vm7, %v3369_v24, %v3367_v20  ;;  %v3402_v63 = vrot.slane %v3356_v2, 6  ;;  %v3404_v6 = vrot.slane %v3363_v29, 5  ;;  %v3374_v32 = vsel %vm3373_vm6, %v7683_v47, %v3372_v23  ;;  %v2357_v20 = vpop.permute.xlu1 %2356 }
 0x2db   : > { %v3386_v1 = vmul.f32 %v3747_v50, %v7696_v31  ;;  %v3406_v56 = vrot.slane %v3370_v33, 4  ;;  %v2644_v42 = vrot.slane %v2628_v19, 1  ;;  %v3377_v8 = vsel %vm3375_vm5, %v3376_v41, %v3374_v32  ;;  %v2429_v19 = vpop.permute.xlu0 %2428 }
 0x2dc   : > { %v3381_v59 = vsel %vm3380_vm4, %v7715_v37, %v3379_v49  ;;  %vm10055_vm7 = vcmask 1042434   ;;  %v2684_v25 = vrot.slane %v2668_v22, 2  ;;  %vm10056_vm6 = vcmask 1043459   ;;  %2456 = vperm.xlu1 %3691, %v7712_v26  }
 0x2dd   : > { %v3403_v24 = vsel %vm10055_vm7, %v3402_v63, %v3401_v9  ;;  %v3384_v52 = vsel %vm3382_vm3, %v3383_v61, %v3381_v59  ;;  %v3388_v16 = vsel %vm3387_vm11, %v7696_v31, %v3386_v1  ;;  %v3408_v51 = vrot.slane %v3377_v8, 3  ;;  %v10062_v9 = vld [vmem:[#allocation31_spill] sm:$0xff]  ;;  %v3834_v63 = vld [vmem:[%s4319_s30 + $0x10] sm:$0xff]  ;;  %vm10138_vm15 = vmmov %vm10055_vm7 }
 0x2de   : > { %v3405_v0 = vsel %vm10056_vm6, %v3404_v6, %v3403_v24  ;;  %v3391_v47 = vsel %vm3389_vm2, %v3390_v27, %v3388_v16  ;;  %vm10057_vm5 = vcmask 1044484   ;;  %v3410_v13 = vrot.slane %v3384_v52, 2  ;;  %v10064_v16 = vld [vmem:[#allocation127_spill] sm:$0xff] }
 0x2df   : > { %v3407_v41 = vsel %vm10057_vm5, %v3406_v56, %v3405_v0  ;;  %v2660_v5 = vadd.f32 %v2644_v42, %v2620_v62  ;;  %v2235_v37 = vadd.f32 %v7724_v28, %v7721_v18  ;;  %v2283_v61 = vadd.f32 %v7728_v17, %v7724_v28  ;;  %v10061_v17 = vld [vmem:[#allocation63_spill] sm:$0xff] }
 0x2e0   : > { %vm10058_vm3 = vcmask 1045509   ;;  %v3412_v14 = vrot.slane %v3391_v47, 1  ;;  %vm10059_vm4 = vcmask 1046534   ;;  %v2247_v31 = vmul.f32 %v10004_v39, %v7791_v58 }
 0x2e1   : > { %v3409_v2 = vsel %vm10058_vm3, %v3408_v51, %v3407_v41  ;;  %v7847_v26 = vadd.f32 %v2684_v25, %v2660_v5  ;;  %v2255_v27 = vmul.f32 %v10005_v54, %v2133_v53  ;;  %v2331_v18 = vadd.f32 %v7731_v4, %v7724_v28 }
 0x2e2   : > { %v3411_v22 = vsel %vm10059_vm4, %v3410_v13, %v3409_v2  ;;  %vm10060_vm2 = vcmask 1047559   ;;  %v2415_v38 = vmul.f32 %v7686_v15, %v10061_v17  ;;  %v2511_v29 = vmul.f32 %v7686_v15, %v10005_v54  ;;  %v10065_v2 = vld [vmem:[#allocation72_spill] sm:$0xff] }
 0x2e3   : > { %v3413_v62 = vsel %vm10060_vm2, %v3412_v14, %v3411_v22  ;;  %v2559_v23 = vmul.f32 %v7686_v15, %v9989_v35  ;;  %v2111_v50 = vmul.f32 %v10062_v9, %v7791_v58  ;;  %v2167_v33 = vmul.f32 %v10061_v17, %v2133_v53  ;;  %v10063_v15 = vld [vmem:[#allocation80_spill] sm:$0xff] }
 0x2e4   : > { %3415 = vadd.xlane.f32.xlu0 %v3413_v62  ;;  %v2263_v49 = vadd.f32 %v2255_v27, %v2247_v31  ;;  %v7865_v28 = vrot.slane %v7791_v58, 4  ;;  %v2295_v4 = vmul.f32 %v9988_v30, %v7791_v58  ;;  %v2459_v6 = vmul.f32 %v3834_v63, %v2429_v19  ;;  %v2445_v58 = vpop.permute.xlu0 %2444  ;;  %v10066_v31 = vld [vmem:[#allocation71_spill] sm:$0xff]  ;;  %v10067_v62 = vld [vmem:[#allocation70_spill] sm:$0xff] }
 0x2e5   : > { %v2523_v32 = vmul.f32 %v2429_v19, %v10049_v43  ;;  %v2303_v1 = vmul.f32 %v9989_v35, %v2133_v53  ;;  %v2479_v56 = vrot.slane %v2133_v53, 4  ;;  %v2571_v42 = vmul.f32 %v2429_v19, %v10063_v15  ;;  %v10115_v43 = vld [vmem:[#allocation105_spill] sm:$0xff] }
 0x2e6   : > { %v2375_v8 = vmul.f32 %v2357_v20, %v10062_v9  ;;  %3748 = vrsqrt.f32 %v7847_v26  ;;  %v2467_v59 = vadd.f32 %v2459_v6, %v7603_v34  ;;  %v2503_v25 = vmul.f32 %v2357_v20, %v10004_v39 }
 0x2e7   : > { %v2531_v24 = vadd.f32 %v2523_v32, %v7605_v60  ;;  %v2175_v52 = vadd.f32 %v2167_v33, %v2111_v50  ;;  %v2279_v0 = vadd.f32 %v10064_v16, %v2263_v49  ;;  %v2579_v51 = vadd.f32 %v2571_v42, %v7612_v57  ;;  %v2437_v50 = vpop.permute.xlu1 %2436 }
 0x2e8   : > { %v2551_v35 = vmul.f32 %v2357_v20, %v9988_v30  ;;  %v2491_v53 = vadd.f32 %v7718_v45, %v2467_v59  ;;  %v2423_v41 = vadd.f32 %v2415_v38, %v2375_v8  ;;  %v2519_v13 = vadd.f32 %v2511_v29, %v2503_v25  ;;  %v10068_v30 = vld [vmem:[#allocation126_spill] sm:$0xff]  ;;  %v10069_v8 = vld [vmem:[#allocation93_spill] sm:$0xff] }
 0x2e9   : > { %v2539_v47 = vadd.f32 %v2531_v24, %v7718_v45  ;;  %v2311_v5 = vadd.f32 %v2303_v1, %v2295_v4  ;;  %v2587_v34 = vadd.f32 %v2579_v51, %v7718_v45  ;;  %v2463_v14 = vmul.f32 %v2445_v58, %v10065_v2  ;;  %v10071_v25 = vld [vmem:[#allocation137_spill] sm:$0xff] }
 0x2ea   : > { %v2567_v60 = vadd.f32 %v2559_v23, %v2551_v35  ;;  %v2595_v19 = vsub.f32 %v2491_v53, %v2235_v37  ;;  %v2527_v27 = vmul.f32 %v2445_v58, %v10066_v31  ;;  %v2575_v57 = vmul.f32 %v2445_v58, %v10067_v62  ;;  %v10072_v35 = vld [vmem:[#allocation190_spill] sm:$0xff]  ;;  %v10168_v31 = vld [vmem:[#allocation9_spill] sm:$0xff] }
 0x2eb   : > { %v2603_v22 = vsub.f32 %v2539_v47, %v2283_v61  ;;  %v2215_v20 = vadd.f32 %v10068_v30, %v2175_v52  ;;  %v2611_v33 = vsub.f32 %v2587_v34, %v2331_v18  ;;  %v2237_v38 = vadd.f32 %v7693_v48, %v7701_v12  ;;  %v10074_v34 = vld [vmem:[#allocation144_spill] sm:$0xff]  ;;  %v10075_v30 = vld [vmem:[#allocation170_spill] sm:$0xff] }
 0x2ec   : > { %v2285_v29 = vadd.f32 %v7705_v36, %v7693_v48  ;;  %v2287_v23 = vadd.f32 %v2279_v0, %v7865_v28  ;;  %v2471_v49 = vadd.f32 %v2463_v14, %v2423_v41  ;;  %v2535_v37 = vadd.f32 %v2527_v27, %v2519_v13  ;;  %v10070_v36 = vld [vmem:[#allocation121_spill] sm:$0xff]  ;;  %v10073_v41 = vld [vmem:[#allocation187_spill] sm:$0xff] }
 0x2ed   : > { %v2627_v45 = vmul.f32 %v2603_v22, %v2603_v22  ;;  %v2667_v61 = vmul.f32 %v2611_v33, %v2611_v33  ;;  %v2583_v4 = vadd.f32 %v2575_v57, %v2567_v60  ;;  %v2333_v6 = vadd.f32 %v7709_v46, %v7693_v48  ;;  %v10076_v33 = vld [vmem:[#allocation98_spill] sm:$0xff] }
 0x2ee   : > { %v2461_v32 = vmul.f32 %v2437_v50, %v10067_v62  ;;  %v2619_v1 = vmul.f32 %v2595_v19, %v2595_v19  ;;  %v2543_v42 = vadd.f32 %v2535_v37, %v2479_v56  ;;  %v2525_v12 = vmul.f32 %v2437_v50, %v10047_v40  ;;  %v10078_v37 = vld [vmem:[#allocation91_spill] sm:$0xff]  ;;  %v10123_v40 = vld [vmem:[#allocation130_spill] sm:$0xff] }
 0x2ef   : > { %v2643_v18 = vrot.slane %v2627_v45, 1  ;;  %v2477_v59 = vrot.slane %v10069_v8, 4  ;;  %v2327_v24 = vadd.f32 %v10070_v36, %v2311_v5  ;;  %v2573_v52 = vmul.f32 %v3834_v63, %v2437_v50  ;;  %v10082_v8 = vld [vmem:[#allocation28_spill] sm:$0xff]  ;;  %v10125_v62 = vld [vmem:[#allocation62_spill] sm:$0xff] }
 0x2f0   : > { %v2469_v58 = vadd.f32 %v2461_v32, %v10071_v25  ;;  %v2683_v0 = vrot.slane %v2667_v61, 2  ;;  %v2607_v51 = vsub.f32 %v2543_v42, %v2287_v23  ;;  %v2533_v53 = vadd.f32 %v2525_v12, %v10072_v35 }
 0x2f1   : > { %v2659_v16 = vadd.f32 %v2643_v18, %v2619_v1  ;;  %v2495_v48 = vadd.f32 %v2479_v56, %v2471_v49  ;;  %v2591_v46 = vadd.f32 %v2583_v4, %v2479_v56  ;;  %v2581_v13 = vadd.f32 %v2573_v52, %v10073_v41  ;;  %v10077_v49 = vld [vmem:[#allocation82_spill] sm:$0xff]  ;;  %v10079_v1 = vld [vmem:[#allocation83_spill] sm:$0xff] }
 0x2f2   : > { %v2493_v47 = vadd.f32 %v2477_v59, %v2469_v58  ;;  %v1623_v60 = vmul.f32 %v7661_v10, %v10074_v34  ;;  %v2239_v5 = vadd.f32 %v7865_v28, %v2215_v20  ;;  %v2541_v19 = vadd.f32 %v2533_v53, %v2477_v59  ;;  %v10087_v34 = vld [vmem:[#allocation84_spill] sm:$0xff] }
 0x2f3   : > { %v7904_v14 = vadd.f32 %v2683_v0, %v2659_v16  ;;  %v3749_v22 = vpop.eup %3748  ;;  %v2335_v63 = vadd.f32 %v2327_v24, %v7865_v28  ;;  %v2631_v27 = vmul.f32 %v2607_v51, %v2607_v51  ;;  %v2589_v57 = vadd.f32 %v2581_v13, %v2477_v59  ;;  %v10080_v28 = vld [vmem:[#allocation90_spill] sm:$0xff]  ;;  %v10083_v59 = vld [vmem:[#allocation32_spill] sm:$0xff]  ;;  %v7921_v51 = vpop.permute.xlu1 %2080 }
 0x2f4   : > { %v2597_v50 = vsub.f32 %v2493_v47, %v2237_v38  ;;  %v1624_v56 = vmul.f32 %v7669_v21, %v7440_v7  ;;  %v2214_v45 = vadd.f32 %v10076_v33, %v10075_v30  ;;  %v2605_v23 = vsub.f32 %v2541_v19, %v2285_v29  ;;  %v10081_v38 = vld [vmem:[#allocation174_spill] sm:$0xff]  ;;  %v10088_v19 = vld [vmem:[#allocation37_spill] sm:$0xff] }
 0x2f5   : > { %3750 = vrsqrt.f32 %v7904_v14  ;;  %v2278_v61 = vadd.f32 %v10078_v37, %v10077_v49  ;;  %v2599_v20 = vsub.f32 %v2495_v48, %v2239_v5  ;;  %v2615_v4 = vsub.f32 %v2591_v46, %v2335_v63  ;;  %v10089_v30 = vld [vmem:[#allocation165_spill] sm:$0xff] }
 0x2f6   : > { %v2613_v32 = vsub.f32 %v2589_v57, %v2333_v6  ;;  %v2326_v18 = vadd.f32 %v10080_v28, %v10079_v1  ;;  %v2629_v42 = vmul.f32 %v2605_v23, %v2605_v23  ;;  %v9012_v7 = vrot.slane %v10082_v8, 5 }
 0x2f7   : > { %v2222_v36 = vrot.slane %v10083_v59, 4  ;;  %v2647_v24 = vrot.slane %v2631_v27, 1  ;;  %v9013_v29 = vrot.slane %v10081_v38, 5  ;;  %v1625_v58 = vsub.f32 2.0, %v1623_v60  ;;  %v10109_v27 = vld [vmem:[#allocation178_spill] sm:$0xff] }
 0x2f8   : > { %v2669_v25 = vmul.f32 %v2613_v32, %v2613_v32  ;;  %v1626_v52 = vsub.f32 2.0, %v1624_v56  ;;  %v2621_v16 = vmul.f32 %v2597_v50, %v2597_v50  ;;  %v2645_v0 = vrot.slane %v2629_v42, 1  ;;  %v10093_v42 = vld [vmem:[#allocation49_spill] sm:$0xff] }
 0x2f9   : > { %v2623_v6 = vmul.f32 %v2599_v20, %v2599_v20  ;;  %v2671_v35 = vmul.f32 %v2615_v4, %v2615_v4  ;;  %v7923_v53 = vadd.f32 %v2222_v36, %v2214_v45  ;;  %v7925_v48 = vadd.f32 %v2278_v61, %v2222_v36  ;;  %v10100_v50 = vld [vmem:[#allocation133_spill] sm:$0xff] }
 0x2fa   : > { %v2661_v46 = vadd.f32 %v2645_v0, %v2621_v16  ;;  %v2685_v47 = vrot.slane %v2669_v25, 2  ;;  %v7927_v41 = vadd.f32 %v2326_v18, %v2222_v36  ;;  %v2168_v60 = vmul.f32 %v10087_v34, %v7740_v55  ;;  %v10094_v36 = vld [vmem:[#allocation68_spill] sm:$0xff] }
 0x2fb   : > { %10084 = vst [vmem:[#allocation198_spill] sm:$0xff] %v7923_v53  ;;  %10085 = vst [vmem:[#allocation38_spill] sm:$0xff] %v7925_v48  ;;  %v2663_v5 = vadd.f32 %v2647_v24, %v2623_v6  ;;  %v2112_v63 = vmul.f32 %v10088_v19, %v7921_v51  ;;  %v10090_v33 = vrot.slane %v10082_v8, 4  ;;  %v7945_v23 = vmul.f32 %v7661_v10, %v1625_v58  ;;  %v10119_v48 = vld [vmem:[#allocation48_spill] sm:$0xff]  ;;  %v10121_v53 = vld [vmem:[#allocation34_spill] sm:$0xff] }
 0x2fc   : > { %10086 = vst [vmem:[#allocation176_spill] sm:$0xff] %v7927_v41  ;;  %v7935_v57 = vadd.f32 %v2685_v47, %v2661_v46  ;;  %v7948_v49 = vmul.f32 %v7669_v21, %v1626_v52  ;;  %v2687_v37 = vrot.slane %v2671_v35, 2  ;;  %v2715_v61 = vmul.f32 %v3749_v22, %v7847_v26  ;;  %v10117_v41 = vld [vmem:[#allocation156_spill] sm:$0xff]  ;;  %v10176_v19 = vld [vmem:[#allocation107_spill] sm:$0xff] }
 0x2fd   : > { %v7942_v45 = vmul.f32 %v10090_v33, %v10089_v30  ;;  %v7953_v20 = vmul.f32 %v10061_v17, %v7740_v55  ;;  %vm2716_vm8 = vcmp.eq.f32.partialorder %v7847_v26, inf  ;;  %v2719_v4 = vand.u32 2147483648, %v7847_v26  ;;  %v10182_v34 = vld [vmem:[#allocation128_spill] sm:$0xff] }
 0x2fe   : > { %3752 = vrsqrt.f32 %v7935_v57  ;;  %v7958_v32 = vadd.f32 %v2687_v37, %v2663_v5  ;;  %v7960_v10 = vadd.f32 %v2168_v60, %v2112_v63  ;;  %v2717_v21 = vsel %vm2716_vm8, %v7847_v26, %v2715_v61 }
 0x2ff   : > { %10091 = vst [vmem:[#allocation65_spill] sm:$0xff] %v7953_v20  ;;  %vm2718_vm9 = vcmp.eq.f32.partialorder %v7847_v26, 0.0  ;;  %vm2709_vm10 = vcmp.eq.f32.partialorder %v7904_v14, inf  ;;  %vm2711_vm12 = vcmp.eq.f32.partialorder %v7904_v14, 0.0  ;;  %v2712_v22 = vand.u32 2147483648, %v7904_v14 }
 0x300   : > { %10092 = vst [vmem:[#allocation124_spill] sm:$0xff] %v7960_v10  ;;  %v2720_v1 = vsel %vm2718_vm9, %v2719_v4, %v2717_v21  ;;  %v1321_v59 = vadd.f32 %v7361_v44, %v10093_v42  ;;  %v1322_v24 = vadd.f32 %v7361_v44, %v10094_v36  ;;  %v8999_v25 = vrot.slane %v7945_v23, 1  ;;  %v10095_v21 = vld [vmem:[#allocation192_spill] sm:$0xff]  ;;  %v10097_v36 = vld [vmem:[#allocation74_spill] sm:$0xff] }
 0x301   : > { %v2771_v18 = vrot.slane %v2720_v1, 7  ;;  %v9000_v26 = vrot.slane %v7948_v49, 1  ;;  %v9001_v52 = vrot.slane %v7945_v23, 2  ;;  %v9002_v16 = vrot.slane %v7948_v49, 2 }
 0x302   : > { %v3751_v28 = vpop.eup %3750  ;;  %v9003_v0 = vrot.slane %v7945_v23, 3  ;;  %v9005_v6 = vrot.slane %v7948_v49, 3  ;;  %v9004_v35 = vrot.slane %v7945_v23, 4  ;;  %v9006_v46 = vrot.slane %v7948_v49, 4 }
 0x303   : > { %v2708_v58 = vmul.f32 %v3751_v28, %v7904_v14  ;;  %v9007_v60 = vrot.slane %v7945_v23, 5  ;;  %v9010_v5 = vrot.slane %v7948_v49, 5  ;;  %v9008_v63 = vrot.slane %v7945_v23, 6  ;;  %v10096_v28 = vld [vmem:[#allocation132_spill] sm:$0xff] }
 0x304   : > { %vm2723_vm13 = vcmp.eq.f32.partialorder %v7935_v57, inf  ;;  %v9009_v33 = vrot.slane %v7948_v49, 6  ;;  %v1643_v37 = vrot.slane %v7945_v23, 7  ;;  %v1644_v61 = vrot.slane %v7948_v49, 7 }
 0x305   : > { %v2710_v47 = vsel %vm2709_vm10, %v7904_v14, %v2708_v58  ;;  %v1661_v1 = vmul.f32 %v7945_v23, %v10095_v21  ;;  %v1662_v42 = vmul.f32 %v7948_v49, %v10096_v28  ;;  %v1663_v14 = vmul.f32 %v8999_v25, %v10097_v36  ;;  %v10102_v28 = vld [vmem:[#allocation193_spill] sm:$0xff]  ;;  %v10103_v25 = vld [vmem:[#allocation180_spill] sm:$0xff] }
 0x306   : > { %v2713_v30 = vsel %vm2711_vm12, %v2712_v22, %v2710_v47  ;;  %v10098_v22 = vld [vmem:[#allocation104_spill] sm:$0xff]  ;;  %v10099_v47 = vld [vmem:[#allocation162_spill] sm:$0xff]  ;;  %vm2725_vm14 = vcmp.eq.f32.partialorder %v7935_v57, 0.0  ;;  %v1668_v36 = vmul.f32 %v9005_v6, %v10102_v28  ;;  %v1674_v28 = vmul.f32 %v9009_v33, %v1322_v24 }
 0x307   : > { %v2772_v4 = vsel %vm413_vm1, %v2771_v18, %v2713_v30  ;;  %v1664_v58 = vmul.f32 %v9000_v26, %v10098_v22  ;;  %v1665_v56 = vmul.f32 %v9001_v52, %v10099_v47  ;;  %v1666_v18 = vmul.f32 %v9002_v16, %v10100_v50  ;;  %v10101_v30 = vld [vmem:[#allocation122_spill] sm:$0xff]  ;;  %v10104_v26 = vld [vmem:[#allocation19_spill] sm:$0xff] }
 0x308   : > { %v1667_v21 = vmul.f32 %v9003_v0, %v10101_v30  ;;  %v1669_v22 = vmul.f32 %v9004_v35, %v10103_v25  ;;  %v1670_v47 = vmul.f32 %v9006_v46, %v10104_v26  ;;  %v10105_v52 = vld [vmem:[#allocation22_spill] sm:$0xff]  ;;  %v10106_v16 = vld [vmem:[#allocation23_spill] sm:$0xff]  ;;  %v1673_v0 = vmul.f32 %v9008_v63, %v1321_v59  ;;  %v10107_v35 = vld [vmem:[#allocation69_spill] sm:$0xff] }
 0x309   : > { %v1671_v50 = vmul.f32 %v9007_v60, %v10105_v52  ;;  %v1672_v30 = vmul.f32 %v9010_v5, %v10106_v16  ;;  %v2726_v25 = vand.u32 2147483648, %v7935_v57  ;;  %v1417_v6 = vadd.f32 %v10107_v35, %v7361_v44  ;;  %v10108_v26 = vld [vmem:[#allocation177_spill] sm:$0xff]  ;;  %v10110_v60 = vld [vmem:[#allocation66_spill] sm:$0xff] }
 0x30a   : > { %v1675_v46 = vmul.f32 %v1643_v37, %v10108_v26  ;;  %v1676_v12 = vmul.f32 %v1644_v61, %v10109_v27  ;;  %v1418_v13 = vadd.f32 %v10110_v60, %v7361_v44  ;;  %v10111_v16 = vld [vmem:[#allocation145_spill] sm:$0xff]  ;;  %v10113_v33 = vld [vmem:[#allocation54_spill] sm:$0xff]  ;;  %v10114_v5 = vrot.slane %v10082_v8, 6 }
 0x30b   : > { %v3753_v52 = vpop.eup %3752  ;;  %v1719_v59 = vmul.f32 %v9012_v7, %v10111_v16  ;;  %v10112_v63 = vld [vmem:[#allocation53_spill] sm:$0xff]  ;;  %v10116_v27 = vrot.slane %v10081_v38, 4  ;;  %v10118_v44 = vrot.slane %v10081_v38, 6  ;;  %v10120_v16 = vrot.slane %v10082_v8, 7 }
 0x30c   : > { %v1720_v24 = vmul.f32 %v9013_v29, %v10112_v63  ;;  %v1721_v35 = vmul.f32 %v10114_v5, %v10113_v33  ;;  %v2722_v26 = vmul.f32 %v3753_v52, %v7935_v57  ;;  %v10122_v63 = vrot.slane %v10081_v38, 7  ;;  %v10124_v33 = vld [vmem:[#allocation61_spill] sm:$0xff] }
 0x30d   : > { %v1718_v2 = vmul.f32 %v10116_v27, %v10115_v43  ;;  %v1722_v60 = vmul.f32 %v10118_v44, %v10117_v41  ;;  %v1723_v7 = vmul.f32 %v10120_v16, %v10119_v48  ;;  %v8062_v5 = vsub.f32 %v1661_v1, %v10123_v40  ;;  %v10126_v27 = vld [vmem:[#allocation57_spill] sm:$0xff]  ;;  %v10127_v48 = vld [vmem:[#allocation58_spill] sm:$0xff]  ;;  %v10129_v1 = vld [vmem:[#allocation95_spill] sm:$0xff] }
 0x30e   : > { %v1724_v29 = vmul.f32 %v10122_v63, %v10121_v53  ;;  %v8065_v52 = vsub.f32 %v1662_v42, %v10124_v33  ;;  %v8068_v43 = vsub.f32 %v1663_v14, %v10125_v62  ;;  %v2724_v41 = vsel %vm2723_vm13, %v7935_v57, %v2722_v26  ;;  %v10128_v53 = vld [vmem:[#allocation50_spill] sm:$0xff]  ;;  %v10130_v62 = vld [vmem:[#allocation87_spill] sm:$0xff] }
 0x30f   : > { %v8074_v44 = vsub.f32 %v1664_v58, %v10126_v27  ;;  %v8077_v16 = vsub.f32 %v1665_v56, %v10127_v48  ;;  %v8080_v63 = vsub.f32 %v1666_v18, %v10128_v53  ;;  %v2727_v40 = vsel %vm2725_vm14, %v2726_v25, %v2724_v41  ;;  %v10141_v41 = vld [vmem:[#allocation76_spill] sm:$0xff] }
 0x310   : > { %v8085_v42 = vsub.f32 %v1667_v21, %v10129_v1  ;;  %v8088_v14 = vsub.f32 %v1668_v36, %v10130_v62  ;;  %v8091_v26 = vsub.f32 %v1669_v22, %v7942_v45  ;;  %v2773_v58 = vrot.slane %v2727_v40, 6  ;;  %v10140_v45 = vld [vmem:[#allocation73_spill] sm:$0xff]  ;;  %v10152_v48 = vld [vmem:[#allocation44_spill] sm:$0xff] }
 0x311   : > { %v8093_v33 = vsub.f32 %v1670_v47, %v1718_v2  ;;  %v8095_v56 = vsub.f32 %v1671_v50, %v1719_v59  ;;  %v8097_v27 = vsub.f32 %v1672_v30, %v1720_v24  ;;  %v8099_v18 = vsub.f32 %v1673_v0, %v1721_v35  ;;  %v10142_v47 = vld [vmem:[#allocation106_spill] sm:$0xff]  ;;  %v10143_v30 = vld [vmem:[#allocation108_spill] sm:$0xff]  ;;  %v10144_v59 = vld [vmem:[#allocation189_spill] sm:$0xff] }
 0x312   : > { %v8101_v57 = vsub.f32 %v1674_v28, %v1722_v60  ;;  %v8103_v25 = vsub.f32 %v1675_v46, %v1723_v7  ;;  %v8105_v21 = vsub.f32 %v1676_v12, %v1724_v29  ;;  %v8108_v36 = vsel %vm10138_vm15, %v2773_v58, %v2772_v4  ;;  %v10146_v46 = vld [vmem:[#allocation64_spill] sm:$0xff]  ;;  %v10148_v4 = vld [vmem:[#allocation194_spill] sm:$0xff]  ;;  %v10150_v35 = vld [vmem:[#allocation139_spill] sm:$0xff] }
 0x313   : > { %10131 = vst [vmem:[#allocation152_spill] sm:$0xff] %v8093_v33  ;;  %10132 = vst [vmem:[#allocation199_spill] sm:$0xff] %v8095_v56  ;;  %v1741_v22 = vmul.f32 %v1643_v37, %v10140_v45  ;;  %v1742_v2 = vmul.f32 %v1644_v61, %v10141_v41  ;;  %v1743_v50 = vmul.f32 %v7945_v23, %v10142_v47  ;;  %v10145_v28 = vrot.slane %v7945_v23, 1  ;;  %v10154_v1 = vld [vmem:[#allocation33_spill] sm:$0xff]  ;;  %v10156_v45 = vld [vmem:[#allocation52_spill] sm:$0xff] }
 0x314   : > { %10133 = vst [vmem:[#allocation25_spill] sm:$0xff] %v8097_v27  ;;  %10134 = vst [vmem:[#allocation14_spill] sm:$0xff] %v8099_v18  ;;  %v1744_v0 = vmul.f32 %v7948_v49, %v10143_v30  ;;  %v10147_v12 = vrot.slane %v7948_v49, 1  ;;  %v10149_v24 = vrot.slane %v7945_v23, 2  ;;  %v10151_v61 = vrot.slane %v7948_v49, 2  ;;  %v10158_v30 = vld [vmem:[#allocation55_spill] sm:$0xff] }
 0x315   : > { %10135 = vst [vmem:[#allocation45_spill] sm:$0xff] %v8101_v57  ;;  %10136 = vst [vmem:[#allocation92_spill] sm:$0xff] %v8103_v25  ;;  %v1745_v7 = vmul.f32 %v10145_v28, %v10144_v59  ;;  %v10153_v53 = vrot.slane %v7945_v23, 3  ;;  %v10155_v62 = vrot.slane %v7948_v49, 3  ;;  %v10157_v41 = vrot.slane %v7945_v23, 4 }
 0x316   : > { %10137 = vst [vmem:[#allocation16_spill] sm:$0xff] %v8105_v21  ;;  %10139 = vst [vmem:[#allocation35_spill] sm:$0xff] %v8108_v36  ;;  %v1746_v29 = vmul.f32 %v10147_v12, %v10146_v46  ;;  %v1747_v37 = vmul.f32 %v10149_v24, %v10148_v4  ;;  %v1748_v60 = vmul.f32 %v10151_v61, %v10150_v35  ;;  %v10159_v59 = vrot.slane %v7948_v49, 4  ;;  %v10162_v35 = vld [vmem:[#allocation179_spill] sm:$0xff] }
 0x317   : > { %v1749_v40 = vmul.f32 %v10153_v53, %v10152_v48  ;;  %v1750_v58 = vmul.f32 %v10155_v62, %v10154_v1  ;;  %v1751_v47 = vmul.f32 %v10157_v41, %v10156_v45  ;;  %v10160_v46 = vrot.slane %v7945_v23, 5  ;;  %v10164_v53 = vld [vmem:[#allocation120_spill] sm:$0xff]  ;;  %v10166_v36 = vld [vmem:[#allocation159_spill] sm:$0xff] }
 0x318   : > { %v1752_v28 = vmul.f32 %v10159_v59, %v10158_v30  ;;  %v10161_v4 = vrot.slane %v7948_v49, 5  ;;  %v10163_v61 = vrot.slane %v7945_v23, 6  ;;  %v10165_v1 = vrot.slane %v7948_v49, 6  ;;  %v10172_v23 = vld [vmem:[#allocation147_spill] sm:$0xff]  ;;  %v10174_v49 = vld [vmem:[#allocation125_spill] sm:$0xff] }
 0x319   : > { %v1753_v12 = vmul.f32 %v10160_v46, %v1417_v6  ;;  %v10167_v45 = vrot.slane %v10082_v8, 7  ;;  %v10169_v30 = vrot.slane %v10081_v38, 7  ;;  %v10170_v6 = vld [vmem:[#allocation96_spill] sm:$0xff]  ;;  %v10181_v17 = vrot.slane %v10082_v8, 3 }
 0x31a   : > { %v1754_v24 = vmul.f32 %v10161_v4, %v1418_v13  ;;  %v1755_v48 = vmul.f32 %v10163_v61, %v10162_v35  ;;  %v1756_v62 = vmul.f32 %v10165_v1, %v10164_v53  ;;  %v1759_v46 = vmul.f32 %v10082_v8, %v10170_v6  ;;  %v10171_v13 = vld [vmem:[#allocation99_spill] sm:$0xff] }
 0x31b   : > { %v1757_v41 = vmul.f32 %v10167_v45, %v10166_v36  ;;  %v1758_v59 = vmul.f32 %v10169_v30, %v10168_v31  ;;  %v1760_v4 = vmul.f32 %v10081_v38, %v10171_v13  ;;  %v10173_v35 = vrot.slane %v10082_v8, 1  ;;  %v10180_v6 = vld [vmem:[#allocation119_spill] sm:$0xff] }
 0x31c   : > { %v10175_v53 = vrot.slane %v10081_v38, 1  ;;  %v10177_v36 = vrot.slane %v10082_v8, 2  ;;  %v10179_v31 = vrot.slane %v10081_v38, 2  ;;  %v1765_v13 = vmul.f32 %v10181_v17, %v10180_v6  ;;  %v10192_v6 = vld [vmem:[#allocation142_spill] sm:$0xff] }
 0x31d   : > { %v1761_v61 = vmul.f32 %v10173_v35, %v10172_v23  ;;  %v10183_v39 = vrot.slane %v10081_v38, 3  ;;  %v10184_v35 = vld [vmem:[#allocation123_spill] sm:$0xff]  ;;  %v10185_v20 = vrot.slane %v10082_v8, 4  ;;  %v10187_v10 = vrot.slane %v10081_v38, 4 }
 0x31e   : > { %v1762_v1 = vmul.f32 %v10175_v53, %v10174_v49  ;;  %v1763_v45 = vmul.f32 %v10177_v36, %v10176_v19  ;;  %v1764_v30 = vmul.f32 %v10179_v31, %v10178_v3  ;;  %v10186_v53 = vld [vmem:[#allocation12_spill] sm:$0xff]  ;;  %v10188_v36 = vld [vmem:[#allocation85_spill] sm:$0xff]  ;;  %v10189_v11 = vrot.slane %v10082_v8, 5 }
 0x31f   : > { %v1766_v23 = vmul.f32 %v10183_v39, %v10182_v34  ;;  %v1767_v49 = vmul.f32 %v10185_v20, %v10184_v35  ;;  %v1768_v19 = vmul.f32 %v10187_v10, %v10186_v53  ;;  %v10190_v31 = vld [vmem:[#allocation13_spill] sm:$0xff]  ;;  %v10191_v54 = vrot.slane %v10081_v38, 5  ;;  %v10194_v34 = vld [vmem:[#allocation143_spill] sm:$0xff] }
 0x320   : > { %v1769_v3 = vmul.f32 %v10189_v11, %v10188_v36  ;;  %v10193_v55 = vrot.slane %v10082_v8, 6  ;;  %v10195_v15 = vrot.slane %v10081_v38, 6  ;;  %v1773_v35 = vsub.f32 %v1741_v22, %v1757_v41 }
 0x321   : > { %v1770_v17 = vmul.f32 %v10191_v54, %v10190_v31  ;;  %v1774_v21 = vsub.f32 %v1742_v2, %v1758_v59  ;;  %v1775_v25 = vsub.f32 %v1743_v50, %v1759_v46  ;;  %v1776_v10 = vsub.f32 %v1744_v0, %v1760_v4 }
 0x322   : > { %v1771_v39 = vmul.f32 %v10193_v55, %v10192_v6  ;;  %v1772_v20 = vmul.f32 %v10195_v15, %v10194_v34  ;;  %v1777_v53 = vsub.f32 %v1745_v7, %v1761_v61  ;;  %v1778_v57 = vsub.f32 %v1746_v29, %v1762_v1 }
 0x323   : > { %v1779_v18 = vsub.f32 %v1747_v37, %v1763_v45  ;;  %v1780_v11 = vsub.f32 %v1748_v60, %v1764_v30  ;;  %v1781_v36 = vsub.f32 %v1749_v40, %v1765_v13  ;;  %v1782_v27 = vsub.f32 %v1750_v58, %v1766_v23  ;;  %v10196_v37 = vld [vmem:[#allocation152_spill] sm:$0xff]  ;;  %v10197_v60 = vld [vmem:[#allocation199_spill] sm:$0xff]  ;;  %v10198_v40 = vld [vmem:[#allocation25_spill] sm:$0xff]  ;;  %v8231_v23 = vpop.permute.xlu1 %2360 }
 0x324   : > { %v1783_v56 = vsub.f32 %v1751_v47, %v1767_v49  ;;  %v1784_v54 = vsub.f32 %v1752_v28, %v1768_v19  ;;  %v1785_v31 = vsub.f32 %v1753_v12, %v1769_v3  ;;  %v1786_v33 = vsub.f32 %v1754_v24, %v1770_v17  ;;  %v10199_v58 = vld [vmem:[#allocation14_spill] sm:$0xff]  ;;  %v10200_v47 = vld [vmem:[#allocation45_spill] sm:$0xff]  ;;  %v10201_v28 = vld [vmem:[#allocation92_spill] sm:$0xff] }
 0x325   : > { %v1787_v8 = vsub.f32 %v1755_v48, %v1771_v39  ;;  %3754 = vrsqrt.f32 %v7958_v32  ;;  %v8199_v55 = vmul.f32 %v10062_v9, %v7921_v51  ;;  %v1788_v15 = vsub.f32 %v1756_v62, %v1772_v20 }
 0x326   : > { %v1789_v38 = vmul.f32 %v8062_v5, %v8062_v5  ;;  %v1790_v22 = vmul.f32 %v8065_v52, %v8065_v52  ;;  %v1791_v2 = vmul.f32 %v8068_v43, %v8068_v43  ;;  %v1792_v50 = vmul.f32 %v8074_v44, %v8074_v44 }
 0x327   : > { %v1793_v0 = vmul.f32 %v8077_v16, %v8077_v16  ;;  %v1794_v7 = vmul.f32 %v8080_v63, %v8080_v63  ;;  %v1795_v29 = vmul.f32 %v8085_v42, %v8085_v42  ;;  %v1796_v5 = vmul.f32 %v8088_v14, %v8088_v14 }
 0x328   : > { %v1797_v52 = vmul.f32 %v8091_v26, %v8091_v26  ;;  %v1798_v43 = vmul.f32 %v10196_v37, %v10196_v37  ;;  %v1799_v44 = vmul.f32 %v10197_v60, %v10197_v60  ;;  %v1800_v16 = vmul.f32 %v10198_v40, %v10198_v40 }
 0x329   : > { %v1801_v63 = vmul.f32 %v10199_v58, %v10199_v58  ;;  %v1802_v42 = vmul.f32 %v10200_v47, %v10200_v47  ;;  %v1803_v14 = vmul.f32 %v10201_v28, %v10201_v28  ;;  %v1805_v12 = vmul.f32 %v1773_v35, %v1773_v35 }
 0x32a   : > { %v1806_v26 = vmul.f32 %v1774_v21, %v1774_v21  ;;  %v1807_v24 = vmul.f32 %v1775_v25, %v1775_v25  ;;  %v1808_v48 = vmul.f32 %v1776_v10, %v1776_v10  ;;  %v1809_v62 = vmul.f32 %v1777_v53, %v1777_v53  ;;  %v8233_v53 = vpop.xlane.xlu1 %430 }
 0x32b   : > { %v1810_v41 = vmul.f32 %v1778_v57, %v1778_v57  ;;  %v1811_v59 = vmul.f32 %v1779_v18, %v1779_v18  ;;  %v1812_v46 = vmul.f32 %v1780_v11, %v1780_v11  ;;  %v1813_v4 = vmul.f32 %v1781_v36, %v1781_v36  ;;  %10202 = vst [vmem:[#allocation20_spill] sm:$0xff] %v8233_v53  ;;  %v10234_v53 = vld [vmem:[#allocation196_spill] sm:$0xff] }
 0x32c   : > { %v1814_v61 = vmul.f32 %v1782_v27, %v1782_v27  ;;  %v1815_v1 = vmul.f32 %v1783_v56, %v1783_v56  ;;  %v1816_v45 = vmul.f32 %v1784_v54, %v1784_v54  ;;  %v1817_v30 = vmul.f32 %v1785_v31, %v1785_v31 }
 0x32d   : > { %v1818_v13 = vmul.f32 %v1786_v33, %v1786_v33  ;;  %v1819_v49 = vmul.f32 %v1787_v8, %v1787_v8  ;;  %v1820_v19 = vmul.f32 %v1788_v15, %v1788_v15  ;;  %v1837_v3 = vrot.slane %v1805_v12, 1  ;;  %v10203_v8 = vld [vmem:[#allocation16_spill] sm:$0xff] }
 0x32e   : > { %v1838_v17 = vrot.slane %v1806_v26, 1  ;;  %v1839_v6 = vrot.slane %v1807_v24, 1  ;;  %v1840_v21 = vrot.slane %v1808_v48, 1  ;;  %v1841_v25 = vrot.slane %v1809_v62, 1  ;;  %v10205_v12 = vld [vmem:[#allocation80_spill] sm:$0xff] }
 0x32f   : > { %v1842_v39 = vrot.slane %v1810_v41, 1  ;;  %v1843_v34 = vrot.slane %v1811_v59, 1  ;;  %v1844_v57 = vrot.slane %v1812_v46, 1  ;;  %v1845_v18 = vrot.slane %v1813_v4, 1  ;;  %v10213_v41 = vld [vmem:[#allocation97_spill] sm:$0xff]  ;;  %v10214_v59 = vld [vmem:[#allocation115_spill] sm:$0xff] }
 0x330   : > { %v1846_v20 = vrot.slane %v1814_v61, 1  ;;  %v1847_v35 = vrot.slane %v1815_v1, 1  ;;  %v1848_v27 = vrot.slane %v1816_v45, 1  ;;  %v1849_v56 = vrot.slane %v1817_v30, 1  ;;  %v10217_v4 = vld [vmem:[#allocation56_spill] sm:$0xff]  ;;  %v10220_v45 = vld [vmem:[#allocation65_spill] sm:$0xff] }
 0x331   : > { %v1850_v10 = vrot.slane %v1818_v13, 1  ;;  %v1851_v33 = vrot.slane %v1819_v49, 1  ;;  %v1852_v11 = vrot.slane %v1820_v19, 1  ;;  %v8235_v36 = vadd.f32 %v1837_v3, %v1789_v38  ;;  %v10219_v61 = vld [vmem:[#allocation100_spill] sm:$0xff]  ;;  %v10221_v13 = vld [vmem:[#allocation27_spill] sm:$0xff] }
 0x332   : > { %v8237_v54 = vadd.f32 %v1838_v17, %v1790_v22  ;;  %v3755_v31 = vpop.eup %3754  ;;  %v1804_v15 = vmul.f32 %v10203_v8, %v10203_v8  ;;  %v8241_v37 = vadd.f32 %v1839_v6, %v1791_v2  ;;  %v8243_v60 = vadd.f32 %v1840_v21, %v1792_v50  ;;  %v10204_v22 = vld [vmem:[#allocation117_spill] sm:$0xff]  ;;  %v10222_v19 = vld [vmem:[#allocation84_spill] sm:$0xff]  ;;  %v10223_v17 = vld [vmem:[#allocation63_spill] sm:$0xff] }
 0x333   : > { %v8245_v40 = vadd.f32 %v1841_v25, %v1793_v0  ;;  %v8247_v58 = vadd.f32 %v1842_v39, %v1794_v7  ;;  %v8249_v47 = vadd.f32 %v1843_v34, %v1795_v29  ;;  %v8251_v28 = vadd.f32 %v1844_v57, %v1796_v5  ;;  %v2401_v0 = vpop.permute.xlu1 %2400  ;;  %v10224_v25 = vld [vmem:[#allocation21_spill] sm:$0xff]  ;;  %v10226_v57 = vld [vmem:[#allocation40_spill] sm:$0xff]  ;;  %v10229_v8 = vld [vmem:[#allocation70_spill] sm:$0xff] }
 0x334   : > { %v8253_v38 = vadd.f32 %v1845_v18, %v1797_v52  ;;  %v8257_v26 = vmul.f32 %v10205_v12, %v10204_v22  ;;  %v8259_v24 = vadd.f32 %v1846_v20, %v1798_v43  ;;  %v8261_v2 = vadd.f32 %v1847_v35, %v1799_v44  ;;  %v10212_v52 = vld [vmem:[#allocation79_spill] sm:$0xff]  ;;  %v10215_v44 = vld [vmem:[#allocation60_spill] sm:$0xff]  ;;  %v10225_v39 = vld [vmem:[#allocation197_spill] sm:$0xff] }
 0x335   : > { %v8263_v50 = vadd.f32 %v1848_v27, %v1800_v16  ;;  %v8265_v48 = vadd.f32 %v1849_v56, %v1801_v63  ;;  %v8267_v7 = vadd.f32 %v1850_v10, %v1802_v42  ;;  %v8269_v29 = vadd.f32 %v1851_v33, %v1803_v14  ;;  %v10216_v63 = vld [vmem:[#allocation151_spill] sm:$0xff]  ;;  %v10218_v14 = vld [vmem:[#allocation124_spill] sm:$0xff]  ;;  %v10227_v18 = vld [vmem:[#allocation37_spill] sm:$0xff] }
 0x336   : > { %10206 = vst [vmem:[#allocation11_spill] sm:$0xff] %v8261_v2  ;;  %v8271_v5 = vadd.f32 %v1852_v11, %v1804_v15  ;;  %v8275_v62 = vmul.f32 %v10212_v52, %v10204_v22  ;;  %v2478_v43 = vrot.slane %v10213_v41, 4  ;;  %v2304_v46 = vmul.f32 %v10215_v44, %v10214_v59  ;;  %v10228_v33 = vld [vmem:[#allocation71_spill] sm:$0xff]  ;;  %v10230_v22 = vld [vmem:[#allocation101_spill] sm:$0xff] }
 0x337   : > { %10207 = vst [vmem:[#allocation59_spill] sm:$0xff] %v8263_v50  ;;  %10208 = vst [vmem:[#allocation146_spill] sm:$0xff] %v8265_v48  ;;  %v8281_v16 = vrot.slane %v10214_v59, 4  ;;  %v8285_v42 = vmul.f32 %v10217_v4, %v10216_v63  ;;  %v2216_v1 = vadd.f32 %v10219_v61, %v10218_v14  ;;  %v2264_v30 = vadd.f32 %v10220_v45, %v8199_v55  ;;  %v2441_v27 = vpop.permute.xlu1 %2440 }
 0x338   : > { %10209 = vst [vmem:[#allocation183_spill] sm:$0xff] %v8267_v7  ;;  %10210 = vst [vmem:[#allocation184_spill] sm:$0xff] %v8269_v29  ;;  %v2296_v49 = vmul.f32 %v10221_v13, %v7921_v51  ;;  %v8295_v3 = vmul.f32 %v10222_v19, %v10216_v63  ;;  %v8299_v6 = vmul.f32 %v10223_v17, %v10216_v63  ;;  %v8302_v21 = vrot.slane %v10216_v63, 4  ;;  %v10231_v63 = vld [vmem:[#allocation149_spill] sm:$0xff] }
 0x339   : > { %10211 = vst [vmem:[#allocation110_spill] sm:$0xff] %v8271_v5  ;;  %v8306_v34 = vmul.f32 %v10225_v39, %v10224_v25  ;;  %v8310_v55 = vmul.f32 %v10225_v39, %v10226_v57  ;;  %v8314_v20 = vmul.f32 %v10225_v39, %v10227_v18  ;;  %v2224_v35 = vrot.slane %v7921_v51, 4  ;;  %v10232_v51 = vld [vmem:[#allocation112_spill] sm:$0xff]  ;;  %v10233_v39 = vld [vmem:[#allocation113_spill] sm:$0xff] }
 0x33a   : > { %v2736_v56 = vmul.f32 %v3755_v31, %v7958_v32  ;;  %v2376_v10 = vmul.f32 %v8231_v23, %v10227_v18  ;;  %v2462_v11 = vmul.f32 %v2441_v27, %v10228_v33  ;;  %v2526_v15 = vmul.f32 %v2441_v27, %v10229_v8 }
 0x33b   : > { %v2574_v41 = vmul.f32 %v2441_v27, %v10230_v22  ;;  %v8323_v59 = vadd.f32 %v2224_v35, %v2216_v1  ;;  %v2280_v14 = vadd.f32 %v10231_v63, %v2264_v30  ;;  %v2312_v61 = vadd.f32 %v2304_v46, %v2296_v49 }
 0x33c   : > { %vm2737_vm0 = vcmp.eq.f32.partialorder %v7958_v32, inf  ;;  %v2470_v45 = vadd.f32 %v2462_v11, %v10232_v51  ;;  %v2534_v31 = vadd.f32 %v2526_v15, %v10233_v39  ;;  %3756 = vrsqrt.f32 %v8235_v36  ;;  %v8337_v11 = vpop.permute.xlu1 %2084  ;;  %v10235_v15 = vld [vmem:[#allocation155_spill] sm:$0xff]  ;;  %v10238_v51 = vld [vmem:[#allocation176_spill] sm:$0xff]  ;;  %v2453_v39 = vpop.permute.xlu0 %2452 }
 0x33d   : > { %v2582_v5 = vadd.f32 %v2574_v41, %v10234_v53  ;;  %v2504_v8 = vmul.f32 %v8231_v23, %v10062_v9  ;;  %v2552_v1 = vmul.f32 %v8231_v23, %v10221_v13  ;;  %v2738_v27 = vsel %vm2737_vm0, %v7958_v32, %v2736_v56  ;;  %v10236_v23 = vld [vmem:[#allocation198_spill] sm:$0xff] }
 0x33e   : > { %3758 = vrsqrt.f32 %v8237_v54  ;;  %v2494_v46 = vadd.f32 %v2478_v43, %v2470_v45  ;;  %v2542_v30 = vadd.f32 %v2534_v31, %v2478_v43  ;;  %v8340_v53 = vadd.f32 %v2280_v14, %v2224_v35  ;;  %v10237_v56 = vld [vmem:[#allocation38_spill] sm:$0xff] }
 0x33f   : > { %v2590_v49 = vadd.f32 %v2582_v5, %v2478_v43  ;;  %3760 = vrsqrt.f32 %v8241_v37  ;;  %v2328_v22 = vadd.f32 %v10235_v15, %v2312_v61  ;;  %vm2739_vm11 = vcmp.eq.f32.partialorder %v7958_v32, 0.0 }
 0x340   : > { %v2740_v41 = vand.u32 2147483648, %v7958_v32  ;;  %v2598_v13 = vsub.f32 %v2494_v46, %v10236_v23  ;;  %v2606_v63 = vsub.f32 %v2542_v30, %v10237_v56  ;;  %3762 = vrsqrt.f32 %v8243_v60  ;;  %v2365_v15 = vpop.permute.xlu1 %2364 }
 0x341   : > { %v2614_v45 = vsub.f32 %v2590_v49, %v10238_v51  ;;  %v2416_v5 = vmul.f32 %v2401_v0, %v10222_v19  ;;  %v2113_v43 = vmul.f32 %v10226_v57, %v8337_v11  ;;  %3764 = vrsqrt.f32 %v8245_v40 }
 0x342   : > { %v8352_v14 = vsel %vm2739_vm11, %v2740_v41, %v2738_v27  ;;  %v2630_v61 = vmul.f32 %v2606_v63, %v2606_v63  ;;  %v2249_v31 = vmul.f32 %v10227_v18, %v8337_v11  ;;  %3766 = vrsqrt.f32 %v8247_v58  ;;  %v10239_v63 = vld [vmem:[#allocation72_spill] sm:$0xff] }
 0x343   : > { %v2670_v32 = vmul.f32 %v2614_v45, %v2614_v45  ;;  %v2512_v46 = vmul.f32 %v2401_v0, %v10223_v17  ;;  %v2560_v30 = vmul.f32 %v2401_v0, %v10215_v44  ;;  %v2297_v49 = vmul.f32 %v10062_v9, %v8337_v11 }
 0x344   : > { %v2465_v27 = vmul.f32 %v2453_v39, %v10205_v12  ;;  %v2622_v41 = vmul.f32 %v2598_v13, %v2598_v13  ;;  %v2646_v23 = vrot.slane %v2630_v61, 1  ;;  %v2529_v56 = vmul.f32 %v2453_v39, %v10212_v52 }
 0x345   : > { %v2577_v51 = vmul.f32 %v2453_v39, %v10239_v63  ;;  %v8365_v45 = vadd.f32 %v2328_v22, %v2224_v35  ;;  %v8367_v29 = vadd.f32 %v2416_v5, %v2376_v10  ;;  %v1890_v0 = vand.u32 2147483648, %v8235_v36 }
 0x346   : > { %v2662_v44 = vadd.f32 %v2646_v23, %v2622_v41  ;;  %v2686_v48 = vrot.slane %v2670_v32, 2  ;;  %v2177_v50 = vadd.f32 %v8285_v42, %v2113_v43  ;;  %v2265_v2 = vadd.f32 %v8295_v3, %v2249_v31  ;;  %v2405_v43 = vpop.permute.xlu1 %2404  ;;  %v10240_v32 = vld [vmem:[#allocation161_spill] sm:$0xff] }
 0x347   : > { %v8373_v13 = vadd.f32 %v2512_v46, %v2504_v8  ;;  %v8375_v61 = vadd.f32 %v2560_v30, %v2552_v1  ;;  %v2313_v39 = vadd.f32 %v8299_v6, %v2297_v49  ;;  %vm1887_vm7 = vcmp.eq.f32.partialorder %v8235_v36, inf }
 0x348   : > { %v8380_v10 = vadd.f32 %v2686_v48, %v2662_v44  ;;  %v2377_v22 = vmul.f32 %v2365_v15, %v10226_v57  ;;  %v2505_v5 = vmul.f32 %v2365_v15, %v10227_v18  ;;  %v2553_v42 = vmul.f32 %v2365_v15, %v10062_v9  ;;  %v10241_v9 = vld [vmem:[#allocation164_spill] sm:$0xff]  ;;  %v10242_v15 = vld [vmem:[#allocation166_spill] sm:$0xff] }
 0x349   : > { %vm1894_vm6 = vcmp.eq.f32.partialorder %v8237_v54, inf  ;;  %v3757_v3 = vpop.eup %3756  ;;  %v2417_v8 = vmul.f32 %v2405_v43, %v10217_v4  ;;  %v2513_v6 = vmul.f32 %v2405_v43, %v10222_v19  ;;  %v2561_v1 = vmul.f32 %v2405_v43, %v10223_v17 }
 0x34a   : > { %vm1901_vm5 = vcmp.eq.f32.partialorder %v8241_v37, inf  ;;  %3768 = vrsqrt.f32 %v8249_v47  ;;  %v2217_v31 = vadd.f32 %v10240_v32, %v2177_v50  ;;  %v2281_v46 = vadd.f32 %v10241_v9, %v2265_v2 }
 0x34b   : > { %v3759_v48 = vpop.eup %3758  ;;  %3770 = vrsqrt.f32 %v8380_v10  ;;  %vm1889_vm3 = vcmp.eq.f32.partialorder %v8235_v36, 0.0  ;;  %v1904_v30 = vand.u32 2147483648, %v8241_v37  ;;  %v2329_v41 = vadd.f32 %v10242_v15, %v2313_v39  ;;  %v2089_v39 = vpop.permute.xlu1 %2088 }
 0x34c   : > { %v3761_v49 = vpop.eup %3760  ;;  %v2425_v23 = vadd.f32 %v2417_v8, %v2377_v22  ;;  %v2521_v17 = vadd.f32 %v2513_v6, %v2505_v5  ;;  %v2569_v44 = vadd.f32 %v2561_v1, %v2553_v42  ;;  %vm1896_vm4 = vcmp.eq.f32.partialorder %v8237_v54, 0.0 }
 0x34d   : > { %v2225_v43 = vrot.slane %v8337_v11, 4  ;;  %v1886_v7 = vmul.f32 %v3757_v3, %v8235_v36  ;;  %vm1903_vm2 = vcmp.eq.f32.partialorder %v8241_v37, 0.0  ;;  %v1911_v2 = vand.u32 2147483648, %v8243_v60  ;;  %v3763_v50 = vpop.eup %3762 }
 0x34e   : > { %3772 = vrsqrt.f32 %v8251_v28  ;;  %v2473_v32 = vadd.f32 %v2465_v27, %v2425_v23  ;;  %v2537_v9 = vadd.f32 %v2529_v56, %v2521_v17  ;;  %v2585_v35 = vadd.f32 %v2577_v51, %v2569_v44  ;;  %v3765_v11 = vpop.eup %3764 }
 0x34f   : > { %v1893_v22 = vmul.f32 %v3759_v48, %v8237_v54  ;;  %vm1908_vm8 = vcmp.eq.f32.partialorder %v8243_v60, inf  ;;  %vm1915_vm9 = vcmp.eq.f32.partialorder %v8245_v40, inf  ;;  %v2241_v5 = vadd.f32 %v2225_v43, %v2217_v31  ;;  %v3767_v6 = vpop.eup %3766 }
 0x350   : > { %v2289_v42 = vadd.f32 %v2281_v46, %v2225_v43  ;;  %v1900_v3 = vmul.f32 %v3761_v49, %v8241_v37  ;;  %v1918_v8 = vand.u32 2147483648, %v8245_v40  ;;  %v2337_v1 = vadd.f32 %v2329_v41, %v2225_v43 }
 0x351   : > { %v2497_v27 = vadd.f32 %v8302_v21, %v2473_v32  ;;  %v2545_v56 = vadd.f32 %v2537_v9, %v8302_v21  ;;  %v2593_v51 = vadd.f32 %v2585_v35, %v8302_v21  ;;  %v1888_v48 = vsel %vm1887_vm7, %v8235_v36, %v1886_v7  ;;  %v2145_v7 = vpop.permute.xlu1 %2144 }
 0x352   : > { %vm1910_vm10 = vcmp.eq.f32.partialorder %v8243_v60, 0.0  ;;  %vm1917_vm12 = vcmp.eq.f32.partialorder %v8245_v40, 0.0  ;;  %vm1922_vm13 = vcmp.eq.f32.partialorder %v8247_v58, inf  ;;  %v1925_v31 = vand.u32 2147483648, %v8247_v58 }
 0x353   : > { %v1932_v46 = vand.u32 2147483648, %v8249_v47  ;;  %v2601_v49 = vsub.f32 %v2497_v27, %v2241_v5  ;;  %v2609_v15 = vsub.f32 %v2545_v56, %v2289_v42  ;;  %v2617_v41 = vsub.f32 %v2593_v51, %v2337_v1 }
 0x354   : > { %v1895_v21 = vsel %vm1894_vm6, %v8237_v54, %v1893_v22  ;;  %vm1924_vm14 = vcmp.eq.f32.partialorder %v8247_v58, 0.0  ;;  %v1902_v35 = vsel %vm1901_vm5, %v8241_v37, %v1900_v3  ;;  %v1907_v23 = vmul.f32 %v3763_v50, %v8243_v60  ;;  %v10243_v22 = vld [vmem:[#allocation47_spill] sm:$0xff] }
 0x355   : > { %v1914_v17 = vmul.f32 %v3765_v11, %v8245_v40  ;;  %v1921_v44 = vmul.f32 %v3767_v6, %v8247_v58  ;;  %v2633_v43 = vmul.f32 %v2609_v15, %v2609_v15  ;;  %v2673_v32 = vmul.f32 %v2617_v41, %v2617_v41 }
 0x356   : > { %vm2730_vm15 = vcmp.eq.f32.partialorder %v8380_v10, inf  ;;  %v8434_v9 = vsel %vm1889_vm3, %v1890_v0, %v1888_v48  ;;  %v2170_v5 = vmul.f32 %v10243_v22, %v2145_v7  ;;  %vm2732_vm0 = vcmp.eq.f32.partialorder %v8380_v10, 0.0 }
 0x357   : > { %v2733_v50 = vand.u32 2147483648, %v8380_v10  ;;  %v10244_v11 = vand.u32 2147483648, %v8237_v54  ;;  %v2625_v3 = vmul.f32 %v2601_v49, %v2601_v49  ;;  %v2649_v6 = vrot.slane %v2633_v43, 1  ;;  %v3769_v0 = vpop.eup %3768  ;;  %v2409_v49 = vpop.permute.xlu1 %2408 }
 0x358   : > { %v2114_v1 = vmul.f32 %v10224_v25, %v2089_v39  ;;  %v8448_v36 = vsel %vm1903_vm2, %v1904_v30, %v1902_v35  ;;  %vm1929_vm11 = vcmp.eq.f32.partialorder %v8249_v47, inf  ;;  %v1909_v27 = vsel %vm1908_vm8, %v8243_v60, %v1907_v23  ;;  %v3771_v37 = vpop.eup %3770 }
 0x359   : > { %v8443_v42 = vsel %vm1896_vm4, %v10244_v11, %v1895_v21  ;;  %v1916_v54 = vsel %vm1915_vm9, %v8245_v40, %v1914_v17  ;;  %v1923_v56 = vsel %vm1922_vm13, %v8247_v58, %v1921_v44  ;;  %3774 = vrsqrt.f32 %v8253_v38  ;;  %v10245_v40 = vld [vmem:[#allocation36_spill] sm:$0xff] }
 0x35a   : > { %v2665_v25 = vadd.f32 %v2649_v6, %v2625_v3  ;;  %v2689_v30 = vrot.slane %v2673_v32, 2  ;;  %v2258_v51 = vmul.f32 %v10217_v4, %v2145_v7  ;;  %v2306_v48 = vmul.f32 %v10222_v19, %v2145_v7 }
 0x35b   : > { %v8463_v15 = vrot.slane %v2089_v39, 4  ;;  %v2250_v41 = vmul.f32 %v10226_v57, %v2089_v39  ;;  %v2298_v21 = vmul.f32 %v10227_v18, %v2089_v39  ;;  %v2178_v35 = vadd.f32 %v2170_v5, %v2114_v1  ;;  %v3773_v23 = vpop.eup %3772 }
 0x35c   : > { %v8467_v17 = vadd.f32 %v2689_v30, %v2665_v25  ;;  %v2729_v44 = vmul.f32 %v3771_v37, %v8380_v10  ;;  %v8474_v43 = vsel %vm1910_vm10, %v1911_v2, %v1909_v27  ;;  %v8478_v32 = vsel %vm1917_vm12, %v1918_v8, %v1916_v54 }
 0x35d   : > { %v2482_v11 = vrot.slane %v2145_v7, 4  ;;  %v8482_v57 = vsel %vm1924_vm14, %v1925_v31, %v1923_v56  ;;  %v1928_v18 = vmul.f32 %v3769_v0, %v8249_v47  ;;  %v1939_v39 = vand.u32 2147483648, %v8251_v28  ;;  %v2449_v7 = vpop.permute.xlu1 %2448 }
 0x35e   : > { %v2266_v5 = vadd.f32 %v2258_v51, %v2250_v41  ;;  %v2314_v3 = vadd.f32 %v2306_v48, %v2298_v21  ;;  %v2731_v60 = vsel %vm2730_vm15, %v8380_v10, %v2729_v44  ;;  %3776 = vrsqrt.f32 %v8467_v17 }
 0x35f   : > { %v2218_v2 = vadd.f32 %v10245_v40, %v2178_v35  ;;  %v2418_v8 = vmul.f32 %v2409_v49, %v10243_v22  ;;  %v2734_v58 = vsel %vm2732_vm0, %v2733_v50, %v2731_v60  ;;  %v1935_v31 = vmul.f32 %v3773_v23, %v8251_v28 }
 0x360   : > { %v2464_v6 = vmul.f32 %v2449_v7, %v10212_v52  ;;  %v2528_v1 = vmul.f32 %v2449_v7, %v10239_v63  ;;  %v2576_v0 = vmul.f32 %v2449_v7, %v10228_v33  ;;  %v2775_v27 = vrot.slane %v2734_v58, 5  ;;  %v10246_v63 = vld [vmem:[#allocation35_spill] sm:$0xff] }
 0x361   : > { %v2514_v54 = vmul.f32 %v2409_v49, %v10217_v4  ;;  %v2562_v56 = vmul.f32 %v2409_v49, %v10222_v19  ;;  %v1930_v22 = vsel %vm1929_vm11, %v8249_v47, %v1928_v18  ;;  %3778 = vrsqrt.f32 %v8259_v24  ;;  %v2457_v30 = vpop.permute.xlu1 %2456  ;;  %v10250_v49 = vld [vmem:[#allocation81_spill] sm:$0xff]  ;;  %v10251_v18 = vld [vmem:[#allocation11_spill] sm:$0xff] }
 0x362   : > { %v2472_v10 = vadd.f32 %v2464_v6, %v8367_v29  ;;  %v2536_v50 = vadd.f32 %v2528_v1, %v8373_v13  ;;  %v2584_v37 = vadd.f32 %v2576_v0, %v8375_v61  ;;  %vm10247_vm7 = vcmask 1043459   ;;  %v10252_v0 = vld [vmem:[#allocation59_spill] sm:$0xff] }
 0x363   : > { %v2776_v33 = vsel %vm10247_vm7, %v2775_v27, %v10246_v63  ;;  %v2282_v25 = vadd.f32 %v8257_v26, %v2266_v5  ;;  %v2330_v4 = vadd.f32 %v8275_v62, %v2314_v3  ;;  %v2426_v19 = vadd.f32 %v2418_v8, %v8306_v34 }
 0x364   : > { %v10248_v51 = vrot.slane %v8352_v14, 4  ;;  %vm10249_vm6 = vcmask 1044484   ;;  %vm1936_vm5 = vcmp.eq.f32.partialorder %v8251_v28, inf  ;;  %v2496_v29 = vadd.f32 %v8281_v16, %v2472_v10 }
 0x365   : > { %v2544_v13 = vadd.f32 %v2536_v50, %v8281_v16  ;;  %v2592_v61 = vadd.f32 %v2584_v37, %v8281_v16  ;;  %v2466_v26 = vmul.f32 %v2457_v30, %v10250_v49  ;;  %v2522_v62 = vadd.f32 %v2514_v54, %v8310_v55  ;;  %v10253_v37 = vld [vmem:[#allocation146_spill] sm:$0xff] }
 0x366   : > { %v8515_v48 = vsel %vm10249_vm6, %v10248_v51, %v2776_v33  ;;  %v2570_v34 = vadd.f32 %v2562_v56, %v8314_v20  ;;  %v2530_v41 = vmul.f32 %v2457_v30, %v10205_v12  ;;  %v2578_v14 = vmul.f32 %v2457_v30, %v10212_v52  ;;  %v3775_v21 = vpop.eup %3774 }
 0x367   : > { %vm1931_vm3 = vcmp.eq.f32.partialorder %v8249_v47, 0.0  ;;  %vm1943_vm4 = vcmp.eq.f32.partialorder %v8253_v38, inf  ;;  %v2600_v35 = vsub.f32 %v2496_v29, %v8323_v59  ;;  %v2608_v23 = vsub.f32 %v2544_v13, %v8340_v53 }
 0x368   : > { %v2616_v16 = vsub.f32 %v2592_v61, %v8365_v45  ;;  %v2474_v44 = vadd.f32 %v2466_v26, %v2426_v19  ;;  %vm1938_vm2 = vcmp.eq.f32.partialorder %v8251_v28, 0.0  ;;  %v2242_v55 = vadd.f32 %v8463_v15, %v2218_v2  ;;  %v10254_v61 = vld [vmem:[#allocation183_spill] sm:$0xff] }
 0x369   : > { %v2538_v20 = vadd.f32 %v2530_v41, %v2522_v62  ;;  %v2586_v12 = vadd.f32 %v2578_v14, %v2570_v34  ;;  %3780 = vrsqrt.f32 %v10251_v18  ;;  %v2632_v52 = vmul.f32 %v2608_v23, %v2608_v23  ;;  %v10256_v14 = vld [vmem:[#allocation110_spill] sm:$0xff] }
 0x36a   : > { %v2672_v5 = vmul.f32 %v2616_v16, %v2616_v16  ;;  %v2290_v3 = vadd.f32 %v2282_v25, %v8463_v15  ;;  %v2498_v60 = vadd.f32 %v2482_v11, %v2474_v44  ;;  %vm1945_vm8 = vcmp.eq.f32.partialorder %v8253_v38, 0.0 }
 0x36b   : > { %v2338_v59 = vadd.f32 %v2330_v4, %v8463_v15  ;;  %v2546_v53 = vadd.f32 %v2538_v20, %v2482_v11  ;;  %v2594_v45 = vadd.f32 %v2586_v12, %v2482_v11  ;;  %vm2751_vm9 = vcmp.eq.f32.partialorder %v8467_v17, inf  ;;  %v3777_v7 = vpop.eup %3776 }
 0x36c   : > { %v2624_v40 = vmul.f32 %v2600_v35, %v2600_v35  ;;  %v2648_v8 = vrot.slane %v2632_v52, 1  ;;  %vm2753_vm10 = vcmp.eq.f32.partialorder %v8467_v17, 0.0  ;;  %v1942_v2 = vmul.f32 %v3775_v21, %v8253_v38 }
 0x36d   : > { %v2602_v58 = vsub.f32 %v2498_v60, %v2242_v55  ;;  %v2610_v6 = vsub.f32 %v2546_v53, %v2290_v3  ;;  %v2618_v1 = vsub.f32 %v2594_v45, %v2338_v59  ;;  %3782 = vrsqrt.f32 %v10252_v0 }
 0x36e   : > { %v2664_v27 = vadd.f32 %v2648_v8, %v2624_v40  ;;  %v2688_v54 = vrot.slane %v2672_v5, 2  ;;  %v2750_v15 = vmul.f32 %v3777_v7, %v8467_v17  ;;  %v1937_v11 = vsel %vm1936_vm5, %v8251_v28, %v1935_v31  ;;  %v3779_v63 = vpop.eup %3778 }
 0x36f   : > { %v2634_v56 = vmul.f32 %v2610_v6, %v2610_v6  ;;  %v2674_v10 = vmul.f32 %v2618_v1, %v2618_v1  ;;  %v2754_v50 = vand.u32 2147483648, %v8467_v17  ;;  %3784 = vrsqrt.f32 %v10253_v37 }
 0x370   : > { %v8547_v33 = vadd.f32 %v2688_v54, %v2664_v27  ;;  %v1933_v25 = vsel %vm1931_vm3, %v1932_v46, %v1930_v22  ;;  %v1944_v4 = vsel %vm1943_vm4, %v8253_v38, %v1942_v2  ;;  %v1946_v31 = vand.u32 2147483648, %v8253_v38  ;;  %v10255_v38 = vld [vmem:[#allocation184_spill] sm:$0xff] }
 0x371   : > { %v2626_v19 = vmul.f32 %v2602_v58, %v2602_v58  ;;  %v2650_v30 = vrot.slane %v2634_v56, 1  ;;  %v1940_v51 = vsel %vm1938_vm2, %v1939_v39, %v1937_v11  ;;  %vm1950_vm12 = vcmp.eq.f32.partialorder %v8259_v24, inf }
 0x372   : > { %3786 = vrsqrt.f32 %v8547_v33  ;;  %v2752_v47 = vsel %vm2751_vm9, %v8467_v17, %v2750_v15  ;;  %v1949_v46 = vmul.f32 %v3779_v63, %v8259_v24  ;;  %vm1952_vm13 = vcmp.eq.f32.partialorder %v8259_v24, 0.0 }
 0x373   : > { %v2666_v22 = vadd.f32 %v2650_v30, %v2626_v19  ;;  %v2690_v29 = vrot.slane %v2674_v10, 2  ;;  %v1947_v13 = vsel %vm1945_vm8, %v1946_v31, %v1944_v4  ;;  %v1953_v28 = vand.u32 2147483648, %v8259_v24 }
 0x374   : > { %vm1957_vm14 = vcmp.eq.f32.partialorder %v10251_v18, inf  ;;  %vm1959_vm15 = vcmp.eq.f32.partialorder %v10251_v18, 0.0  ;;  %v1960_v39 = vand.u32 2147483648, %v10251_v18  ;;  %3788 = vrsqrt.f32 %v10254_v61 }
 0x375   : > { %v8575_v49 = vadd.f32 %v2690_v29, %v2666_v22  ;;  %v8579_v26 = vsel %vm2753_vm10, %v2754_v50, %v2752_v47  ;;  %vm1964_vm0 = vcmp.eq.f32.partialorder %v10252_v0, inf  ;;  %3790 = vrsqrt.f32 %v10255_v38 }
 0x376   : > { %v3781_v62 = vpop.eup %3780  ;;  %v1951_v34 = vsel %vm1950_vm12, %v8259_v24, %v1949_v46  ;;  %vm1966_vm11 = vcmp.eq.f32.partialorder %v10252_v0, 0.0  ;;  %v1967_v41 = vand.u32 2147483648, %v10252_v0  ;;  %3792 = vrsqrt.f32 %v10256_v14 }
 0x377   : > { %v2747_v21 = vand.u32 2147483648, %v8547_v33  ;;  %3794 = vrsqrt.f32 %v8575_v49  ;;  %vm1971_vm7 = vcmp.eq.f32.partialorder %v10253_v37, inf  ;;  %vm1973_vm6 = vcmp.eq.f32.partialorder %v10253_v37, 0.0 }
 0x378   : > { %v2781_v17 = vrot.slane %v8579_v26, 2  ;;  %v1956_v35 = vmul.f32 %v3781_v62, %v10251_v18  ;;  %v1974_v23 = vand.u32 2147483648, %v10253_v37  ;;  %v2013_v16 = vrot.slane %v8448_v36, 7 }
 0x379   : > { %vm2744_vm5 = vcmp.eq.f32.partialorder %v8547_v33, inf  ;;  %v1954_v44 = vsel %vm1952_vm13, %v1953_v28, %v1951_v34  ;;  %v2015_v55 = vrot.slane %v8478_v32, 6  ;;  %v2017_v20 = vrot.slane %v1933_v25, 5 }
 0x37a   : > { %v2019_v12 = vrot.slane %v1947_v13, 4  ;;  %v3783_v52 = vpop.eup %3782  ;;  %vm2746_vm3 = vcmp.eq.f32.partialorder %v8547_v33, 0.0  ;;  %v1958_v5 = vsel %vm1957_vm14, %v10251_v18, %v1956_v35  ;;  %v2014_v3 = vsel %vm413_vm1, %v2013_v16, %v8434_v9 }
 0x37b   : > { %v2027_v36 = vrot.slane %v8474_v43, 7  ;;  %v2029_v60 = vrot.slane %v8482_v57, 6  ;;  %v1961_v24 = vsel %vm1959_vm15, %v1960_v39, %v1958_v5  ;;  %v1963_v32 = vmul.f32 %v3783_v52, %v10252_v0  ;;  %v10271_v5 = vld [vmem:[#allocation140_spill] sm:$0xff] }
 0x37c   : > { %vm1978_vm4 = vcmp.eq.f32.partialorder %v10254_v61, inf  ;;  %vm10257_vm2 = vcmask 1042434   ;;  %v2031_v53 = vrot.slane %v1940_v51, 5  ;;  %v3785_v45 = vpop.eup %3784  ;;  %vm10258_vm8 = vcmask 1043459  }
 0x37d   : > { %v2016_v59 = vsel %vm10257_vm2, %v2015_v55, %v2014_v3  ;;  %v2021_v8 = vrot.slane %v1961_v24, 3  ;;  %v2028_v9 = vsel %vm413_vm1, %v2027_v36, %v8443_v42  ;;  %v2033_v43 = vrot.slane %v1954_v44, 4  ;;  %vm10260_vm10 = vmmov %vm10257_vm2  ;;  %v10274_v36 = vld [vmem:[#allocation141_spill] sm:$0xff] }
 0x37e   : > { %v2018_v40 = vsel %vm10258_vm8, %v2017_v20, %v2016_v59  ;;  %v1965_v57 = vsel %vm1964_vm0, %v10252_v0, %v1963_v32  ;;  %v1970_v18 = vmul.f32 %v3785_v45, %v10253_v37  ;;  %vm10259_vm9 = vcmask 1044484   ;;  %vm10262_vm14 = vmmov %vm10258_vm8  ;;  %v10276_v45 = vld [vmem:[#allocation77_spill] sm:$0xff] }
 0x37f   : > { %v2020_v2 = vsel %vm10259_vm9, %v2019_v12, %v2018_v40  ;;  %v2030_v7 = vsel %vm10260_vm10, %v2029_v60, %v2028_v9  ;;  %v1968_v58 = vsel %vm1966_vm11, %v1967_v41, %v1965_v57  ;;  %vm1980_vm12 = vcmp.eq.f32.partialorder %v10254_v61, 0.0  ;;  %v3787_v1 = vpop.eup %3786  ;;  %vm10263_vm1 = vmmov %vm10259_vm9  ;;  %v10277_v40 = vld [vmem:[#allocation171_spill] sm:$0xff]  ;;  %v10278_v9 = vld [vmem:[#allocation20_spill] sm:$0xff] }
 0x380   : > { %vm10261_vm13 = vcmask 1045509   ;;  %v2032_v42 = vsel %vm10262_vm14, %v2031_v53, %v2030_v7  ;;  %v1972_v27 = vsel %vm1971_vm7, %v10253_v37, %v1970_v18  ;;  %v1981_v54 = vand.u32 2147483648, %v10254_v61 }
 0x381   : > { %v2022_v6 = vsel %vm10261_vm13, %v2021_v8, %v2020_v2  ;;  %v2034_v15 = vsel %vm10263_vm1, %v2033_v43, %v2032_v42  ;;  %v2035_v11 = vrot.slane %v1968_v58, 3  ;;  %v2743_v56 = vmul.f32 %v3787_v1, %v8547_v33  ;;  %v3789_v10 = vpop.eup %3788  ;;  %vm10264_vm7 = vmmov %vm10261_vm13 }
 0x382   : > { %v1975_v0 = vsel %vm1973_vm6, %v1974_v23, %v1972_v27  ;;  %vm1985_vm15 = vcmp.eq.f32.partialorder %v10255_v38, inf  ;;  %vm1987_vm0 = vcmp.eq.f32.partialorder %v10255_v38, 0.0  ;;  %v1988_v50 = vand.u32 2147483648, %v10255_v38  ;;  %v3791_v4 = vpop.eup %3790 }
 0x383   : > { %vm1992_vm11 = vcmp.eq.f32.partialorder %v10256_v14, inf  ;;  %v2023_v63 = vrot.slane %v1975_v0, 2  ;;  %v2036_v25 = vsel %vm10264_vm7, %v2035_v11, %v2034_v15  ;;  %v2745_v31 = vsel %vm2744_vm5, %v8547_v33, %v2743_v56  ;;  %v3793_v19 = vpop.eup %3792 }
 0x384   : > { %vm2758_vm2 = vcmp.eq.f32.partialorder %v8575_v49, inf  ;;  %vm2760_vm6 = vcmp.eq.f32.partialorder %v8575_v49, 0.0  ;;  %v1977_v37 = vmul.f32 %v3789_v10, %v10254_v61  ;;  %v2748_v30 = vsel %vm2746_vm3, %v2747_v21, %v2745_v31  ;;  %v3795_v22 = vpop.eup %3794  ;;  %vm10266_vm3 = vmmov %vm10264_vm7 }
 0x385   : > { %v2761_v51 = vand.u32 2147483648, %v8575_v49  ;;  %v1984_v47 = vmul.f32 %v3791_v4, %v10255_v38  ;;  %vm10265_vm8 = vcmask 1046534   ;;  %v2779_v29 = vrot.slane %v2748_v30, 3 }
 0x386   : > { %v2024_v46 = vsel %vm10265_vm8, %v2023_v63, %v2022_v6  ;;  %v1979_v13 = vsel %vm1978_vm4, %v10254_v61, %v1977_v37  ;;  %v1991_v28 = vmul.f32 %v3793_v19, %v10256_v14  ;;  %vm1994_vm5 = vcmp.eq.f32.partialorder %v10256_v14, 0.0  ;;  %vm10267_vm4 = vmmov %vm10265_vm8 }
 0x387   : > { %v2757_v39 = vmul.f32 %v3795_v22, %v8575_v49  ;;  %v1982_v33 = vsel %vm1980_vm12, %v1981_v54, %v1979_v13  ;;  %v1986_v62 = vsel %vm1985_vm15, %v10255_v38, %v1984_v47  ;;  %v1995_v34 = vand.u32 2147483648, %v10256_v14  ;;  %vm10268_vm9 = vmmov %vm10267_vm4 }
 0x388   : > { %v2780_v41 = vsel %vm10266_vm3, %v2779_v29, %v8515_v48  ;;  %v1989_v21 = vsel %vm1987_vm0, %v1988_v50, %v1986_v62  ;;  %v1993_v35 = vsel %vm1992_vm11, %v10256_v14, %v1991_v28  ;;  %v2037_v23 = vrot.slane %v1982_v33, 2 }
 0x389   : > { %v2759_v61 = vsel %vm2758_vm2, %v8575_v49, %v2757_v39  ;;  %v2782_v16 = vsel %vm10267_vm4, %v2781_v17, %v2780_v41  ;;  %v1996_v44 = vsel %vm1994_vm5, %v1995_v34, %v1993_v35  ;;  %v2025_v55 = vrot.slane %v1989_v21, 1  ;;  %v2804_v49 = vpop.permute.xlu0 %2803 }
 0x38a   : > { %v2762_v48 = vsel %vm2760_vm6, %v2761_v51, %v2759_v61  ;;  %v2038_v38 = vsel %vm10268_vm9, %v2037_v23, %v2036_v25  ;;  %v2039_v20 = vrot.slane %v1996_v44, 1  ;;  %vm10269_vm10 = vcmask 1047559  }
 0x38b   : > { %v2783_v12 = vrot.slane %v2762_v48, 1  ;;  %v2026_v14 = vsel %vm10269_vm10, %v2025_v55, %v2024_v46  ;;  %vm10270_vm12 = vmmov %vm10269_vm10  ;;  %vm10272_vm13 = vcmp.gt.f32.partialorder %v10271_v5, 0.0  ;;  %vm10275_vm1 = vcmp.gt.f32.partialorder %v10274_v36, 0.0 }
 0x38c   : > { %v2040_v52 = vsel %vm10270_vm12, %v2039_v20, %v2038_v38  ;;  %v2043_v3 = vsel %vm10272_vm13, %v2026_v14, 0.0  ;;  %vm10273_vm14 = vmmov %vm10269_vm10  ;;  %3796 = vrcp.f32 %v2804_v49  ;;  %v2048_v8 = vmax.f32 %v10277_v40, 1.0 }
 0x38d   : > { %v2784_v26 = vsel %vm10273_vm14, %v2783_v12, %v2782_v16  ;;  %v2044_v17 = vsel %vm10275_vm1, %v2040_v52, 0.0  ;;  %3798 = vrsqrt.f32 %v10276_v45  ;;  %v432_v43 = vmax.f32 %v10278_v9, -1.0  ;;  %v3416_v27 = vpop.xlane.xlu0 %3415 }
 0x38e   : > { %2786 = vadd.xlane.f32.xlu1 %v2784_v26  ;;  %v2049_v60 = vadd.f32 %v2044_v17, %v2043_v3  ;;  %3800 = vrcp.f32 %v2048_v8  ;;  %vm554_vm15 = vcmp.eq.f32.partialorder %v10276_v45, inf  ;;  %v557_v6 = vand.u32 2147483648, %v10276_v45 }
 0x38f   : > { %v433_v2 = vmin.f32 %v432_v43, 3.0  ;;  %vm556_vm0 = vcmp.eq.f32.partialorder %v10276_v45, 0.0  ;;  %vm3422_vm11 = vcmask 7168   ;;  %vm3424_vm7 = vcmask 15360  }
 0x390   : > { %v3417_v56 = vmul.f32 0.0078125, %v3416_v27  ;;  %vm3427_vm2 = vcmask 31744   ;;  %vm3429_vm6 = vcmask 39936   ;;  %vm3431_vm8 = vcmask 64512  }
 0x391   : > { %v3555_v7 = vadd.f32 -1.0, %v433_v2  ;;  %vm10279_vm5 = vcmask 23552  }
 0x392   : > { %2050 = vadd.xlane.f32.xlu1 %v2049_v60 }
 0x393   : > { %v435_v1 = vmul.f32 0.5, %v3555_v7 }
 0x399   : > { %v3797_v24 = vpop.eup %3796 }
 0x39a   : > { %v3799_v57 = vpop.eup %3798 }
 0x39b   : > { %v553_v18 = vmul.f32 %v3799_v57, %v10276_v45  ;;  %v3801_v11 = vpop.eup %3800 }
 0x39d   : > { %v555_v58 = vsel %vm554_vm15, %v10276_v45, %v553_v18 }
 0x39e   : > { %v558_v42 = vsel %vm556_vm0, %v557_v6, %v555_v58 }
 0x39f   : > { %v559_v15 = vmul.f32 100.0, %v558_v42 }
 0x3a1   : > { %v3423_v0 = vsel %vm3422_vm11, %v435_v1, %v559_v15 }
 0x417   : > { %v2787_v32 = vpop.xlane.xlu1 %2786 }
 0x418   : > { %v2788_v59 = vmul.f32 0.0078125, %v2787_v32 }
 0x41a   : > { %v2807_v53 = vmul.f32 %v3797_v24, %v2788_v59 }
 0x41b   : > { %v2051_v54 = vpop.xlane.xlu1 %2050 }
 0x41c   : > { %3419 = vrot.lane.b32.xlu0 %v2807_v53, %s3983_s6  ;;  %v2053_v50 = vmul.f32 %v3801_v11, %v2051_v54 }
 0x48e   : > { %v3420_v10 = vpop.permute.xlu0 %3419 }
 0x48f   : > { %v3425_v63 = vsel %vm3424_vm7, %v3423_v0, %v3420_v10 }
 0x490   : > { %v3426_v25 = vsel %vm10279_vm5, %v3425_v63, %v3417_v56 }
 0x491   : > { %v3428_v4 = vsel %vm3427_vm2, %v3426_v25, %v2053_v50 }
 0x492   : > { %v3430_v31 = vsel %vm3429_vm6, %v3428_v4, 0.0 }
 0x493   : > { %3432 = vst.msk [vmem:[%s265_s22] sm:$0xff] %vm3431_vm8, %v3430_v31 }
 0x494 PF: > { %p16_p4 = scmp.ge.s32.totalorder %s4026_s17, 4   ;;  %s10280_s12 = smov %s3949_s13 }
 0x495   : > { %s10281_s13 = smov %s3953_s14  ;;  %s10282_s14 = smov %s4036_s20 }
 0x496   : > { %s10283_s15 = smov %s4026_s17  ;;  %18 = sbr.rel (!%p16_p4) target bundleno = 5 (0x5), region = 101 }
 0x49b   :  { %3452 = vsyncpa [#allocation3], 1 }
 0x49c   :  { %3454 = vsyncpa [#allocation3 + $0x1], 1 }
 0x49d   :  { %3455 = vsyncpa [#allocation5], 1 }
 0x49e   :  { %3457 = vsyncpa [#allocation5 + $0x1], 1 }

</bundles_post_ra>
